<compile_context>
chip_gen: v7x
topology: tpu7x:2x2x1
jax: 0.10.0
libtpu: 0.0.40
codegen_flags: <defaults>
</compile_context>

<pallas_src>
import functools

import jax
import jax.numpy as jnp
from jax.experimental import pallas as pl
from jax.experimental.pallas import tpu as pltpu


# ---------------------------------------------------------------------------
# Fused Pallas kernel
# ---------------------------------------------------------------------------
def _conv3x3_from_padded(xp_ref, w_ref, H, W, cin, cout):
    """3x3 conv (stride 1) from a zero-padded VMEM scratch, as 9 matmuls.

    xp_ref: (H+2, W+2, cin) VMEM scratch (matmul dtype, e.g. bf16)
    w_ref : (3, 3, cin, cout) (matmul dtype)
    returns: (H*W, cout) f32 accumulator
    """
    acc = jnp.zeros((H * W, cout), jnp.float32)
    for dy in range(3):
        for dx in range(3):
            patch = xp_ref[dy:dy + H, dx:dx + W, :].reshape(H * W, cin)
            acc += jnp.dot(patch, w_ref[dy, dx],
                           preferred_element_type=jnp.float32)
    return acc


def basic_block_kernel(x_ref, w1_ref, s1_ref, b1_ref, w2_ref, s2_ref, b2_ref,
                       o_ref, xp_ref, mid_ref):
    """Fused: relu(bn2(conv2(relu(bn1(conv1(x))))) + x)  (inference-mode BN)."""
    _, H, W, cout = o_ref.shape
    cin = x_ref.shape[-1]
    cmid = mid_ref.shape[-1]
    mm_dtype = xp_ref.dtype

    # ---- build zero halo for x inside VMEM (no host-side pad / HBM pass) ----
    xp_ref[...] = jnp.zeros_like(xp_ref)
    xp_ref[1:H + 1, 1:W + 1, :] = x_ref[0].astype(mm_dtype)

    # ---- conv1 + bn1 + relu (f32 accumulate / f32 epilogue) ----
    acc1 = _conv3x3_from_padded(xp_ref, w1_ref, H, W, cin, cmid)
    y1 = jnp.maximum(acc1 * s1_ref[...] + b1_ref[...], 0.0)

    # intermediate stays in VMEM scratch (padded, zero halo), never hits HBM
    mid_ref[...] = jnp.zeros_like(mid_ref)
    mid_ref[1:H + 1, 1:W + 1, :] = y1.reshape(H, W, cmid).astype(mm_dtype)

    # ---- conv2 + bn2 + residual + relu ----
    acc2 = _conv3x3_from_padded(mid_ref, w2_ref, H, W, cmid, cout)
    y2 = acc2 * s2_ref[...] + b2_ref[...]
    # residual: reuse the already-resident x tile (exact f32 add)
    y2 = y2 + x_ref[0].reshape(H * W, cin)
    o_ref[0] = jnp.maximum(y2, 0.0).reshape(H, W, cout).astype(o_ref.dtype)


# ---------------------------------------------------------------------------
# Wrapper around pallas_call
# ---------------------------------------------------------------------------
def _fused_basic_block(x_nhwc, w1_hwio, s1, b1, w2_hwio, s2, b2,
                       compute_dtype=jnp.bfloat16):
    N, H, W, cin = x_nhwc.shape
    cmid = w1_hwio.shape[-1]
    cout = w2_hwio.shape[-1]
    assert cin == cout, "residual path requires inplanes == planes (no downsample)"

    w1 = w1_hwio.astype(compute_dtype)
    w2 = w2_hwio.astype(compute_dtype)

    itemsize = jnp.dtype(compute_dtype).itemsize
    flops = 2 * N * H * W * 9 * (cin * cmid + cmid * cout)
    bytes_accessed = (
        N * H * W * cin * 4                    # x (f32 in)
        + 9 * (cin * cmid + cmid * cout) * itemsize   # weights
        + 2 * (cmid + cout) * 4                # folded BN scale/bias
        + N * H * W * cout * 4                 # output (f32)
    )

    return pl.pallas_call(
        basic_block_kernel,
        out_shape=jax.ShapeDtypeStruct((N, H, W, cout), jnp.float32),
        grid=(N,),
        in_specs=[
            pl.BlockSpec((1, H, W, cin), lambda n: (n, 0, 0, 0)),     # x (also residual)
            pl.BlockSpec((3, 3, cin, cmid), lambda n: (0, 0, 0, 0)),  # w1
            pl.BlockSpec((1, cmid), lambda n: (0, 0)),                # bn1 scale
            pl.BlockSpec((1, cmid), lambda n: (0, 0)),                # bn1 bias
            pl.BlockSpec((3, 3, cmid, cout), lambda n: (0, 0, 0, 0)), # w2
            pl.BlockSpec((1, cout), lambda n: (0, 0)),                # bn2 scale
            pl.BlockSpec((1, cout), lambda n: (0, 0)),                # bn2 bias
        ],
        out_specs=pl.BlockSpec((1, H, W, cout), lambda n: (n, 0, 0, 0)),
        scratch_shapes=[
            pltpu.VMEM((H + 2, W + 2, cin), compute_dtype),   # padded x tile
            pltpu.VMEM((H + 2, W + 2, cmid), compute_dtype),  # padded conv1 activation
        ],
        compiler_params=pltpu.CompilerParams(dimension_semantics=("parallel",)),
        cost_estimate=pl.CostEstimate(flops=flops, transcendentals=0,
                                      bytes_accessed=bytes_accessed),
    )(x_nhwc, w1, s1, b1, w2, s2, b2)


def _fold_bn(gamma, beta, mean, var, eps=1e-5):
    scale = gamma / jnp.sqrt(var + eps)
    bias = beta - mean * scale
    return scale.reshape(1, -1).astype(jnp.float32), bias.reshape(1, -1).astype(jnp.float32)


@functools.partial(jax.jit, static_argnames=("compute_dtype",))
def basic_block_forward(x_nchw, params, compute_dtype=jnp.bfloat16):
    """BasicBlock forward. Input/output are NCHW float32 (PyTorch convention)."""
    x = jnp.transpose(x_nchw, (0, 2, 3, 1))                 # NCHW -> NHWC
    w1 = jnp.transpose(params["conv1_w"], (2, 3, 1, 0))     # OIHW -> HWIO
    w2 = jnp.transpose(params["conv2_w"], (2, 3, 1, 0))

    s1, b1 = _fold_bn(params["bn1_g"], params["bn1_b"], params["bn1_m"], params["bn1_v"])
    s2, b2 = _fold_bn(params["bn2_g"], params["bn2_b"], params["bn2_m"], params["bn2_v"])

    out = _fused_basic_block(x, w1, s1, b1, w2, s2, b2, compute_dtype=compute_dtype)
    return jnp.transpose(out, (0, 3, 1, 2))                 # NHWC -> NCHW


# ---------------------------------------------------------------------------
# Pure-JAX reference (for correctness check)
# ---------------------------------------------------------------------------
def reference_forward(x, p, eps=1e-5):
    def conv(x, w):
        return jax.lax.conv_general_dilated(
            x, w, window_strides=(1, 1), padding=((1, 1), (1, 1)),
            dimension_numbers=("NCHW", "OIHW", "NCHW"))

    def bn(y, g, b, m, v):
        g, b, m, v = (t[None, :, None, None] for t in (g, b, m, v))
        return (y - m) / jnp.sqrt(v + eps) * g + b

    out = jnp.maximum(bn(conv(x, p["conv1_w"]), p["bn1_g"], p["bn1_b"],
                         p["bn1_m"], p["bn1_v"]), 0.0)
    out = bn(conv(out, p["conv2_w"]), p["bn2_g"], p["bn2_b"],
             p["bn2_m"], p["bn2_v"]) + x
    return jnp.maximum(out, 0.0)


# ---------------------------------------------------------------------------
if __name__ == "__main__":
    key = jax.random.PRNGKey(0)
    N, C, Hs, Ws = 2, 4, 16, 16          # batch=2, inplanes=planes=4, spatial=16
    inplanes = planes = C

    ks = jax.random.split(key, 8)
    fan_in = inplanes * 3 * 3
    params = {
        "conv1_w": jax.random.normal(ks[0], (planes, inplanes, 3, 3), jnp.float32)
                   * (2.0 / fan_in) ** 0.5,
        "conv2_w": jax.random.normal(ks[1], (planes, planes, 3, 3), jnp.float32)
                   * (2.0 / (planes * 9)) ** 0.5,
        "bn1_g": 1.0 + 0.1 * jax.random.normal(ks[2], (planes,), jnp.float32),
        "bn1_b": 0.1 * jax.random.normal(ks[3], (planes,), jnp.float32),
        "bn1_m": 0.1 * jax.random.normal(ks[4], (planes,), jnp.float32),
        "bn1_v": 1.0 + 0.1 * jnp.abs(jax.random.normal(ks[5], (planes,), jnp.float32)),
        "bn2_g": 1.0 + 0.1 * jax.random.normal(ks[6], (planes,), jnp.float32),
        "bn2_b": 0.1 * jax.random.normal(ks[7], (planes,), jnp.float32),
        "bn2_m": jnp.zeros((planes,), jnp.float32),
        "bn2_v": jnp.ones((planes,), jnp.float32),
    }

    x = jax.random.normal(jax.random.PRNGKey(42), (N, C, Hs, Ws), jnp.float32)

    out = basic_block_forward(x, params)
    out = jax.block_until_ready(out)

    ref = reference_forward(x, params)
    assert out.shape == ref.shape == (N, C, Hs, Ws)
    # bf16 matmul operands (f32 accumulate / f32 epilogue) -> modest tolerance
    max_err = jnp.max(jnp.abs(out - ref))
    assert jnp.allclose(out, ref, atol=5e-2, rtol=5e-2), f"max err {max_err}"

    print("KERNEL_OK")
</pallas_src>

<mosaic_0001>
module attributes {stable_mosaic.version = 11 : i64} {
  func.func @basic_block_kernel(%arg0: i32, %arg1: memref<1x16x16x4xf32, #tpu.memory_space<vmem>>, %arg2: memref<3x3x4x4xbf16, #tpu.memory_space<vmem>>, %arg3: memref<1x4xf32, #tpu.memory_space<vmem>>, %arg4: memref<1x4xf32, #tpu.memory_space<vmem>>, %arg5: memref<3x3x4x4xbf16, #tpu.memory_space<vmem>>, %arg6: memref<1x4xf32, #tpu.memory_space<vmem>>, %arg7: memref<1x4xf32, #tpu.memory_space<vmem>>, %arg8: memref<1x16x16x4xf32, #tpu.memory_space<vmem>>, %arg9: memref<18x18x4xbf16, #tpu.memory_space<vmem>>, %arg10: memref<18x18x4xbf16, #tpu.memory_space<vmem>>) attributes {dimension_semantics = [#tpu.dimension_semantics<parallel>], iteration_bounds = array<i64: 2>, scalar_prefetch = 0 : i64, scratch_operands = 2 : i64, tpu.core_type = #tpu.core_type<tc>, window_params = [{transform_indices = @transform_0, window_bounds = array<i64: 1, 16, 16, 4>}, {pipeline_mode = #tpu.pipeline_mode<synchronous>, transform_indices = @transform_1, window_bounds = array<i64: 3, 3, 4, 4>}, {pipeline_mode = #tpu.pipeline_mode<synchronous>, transform_indices = @transform_2, window_bounds = array<i64: 1, 4>}, {pipeline_mode = #tpu.pipeline_mode<synchronous>, transform_indices = @transform_3, window_bounds = array<i64: 1, 4>}, {pipeline_mode = #tpu.pipeline_mode<synchronous>, transform_indices = @transform_4, window_bounds = array<i64: 3, 3, 4, 4>}, {pipeline_mode = #tpu.pipeline_mode<synchronous>, transform_indices = @transform_5, window_bounds = array<i64: 1, 4>}, {pipeline_mode = #tpu.pipeline_mode<synchronous>, transform_indices = @transform_6, window_bounds = array<i64: 1, 4>}, {transform_indices = @transform_7, window_bounds = array<i64: 1, 16, 16, 4>}]} {
    %cst = arith.constant 0.000000e+00 : bf16
    %0 = vector.broadcast %cst : bf16 to vector<18x18x4xbf16>
    %c0 = arith.constant 0 : index
    %c0_0 = arith.constant 0 : index
    %c0_1 = arith.constant 0 : index
    %1 = vector.load %arg9[%c0, %c0_0, %c0_1] : memref<18x18x4xbf16, #tpu.memory_space<vmem>>, vector<18x18x4xbf16>
    tpu.vector_store %arg9[%c0, %c0_0, %c0_1], %0 {strides = array<i32>} : memref<18x18x4xbf16, #tpu.memory_space<vmem>>, vector<18x18x4xbf16>,
    %c0_2 = arith.constant 0 : index
    %c0_3 = arith.constant 0 : index
    %c0_4 = arith.constant 0 : index
    %c0_5 = arith.constant 0 : index
    %2 = vector.load %arg1[%c0_2, %c0_3, %c0_4, %c0_5] : memref<1x16x16x4xf32, #tpu.memory_space<vmem>>, vector<1x16x16x4xf32>
    %3 = vector.shape_cast %2 : vector<1x16x16x4xf32> to vector<16x16x4xf32>
    %4 = arith.truncf %3 : vector<16x16x4xf32> to vector<16x16x4xbf16>
    %c1 = arith.constant 1 : index
    %c1_6 = arith.constant 1 : index
    %c0_7 = arith.constant 0 : index
    %5 = vector.load %arg9[%c1, %c1_6, %c0_7] : memref<18x18x4xbf16, #tpu.memory_space<vmem>>, vector<16x16x4xbf16>
    tpu.vector_store %arg9[%c1, %c1_6, %c0_7], %4 {strides = array<i32>} : memref<18x18x4xbf16, #tpu.memory_space<vmem>>, vector<16x16x4xbf16>,
    %cst_8 = arith.constant 0.000000e+00 : f32
    %6 = vector.broadcast %cst_8 : f32 to vector<256x4xf32>
    %c0_9 = arith.constant 0 : index
    %c0_10 = arith.constant 0 : index
    %c0_11 = arith.constant 0 : index
    %7 = vector.load %arg9[%c0_9, %c0_10, %c0_11] : memref<18x18x4xbf16, #tpu.memory_space<vmem>>, vector<16x16x4xbf16>
    %8 = vector.shape_cast %7 : vector<16x16x4xbf16> to vector<256x4xbf16>
    %c0_12 = arith.constant 0 : index
    %c0_13 = arith.constant 0 : index
    %c0_14 = arith.constant 0 : index
    %c0_15 = arith.constant 0 : index
    %9 = vector.load %arg2[%c0_12, %c0_13, %c0_14, %c0_15] : memref<3x3x4x4xbf16, #tpu.memory_space<vmem>>, vector<1x1x4x4xbf16>
    %10 = vector.shape_cast %9 : vector<1x1x4x4xbf16> to vector<4x4xbf16>
    %cst_16 = arith.constant dense<0.000000e+00> : vector<256x4xf32>
    %11 = tpu.matmul %8, %10, %cst_16 {dimension_numbers = #tpu.dot_dimension_numbers<[1], [0], [0], [1], [0, 0, 1, 1], [], []>} : vector<256x4xbf16>, vector<4x4xbf16>, vector<256x4xf32> -> vector<256x4xf32>
    %12 = arith.addf %6, %11 : vector<256x4xf32>
    %c0_17 = arith.constant 0 : index
    %c1_18 = arith.constant 1 : index
    %c0_19 = arith.constant 0 : index
    %13 = vector.load %arg9[%c0_17, %c1_18, %c0_19] : memref<18x18x4xbf16, #tpu.memory_space<vmem>>, vector<16x16x4xbf16>
    %14 = vector.shape_cast %13 : vector<16x16x4xbf16> to vector<256x4xbf16>
    %c0_20 = arith.constant 0 : index
    %c1_21 = arith.constant 1 : index
    %c0_22 = arith.constant 0 : index
    %c0_23 = arith.constant 0 : index
    %15 = vector.load %arg2[%c0_20, %c1_21, %c0_22, %c0_23] : memref<3x3x4x4xbf16, #tpu.memory_space<vmem>>, vector<1x1x4x4xbf16>
    %16 = vector.shape_cast %15 : vector<1x1x4x4xbf16> to vector<4x4xbf16>
    %cst_24 = arith.constant dense<0.000000e+00> : vector<256x4xf32>
    %17 = tpu.matmul %14, %16, %cst_24 {dimension_numbers = #tpu.dot_dimension_numbers<[1], [0], [0], [1], [0, 0, 1, 1], [], []>} : vector<256x4xbf16>, vector<4x4xbf16>, vector<256x4xf32> -> vector<256x4xf32>
    %18 = arith.addf %12, %17 : vector<256x4xf32>
    %c0_25 = arith.constant 0 : index
    %c2 = arith.constant 2 : index
    %c0_26 = arith.constant 0 : index
    %19 = vector.load %arg9[%c0_25, %c2, %c0_26] : memref<18x18x4xbf16, #tpu.memory_space<vmem>>, vector<16x16x4xbf16>
    %20 = vector.shape_cast %19 : vector<16x16x4xbf16> to vector<256x4xbf16>
    %c0_27 = arith.constant 0 : index
    %c2_28 = arith.constant 2 : index
    %c0_29 = arith.constant 0 : index
    %c0_30 = arith.constant 0 : index
    %21 = vector.load %arg2[%c0_27, %c2_28, %c0_29, %c0_30] : memref<3x3x4x4xbf16, #tpu.memory_space<vmem>>, vector<1x1x4x4xbf16>
    %22 = vector.shape_cast %21 : vector<1x1x4x4xbf16> to vector<4x4xbf16>
    %cst_31 = arith.constant dense<0.000000e+00> : vector<256x4xf32>
    %23 = tpu.matmul %20, %22, %cst_31 {dimension_numbers = #tpu.dot_dimension_numbers<[1], [0], [0], [1], [0, 0, 1, 1], [], []>} : vector<256x4xbf16>, vector<4x4xbf16>, vector<256x4xf32> -> vector<256x4xf32>
    %24 = arith.addf %18, %23 : vector<256x4xf32>
    %c1_32 = arith.constant 1 : index
    %c0_33 = arith.constant 0 : index
    %c0_34 = arith.constant 0 : index
    %25 = vector.load %arg9[%c1_32, %c0_33, %c0_34] : memref<18x18x4xbf16, #tpu.memory_space<vmem>>, vector<16x16x4xbf16>
    %26 = vector.shape_cast %25 : vector<16x16x4xbf16> to vector<256x4xbf16>
    %c1_35 = arith.constant 1 : index
    %c0_36 = arith.constant 0 : index
    %c0_37 = arith.constant 0 : index
    %c0_38 = arith.constant 0 : index
    %27 = vector.load %arg2[%c1_35, %c0_36, %c0_37, %c0_38] : memref<3x3x4x4xbf16, #tpu.memory_space<vmem>>, vector<1x1x4x4xbf16>
    %28 = vector.shape_cast %27 : vector<1x1x4x4xbf16> to vector<4x4xbf16>
    %cst_39 = arith.constant dense<0.000000e+00> : vector<256x4xf32>
    %29 = tpu.matmul %26, %28, %cst_39 {dimension_numbers = #tpu.dot_dimension_numbers<[1], [0], [0], [1], [0, 0, 1, 1], [], []>} : vector<256x4xbf16>, vector<4x4xbf16>, vector<256x4xf32> -> vector<256x4xf32>
    %30 = arith.addf %24, %29 : vector<256x4xf32>
    %c1_40 = arith.constant 1 : index
    %c1_41 = arith.constant 1 : index
    %c0_42 = arith.constant 0 : index
    %31 = vector.load %arg9[%c1_40, %c1_41, %c0_42] : memref<18x18x4xbf16, #tpu.memory_space<vmem>>, vector<16x16x4xbf16>
    %32 = vector.shape_cast %31 : vector<16x16x4xbf16> to vector<256x4xbf16>
    %c1_43 = arith.constant 1 : index
    %c1_44 = arith.constant 1 : index
    %c0_45 = arith.constant 0 : index
    %c0_46 = arith.constant 0 : index
    %33 = vector.load %arg2[%c1_43, %c1_44, %c0_45, %c0_46] : memref<3x3x4x4xbf16, #tpu.memory_space<vmem>>, vector<1x1x4x4xbf16>
    %34 = vector.shape_cast %33 : vector<1x1x4x4xbf16> to vector<4x4xbf16>
    %cst_47 = arith.constant dense<0.000000e+00> : vector<256x4xf32>
    %35 = tpu.matmul %32, %34, %cst_47 {dimension_numbers = #tpu.dot_dimension_numbers<[1], [0], [0], [1], [0, 0, 1, 1], [], []>} : vector<256x4xbf16>, vector<4x4xbf16>, vector<256x4xf32> -> vector<256x4xf32>
    %36 = arith.addf %30, %35 : vector<256x4xf32>
    %c1_48 = arith.constant 1 : index
    %c2_49 = arith.constant 2 : index
    %c0_50 = arith.constant 0 : index
    %37 = vector.load %arg9[%c1_48, %c2_49, %c0_50] : memref<18x18x4xbf16, #tpu.memory_space<vmem>>, vector<16x16x4xbf16>
    %38 = vector.shape_cast %37 : vector<16x16x4xbf16> to vector<256x4xbf16>
    %c1_51 = arith.constant 1 : index
    %c2_52 = arith.constant 2 : index
    %c0_53 = arith.constant 0 : index
    %c0_54 = arith.constant 0 : index
    %39 = vector.load %arg2[%c1_51, %c2_52, %c0_53, %c0_54] : memref<3x3x4x4xbf16, #tpu.memory_space<vmem>>, vector<1x1x4x4xbf16>
    %40 = vector.shape_cast %39 : vector<1x1x4x4xbf16> to vector<4x4xbf16>
    %cst_55 = arith.constant dense<0.000000e+00> : vector<256x4xf32>
    %41 = tpu.matmul %38, %40, %cst_55 {dimension_numbers = #tpu.dot_dimension_numbers<[1], [0], [0], [1], [0, 0, 1, 1], [], []>} : vector<256x4xbf16>, vector<4x4xbf16>, vector<256x4xf32> -> vector<256x4xf32>
    %42 = arith.addf %36, %41 : vector<256x4xf32>
    %c2_56 = arith.constant 2 : index
    %c0_57 = arith.constant 0 : index
    %c0_58 = arith.constant 0 : index
    %43 = vector.load %arg9[%c2_56, %c0_57, %c0_58] : memref<18x18x4xbf16, #tpu.memory_space<vmem>>, vector<16x16x4xbf16>
    %44 = vector.shape_cast %43 : vector<16x16x4xbf16> to vector<256x4xbf16>
    %c2_59 = arith.constant 2 : index
    %c0_60 = arith.constant 0 : index
    %c0_61 = arith.constant 0 : index
    %c0_62 = arith.constant 0 : index
    %45 = vector.load %arg2[%c2_59, %c0_60, %c0_61, %c0_62] : memref<3x3x4x4xbf16, #tpu.memory_space<vmem>>, vector<1x1x4x4xbf16>
    %46 = vector.shape_cast %45 : vector<1x1x4x4xbf16> to vector<4x4xbf16>
    %cst_63 = arith.constant dense<0.000000e+00> : vector<256x4xf32>
    %47 = tpu.matmul %44, %46, %cst_63 {dimension_numbers = #tpu.dot_dimension_numbers<[1], [0], [0], [1], [0, 0, 1, 1], [], []>} : vector<256x4xbf16>, vector<4x4xbf16>, vector<256x4xf32> -> vector<256x4xf32>
    %48 = arith.addf %42, %47 : vector<256x4xf32>
    %c2_64 = arith.constant 2 : index
    %c1_65 = arith.constant 1 : index
    %c0_66 = arith.constant 0 : index
    %49 = vector.load %arg9[%c2_64, %c1_65, %c0_66] : memref<18x18x4xbf16, #tpu.memory_space<vmem>>, vector<16x16x4xbf16>
    %50 = vector.shape_cast %49 : vector<16x16x4xbf16> to vector<256x4xbf16>
    %c2_67 = arith.constant 2 : index
    %c1_68 = arith.constant 1 : index
    %c0_69 = arith.constant 0 : index
    %c0_70 = arith.constant 0 : index
    %51 = vector.load %arg2[%c2_67, %c1_68, %c0_69, %c0_70] : memref<3x3x4x4xbf16, #tpu.memory_space<vmem>>, vector<1x1x4x4xbf16>
    %52 = vector.shape_cast %51 : vector<1x1x4x4xbf16> to vector<4x4xbf16>
    %cst_71 = arith.constant dense<0.000000e+00> : vector<256x4xf32>
    %53 = tpu.matmul %50, %52, %cst_71 {dimension_numbers = #tpu.dot_dimension_numbers<[1], [0], [0], [1], [0, 0, 1, 1], [], []>} : vector<256x4xbf16>, vector<4x4xbf16>, vector<256x4xf32> -> vector<256x4xf32>
    %54 = arith.addf %48, %53 : vector<256x4xf32>
    %c2_72 = arith.constant 2 : index
    %c2_73 = arith.constant 2 : index
    %c0_74 = arith.constant 0 : index
    %55 = vector.load %arg9[%c2_72, %c2_73, %c0_74] : memref<18x18x4xbf16, #tpu.memory_space<vmem>>, vector<16x16x4xbf16>
    %56 = vector.shape_cast %55 : vector<16x16x4xbf16> to vector<256x4xbf16>
    %c2_75 = arith.constant 2 : index
    %c2_76 = arith.constant 2 : index
    %c0_77 = arith.constant 0 : index
    %c0_78 = arith.constant 0 : index
    %57 = vector.load %arg2[%c2_75, %c2_76, %c0_77, %c0_78] : memref<3x3x4x4xbf16, #tpu.memory_space<vmem>>, vector<1x1x4x4xbf16>
    %58 = vector.shape_cast %57 : vector<1x1x4x4xbf16> to vector<4x4xbf16>
    %cst_79 = arith.constant dense<0.000000e+00> : vector<256x4xf32>
    %59 = tpu.matmul %56, %58, %cst_79 {dimension_numbers = #tpu.dot_dimension_numbers<[1], [0], [0], [1], [0, 0, 1, 1], [], []>} : vector<256x4xbf16>, vector<4x4xbf16>, vector<256x4xf32> -> vector<256x4xf32>
    %60 = arith.addf %54, %59 : vector<256x4xf32>
    %c0_80 = arith.constant 0 : index
    %c0_81 = arith.constant 0 : index
    %61 = vector.load %arg3[%c0_80, %c0_81] : memref<1x4xf32, #tpu.memory_space<vmem>>, vector<1x4xf32>
    %62 = vector.broadcast %61 : vector<1x4xf32> to vector<256x4xf32>
    %63 = arith.mulf %60, %62 : vector<256x4xf32>
    %c0_82 = arith.constant 0 : index
    %c0_83 = arith.constant 0 : index
    %64 = vector.load %arg4[%c0_82, %c0_83] : memref<1x4xf32, #tpu.memory_space<vmem>>, vector<1x4xf32>
    %65 = vector.broadcast %64 : vector<1x4xf32> to vector<256x4xf32>
    %66 = arith.addf %63, %65 : vector<256x4xf32>
    %cst_84 = arith.constant 0.000000e+00 : f32
    %67 = vector.broadcast %cst_84 : f32 to vector<256x4xf32>
    %68 = arith.maximumf %66, %67 : vector<256x4xf32>
    %cst_85 = arith.constant 0.000000e+00 : bf16
    %69 = vector.broadcast %cst_85 : bf16 to vector<18x18x4xbf16>
    %c0_86 = arith.constant 0 : index
    %c0_87 = arith.constant 0 : index
    %c0_88 = arith.constant 0 : index
    %70 = vector.load %arg10[%c0_86, %c0_87, %c0_88] : memref<18x18x4xbf16, #tpu.memory_space<vmem>>, vector<18x18x4xbf16>
    tpu.vector_store %arg10[%c0_86, %c0_87, %c0_88], %69 {strides = array<i32>} : memref<18x18x4xbf16, #tpu.memory_space<vmem>>, vector<18x18x4xbf16>,
    %71 = vector.shape_cast %68 : vector<256x4xf32> to vector<16x16x4xf32>
    %72 = arith.truncf %71 : vector<16x16x4xf32> to vector<16x16x4xbf16>
    %c1_89 = arith.constant 1 : index
    %c1_90 = arith.constant 1 : index
    %c0_91 = arith.constant 0 : index
    %73 = vector.load %arg10[%c1_89, %c1_90, %c0_91] : memref<18x18x4xbf16, #tpu.memory_space<vmem>>, vector<16x16x4xbf16>
    tpu.vector_store %arg10[%c1_89, %c1_90, %c0_91], %72 {strides = array<i32>} : memref<18x18x4xbf16, #tpu.memory_space<vmem>>, vector<16x16x4xbf16>,
    %cst_92 = arith.constant 0.000000e+00 : f32
    %74 = vector.broadcast %cst_92 : f32 to vector<256x4xf32>
    %c0_93 = arith.constant 0 : index
    %c0_94 = arith.constant 0 : index
    %c0_95 = arith.constant 0 : index
    %75 = vector.load %arg10[%c0_93, %c0_94, %c0_95] : memref<18x18x4xbf16, #tpu.memory_space<vmem>>, vector<16x16x4xbf16>
    %76 = vector.shape_cast %75 : vector<16x16x4xbf16> to vector<256x4xbf16>
    %c0_96 = arith.constant 0 : index
    %c0_97 = arith.constant 0 : index
    %c0_98 = arith.constant 0 : index
    %c0_99 = arith.constant 0 : index
    %77 = vector.load %arg5[%c0_96, %c0_97, %c0_98, %c0_99] : memref<3x3x4x4xbf16, #tpu.memory_space<vmem>>, vector<1x1x4x4xbf16>
    %78 = vector.shape_cast %77 : vector<1x1x4x4xbf16> to vector<4x4xbf16>
    %cst_100 = arith.constant dense<0.000000e+00> : vector<256x4xf32>
    %79 = tpu.matmul %76, %78, %cst_100 {dimension_numbers = #tpu.dot_dimension_numbers<[1], [0], [0], [1], [0, 0, 1, 1], [], []>} : vector<256x4xbf16>, vector<4x4xbf16>, vector<256x4xf32> -> vector<256x4xf32>
    %80 = arith.addf %74, %79 : vector<256x4xf32>
    %c0_101 = arith.constant 0 : index
    %c1_102 = arith.constant 1 : index
    %c0_103 = arith.constant 0 : index
    %81 = vector.load %arg10[%c0_101, %c1_102, %c0_103] : memref<18x18x4xbf16, #tpu.memory_space<vmem>>, vector<16x16x4xbf16>
    %82 = vector.shape_cast %81 : vector<16x16x4xbf16> to vector<256x4xbf16>
    %c0_104 = arith.constant 0 : index
    %c1_105 = arith.constant 1 : index
    %c0_106 = arith.constant 0 : index
    %c0_107 = arith.constant 0 : index
    %83 = vector.load %arg5[%c0_104, %c1_105, %c0_106, %c0_107] : memref<3x3x4x4xbf16, #tpu.memory_space<vmem>>, vector<1x1x4x4xbf16>
    %84 = vector.shape_cast %83 : vector<1x1x4x4xbf16> to vector<4x4xbf16>
    %cst_108 = arith.constant dense<0.000000e+00> : vector<256x4xf32>
    %85 = tpu.matmul %82, %84, %cst_108 {dimension_numbers = #tpu.dot_dimension_numbers<[1], [0], [0], [1], [0, 0, 1, 1], [], []>} : vector<256x4xbf16>, vector<4x4xbf16>, vector<256x4xf32> -> vector<256x4xf32>
    %86 = arith.addf %80, %85 : vector<256x4xf32>
    %c0_109 = arith.constant 0 : index
    %c2_110 = arith.constant 2 : index
    %c0_111 = arith.constant 0 : index
    %87 = vector.load %arg10[%c0_109, %c2_110, %c0_111] : memref<18x18x4xbf16, #tpu.memory_space<vmem>>, vector<16x16x4xbf16>
    %88 = vector.shape_cast %87 : vector<16x16x4xbf16> to vector<256x4xbf16>
    %c0_112 = arith.constant 0 : index
    %c2_113 = arith.constant 2 : index
    %c0_114 = arith.constant 0 : index
    %c0_115 = arith.constant 0 : index
    %89 = vector.load %arg5[%c0_112, %c2_113, %c0_114, %c0_115] : memref<3x3x4x4xbf16, #tpu.memory_space<vmem>>, vector<1x1x4x4xbf16>
    %90 = vector.shape_cast %89 : vector<1x1x4x4xbf16> to vector<4x4xbf16>
    %cst_116 = arith.constant dense<0.000000e+00> : vector<256x4xf32>
    %91 = tpu.matmul %88, %90, %cst_116 {dimension_numbers = #tpu.dot_dimension_numbers<[1], [0], [0], [1], [0, 0, 1, 1], [], []>} : vector<256x4xbf16>, vector<4x4xbf16>, vector<256x4xf32> -> vector<256x4xf32>
    %92 = arith.addf %86, %91 : vector<256x4xf32>
    %c1_117 = arith.constant 1 : index
    %c0_118 = arith.constant 0 : index
    %c0_119 = arith.constant 0 : index
    %93 = vector.load %arg10[%c1_117, %c0_118, %c0_119] : memref<18x18x4xbf16, #tpu.memory_space<vmem>>, vector<16x16x4xbf16>
    %94 = vector.shape_cast %93 : vector<16x16x4xbf16> to vector<256x4xbf16>
    %c1_120 = arith.constant 1 : index
    %c0_121 = arith.constant 0 : index
    %c0_122 = arith.constant 0 : index
    %c0_123 = arith.constant 0 : index
    %95 = vector.load %arg5[%c1_120, %c0_121, %c0_122, %c0_123] : memref<3x3x4x4xbf16, #tpu.memory_space<vmem>>, vector<1x1x4x4xbf16>
    %96 = vector.shape_cast %95 : vector<1x1x4x4xbf16> to vector<4x4xbf16>
    %cst_124 = arith.constant dense<0.000000e+00> : vector<256x4xf32>
    %97 = tpu.matmul %94, %96, %cst_124 {dimension_numbers = #tpu.dot_dimension_numbers<[1], [0], [0], [1], [0, 0, 1, 1], [], []>} : vector<256x4xbf16>, vector<4x4xbf16>, vector<256x4xf32> -> vector<256x4xf32>
    %98 = arith.addf %92, %97 : vector<256x4xf32>
    %c1_125 = arith.constant 1 : index
    %c1_126 = arith.constant 1 : index
    %c0_127 = arith.constant 0 : index
    %99 = vector.load %arg10[%c1_125, %c1_126, %c0_127] : memref<18x18x4xbf16, #tpu.memory_space<vmem>>, vector<16x16x4xbf16>
    %100 = vector.shape_cast %99 : vector<16x16x4xbf16> to vector<256x4xbf16>
    %c1_128 = arith.constant 1 : index
    %c1_129 = arith.constant 1 : index
    %c0_130 = arith.constant 0 : index
    %c0_131 = arith.constant 0 : index
    %101 = vector.load %arg5[%c1_128, %c1_129, %c0_130, %c0_131] : memref<3x3x4x4xbf16, #tpu.memory_space<vmem>>, vector<1x1x4x4xbf16>
    %102 = vector.shape_cast %101 : vector<1x1x4x4xbf16> to vector<4x4xbf16>
    %cst_132 = arith.constant dense<0.000000e+00> : vector<256x4xf32>
    %103 = tpu.matmul %100, %102, %cst_132 {dimension_numbers = #tpu.dot_dimension_numbers<[1], [0], [0], [1], [0, 0, 1, 1], [], []>} : vector<256x4xbf16>, vector<4x4xbf16>, vector<256x4xf32> -> vector<256x4xf32>
    %104 = arith.addf %98, %103 : vector<256x4xf32>
    %c1_133 = arith.constant 1 : index
    %c2_134 = arith.constant 2 : index
    %c0_135 = arith.constant 0 : index
    %105 = vector.load %arg10[%c1_133, %c2_134, %c0_135] : memref<18x18x4xbf16, #tpu.memory_space<vmem>>, vector<16x16x4xbf16>
    %106 = vector.shape_cast %105 : vector<16x16x4xbf16> to vector<256x4xbf16>
    %c1_136 = arith.constant 1 : index
    %c2_137 = arith.constant 2 : index
    %c0_138 = arith.constant 0 : index
    %c0_139 = arith.constant 0 : index
    %107 = vector.load %arg5[%c1_136, %c2_137, %c0_138, %c0_139] : memref<3x3x4x4xbf16, #tpu.memory_space<vmem>>, vector<1x1x4x4xbf16>
    %108 = vector.shape_cast %107 : vector<1x1x4x4xbf16> to vector<4x4xbf16>
    %cst_140 = arith.constant dense<0.000000e+00> : vector<256x4xf32>
    %109 = tpu.matmul %106, %108, %cst_140 {dimension_numbers = #tpu.dot_dimension_numbers<[1], [0], [0], [1], [0, 0, 1, 1], [], []>} : vector<256x4xbf16>, vector<4x4xbf16>, vector<256x4xf32> -> vector<256x4xf32>
    %110 = arith.addf %104, %109 : vector<256x4xf32>
    %c2_141 = arith.constant 2 : index
    %c0_142 = arith.constant 0 : index
    %c0_143 = arith.constant 0 : index
    %111 = vector.load %arg10[%c2_141, %c0_142, %c0_143] : memref<18x18x4xbf16, #tpu.memory_space<vmem>>, vector<16x16x4xbf16>
    %112 = vector.shape_cast %111 : vector<16x16x4xbf16> to vector<256x4xbf16>
    %c2_144 = arith.constant 2 : index
    %c0_145 = arith.constant 0 : index
    %c0_146 = arith.constant 0 : index
    %c0_147 = arith.constant 0 : index
    %113 = vector.load %arg5[%c2_144, %c0_145, %c0_146, %c0_147] : memref<3x3x4x4xbf16, #tpu.memory_space<vmem>>, vector<1x1x4x4xbf16>
    %114 = vector.shape_cast %113 : vector<1x1x4x4xbf16> to vector<4x4xbf16>
    %cst_148 = arith.constant dense<0.000000e+00> : vector<256x4xf32>
    %115 = tpu.matmul %112, %114, %cst_148 {dimension_numbers = #tpu.dot_dimension_numbers<[1], [0], [0], [1], [0, 0, 1, 1], [], []>} : vector<256x4xbf16>, vector<4x4xbf16>, vector<256x4xf32> -> vector<256x4xf32>
    %116 = arith.addf %110, %115 : vector<256x4xf32>
    %c2_149 = arith.constant 2 : index
    %c1_150 = arith.constant 1 : index
    %c0_151 = arith.constant 0 : index
    %117 = vector.load %arg10[%c2_149, %c1_150, %c0_151] : memref<18x18x4xbf16, #tpu.memory_space<vmem>>, vector<16x16x4xbf16>
    %118 = vector.shape_cast %117 : vector<16x16x4xbf16> to vector<256x4xbf16>
    %c2_152 = arith.constant 2 : index
    %c1_153 = arith.constant 1 : index
    %c0_154 = arith.constant 0 : index
    %c0_155 = arith.constant 0 : index
    %119 = vector.load %arg5[%c2_152, %c1_153, %c0_154, %c0_155] : memref<3x3x4x4xbf16, #tpu.memory_space<vmem>>, vector<1x1x4x4xbf16>
    %120 = vector.shape_cast %119 : vector<1x1x4x4xbf16> to vector<4x4xbf16>
    %cst_156 = arith.constant dense<0.000000e+00> : vector<256x4xf32>
    %121 = tpu.matmul %118, %120, %cst_156 {dimension_numbers = #tpu.dot_dimension_numbers<[1], [0], [0], [1], [0, 0, 1, 1], [], []>} : vector<256x4xbf16>, vector<4x4xbf16>, vector<256x4xf32> -> vector<256x4xf32>
    %122 = arith.addf %116, %121 : vector<256x4xf32>
    %c2_157 = arith.constant 2 : index
    %c2_158 = arith.constant 2 : index
    %c0_159 = arith.constant 0 : index
    %123 = vector.load %arg10[%c2_157, %c2_158, %c0_159] : memref<18x18x4xbf16, #tpu.memory_space<vmem>>, vector<16x16x4xbf16>
    %124 = vector.shape_cast %123 : vector<16x16x4xbf16> to vector<256x4xbf16>
    %c2_160 = arith.constant 2 : index
    %c2_161 = arith.constant 2 : index
    %c0_162 = arith.constant 0 : index
    %c0_163 = arith.constant 0 : index
    %125 = vector.load %arg5[%c2_160, %c2_161, %c0_162, %c0_163] : memref<3x3x4x4xbf16, #tpu.memory_space<vmem>>, vector<1x1x4x4xbf16>
    %126 = vector.shape_cast %125 : vector<1x1x4x4xbf16> to vector<4x4xbf16>
    %cst_164 = arith.constant dense<0.000000e+00> : vector<256x4xf32>
    %127 = tpu.matmul %124, %126, %cst_164 {dimension_numbers = #tpu.dot_dimension_numbers<[1], [0], [0], [1], [0, 0, 1, 1], [], []>} : vector<256x4xbf16>, vector<4x4xbf16>, vector<256x4xf32> -> vector<256x4xf32>
    %128 = arith.addf %122, %127 : vector<256x4xf32>
    %c0_165 = arith.constant 0 : index
    %c0_166 = arith.constant 0 : index
    %129 = vector.load %arg6[%c0_165, %c0_166] : memref<1x4xf32, #tpu.memory_space<vmem>>, vector<1x4xf32>
    %130 = vector.broadcast %129 : vector<1x4xf32> to vector<256x4xf32>
    %131 = arith.mulf %128, %130 : vector<256x4xf32>
    %c0_167 = arith.constant 0 : index
    %c0_168 = arith.constant 0 : index
    %132 = vector.load %arg7[%c0_167, %c0_168] : memref<1x4xf32, #tpu.memory_space<vmem>>, vector<1x4xf32>
    %133 = vector.broadcast %132 : vector<1x4xf32> to vector<256x4xf32>
    %134 = arith.addf %131, %133 : vector<256x4xf32>
    %c0_169 = arith.constant 0 : index
    %c0_170 = arith.constant 0 : index
    %c0_171 = arith.constant 0 : index
    %c0_172 = arith.constant 0 : index
    %135 = vector.load %arg1[%c0_169, %c0_170, %c0_171, %c0_172] : memref<1x16x16x4xf32, #tpu.memory_space<vmem>>, vector<1x16x16x4xf32>
    %136 = vector.shape_cast %135 : vector<1x16x16x4xf32> to vector<16x16x4xf32>
    %137 = vector.shape_cast %136 : vector<16x16x4xf32> to vector<256x4xf32>
    %138 = arith.addf %134, %137 : vector<256x4xf32>
    %cst_173 = arith.constant 0.000000e+00 : f32
    %139 = vector.broadcast %cst_173 : f32 to vector<256x4xf32>
    %140 = arith.maximumf %138, %139 : vector<256x4xf32>
    %141 = vector.shape_cast %140 : vector<256x4xf32> to vector<16x16x4xf32>
    %c0_174 = arith.constant 0 : index
    %c0_175 = arith.constant 0 : index
    %c0_176 = arith.constant 0 : index
    %c0_177 = arith.constant 0 : index
    %142 = vector.load %arg8[%c0_174, %c0_175, %c0_176, %c0_177] : memref<1x16x16x4xf32, #tpu.memory_space<vmem>>, vector<1x16x16x4xf32>
    %143 = vector.shape_cast %142 : vector<1x16x16x4xf32> to vector<16x16x4xf32>
    %144 = vector.shape_cast %141 : vector<16x16x4xf32> to vector<1x16x16x4xf32>
    tpu.vector_store %arg8[%c0_174, %c0_175, %c0_176, %c0_177], %144 {strides = array<i32>} : memref<1x16x16x4xf32, #tpu.memory_space<vmem>>, vector<1x16x16x4xf32>,
    return
  }
  func.func @transform_0(%arg0: i32) -> (i32, i32, i32, i32) {
    %c0_i32 = arith.constant 0 : i32
    %c0_i32_0 = arith.constant 0 : i32
    %c0_i32_1 = arith.constant 0 : i32
    %c0_i32_2 = arith.constant 0 : i32
    return %arg0, %c0_i32, %c0_i32_0, %c0_i32_1 : i32, i32, i32, i32
  }
  func.func @transform_1(%arg0: i32) -> (i32, i32, i32, i32) {
    %c0_i32 = arith.constant 0 : i32
    %c0_i32_0 = arith.constant 0 : i32
    %c0_i32_1 = arith.constant 0 : i32
    %c0_i32_2 = arith.constant 0 : i32
    %c0_i32_3 = arith.constant 0 : i32
    return %c0_i32, %c0_i32_0, %c0_i32_1, %c0_i32_2 : i32, i32, i32, i32
  }
  func.func @transform_2(%arg0: i32) -> (i32, i32) {
    %c0_i32 = arith.constant 0 : i32
    %c0_i32_0 = arith.constant 0 : i32
    %c0_i32_1 = arith.constant 0 : i32
    return %c0_i32, %c0_i32_0 : i32, i32
  }
  func.func @transform_3(%arg0: i32) -> (i32, i32) {
    %c0_i32 = arith.constant 0 : i32
    %c0_i32_0 = arith.constant 0 : i32
    %c0_i32_1 = arith.constant 0 : i32
    return %c0_i32, %c0_i32_0 : i32, i32
  }
  func.func @transform_4(%arg0: i32) -> (i32, i32, i32, i32) {
    %c0_i32 = arith.constant 0 : i32
    %c0_i32_0 = arith.constant 0 : i32
    %c0_i32_1 = arith.constant 0 : i32
    %c0_i32_2 = arith.constant 0 : i32
    %c0_i32_3 = arith.constant 0 : i32
    return %c0_i32, %c0_i32_0, %c0_i32_1, %c0_i32_2 : i32, i32, i32, i32
  }
  func.func @transform_5(%arg0: i32) -> (i32, i32) {
    %c0_i32 = arith.constant 0 : i32
    %c0_i32_0 = arith.constant 0 : i32
    %c0_i32_1 = arith.constant 0 : i32
    return %c0_i32, %c0_i32_0 : i32, i32
  }
  func.func @transform_6(%arg0: i32) -> (i32, i32) {
    %c0_i32 = arith.constant 0 : i32
    %c0_i32_0 = arith.constant 0 : i32
    %c0_i32_1 = arith.constant 0 : i32
    return %c0_i32, %c0_i32_0 : i32, i32
  }
  func.func @transform_7(%arg0: i32) -> (i32, i32, i32, i32) {
    %c0_i32 = arith.constant 0 : i32
    %c0_i32_0 = arith.constant 0 : i32
    %c0_i32_1 = arith.constant 0 : i32
    %c0_i32_2 = arith.constant 0 : i32
    return %arg0, %c0_i32, %c0_i32_0, %c0_i32_1 : i32, i32, i32, i32
  }
}

</mosaic_0001>

<bundles_post_ra>
// kernel: basic_block_forward.1
= control target key start
LH: loop header
LB: loop body
LE: loop exit
PB: predicated region body
PF: predicated region fallthrough
CT: control target
= control target key end

     0   :  { %s13423_s24 = smov 0   ;;  %s17337_s0 = inlined_call_operand.vmem [shape: f32[2,16,16,4], index: 0, kind: input, shape index: {}]   ;;  %s17338_s1 = inlined_call_operand.vmem [shape: bf16[3,3,4,4], index: 1, kind: input, shape index: {}]   ;;  %s17339_s2 = inlined_call_operand.vmem [shape: f32[1,4], index: 2, kind: input, shape index: {}]   ;;  %s17340_s3 = inlined_call_operand.vmem [shape: f32[1,4], index: 3, kind: input, shape index: {}]   ;;  %s17341_s4 = inlined_call_operand.vmem [shape: bf16[3,3,4,4], index: 4, kind: input, shape index: {}]   ;;  %s17342_s5 = inlined_call_operand.vmem [shape: f32[1,4], index: 5, kind: input, shape index: {}]   ;;  %s17343_s6 = inlined_call_operand.vmem [shape: f32[1,4], index: 6, kind: input, shape index: {}]   ;;  %s17344_s7 = inlined_call_operand.vmem [shape: f32[2,16,16,4], index: 7, kind: output, shape index: {}]  }
   0x1 LB: > { %s10967_s25 = sadd.s32 4294967295, %s13380_s24   ;;  %p10971_p0 = scmp.ge.s32.totalorder %s13380_s24, 1  ;;  %s13380_s24 = sphi %s13423_s24, %s17_s24  }
   0x2   : > { %p237_p1 = scmp.lt.s32.totalorder %s13380_s24, 3 }
   0x4   : > { %p238_p2 = pnand %p10971_p0, %p237_p1 }
   0x6   : > { %241 = sbr.rel (%p238_p2) target bundleno = 1763 (0x6e3), region = 48 }
   0xd   : > { %v11008_v0 = vld [vmem:[%s17338_s1 + $0x2] sm:$0x3]  ;;  %vm1440_vm0 = vcmask 1041408   ;;  %vm280_vm1 = vcmask 27648   ;;  %vm283_vm2 = vcmask 24576   ;;  %v13382_v2 = vmov 0  }
   0xe   : > { %13230 = vmatprep.subr.msk.bf16.mxu0 %vm1440_vm0, %v11008_v0  ;;  %v13436_v1 = vsel %vm1440_vm0, %v11008_v0, 0  ;;  %281 = vst.msk [vmem:[#allocation2] sm:$0xf] %vm280_vm1, %v13382_v2  ;;  %282 = vst.msk [vmem:[#allocation2 + $0x4] sm:$0xf] %vm280_vm1, %v13382_v2  ;;  %p269_p3 = scmp.lt.s32.totalorder %s10967_s25, 1 }
   0xf   : > { %284 = vst.msk [vmem:[#allocation2 + $0x8] sm:$0x1] %vm283_vm2, %v13382_v2  ;;  %287 = vst.msk [vmem:[#allocation2 + $0x14] sm:$0x1] %vm283_vm2, %v13382_v2  ;;  %12107 = vmatpush3.bf16.msra.mxu0 %v13436_v1  ;;  %v13658_v3 = vld [vmem:[%s17338_s1] sm:$0x3] }
  0x10   : > { %285 = vst.msk [vmem:[#allocation2 + $0xc] sm:$0xf] %vm280_vm1, %v13382_v2  ;;  %286 = vst.msk [vmem:[#allocation2 + $0x10] sm:$0xf] %vm280_vm1, %v13382_v2  ;;  %13231 = vmatprep.subr.msk.bf16.mxu0 %vm1440_vm0, %v13658_v3  ;;  %s17738_s25 = smov (!%p269_p3, %s10967_s25), 1  ;;  %vm1391_vm7 = vcmask 31744  }
  0x11   : > { %288 = vst.msk [vmem:[#allocation2 + $0x18] sm:$0xf] %vm280_vm1, %v13382_v2  ;;  %289 = vst.msk [vmem:[#allocation2 + $0x1c] sm:$0xf] %vm280_vm1, %v13382_v2  ;;  %vm954_vm3 = vsmask.f32 3328 }
  0x12   : > { %290 = vst.msk [vmem:[#allocation2 + $0x20] sm:$0x1] %vm283_vm2, %v13382_v2  ;;  %293 = vst.msk [vmem:[#allocation2 + $0x2c] sm:$0x1] %vm283_vm2, %v13382_v2  ;;  %s11734_s30 = sshll.u32 %s17738_s25, 8  ;;  %v17462_v30 = vmov 0 }
  0x13   : > { %291 = vst.msk [vmem:[#allocation2 + $0x24] sm:$0xf] %vm280_vm1, %v13382_v2  ;;  %292 = vst.msk [vmem:[#allocation2 + $0x28] sm:$0xf] %vm280_vm1, %v13382_v2  ;;  %vm955_vm4 = vsmask.f32 7440  ;;  %s13674_s10 = scalar_lea.vmem %s17337_s0, %s11734_s30  ;;  %s17183_s21 = scalar_lea.vmem %s17344_s7, %s11734_s30 }
  0x14   : > { %294 = vst.msk [vmem:[#allocation2 + $0x30] sm:$0xf] %vm280_vm1, %v13382_v2  ;;  %295 = vst.msk [vmem:[#allocation2 + $0x34] sm:$0xf] %vm280_vm1, %v13382_v2  ;;  %vm464_vm5 = vsmask.f32 256 }
  0x15   : > { %296 = vst.msk [vmem:[#allocation2 + $0x38] sm:$0x1] %vm283_vm2, %v13382_v2  ;;  %299 = vst.msk [vmem:[#allocation2 + $0x44] sm:$0x1] %vm283_vm2, %v13382_v2  ;;  %vm465_vm6 = vsmask.f32 4368 }
  0x16   : > { %297 = vst.msk [vmem:[#allocation2 + $0x3c] sm:$0xf] %vm280_vm1, %v13382_v2  ;;  %298 = vst.msk [vmem:[#allocation2 + $0x40] sm:$0xf] %vm280_vm1, %v13382_v2  ;;  %v905_v4 = vld [vmem:[#allocation2] sm:$0xf] }
  0x17   : > { %300 = vst.msk [vmem:[#allocation2 + $0x48] sm:$0xf] %vm280_vm1, %v13382_v2  ;;  %301 = vst.msk [vmem:[#allocation2 + $0x4c] sm:$0xf] %vm280_vm1, %v13382_v2  ;;  %v906_v5 = vld [vmem:[#allocation2 + $0x4] sm:$0xf] }
  0x18   : > { %302 = vst.msk [vmem:[#allocation2 + $0x50] sm:$0x1] %vm283_vm2, %v13382_v2  ;;  %305 = vst.msk [vmem:[#allocation2 + $0x5c] sm:$0x1] %vm283_vm2, %v13382_v2  ;;  %v938_v6 = vld [vmem:[#allocation2 + $0x8] sm:$0x1] }
  0x19   : > { %303 = vst.msk [vmem:[#allocation2 + $0x54] sm:$0xf] %vm280_vm1, %v13382_v2  ;;  %304 = vst.msk [vmem:[#allocation2 + $0x58] sm:$0xf] %vm280_vm1, %v13382_v2  ;;  %v958_v7 = vshrl.u32 %v905_v4, 16  ;;  %v961_v8 = vshll.u32 %v905_v4, 16 }
  0x1a   : > { %306 = vst.msk [vmem:[#allocation2 + $0x60] sm:$0xf] %vm280_vm1, %v13382_v2  ;;  %307 = vst.msk [vmem:[#allocation2 + $0x64] sm:$0xf] %vm280_vm1, %v13382_v2  ;;  %v967_v9 = vshll.u32 %v906_v5, 16  ;;  %v971_v10 = vshrl.u32 %v906_v5, 16 }
  0x1b   : > { %308 = vst.msk [vmem:[#allocation2 + $0x68] sm:$0x1] %vm283_vm2, %v13382_v2  ;;  %311 = vst.msk [vmem:[#allocation2 + $0x74] sm:$0x1] %vm283_vm2, %v13382_v2  ;;  %v336_v11 = vld [vmem:[%s13674_s10] sm:$0xff]  ;;  %v337_v12 = vld [vmem:[%s13674_s10 + $0x8] sm:$0xff] }
  0x1c   : > { %309 = vst.msk [vmem:[#allocation2 + $0x6c] sm:$0xf] %vm280_vm1, %v13382_v2  ;;  %310 = vst.msk [vmem:[#allocation2 + $0x70] sm:$0xf] %vm280_vm1, %v13382_v2  ;;  %v977_v13 = vshll.u32 %v938_v6, 16  ;;  %v11736_v14 = vpack.c.bf16 %v336_v11, %v336_v11  ;;  %v11737_v15 = vpack.c.bf16 %v337_v12, %v337_v12  ;;  %v960_v16 = vrot.slane %v958_v7, 4 }
  0x1d   : > { %312 = vst.msk [vmem:[#allocation2 + $0x78] sm:$0xf] %vm280_vm1, %v13382_v2  ;;  %313 = vst.msk [vmem:[#allocation2 + $0x7c] sm:$0xf] %vm280_vm1, %v13382_v2  ;;  %vm789_vm8 = vsmask.f32 7938 }
  0x1e   : > { %314 = vst.msk [vmem:[#allocation2 + $0x80] sm:$0x1] %vm283_vm2, %v13382_v2  ;;  %317 = vst.msk [vmem:[#allocation2 + $0x8c] sm:$0x1] %vm283_vm2, %v13382_v2  ;;  %v963_v17 = vrot.slane %v961_v8, 5  ;;  %v969_v18 = vrot.slane %v967_v9, 5 }
  0x1f   : > { %315 = vst.msk [vmem:[#allocation2 + $0x84] sm:$0xf] %vm280_vm1, %v13382_v2  ;;  %316 = vst.msk [vmem:[#allocation2 + $0x88] sm:$0xf] %vm280_vm1, %v13382_v2  ;;  %v973_v19 = vrot.slane %v971_v10, 4  ;;  %v338_v20 = vld [vmem:[%s13674_s10 + $0x10] sm:$0xff] }
  0x20   : > { %318 = vst.msk [vmem:[#allocation2 + $0x90] sm:$0xf] %vm280_vm1, %v13382_v2  ;;  %319 = vst.msk [vmem:[#allocation2 + $0x94] sm:$0xf] %vm280_vm1, %v13382_v2  ;;  %v339_v21 = vld [vmem:[%s13674_s10 + $0x18] sm:$0xff]  ;;  %v979_v23 = vrot.slane %v977_v13, 5  ;;  %v964_v27 = vor.u32 %v963_v17, %v960_v16  ;;  %v11738_v31 = vpack.c.bf16 %v338_v20, %v338_v20 }
  0x21   : > { %320 = vst.msk [vmem:[#allocation2 + $0x98] sm:$0x1] %vm283_vm2, %v13382_v2  ;;  %323 = vst.msk [vmem:[#allocation2 + $0xa4] sm:$0x1] %vm283_vm2, %v13382_v2  ;;  %v468_v24 = vshrl.u32 %v11736_v14, 16  ;;  %v471_v25 = vshll.u32 %v11736_v14, 16  ;;  %v974_v28 = vor.u32 %v973_v19, %v969_v18  ;;  %v11739_v37 = vpack.c.bf16 %v339_v21, %v339_v21 }
  0x22   : > { %321 = vst.msk [vmem:[#allocation2 + $0x9c] sm:$0xf] %vm280_vm1, %v13382_v2  ;;  %322 = vst.msk [vmem:[#allocation2 + $0xa0] sm:$0xf] %vm280_vm1, %v13382_v2  ;;  %v476_v26 = vshrl.u32 %v11737_v15, 16  ;;  %v479_v29 = vshll.u32 %v11737_v15, 16 }
  0x23   : > { %324 = vst.msk [vmem:[#allocation2 + $0xa8] sm:$0xf] %vm280_vm1, %v13382_v2  ;;  %325 = vst.msk [vmem:[#allocation2 + $0xac] sm:$0xf] %vm280_vm1, %v13382_v2  ;;  %v340_v32 = vld [vmem:[%s13674_s10 + $0x20] sm:$0xff]  ;;  %v17465_v33 = vmov 0 }
  0x24   : > { %326 = vst.msk [vmem:[#allocation2 + $0xb0] sm:$0x1] %vm283_vm2, %v13382_v2  ;;  %329 = vst.msk [vmem:[#allocation2 + $0xbc] sm:$0x1] %vm283_vm2, %v13382_v2  ;;  %v470_v34 = vrot.slane %v468_v24, 7  ;;  %v478_v35 = vrot.slane %v476_v26, 7  ;;  %v11740_v38 = vpack.c.bf16 %v340_v32, %v340_v32 }
  0x25   : > { %327 = vst.msk [vmem:[#allocation2 + $0xb4] sm:$0xf] %vm280_vm1, %v13382_v2  ;;  %328 = vst.msk [vmem:[#allocation2 + $0xb8] sm:$0xf] %vm280_vm1, %v13382_v2  ;;  %v791_v36 = vld [vmem:[#allocation2 + $0xc] sm:$0xf] }
  0x26   : > { %330 = vst.msk [vmem:[#allocation2 + $0xc0] sm:$0xf] %vm280_vm1, %v13382_v2  ;;  %331 = vst.msk [vmem:[#allocation2 + $0xc4] sm:$0xf] %vm280_vm1, %v13382_v2  ;;  %v965_v39 = vrot.slane %v964_v27, 4  ;;  %v975_v40 = vrot.slane %v974_v28, 4  ;;  %v473_v45 = vor.u32 %v471_v25, %v470_v34  ;;  %v481_v47 = vor.u32 %v479_v29, %v478_v35 }
  0x27   : > { %332 = vst.msk [vmem:[#allocation2 + $0xc8] sm:$0x1] %vm283_vm2, %v13382_v2  ;;  %335 = vst.msk [vmem:[#allocation2 + $0xd4] sm:$0x1] %vm283_vm2, %v13382_v2  ;;  %v17468_v41 = vmov 0  ;;  %v485_v43 = vshrl.u32 %v11738_v31, 16 }
  0x28   : > { %333 = vst.msk [vmem:[#allocation2 + $0xcc] sm:$0xf] %vm280_vm1, %v13382_v2  ;;  %334 = vst.msk [vmem:[#allocation2 + $0xd0] sm:$0xf] %vm280_vm1, %v13382_v2  ;;  %v797_v42 = vld [vmem:[#allocation2 + $0x14] sm:$0x1] }
  0x29   : > { %5573 = vst.msk [vmem:[#allocation3] sm:$0xf] %vm280_vm1, %v13382_v2  ;;  %5574 = vst.msk [vmem:[#allocation3 + $0x4] sm:$0xf] %vm280_vm1, %v13382_v2  ;;  %v488_v44 = vshll.u32 %v11738_v31, 16  ;;  %v474_v46 = vrot.slane %v470_v34, 4 }
  0x2a   : > { %5575 = vst.msk [vmem:[#allocation3 + $0x8] sm:$0x1] %vm283_vm2, %v13382_v2  ;;  %5578 = vst.msk [vmem:[#allocation3 + $0x14] sm:$0x1] %vm283_vm2, %v13382_v2  ;;  %v483_v48 = vrot.slane %v478_v35, 4  ;;  %v487_v51 = vrot.slane %v485_v43, 7 }
  0x2b   : > { %5576 = vst.msk [vmem:[#allocation3 + $0xc] sm:$0xf] %vm280_vm1, %v13382_v2  ;;  %5577 = vst.msk [vmem:[#allocation3 + $0x10] sm:$0xf] %vm280_vm1, %v13382_v2  ;;  %v493_v52 = vshrl.u32 %v11739_v37, 16  ;;  %v341_v53 = vld [vmem:[%s13674_s10 + $0x28] sm:$0xff] }
  0x2c   : > { %5579 = vst.msk [vmem:[#allocation3 + $0x18] sm:$0xf] %vm280_vm1, %v13382_v2  ;;  %5580 = vst.msk [vmem:[#allocation3 + $0x1c] sm:$0xf] %vm280_vm1, %v13382_v2  ;;  %v342_v54 = vld [vmem:[%s13674_s10 + $0x30] sm:$0xff]  ;;  %v343_v60 = vld [vmem:[%s13674_s10 + $0x38] sm:$0xff]  ;;  %v490_v61 = vor.u32 %v488_v44, %v487_v51 }
  0x2d   : > { %5581 = vst.msk [vmem:[#allocation3 + $0x20] sm:$0x1] %vm283_vm2, %v13382_v2  ;;  %5584 = vst.msk [vmem:[#allocation3 + $0x2c] sm:$0x1] %vm283_vm2, %v13382_v2  ;;  %v800_v59 = vld [vmem:[#allocation2 + $0x18] sm:$0xf]  ;;  %v11742_v6 = vpack.c.bf16 %v342_v54, %v342_v54  ;;  %v11743_v10 = vpack.c.bf16 %v343_v60, %v343_v60 }
  0x2e   : > { %5582 = vst.msk [vmem:[#allocation3 + $0x24] sm:$0xf] %vm280_vm1, %v13382_v2  ;;  %5583 = vst.msk [vmem:[#allocation3 + $0x28] sm:$0xf] %vm280_vm1, %v13382_v2  ;;  %v491_v62 = vrot.slane %v487_v51, 4  ;;  %v495_v63 = vrot.slane %v493_v52, 7 }
  0x2f   : > { %5585 = vst.msk [vmem:[#allocation3 + $0x30] sm:$0xf] %vm280_vm1, %v13382_v2  ;;  %5586 = vst.msk [vmem:[#allocation3 + $0x34] sm:$0xf] %vm280_vm1, %v13382_v2  ;;  %v496_v0 = vshll.u32 %v11739_v37, 16  ;;  %v502_v4 = vshrl.u32 %v11740_v38, 16 }
  0x30   : > { %5587 = vst.msk [vmem:[#allocation3 + $0x38] sm:$0x1] %vm283_vm2, %v13382_v2  ;;  %5590 = vst.msk [vmem:[#allocation3 + $0x44] sm:$0x1] %vm283_vm2, %v13382_v2  ;;  %v804_v1 = vld [vmem:[#allocation2 + $0x20] sm:$0x1] }
  0x31   : > { %5588 = vst.msk [vmem:[#allocation3 + $0x3c] sm:$0xf] %vm280_vm1, %v13382_v2  ;;  %5589 = vst.msk [vmem:[#allocation3 + $0x40] sm:$0xf] %vm280_vm1, %v13382_v2  ;;  %v505_v5 = vshll.u32 %v11740_v38, 16  ;;  %v498_v7 = vor.u32 %v496_v0, %v495_v63  ;;  %v500_v8 = vrot.slane %v495_v63, 4 }
  0x32   : > { %5591 = vst.msk [vmem:[#allocation3 + $0x48] sm:$0xf] %vm280_vm1, %v13382_v2  ;;  %5592 = vst.msk [vmem:[#allocation3 + $0x4c] sm:$0xf] %vm280_vm1, %v13382_v2  ;;  %v504_v11 = vrot.slane %v502_v4, 7  ;;  %v519_v14 = vshrl.u32 %v11742_v6, 16 }
  0x33   : > { %5593 = vst.msk [vmem:[#allocation3 + $0x50] sm:$0x1] %vm283_vm2, %v13382_v2  ;;  %5596 = vst.msk [vmem:[#allocation3 + $0x5c] sm:$0x1] %vm283_vm2, %v13382_v2  ;;  %v807_v17 = vld [vmem:[#allocation2 + $0x24] sm:$0xf] }
  0x34   : > { %5594 = vst.msk [vmem:[#allocation3 + $0x54] sm:$0xf] %vm280_vm1, %v13382_v2  ;;  %5595 = vst.msk [vmem:[#allocation3 + $0x58] sm:$0xf] %vm280_vm1, %v13382_v2  ;;  %v527_v19 = vshrl.u32 %v11743_v10, 16  ;;  %v344_v20 = vld [vmem:[%s13674_s10 + $0x40] sm:$0xff] }
  0x35   : > { %5597 = vst.msk [vmem:[#allocation3 + $0x60] sm:$0xf] %vm280_vm1, %v13382_v2  ;;  %5598 = vst.msk [vmem:[#allocation3 + $0x64] sm:$0xf] %vm280_vm1, %v13382_v2  ;;  %v345_v21 = vld [vmem:[%s13674_s10 + $0x48] sm:$0xff]  ;;  %v508_v24 = vrot.slane %v504_v11, 4  ;;  %v13738_v38 = vpack.c.bf16 %v344_v20, %v344_v20 }
  0x36   : > { %5599 = vst.msk [vmem:[#allocation3 + $0x68] sm:$0x1] %vm283_vm2, %v13382_v2  ;;  %5602 = vst.msk [vmem:[#allocation3 + $0x74] sm:$0x1] %vm283_vm2, %v13382_v2  ;;  %v521_v26 = vrot.slane %v519_v14, 7  ;;  %v13731_v27 = vsel %vm1440_vm0, %v13658_v3, 0 }
  0x37   : > { %5600 = vst.msk [vmem:[#allocation3 + $0x6c] sm:$0xf] %vm280_vm1, %v13382_v2  ;;  %5601 = vst.msk [vmem:[#allocation3 + $0x70] sm:$0xf] %vm280_vm1, %v13382_v2  ;;  %v13733_v28 = vrot.slane %v527_v19, 7  ;;  %v530_v29 = vshll.u32 %v11743_v10, 16 }
  0x38   : > { %5603 = vst.msk [vmem:[#allocation3 + $0x78] sm:$0xf] %vm280_vm1, %v13382_v2  ;;  %5604 = vst.msk [vmem:[#allocation3 + $0x7c] sm:$0xf] %vm280_vm1, %v13382_v2  ;;  %v346_v31 = vld [vmem:[%s13674_s10 + $0x50] sm:$0xff]  ;;  %vm1945_vm13 = vcmask 1042432  }
  0x39   : > { %5605 = vst.msk [vmem:[#allocation3 + $0x80] sm:$0x1] %vm283_vm2, %v13382_v2  ;;  %5608 = vst.msk [vmem:[#allocation3 + $0x8c] sm:$0x1] %vm283_vm2, %v13382_v2  ;;  %v532_v63 = vor.u32 %v530_v29, %v13733_v28  ;;  %vm1946_vm14 = vcmask 1046532  }
  0x3a   : > { %5606 = vst.msk [vmem:[#allocation3 + $0x84] sm:$0xf] %vm280_vm1, %v13382_v2  ;;  %5607 = vst.msk [vmem:[#allocation3 + $0x88] sm:$0xf] %vm280_vm1, %v13382_v2 }
  0x3b   : > { %5609 = vst.msk [vmem:[#allocation3 + $0x90] sm:$0xf] %vm280_vm1, %v13382_v2  ;;  %5610 = vst.msk [vmem:[#allocation3 + $0x94] sm:$0xf] %vm280_vm1, %v13382_v2 }
  0x3c   : > { %5611 = vst.msk [vmem:[#allocation3 + $0x98] sm:$0x1] %vm283_vm2, %v13382_v2  ;;  %5614 = vst.msk [vmem:[#allocation3 + $0xa4] sm:$0x1] %vm283_vm2, %v13382_v2 }
  0x3d   : > { %5612 = vst.msk [vmem:[#allocation3 + $0x9c] sm:$0xf] %vm280_vm1, %v13382_v2  ;;  %5613 = vst.msk [vmem:[#allocation3 + $0xa0] sm:$0xf] %vm280_vm1, %v13382_v2 }
  0x3e   : > { %5615 = vst.msk [vmem:[#allocation3 + $0xa8] sm:$0xf] %vm280_vm1, %v13382_v2  ;;  %5616 = vst.msk [vmem:[#allocation3 + $0xac] sm:$0xf] %vm280_vm1, %v13382_v2 }
  0x3f   : > { %5617 = vst.msk [vmem:[#allocation3 + $0xb0] sm:$0x1] %vm283_vm2, %v13382_v2  ;;  %5620 = vst.msk [vmem:[#allocation3 + $0xbc] sm:$0x1] %vm283_vm2, %v13382_v2 }
  0x40   : > { %5618 = vst.msk [vmem:[#allocation3 + $0xb4] sm:$0xf] %vm280_vm1, %v13382_v2  ;;  %5619 = vst.msk [vmem:[#allocation3 + $0xb8] sm:$0xf] %vm280_vm1, %v13382_v2 }
  0x41   : > { %5621 = vst.msk [vmem:[#allocation3 + $0xc0] sm:$0xf] %vm280_vm1, %v13382_v2  ;;  %5622 = vst.msk [vmem:[#allocation3 + $0xc4] sm:$0xf] %vm280_vm1, %v13382_v2 }
  0x42   : > { %5623 = vst.msk [vmem:[#allocation3 + $0xc8] sm:$0x1] %vm283_vm2, %v13382_v2  ;;  %5626 = vst.msk [vmem:[#allocation3 + $0xd4] sm:$0x1] %vm283_vm2, %v13382_v2 }
  0x43   : > { %5624 = vst.msk [vmem:[#allocation3 + $0xcc] sm:$0xf] %vm280_vm1, %v13382_v2  ;;  %5625 = vst.msk [vmem:[#allocation3 + $0xd0] sm:$0xf] %vm280_vm1, %v13382_v2  ;;  %v11741_v2 = vpack.c.bf16 %v341_v53, %v341_v53 }
  0x44   : > { %vm13682_vm9 = vmor %vm954_vm3, %vm955_vm4 }
  0x45   : > { %vm13688_vm10 = vmand %vm283_vm2, %vm464_vm5  ;;  %v970_v49 = vsel %vm13682_vm9, %v965_v39, %v969_v18  ;;  %v980_v50 = vsel %vm13682_vm9, %v975_v40, %v979_v23  ;;  %v510_v12 = vshrl.u32 %v11741_v2, 16  ;;  %v513_v13 = vshll.u32 %v11741_v2, 16 }
  0x46   : > { %v17463_v30 = vsel %vm13688_vm10, 4294967295, %v17462_v30  ;;  %vm13695_vm11 = vmor %vm464_vm5, %vm465_vm6  ;;  %v11009_v55 = vcombine.low %v970_v49, %v980_v50  ;;  %v798_v58 = vsel %vm13688_vm10, %v483_v48, %v797_v42  ;;  %v805_v16 = vsel %vm13688_vm10, %v500_v8, %v804_v1 }
  0x47   : > { %17464 = vst [vmem:[#allocation4_spill] sm:$0xff] %v17463_v30  ;;  %v17466_v33 = vsel %vm13695_vm11, 4294967295, %v17465_v33  ;;  %vm13701_vm12 = vmand %vm280_vm1, %vm789_vm8  ;;  %v482_v56 = vsel %vm13695_vm11, %v474_v46, %v481_v47  ;;  %v499_v15 = vsel %vm13695_vm11, %v491_v62, %v498_v7  ;;  %v522_v18 = vshll.u32 %v11742_v6, 16 }
  0x48   : > { %17467 = vst [vmem:[#allocation5_spill] sm:$0xff] %v17466_v33  ;;  %v17469_v41 = vsel %vm13701_vm12, 4294967295, %v17468_v41  ;;  %v792_v57 = vsel %vm13701_vm12, %v473_v45, %v791_v36  ;;  %794 = vst.msk [vmem:[#allocation2 + $0x10] sm:$0xf] %vm280_vm1, %v482_v56  ;;  %12108 = vmatprep.mubr.msk.bf16.mxu0 %vm1391_vm7, %v11009_v55  ;;  %v801_v9 = vsel %vm13701_vm12, %v490_v61, %v800_v59  ;;  %v512_v25 = vrot.slane %v510_v12, 7 }
  0x49   : > { %17470 = vst [vmem:[#allocation6_spill] sm:$0xff] %v17469_v41  ;;  %793 = vst [vmem:[#allocation2 + $0xc] sm:$0xf] %v792_v57  ;;  %v507_v23 = vor.u32 %v505_v5, %v504_v11  ;;  %v13740_v39 = vpack.c.bf16 %v345_v21, %v345_v21  ;;  %v524_v46 = vor.u32 %v522_v18, %v521_v26  ;;  %v811_v57 = vld [vmem:[#allocation2 + $0x2c] sm:$0x1]  ;;  %v525_v62 = vrot.slane %v521_v26, 4 }
  0x4a   : > { %799 = vst [vmem:[#allocation2 + $0x14] sm:$0x1] %v798_v58  ;;  %802 = vst [vmem:[#allocation2 + $0x18] sm:$0xf] %v801_v9  ;;  %v515_v36 = vor.u32 %v513_v13, %v512_v25  ;;  %v13744_v47 = vpack.c.bf16 %v346_v31, %v346_v31  ;;  %v517_v56 = vrot.slane %v512_v25, 4 }
  0x4b   : > { %803 = vst.msk [vmem:[#allocation2 + $0x1c] sm:$0xf] %vm280_vm1, %v499_v15  ;;  %806 = vst [vmem:[#allocation2 + $0x20] sm:$0x1] %v805_v16  ;;  %v808_v37 = vsel %vm13701_vm12, %v507_v23, %v807_v17  ;;  %v533_v13 = vsel %vm13695_vm11, %v525_v62, %v532_v63  ;;  %v814_v18 = vld [vmem:[#allocation2 + $0x30] sm:$0xf] }
  0x4c   : > { %809 = vst [vmem:[#allocation2 + $0x24] sm:$0xf] %v808_v37  ;;  %v516_v45 = vsel %vm13695_vm11, %v508_v24, %v515_v36  ;;  %v812_v8 = vsel %vm13688_vm10, %v517_v56, %v811_v57  ;;  %817 = vst.msk [vmem:[#allocation2 + $0x34] sm:$0xf] %vm280_vm1, %v533_v13  ;;  %v818_v25 = vld [vmem:[#allocation2 + $0x38] sm:$0x1]  ;;  %v815_v37 = vsel %vm13701_vm12, %v524_v46, %v814_v18 }
  0x4d   : > { %810 = vst.msk [vmem:[#allocation2 + $0x28] sm:$0xf] %vm280_vm1, %v516_v45  ;;  %813 = vst [vmem:[#allocation2 + $0x2c] sm:$0x1] %v812_v8  ;;  %v544_v46 = vshrl.u32 %v13740_v39, 16  ;;  %v348_v13 = vld [vmem:[%s13674_s10 + $0x60] sm:$0xff] }
  0x4e   : > { %816 = vst [vmem:[#allocation2 + $0x30] sm:$0xf] %v815_v37  ;;  %v825_v63 = vld [vmem:[#allocation2 + $0x44] sm:$0x1]  ;;  %vm14095_vm15 = vmor %vm1945_vm13, %vm1946_vm14 }
  0x4f   : > { %v908_v34 = vld [vmem:[#allocation2 + $0x10] sm:$0xf] }
  0x50   : > { %v907_v32 = vld [vmem:[#allocation2 + $0xc] sm:$0xf]  ;;  %v991_v43 = vshll.u32 %v908_v34, 16  ;;  %v995_v3 = vshrl.u32 %v908_v34, 16 }
  0x51   : > { %v939_v35 = vld [vmem:[#allocation2 + $0x14] sm:$0x1]  ;;  %v982_v40 = vshrl.u32 %v907_v32, 16  ;;  %v985_v42 = vshll.u32 %v907_v32, 16  ;;  %v909_v52 = vld [vmem:[#allocation2 + $0x18] sm:$0xf] }
  0x52   : > { %v1001_v44 = vshll.u32 %v939_v35, 16  ;;  %v993_v50 = vrot.slane %v991_v43, 5  ;;  %v997_v51 = vrot.slane %v995_v3, 4  ;;  %v1006_v54 = vshrl.u32 %v909_v52, 16  ;;  %v910_v60 = vld [vmem:[#allocation2 + $0x1c] sm:$0xf] }
  0x53   : > { %v984_v48 = vrot.slane %v982_v40, 4  ;;  %v987_v49 = vrot.slane %v985_v42, 5  ;;  %v1009_v55 = vshll.u32 %v909_v52, 16  ;;  %v940_v61 = vld [vmem:[#allocation2 + $0x20] sm:$0x1]  ;;  %v1015_v2 = vshll.u32 %v910_v60, 16 }
  0x54   : > { %v1003_v53 = vrot.slane %v1001_v44, 5  ;;  %v998_v59 = vor.u32 %v997_v51, %v993_v50  ;;  %v1008_v0 = vrot.slane %v1006_v54, 4  ;;  %v1019_v4 = vshrl.u32 %v910_v60, 16  ;;  %v911_v12 = vld [vmem:[#allocation2 + $0x24] sm:$0xf]  ;;  %v347_v3 = vld [vmem:[%s13674_s10 + $0x58] sm:$0xff] }
  0x55   : > { %v988_v58 = vor.u32 %v987_v49, %v984_v48  ;;  %v1011_v1 = vrot.slane %v1009_v55, 5  ;;  %v1025_v7 = vshll.u32 %v940_v61, 16  ;;  %v1017_v10 = vrot.slane %v1015_v2, 5  ;;  %v912_v23 = vld [vmem:[#allocation2 + $0x28] sm:$0xf] }
  0x56   : > { %v999_v6 = vrot.slane %v998_v59, 4  ;;  %v1021_v11 = vrot.slane %v1019_v4, 4  ;;  %v1030_v17 = vshrl.u32 %v911_v12, 16  ;;  %v1033_v24 = vshll.u32 %v911_v12, 16  ;;  %v821_v49 = vld [vmem:[#allocation2 + $0x3c] sm:$0xf] }
  0x57   : > { %v989_v5 = vrot.slane %v988_v58, 4  ;;  %v1012_v9 = vor.u32 %v1011_v1, %v1008_v0  ;;  %v1027_v16 = vrot.slane %v1025_v7, 5  ;;  %v1039_v29 = vshll.u32 %v912_v23, 16  ;;  %v11089_v54 = vld [vmem:[%s17338_s1 + $0x4] sm:$0x3] }
  0x58   : > { %v1004_v15 = vsel %vm13682_vm9, %v999_v6, %v1003_v53  ;;  %v1022_v21 = vor.u32 %v1021_v11, %v1017_v10  ;;  %v1032_v26 = vrot.slane %v1030_v17, 4  ;;  %v1043_v31 = vshrl.u32 %v912_v23, 16  ;;  %v914_v57 = vld [vmem:[#allocation2 + $0x34] sm:$0xf] }
  0x59   : > { %v994_v14 = vsel %vm13682_vm9, %v989_v5, %v993_v50  ;;  %v1013_v20 = vrot.slane %v1012_v9, 4  ;;  %v534_v32 = vrot.slane %v13733_v28, 4  ;;  %v1035_v36 = vrot.slane %v1033_v24, 5  ;;  %v941_v50 = vld [vmem:[#allocation2 + $0x2c] sm:$0x1] }
  0x5a   : > { %v11010_v19 = vcombine.low %v994_v14, %v1004_v15  ;;  %v1023_v35 = vrot.slane %v1022_v21, 4  ;;  %v1041_v40 = vrot.slane %v1039_v29, 5  ;;  %v1045_v42 = vrot.slane %v1043_v31, 4  ;;  %v913_v9 = vld [vmem:[#allocation2 + $0x30] sm:$0xf]  ;;  %v349_v14 = vld [vmem:[%s13674_s10 + $0x68] sm:$0xff] }
  0x5b   : > { %v1018_v34 = vsel %vm13682_vm9, %v1013_v20, %v1017_v10  ;;  %v819_v43 = vsel %vm13688_vm10, %v534_v32, %v818_v25  ;;  %v536_v28 = vshrl.u32 %v13738_v38, 16  ;;  %v1036_v45 = vor.u32 %v1035_v36, %v1032_v26  ;;  %v828_v20 = vld [vmem:[#allocation2 + $0x48] sm:$0xf]  ;;  %v350_v26 = vld [vmem:[%s13674_s10 + $0x70] sm:$0xff] }
  0x5c   : > { %12109 = vmatmul.mubr.msk.bf16.vlgmr.msra.gmra.mrb[0].mxu0 %vm1391_vm7, %v11010_v19  ;;  %v1028_v44 = vsel %vm13682_vm9, %v1023_v35, %v1027_v16  ;;  %820 = vst [vmem:[#allocation2 + $0x38] sm:$0x1] %v819_v43  ;;  %v539_v48 = vshll.u32 %v13738_v38, 16  ;;  %v1046_v51 = vor.u32 %v1045_v42, %v1041_v40  ;;  %v547_v53 = vshll.u32 %v13740_v39, 16 }
  0x5d   : > { %12141 = vmatpush3.bf16.msra.mxu0 %v13731_v27  ;;  %v11011_v27 = vcombine.low %v1018_v34, %v1028_v44  ;;  %v538_v52 = vrot.slane %v536_v28, 7  ;;  %v1037_v55 = vrot.slane %v1036_v45, 4  ;;  %v1049_v56 = vshll.u32 %v941_v50, 16  ;;  %v832_v34 = vld [vmem:[#allocation2 + $0x50] sm:$0x1] }
  0x5e   : > { %v546_v58 = vrot.slane %v544_v46, 7  ;;  %v11747_v59 = vpack.c.bf16 %v347_v3, %v347_v3  ;;  %13232 = vmatprep.subr.msk.bf16.mxu0 %vm1440_vm0, %v11089_v54  ;;  %v1047_v38 = vrot.slane %v1046_v51, 4  ;;  %v1063_v60 = vshll.u32 %v914_v57, 16 }
  0x5f   : > { %12112 = vmatprep.mubr.msk.bf16.mxu0 %vm1391_vm7, %v11011_v27  ;;  %v1067_v61 = vshrl.u32 %v914_v57, 16  ;;  %v541_v62 = vor.u32 %v539_v48, %v538_v52  ;;  %v1042_v39 = vsel %vm13682_vm9, %v1037_v55, %v1041_v40  ;;  %v1051_v0 = vrot.slane %v1049_v56, 5 }
  0x60   : > { %v542_v1 = vrot.slane %v538_v52, 4  ;;  %v549_v2 = vor.u32 %v547_v53, %v546_v58  ;;  %v13780_v4 = vrot.slane %v1063_v60, 5  ;;  %v551_v6 = vrot.slane %v546_v58, 4  ;;  %v835_v58 = vld [vmem:[#allocation2 + $0x54] sm:$0xf] }
  0x61   : > { %v1069_v5 = vrot.slane %v1067_v61, 4  ;;  %v822_v7 = vsel %vm13701_vm12, %v541_v62, %v821_v49  ;;  %v1052_v8 = vsel %vm13682_vm9, %v1047_v38, %v1051_v0  ;;  %v553_v11 = vshrl.u32 %v13744_v47, 16  ;;  %v839_v62 = vld [vmem:[#allocation2 + $0x5c] sm:$0x1] }
  0x62   : > { %v550_v10 = vsel %vm13695_vm11, %v542_v1, %v549_v2  ;;  %823 = vst [vmem:[#allocation2 + $0x3c] sm:$0xf] %v822_v7  ;;  %v556_v12 = vshll.u32 %v13744_v47, 16  ;;  %v11012_v15 = vcombine.low %v1042_v39, %v1052_v8  ;;  %v1054_v17 = vshrl.u32 %v913_v9, 16 }
  0x63   : > { %v942_v16 = vld [vmem:[#allocation2 + $0x38] sm:$0x1]  ;;  %v1057_v18 = vshll.u32 %v913_v9, 16  ;;  %v1070_v19 = vor.u32 %v1069_v5, %v13780_v4  ;;  %824 = vst.msk [vmem:[#allocation2 + $0x40] sm:$0xf] %vm280_vm1, %v550_v10  ;;  %v826_v23 = vsel %vm13688_vm10, %v551_v6, %v825_v63  ;;  %v555_v24 = vrot.slane %v553_v11, 7 }
  0x64   : > { %v1073_v21 = vshll.u32 %v942_v16, 16  ;;  %v561_v25 = vshrl.u32 %v11747_v59, 16  ;;  %12113 = vmatmul.mubr.msk.bf16.gmra.mrb[4].mxu0 %vm1391_vm7, %v11012_v15  ;;  %v1056_v47 = vrot.slane %v1054_v17, 4  ;;  %827 = vst [vmem:[#allocation2 + $0x44] sm:$0x1] %v826_v23  ;;  %v564_v32 = vshll.u32 %v11747_v59, 16 }
  0x65   : > { %v1059_v29 = vrot.slane %v1057_v18, 5  ;;  %v1071_v31 = vrot.slane %v1070_v19, 4  ;;  %v558_v36 = vor.u32 %v556_v12, %v555_v24  ;;  %v559_v37 = vrot.slane %v555_v24, 4  ;;  %v351_v5 = vld [vmem:[%s13674_s10 + $0x78] sm:$0xff] }
  0x66   : > { %v1075_v35 = vrot.slane %v1073_v21, 5  ;;  %v563_v40 = vrot.slane %v561_v25, 7  ;;  %v11748_v43 = vpack.c.bf16 %v348_v13, %v348_v13  ;;  %v11749_v28 = vpack.c.bf16 %v349_v14, %v349_v14 }
  0x67   : > { %v1060_v42 = vor.u32 %v1059_v29, %v1056_v47  ;;  %v13798_v3 = vpack.c.bf16 %v350_v26, %v350_v26  ;;  %v829_v46 = vsel %vm13701_vm12, %v558_v36, %v828_v20  ;;  %v11751_v16 = vpack.c.bf16 %v351_v5, %v351_v5  ;;  %v842_v47 = vld [vmem:[#allocation2 + $0x60] sm:$0xf] }
  0x68   : > { %v1076_v44 = vsel %vm13682_vm9, %v1071_v31, %v1075_v35  ;;  %v566_v45 = vor.u32 %v564_v32, %v563_v40  ;;  %v568_v48 = vrot.slane %v563_v40, 4  ;;  %830 = vst [vmem:[#allocation2 + $0x48] sm:$0xf] %v829_v46  ;;  %v570_v50 = vshrl.u32 %v11748_v43, 16 }
  0x69   : > { %v1061_v49 = vrot.slane %v1060_v42, 4  ;;  %v915_v27 = vld [vmem:[#allocation2 + $0x3c] sm:$0xf]  ;;  %v573_v51 = vshll.u32 %v11748_v43, 16  ;;  %v578_v52 = vshrl.u32 %v11749_v28, 16  ;;  %v581_v11 = vshll.u32 %v11749_v28, 16 }
  0x6a   : > { %v916_v53 = vld [vmem:[#allocation2 + $0x40] sm:$0xf]  ;;  %v1078_v54 = vshrl.u32 %v915_v27, 16  ;;  %v1081_v55 = vshll.u32 %v915_v27, 16  ;;  %v567_v56 = vsel %vm13695_vm11, %v559_v37, %v566_v45  ;;  %v833_v57 = vsel %vm13688_vm10, %v568_v48, %v832_v34 }
  0x6b   : > { %v1066_v59 = vsel %vm13682_vm9, %v1061_v49, %v13780_v4  ;;  %v1087_v38 = vshll.u32 %v916_v53, 16  ;;  %v1091_v60 = vshrl.u32 %v916_v53, 16  ;;  %831 = vst.msk [vmem:[#allocation2 + $0x4c] sm:$0xf] %vm280_vm1, %v567_v56  ;;  %834 = vst [vmem:[#allocation2 + $0x50] sm:$0x1] %v833_v57 }
  0x6c   : > { %v572_v61 = vrot.slane %v570_v50, 7  ;;  %v11013_v63 = vcombine.low %v1066_v59, %v1076_v44  ;;  %v943_v39 = vld [vmem:[#allocation2 + $0x44] sm:$0x1]  ;;  %v1080_v0 = vrot.slane %v1078_v54, 4  ;;  %v1083_v1 = vrot.slane %v1081_v55, 5 }
  0x6d   : > { %v580_v2 = vrot.slane %v578_v52, 7  ;;  %v1089_v6 = vrot.slane %v1087_v38, 5  ;;  %v1093_v7 = vrot.slane %v1091_v60, 4  ;;  %v1097_v8 = vshll.u32 %v943_v39, 16  ;;  %v352_v37 = vld [vmem:[%s13674_s10 + $0x80] sm:$0xff] }
  0x6e   : > { %v575_v9 = vor.u32 %v573_v51, %v572_v61  ;;  %12116 = vmatprep.mubr.msk.bf16.mxu0 %vm1391_vm7, %v11013_v63  ;;  %v1084_v4 = vor.u32 %v1083_v1, %v1080_v0  ;;  %v576_v10 = vrot.slane %v572_v61, 4  ;;  %v587_v21 = vshrl.u32 %v13798_v3, 16  ;;  %v846_v56 = vld [vmem:[#allocation2 + $0x68] sm:$0x1] }
  0x6f   : > { %v585_v12 = vrot.slane %v580_v2, 4  ;;  %v1094_v13 = vor.u32 %v1093_v7, %v1089_v6  ;;  %v1099_v14 = vrot.slane %v1097_v8, 5  ;;  %v13816_v18 = vld [vmem:[#allocation2 + $0x48] sm:$0xf]  ;;  %v583_v19 = vor.u32 %v581_v11, %v580_v2 }
  0x70   : > { %v836_v15 = vsel %vm13701_vm12, %v575_v9, %v835_v58  ;;  %v1085_v17 = vrot.slane %v1084_v4, 4  ;;  %v1102_v24 = vshrl.u32 %v13816_v18, 16  ;;  %v1105_v25 = vshll.u32 %v13816_v18, 16 }
  0x71   : > { %837 = vst [vmem:[#allocation2 + $0x54] sm:$0xf] %v836_v15  ;;  %v840_v20 = vsel %vm13688_vm10, %v585_v12, %v839_v62  ;;  %v1095_v23 = vrot.slane %v1094_v13, 4  ;;  %v590_v26 = vshll.u32 %v13798_v3, 16  ;;  %v584_v34 = vsel %vm13695_vm11, %v576_v10, %v583_v19  ;;  %v353_v3 = vld [vmem:[%s13674_s10 + $0x88] sm:$0xff] }
  0x72   : > { %841 = vst [vmem:[#allocation2 + $0x5c] sm:$0x1] %v840_v20  ;;  %v1090_v29 = vsel %vm13682_vm9, %v1085_v17, %v1089_v6  ;;  %v13826_v31 = vld [vmem:[#allocation2 + $0x4c] sm:$0xf]  ;;  %v944_v32 = vld [vmem:[#allocation2 + $0x50] sm:$0x1]  ;;  %v11752_v38 = vpack.c.bf16 %v352_v37, %v352_v37  ;;  %v11753_v60 = vpack.c.bf16 %v353_v3, %v353_v3 }
  0x73   : > { %v589_v35 = vrot.slane %v587_v21, 7  ;;  %v595_v36 = vshrl.u32 %v11751_v16, 16  ;;  %v1100_v40 = vsel %vm13682_vm9, %v1095_v23, %v1099_v14  ;;  %v1104_v42 = vrot.slane %v1102_v24, 4  ;;  %838 = vst.msk [vmem:[#allocation2 + $0x58] sm:$0xf] %vm280_vm1, %v584_v34  ;;  %v354_v21 = vld [vmem:[%s13674_s10 + $0x90] sm:$0xff] }
  0x74   : > { %v1107_v43 = vrot.slane %v1105_v25, 5  ;;  %v1111_v28 = vshll.u32 %v13826_v31, 16  ;;  %v11014_v44 = vcombine.low %v1090_v29, %v1100_v40  ;;  %v1115_v45 = vshrl.u32 %v13826_v31, 16  ;;  %v849_v15 = vld [vmem:[#allocation2 + $0x6c] sm:$0xf]  ;;  %v355_v37 = vld [vmem:[%s13674_s10 + $0x98] sm:$0xff] }
  0x75   : > { %v1121_v48 = vshll.u32 %v944_v32, 16  ;;  %v592_v46 = vor.u32 %v590_v26, %v589_v35  ;;  %v593_v50 = vrot.slane %v589_v35, 4  ;;  %v597_v51 = vrot.slane %v595_v36, 7 }
  0x76   : > { %v1108_v49 = vor.u32 %v1107_v43, %v1104_v42  ;;  %v1113_v27 = vrot.slane %v1111_v28, 5  ;;  %12117 = vmatmul.mubr.msk.bf16.gmra.mrb[8].mxu0 %vm1391_vm7, %v11014_v44  ;;  %v1117_v52 = vrot.slane %v1115_v45, 4  ;;  %v598_v54 = vshll.u32 %v11751_v16, 16 }
  0x77   : > { %v1123_v53 = vrot.slane %v1121_v48, 5  ;;  %v843_v55 = vsel %vm13701_vm12, %v592_v46, %v842_v47  ;;  %v602_v59 = vrot.slane %v597_v51, 4  ;;  %v604_v6 = vshrl.u32 %v11752_v38, 16  ;;  %v853_v47 = vld [vmem:[#allocation2 + $0x74] sm:$0x1] }
  0x78   : > { %v1109_v57 = vrot.slane %v1108_v49, 4  ;;  %v13840_v58 = vld [vmem:[#allocation2 + $0x54] sm:$0xf]  ;;  %844 = vst [vmem:[#allocation2 + $0x60] sm:$0xf] %v843_v55  ;;  %v1118_v61 = vor.u32 %v1117_v52, %v1113_v27  ;;  %v600_v0 = vor.u32 %v598_v54, %v597_v51  ;;  %v607_v19 = vshll.u32 %v11752_v38, 16 }
  0x79   : > { %v945_v62 = vld [vmem:[#allocation2 + $0x5c] sm:$0x1]  ;;  %v1126_v63 = vshrl.u32 %v13840_v58, 16  ;;  %v1129_v39 = vshll.u32 %v13840_v58, 16  ;;  %v847_v5 = vsel %vm13688_vm10, %v602_v59, %v846_v56  ;;  %v606_v14 = vrot.slane %v604_v6, 7 }
  0x7a   : > { %v1114_v1 = vsel %vm13682_vm9, %v1109_v57, %v1113_v27  ;;  %v1145_v2 = vshll.u32 %v945_v62, 16  ;;  %v1119_v7 = vrot.slane %v1118_v61, 4  ;;  %v13848_v8 = vld [vmem:[#allocation2 + $0x58] sm:$0xf]  ;;  %v601_v10 = vsel %vm13695_vm11, %v593_v50, %v600_v0  ;;  %848 = vst [vmem:[#allocation2 + $0x68] sm:$0x1] %v847_v5 }
  0x7b   : > { %v1128_v9 = vrot.slane %v1126_v63, 4  ;;  %v1131_v4 = vrot.slane %v1129_v39, 5  ;;  %v1135_v11 = vshll.u32 %v13848_v8, 16  ;;  %v1139_v12 = vshrl.u32 %v13848_v8, 16  ;;  %845 = vst.msk [vmem:[#allocation2 + $0x64] sm:$0xf] %vm280_vm1, %v601_v10 }
  0x7c   : > { %v1147_v13 = vrot.slane %v1145_v2, 5  ;;  %v1124_v16 = vsel %vm13682_vm9, %v1119_v7, %v1123_v53  ;;  %v612_v20 = vshrl.u32 %v11753_v60, 16  ;;  %v610_v26 = vrot.slane %v606_v14, 4  ;;  %v356_v61 = vld [vmem:[%s13674_s10 + $0xa0] sm:$0xff]  ;;  %v357_v2 = vld [vmem:[%s13674_s10 + $0xa8] sm:$0xff] }
  0x7d   : > { %v1132_v17 = vor.u32 %v1131_v4, %v1128_v9  ;;  %v11015_v23 = vcombine.low %v1114_v1, %v1124_v16  ;;  %v1137_v24 = vrot.slane %v1135_v11, 5  ;;  %v1141_v25 = vrot.slane %v1139_v12, 4  ;;  %v856_v1 = vld [vmem:[#allocation2 + $0x78] sm:$0xf]  ;;  %v358_v4 = vld [vmem:[%s13674_s10 + $0xb0] sm:$0xff] }
  0x7e   : > { %v609_v34 = vor.u32 %v607_v19, %v606_v14  ;;  %v614_v35 = vrot.slane %v612_v20, 7  ;;  %v615_v36 = vshll.u32 %v11753_v60, 16  ;;  %v11754_v28 = vpack.c.bf16 %v354_v21, %v354_v21  ;;  %v359_v19 = vld [vmem:[%s13674_s10 + $0xb8] sm:$0xff]  ;;  %v360_v20 = vld [vmem:[%s13674_s10 + $0xc0] sm:$0xff] }
  0x7f   : > { %v1133_v29 = vrot.slane %v1132_v17, 4  ;;  %v13858_v32 = vld [vmem:[#allocation2 + $0x60] sm:$0xf]  ;;  %12120 = vmatprep.mubr.msk.bf16.mxu0 %vm1391_vm7, %v11015_v23  ;;  %v1142_v40 = vor.u32 %v1141_v25, %v1137_v24  ;;  %v11755_v51 = vpack.c.bf16 %v355_v37, %v355_v37  ;;  %v11757_v17 = vpack.c.bf16 %v357_v2, %v357_v2 }
  0x80   : > { %v1150_v42 = vshrl.u32 %v13858_v32, 16  ;;  %v1153_v43 = vshll.u32 %v13858_v32, 16  ;;  %v617_v44 = vor.u32 %v615_v36, %v614_v35  ;;  %v619_v45 = vrot.slane %v614_v35, 4 }
  0x81   : > { %v1138_v3 = vsel %vm13682_vm9, %v1133_v29, %v1137_v24  ;;  %v850_v48 = vsel %vm13701_vm12, %v609_v34, %v849_v15  ;;  %v1143_v46 = vrot.slane %v1142_v40, 4  ;;  %v946_v49 = vld [vmem:[#allocation2 + $0x68] sm:$0x1]  ;;  %v621_v56 = vshrl.u32 %v11754_v28, 16  ;;  %v860_v24 = vld [vmem:[#allocation2 + $0x80] sm:$0x1] }
  0x82   : > { %v1152_v27 = vrot.slane %v1150_v42, 4  ;;  %v1155_v50 = vrot.slane %v1153_v43, 5  ;;  %851 = vst [vmem:[#allocation2 + $0x6c] sm:$0xf] %v850_v48  ;;  %v13868_v52 = vld [vmem:[#allocation2 + $0x64] sm:$0xf]  ;;  %v618_v54 = vsel %vm13695_vm11, %v610_v26, %v617_v44  ;;  %v854_v55 = vsel %vm13688_vm10, %v619_v45, %v853_v47 }
  0x83   : > { %v1169_v53 = vshll.u32 %v946_v49, 16  ;;  %v1148_v57 = vsel %vm13682_vm9, %v1143_v46, %v1147_v13  ;;  %v1159_v38 = vshll.u32 %v13868_v52, 16  ;;  %v1163_v60 = vshrl.u32 %v13868_v52, 16  ;;  %852 = vst.msk [vmem:[#allocation2 + $0x70] sm:$0xf] %vm280_vm1, %v618_v54 }
  0x84   : > { %v1156_v59 = vor.u32 %v1155_v50, %v1152_v27  ;;  %855 = vst [vmem:[#allocation2 + $0x74] sm:$0x1] %v854_v55  ;;  %v11016_v62 = vcombine.low %v1138_v3, %v1148_v57  ;;  %v623_v39 = vrot.slane %v621_v56, 7  ;;  %v624_v0 = vshll.u32 %v11754_v28, 16 }
  0x85   : > { %v1171_v63 = vrot.slane %v1169_v53, 5  ;;  %v1161_v6 = vrot.slane %v1159_v38, 5  ;;  %v1165_v7 = vrot.slane %v1163_v60, 4  ;;  %v629_v9 = vshrl.u32 %v11755_v51, 16  ;;  %v863_v53 = vld [vmem:[#allocation2 + $0x84] sm:$0xf] }
  0x86   : > { %v1157_v5 = vrot.slane %v1156_v59, 4  ;;  %12121 = vmatmul.mubr.msk.bf16.gmra.mrb[12].mxu0 %vm1391_vm7, %v11016_v62  ;;  %v626_v10 = vor.u32 %v624_v0, %v623_v39  ;;  %v627_v11 = vrot.slane %v623_v39, 4  ;;  %v632_v12 = vshll.u32 %v11755_v51, 16  ;;  %v867_v0 = vld [vmem:[#allocation2 + $0x8c] sm:$0x1] }
  0x87   : > { %v11756_v13 = vpack.c.bf16 %v356_v61, %v356_v61  ;;  %v1166_v15 = vor.u32 %v1165_v7, %v1161_v6  ;;  %v631_v16 = vrot.slane %v629_v9, 7  ;;  %v11758_v47 = vpack.c.bf16 %v358_v4, %v358_v4 }
  0x88   : > { %v1162_v14 = vsel %vm13682_vm9, %v1157_v5, %v1161_v6  ;;  %v857_v23 = vsel %vm13701_vm12, %v626_v10, %v856_v1  ;;  %v11759_v28 = vpack.c.bf16 %v359_v19, %v359_v19  ;;  %v13897_v3 = vpack.c.bf16 %v360_v20, %v360_v20 }
  0x89   : > { %v13887_v21 = vld [vmem:[#allocation2 + $0x6c] sm:$0xf]  ;;  %v638_v25 = vshrl.u32 %v11756_v13, 16  ;;  %v641_v26 = vshll.u32 %v11756_v13, 16  ;;  %v1167_v29 = vrot.slane %v1166_v15, 4  ;;  %v634_v36 = vor.u32 %v632_v12, %v631_v16 }
  0x8a   : > { %v1174_v34 = vshrl.u32 %v13887_v21, 16  ;;  %v1177_v35 = vshll.u32 %v13887_v21, 16  ;;  %858 = vst [vmem:[#allocation2 + $0x78] sm:$0xf] %v857_v23  ;;  %v13893_v37 = vld [vmem:[#allocation2 + $0x70] sm:$0xf] }
  0x8b   : > { %v13895_v40 = vld [vmem:[#allocation2 + $0x74] sm:$0x1]  ;;  %v636_v42 = vrot.slane %v631_v16, 4  ;;  %v640_v43 = vrot.slane %v638_v25, 7  ;;  %v1172_v44 = vsel %vm13682_vm9, %v1167_v29, %v1171_v63  ;;  %v1183_v46 = vshll.u32 %v13893_v37, 16 }
  0x8c   : > { %v1176_v45 = vrot.slane %v1174_v34, 4  ;;  %v1179_v48 = vrot.slane %v1177_v35, 5  ;;  %v11017_v49 = vcombine.low %v1162_v14, %v1172_v44  ;;  %v1187_v27 = vshrl.u32 %v13893_v37, 16  ;;  %v870_v13 = vld [vmem:[#allocation2 + $0x90] sm:$0xf]  ;;  %v361_v35 = vld [vmem:[%s13674_s10 + $0xc8] sm:$0xff] }
  0x8d   : > { %v1193_v50 = vshll.u32 %v13895_v40, 16  ;;  %v635_v51 = vsel %vm13695_vm11, %v627_v11, %v634_v36  ;;  %v1185_v55 = vrot.slane %v1183_v46, 5  ;;  %v861_v56 = vsel %vm13688_vm10, %v636_v42, %v860_v24 }
  0x8e   : > { %v1180_v54 = vor.u32 %v1179_v48, %v1176_v45  ;;  %859 = vst.msk [vmem:[#allocation2 + $0x7c] sm:$0xf] %vm280_vm1, %v635_v51  ;;  %v643_v57 = vor.u32 %v641_v26, %v640_v43  ;;  %12124 = vmatprep.mubr.msk.bf16.mxu0 %vm1391_vm7, %v11017_v49  ;;  %v1189_v59 = vrot.slane %v1187_v27, 4  ;;  %862 = vst [vmem:[#allocation2 + $0x80] sm:$0x1] %v861_v56  ;;  %v644_v60 = vrot.slane %v640_v43, 4 }
  0x8f   : > { %v1195_v38 = vrot.slane %v1193_v50, 5  ;;  %v646_v61 = vshrl.u32 %v11757_v17, 16  ;;  %v649_v63 = vshll.u32 %v11757_v17, 16  ;;  %v655_v1 = vshrl.u32 %v11758_v47, 16  ;;  %v874_v27 = vld [vmem:[#allocation2 + $0x98] sm:$0x1] }
  0x90   : > { %v1181_v62 = vrot.slane %v1180_v54, 4  ;;  %v864_v39 = vsel %vm13701_vm12, %v643_v57, %v863_v53  ;;  %v1190_v2 = vor.u32 %v1189_v59, %v1185_v55  ;;  %v658_v7 = vshll.u32 %v11758_v47, 16 }
  0x91   : > { %v13912_v5 = vld [vmem:[#allocation2 + $0x78] sm:$0xf]  ;;  %v648_v6 = vrot.slane %v646_v61, 7  ;;  %865 = vst [vmem:[#allocation2 + $0x84] sm:$0xf] %v864_v39  ;;  %v663_v9 = vshrl.u32 %v11759_v28, 16 }
  0x92   : > { %v1186_v4 = vsel %vm13682_vm9, %v1181_v62, %v1185_v55  ;;  %v1198_v10 = vshrl.u32 %v13912_v5, 16  ;;  %v1201_v11 = vshll.u32 %v13912_v5, 16  ;;  %v657_v12 = vrot.slane %v655_v1, 7  ;;  %v363_v61 = vld [vmem:[%s13674_s10 + $0xd8] sm:$0xff]  ;;  %v364_v1 = vld [vmem:[%s13674_s10 + $0xe0] sm:$0xff] }
  0x93   : > { %v1191_v14 = vrot.slane %v1190_v2, 4  ;;  %v651_v15 = vor.u32 %v649_v63, %v648_v6  ;;  %v653_v16 = vrot.slane %v648_v6, 4  ;;  %v665_v17 = vrot.slane %v663_v9, 7 }
  0x94   : > { %v1200_v19 = vrot.slane %v1198_v10, 4  ;;  %v1203_v20 = vrot.slane %v1201_v11, 5  ;;  %v660_v23 = vor.u32 %v658_v7, %v657_v12  ;;  %v661_v24 = vrot.slane %v657_v12, 4  ;;  %v877_v12 = vld [vmem:[#allocation2 + $0x9c] sm:$0xf] }
  0x95   : > { %v1196_v25 = vsel %vm13682_vm9, %v1191_v14, %v1195_v38  ;;  %v13920_v26 = vld [vmem:[#allocation2 + $0x7c] sm:$0xf]  ;;  %v652_v47 = vsel %vm13695_vm11, %v644_v60, %v651_v15  ;;  %v868_v29 = vsel %vm13688_vm10, %v653_v16, %v867_v0  ;;  %v666_v34 = vshll.u32 %v11759_v28, 16  ;;  %v13927_v42 = vld [vmem:[#allocation2 + $0x80] sm:$0x1]  ;;  %v362_v60 = vld [vmem:[%s13674_s10 + $0xd0] sm:$0xff] }
  0x96   : > { %v11018_v36 = vcombine.low %v1186_v4, %v1196_v25  ;;  %v1204_v43 = vor.u32 %v1203_v20, %v1200_v19  ;;  %v1207_v44 = vshll.u32 %v13920_v26, 16  ;;  %v1211_v45 = vshrl.u32 %v13920_v26, 16  ;;  %866 = vst.msk [vmem:[#allocation2 + $0x88] sm:$0xf] %vm280_vm1, %v652_v47  ;;  %869 = vst [vmem:[#allocation2 + $0x8c] sm:$0x1] %v868_v29 }
  0x97   : > { %v1217_v48 = vshll.u32 %v13927_v42, 16  ;;  %v668_v46 = vor.u32 %v666_v34, %v665_v17  ;;  %v670_v49 = vrot.slane %v665_v17, 4  ;;  %v871_v28 = vsel %vm13701_vm12, %v660_v23, %v870_v13 }
  0x98   : > { %12125 = vmatmul.mubr.msk.bf16.gmra.mrb[16].mxu0 %vm1391_vm7, %v11018_v36  ;;  %v1205_v50 = vrot.slane %v1204_v43, 4  ;;  %v1209_v51 = vrot.slane %v1207_v44, 5  ;;  %v1213_v53 = vrot.slane %v1211_v45, 4  ;;  %v13936_v54 = vld [vmem:[#allocation2 + $0x84] sm:$0xf]  ;;  %v11761_v55 = vpack.c.bf16 %v361_v35, %v361_v35 }
  0x99   : > { %872 = vst [vmem:[#allocation2 + $0x90] sm:$0xf] %v871_v28  ;;  %v1219_v56 = vrot.slane %v1217_v48, 5  ;;  %v1222_v57 = vshrl.u32 %v13936_v54, 16  ;;  %v1225_v59 = vshll.u32 %v13936_v54, 16  ;;  %v669_v38 = vsel %vm13695_vm11, %v661_v24, %v668_v46 }
  0x9a   : > { %v1210_v62 = vsel %vm13682_vm9, %v1205_v50, %v1209_v51  ;;  %v1214_v63 = vor.u32 %v1213_v53, %v1209_v51  ;;  %873 = vst.msk [vmem:[#allocation2 + $0x94] sm:$0xf] %vm280_vm1, %v669_v38  ;;  %v875_v39 = vsel %vm13688_vm10, %v670_v49, %v874_v27  ;;  %v672_v0 = vshrl.u32 %v13897_v3, 16  ;;  %v881_v46 = vld [vmem:[#allocation2 + $0xa4] sm:$0x1] }
  0x9b   : > { %v1224_v2 = vrot.slane %v1222_v57, 4  ;;  %v1227_v6 = vrot.slane %v1225_v59, 5  ;;  %876 = vst [vmem:[#allocation2 + $0x98] sm:$0x1] %v875_v39  ;;  %v675_v7 = vshll.u32 %v13897_v3, 16  ;;  %v680_v9 = vshrl.u32 %v11761_v55, 16 }
  0x9c   : > { %v1215_v4 = vrot.slane %v1214_v63, 4  ;;  %v674_v10 = vrot.slane %v672_v0, 7  ;;  %v683_v11 = vshll.u32 %v11761_v55, 16  ;;  %v11762_v13 = vpack.c.bf16 %v362_v60, %v362_v60 }
  0x9d   : > { %v13952_v14 = vld [vmem:[#allocation2 + $0x88] sm:$0xf]  ;;  %v13954_v15 = vld [vmem:[#allocation2 + $0x8c] sm:$0x1]  ;;  %v1228_v16 = vor.u32 %v1227_v6, %v1224_v2  ;;  %v682_v17 = vrot.slane %v680_v9, 7  ;;  %v13956_v19 = vpack.c.bf16 %v363_v61, %v363_v61  ;;  %v13958_v20 = vpack.c.bf16 %v364_v1, %v364_v1 }
  0x9e   : > { %v1220_v23 = vsel %vm13682_vm9, %v1215_v4, %v1219_v56  ;;  %v1231_v3 = vshll.u32 %v13952_v14, 16  ;;  %v1235_v24 = vshrl.u32 %v13952_v14, 16  ;;  %v1241_v25 = vshll.u32 %v13954_v15, 16  ;;  %v365_v2 = vld [vmem:[%s13674_s10 + $0xe8] sm:$0xff] }
  0x9f   : > { %v11019_v47 = vcombine.low %v1210_v62, %v1220_v23  ;;  %v1229_v29 = vrot.slane %v1228_v16, 4  ;;  %v677_v35 = vor.u32 %v675_v7, %v674_v10  ;;  %v678_v36 = vrot.slane %v674_v10, 4 }
  0xa0   : > { %v13965_v34 = vld [vmem:[#allocation2 + $0x90] sm:$0xf]  ;;  %v1233_v43 = vrot.slane %v1231_v3, 5  ;;  %v1237_v44 = vrot.slane %v1235_v24, 4  ;;  %v1243_v45 = vrot.slane %v1241_v25, 5  ;;  %v685_v27 = vor.u32 %v683_v11, %v682_v17 }
  0xa1   : > { %v1246_v48 = vshrl.u32 %v13965_v34, 16  ;;  %12128 = vmatprep.mubr.msk.bf16.mxu0 %vm1391_vm7, %v11019_v47  ;;  %v13969_v49 = vld [vmem:[#allocation2 + $0x94] sm:$0xf]  ;;  %v1249_v28 = vshll.u32 %v13965_v34, 16  ;;  %v687_v50 = vrot.slane %v682_v17, 4  ;;  %v878_v51 = vsel %vm13701_vm12, %v677_v35, %v877_v12 }
  0xa2   : > { %v1234_v53 = vsel %vm13682_vm9, %v1229_v29, %v1233_v43  ;;  %v1238_v55 = vor.u32 %v1237_v44, %v1233_v43  ;;  %v13976_v56 = vld [vmem:[#allocation2 + $0x98] sm:$0x1]  ;;  %v1255_v59 = vshll.u32 %v13969_v49, 16  ;;  %879 = vst [vmem:[#allocation2 + $0x9c] sm:$0xf] %v878_v51  ;;  %v1259_v60 = vshrl.u32 %v13969_v49, 16 }
  0xa3   : > { %v1248_v57 = vrot.slane %v1246_v48, 4  ;;  %v1251_v38 = vrot.slane %v1249_v28, 5  ;;  %v1265_v61 = vshll.u32 %v13976_v56, 16  ;;  %v686_v62 = vsel %vm13695_vm11, %v678_v36, %v685_v27  ;;  %v884_v24 = vld [vmem:[#allocation2 + $0xa8] sm:$0xf] }
  0xa4   : > { %v1239_v63 = vrot.slane %v1238_v55, 4  ;;  %v1257_v39 = vrot.slane %v1255_v59, 5  ;;  %880 = vst.msk [vmem:[#allocation2 + $0xa0] sm:$0xf] %vm280_vm1, %v686_v62  ;;  %v882_v0 = vsel %vm13688_vm10, %v687_v50, %v881_v46  ;;  %v689_v1 = vshrl.u32 %v11762_v13, 16 }
  0xa5   : > { %v1252_v6 = vor.u32 %v1251_v38, %v1248_v57  ;;  %v1261_v7 = vrot.slane %v1259_v60, 4  ;;  %v1267_v9 = vrot.slane %v1265_v61, 5  ;;  %883 = vst [vmem:[#allocation2 + $0xa4] sm:$0x1] %v882_v0  ;;  %v692_v4 = vshll.u32 %v11762_v13, 16 }
  0xa6   : > { %v1244_v10 = vsel %vm13682_vm9, %v1239_v63, %v1243_v45  ;;  %v691_v11 = vrot.slane %v689_v1, 7  ;;  %v697_v12 = vshrl.u32 %v13956_v19, 16  ;;  %v700_v16 = vshll.u32 %v13956_v19, 16  ;;  %v888_v36 = vld [vmem:[#allocation2 + $0xb0] sm:$0x1] }
  0xa7   : > { %v11020_v17 = vcombine.low %v1234_v53, %v1244_v10  ;;  %v1253_v23 = vrot.slane %v1252_v6, 4  ;;  %v1262_v3 = vor.u32 %v1261_v7, %v1257_v39  ;;  %v11765_v25 = vpack.c.bf16 %v365_v2, %v365_v2  ;;  %v891_v38 = vld [vmem:[#allocation2 + $0xb4] sm:$0xf] }
  0xa8   : > { %v694_v47 = vor.u32 %v692_v4, %v691_v11  ;;  %v695_v29 = vrot.slane %v691_v11, 4  ;;  %v699_v35 = vrot.slane %v697_v12, 7  ;;  %v706_v43 = vshrl.u32 %v13958_v20, 16  ;;  %v895_v4 = vld [vmem:[#allocation2 + $0xbc] sm:$0x1] }
  0xa9   : > { %12129 = vmatmul.mubr.msk.bf16.gmra.mrb[20].mxu0 %vm1391_vm7, %v11020_v17  ;;  %v1258_v13 = vsel %vm13682_vm9, %v1253_v23, %v1257_v39  ;;  %v1263_v44 = vrot.slane %v1262_v3, 4  ;;  %v13995_v45 = vld [vmem:[#allocation2 + $0x9c] sm:$0xf]  ;;  %v709_v19 = vshll.u32 %v13958_v20, 16  ;;  %v714_v48 = vshrl.u32 %v11765_v25, 16 }
  0xaa   : > { %v1270_v46 = vshrl.u32 %v13995_v45, 16  ;;  %v1273_v28 = vshll.u32 %v13995_v45, 16  ;;  %v702_v27 = vor.u32 %v700_v16, %v699_v35  ;;  %v704_v50 = vrot.slane %v699_v35, 4 }
  0xab   : > { %v1268_v51 = vsel %vm13682_vm9, %v1263_v44, %v1267_v9  ;;  %v14002_v53 = vld [vmem:[#allocation2 + $0xa0] sm:$0xf]  ;;  %v885_v55 = vsel %vm13701_vm12, %v694_v47, %v884_v24  ;;  %v708_v57 = vrot.slane %v706_v43, 7  ;;  %v716_v59 = vrot.slane %v714_v48, 7 }
  0xac   : > { %v11021_v60 = vcombine.low %v1258_v13, %v1268_v51  ;;  %v14006_v20 = vld [vmem:[#allocation2 + $0xa4] sm:$0x1]  ;;  %v1272_v61 = vrot.slane %v1270_v46, 4  ;;  %v1275_v62 = vrot.slane %v1273_v28, 5  ;;  %v1279_v63 = vshll.u32 %v14002_v53, 16 }
  0xad   : > { %886 = vst [vmem:[#allocation2 + $0xa8] sm:$0xf] %v885_v55  ;;  %v1283_v39 = vshrl.u32 %v14002_v53, 16  ;;  %v1289_v0 = vshll.u32 %v14006_v20, 16  ;;  %v703_v1 = vsel %vm13695_vm11, %v695_v29, %v702_v27  ;;  %v889_v2 = vsel %vm13688_vm10, %v704_v50, %v888_v36 }
  0xae   : > { %12132 = vmatprep.mubr.msk.bf16.mxu0 %vm1391_vm7, %v11021_v60  ;;  %v1276_v6 = vor.u32 %v1275_v62, %v1272_v61  ;;  %v1281_v7 = vrot.slane %v1279_v63, 5  ;;  %887 = vst.msk [vmem:[#allocation2 + $0xac] sm:$0xf] %vm280_vm1, %v703_v1  ;;  %890 = vst [vmem:[#allocation2 + $0xb0] sm:$0x1] %v889_v2  ;;  %v711_v9 = vor.u32 %v709_v19, %v708_v57  ;;  %v712_v11 = vrot.slane %v708_v57, 4 }
  0xaf   : > { %v1285_v10 = vrot.slane %v1283_v39, 4  ;;  %v717_v12 = vshll.u32 %v11765_v25, 16  ;;  %v721_v16 = vrot.slane %v716_v59, 4  ;;  %v1291_v24 = vrot.slane %v1289_v0, 5 }
  0xb0   : > { %v1277_v17 = vrot.slane %v1276_v6, 4  ;;  %v892_v23 = vsel %vm13701_vm12, %v711_v9, %v891_v38  ;;  %v11051_v28 = vcombine.low %v13912_v5, %v13920_v26  ;;  %v11052_v27 = vcombine.low %v13936_v54, %v13952_v14 }
  0xb1   : > { %v1286_v3 = vor.u32 %v1285_v10, %v1281_v7  ;;  %v719_v47 = vor.u32 %v717_v12, %v716_v59  ;;  %893 = vst [vmem:[#allocation2 + $0xb4] sm:$0xf] %v892_v23  ;;  %v896_v29 = vsel %vm13688_vm10, %v721_v16, %v895_v4  ;;  %v11053_v60 = vcombine.low %v13965_v34, %v13969_v49 }
  0xb2   : > { %897 = vst [vmem:[#allocation2 + $0xbc] sm:$0x1] %v896_v29  ;;  %v1282_v35 = vsel %vm13682_vm9, %v1277_v17, %v1281_v7  ;;  %v11054_v61 = vcombine.low %v13995_v45, %v14002_v53  ;;  %v13345_v45 = vld [vmem:[#allocation2 + $0x14] sm:$0x1] }
  0xb3   : > { %v1287_v36 = vrot.slane %v1286_v3, 4  ;;  %v720_v25 = vsel %vm13695_vm11, %v712_v11, %v719_v47 }
  0xb4   : > { %v14023_v43 = vld [vmem:[#allocation2 + $0xa8] sm:$0xf]  ;;  %894 = vst.msk [vmem:[#allocation2 + $0xb8] sm:$0xf] %vm280_vm1, %v720_v25 }
  0xb5   : > { %v1294_v13 = vshrl.u32 %v14023_v43, 16  ;;  %v1297_v44 = vshll.u32 %v14023_v43, 16  ;;  %v1292_v19 = vsel %vm13682_vm9, %v1287_v36, %v1291_v24  ;;  %v14032_v48 = vld [vmem:[#allocation2 + $0xac] sm:$0xf]  ;;  %v14034_v46 = vld [vmem:[#allocation2 + $0xb0] sm:$0x1] }
  0xb6   : > { %v11022_v50 = vcombine.low %v1282_v35, %v1292_v19  ;;  %v1303_v57 = vshll.u32 %v14032_v48, 16  ;;  %v1307_v59 = vshrl.u32 %v14032_v48, 16  ;;  %v1313_v38 = vshll.u32 %v14034_v46, 16  ;;  %v13271_v33 = vld [vmem:[#allocation2 + $0xa8] sm:$0xff]  }
  0xb7   : > { %v1296_v51 = vrot.slane %v1294_v13, 4  ;;  %v1299_v55 = vrot.slane %v1297_v44, 5  ;;  %v11055_v0 = vcombine.low %v14023_v43, %v14032_v48  ;;  %v13346_v43 = vld [vmem:[#allocation2 + $0x20] sm:$0x1] }
  0xb8   : > { %12133 = vmatmul.mubr.msk.bf16.gmra.mrb[24].mxu0 %vm1391_vm7, %v11022_v50  ;;  %v1305_v63 = vrot.slane %v1303_v57, 5  ;;  %v14048_v39 = vld [vmem:[#allocation2 + $0xb4] sm:$0xf]  ;;  %v1309_v1 = vrot.slane %v1307_v59, 4  ;;  %v1315_v10 = vrot.slane %v1313_v38, 5 }
  0xb9   : > { %v1300_v62 = vor.u32 %v1299_v55, %v1296_v51  ;;  %v14052_v2 = vld [vmem:[#allocation2 + $0xbc] sm:$0x1]  ;;  %v1318_v6 = vshrl.u32 %v14048_v39, 16  ;;  %v1321_v7 = vshll.u32 %v14048_v39, 16  ;;  %v13331_v38 = vld [vmem:[#allocation2] sm:$0xf] }
  0xba   : > { %v1310_v4 = vor.u32 %v1309_v1, %v1305_v63  ;;  %v1337_v3 = vshll.u32 %v14052_v2, 16 }
  0xbb   : > { %v1301_v9 = vrot.slane %v1300_v62, 4  ;;  %v14056_v11 = vld [vmem:[#allocation2 + $0xb8] sm:$0xf]  ;;  %v1320_v12 = vrot.slane %v1318_v6, 4  ;;  %v1323_v16 = vrot.slane %v1321_v7, 5 }
  0xbc   : > { %v1327_v17 = vshll.u32 %v14056_v11, 16  ;;  %v1331_v23 = vshrl.u32 %v14056_v11, 16  ;;  %v1311_v47 = vrot.slane %v1310_v4, 4  ;;  %v11056_v35 = vcombine.low %v14048_v39, %v14056_v11  ;;  %v14072_v62 = vld [vmem:[#allocation2 + $0x4] sm:$0xf] }
  0xbd   : > { %v1306_v24 = vsel %vm13682_vm9, %v1301_v9, %v1305_v63  ;;  %v1324_v29 = vor.u32 %v1323_v16, %v1320_v12  ;;  %v1339_v51 = vrot.slane %v1337_v3, 5  ;;  %v11041_v63 = vcombine.low %v13331_v38, %v14072_v62  ;;  %v13333_v6 = vld [vmem:[#allocation2 + $0xc] sm:$0xf]  ;;  %v14077_v7 = vld [vmem:[#allocation2 + $0x10] sm:$0xf] }
  0xbe   : > { %v1329_v36 = vrot.slane %v1327_v17, 5  ;;  %v1333_v25 = vrot.slane %v1331_v23, 4  ;;  %v1316_v13 = vsel %vm13682_vm9, %v1311_v47, %v1315_v10  ;;  %v11042_v9 = vcombine.low %v13333_v6, %v14077_v7  ;;  %v13335_v4 = vld [vmem:[#allocation2 + $0x18] sm:$0xf]  ;;  %v14080_v10 = vld [vmem:[#allocation2 + $0x1c] sm:$0xf] }
  0xbf   : > { %v1325_v44 = vrot.slane %v1324_v29, 4  ;;  %v11023_v19 = vcombine.low %v1306_v24, %v1316_v13  ;;  %v11043_v12 = vcombine.low %v13335_v4, %v14080_v10  ;;  %v1907_v16 = vld [vmem:[#allocation2 + $0x78] sm:$0xe]  ;;  %v13337_v17 = vld [vmem:[%s17338_s1 + $0x4] sm:$0x3]  ;;  %v2020_v29 = vrot.slane %v13920_v26, 5 }
  0xc0   : > { %v1334_v50 = vor.u32 %v1333_v25, %v1329_v36  ;;  %v2159_v23 = vsel %vm1440_vm0, %v13337_v17, 0  ;;  %v14090_v3 = vld [vmem:[%s17338_s1 + $0x6] sm:$0x3]  ;;  %v11083_v47 = vrot.slane %v1907_v16, 9  ;;  %v2023_v13 = vrot.slane %v13927_v42, 5 }
  0xc1   : > { %12136 = vmatprep.mubr.msk.bf16.mxu0 %vm1391_vm7, %v11023_v19  ;;  %v1330_v55 = vsel %vm13682_vm9, %v1325_v44, %v1329_v36  ;;  %v1908_v24 = vld [vmem:[#allocation2 + $0x84] sm:$0xe]  ;;  %v1909_v36 = vld [vmem:[#allocation2 + $0x90] sm:$0xe]  ;;  %v2022_v19 = vrot.slane %v2020_v29, 4  ;;  %v2030_v38 = vrot.slane %v13954_v15, 5 }
  0xc2   : > { %v1335_v57 = vrot.slane %v1334_v50, 4  ;;  %v14104_v44 = vsel %vm14095_vm15, %v11083_v47, %v2020_v29  ;;  %v11084_v50 = vrot.slane %v1908_v24, 9  ;;  %v2034_v42 = vrot.slane %v13969_v49, 5  ;;  %v14112_v6 = vld [vmem:[#allocation2 + $0x34] sm:$0xf] }
  0xc3   : > { %v2037_v29 = vrot.slane %v13976_v56, 5  ;;  %v2048_v56 = vrot.slane %v14032_v48, 5  ;;  %v1967_v48 = vrot.slane %v13346_v43, 5  ;;  %v1978_v39 = vrot.slane %v14112_v6, 5 }
  0xc4   : > { %v1340_v59 = vsel %vm13682_vm9, %v1335_v57, %v1339_v51  ;;  %v2027_v51 = vrot.slane %v13952_v14, 5  ;;  %v14107_v57 = vld [vmem:[#allocation2 + $0x28] sm:$0xf]  ;;  %v2036_v47 = vrot.slane %v2034_v42, 4 }
  0xc5   : > { %v11024_v1 = vcombine.low %v1330_v55, %v1340_v59  ;;  %v13338_v55 = vld [vmem:[#allocation2 + $0x24] sm:$0xf]  ;;  %v13344_v14 = vld [vmem:[#allocation2 + $0x8] sm:$0x1] }
  0xc6   : > { %v11044_v59 = vcombine.low %v13338_v55, %v14107_v57  ;;  %v14121_v16 = vsel %vm14095_vm15, %v11084_v50, %v2027_v51  ;;  %v2029_v17 = vrot.slane %v2027_v51, 4  ;;  %v2044_v50 = vrot.slane %v14006_v20, 5  ;;  %v1912_v51 = vld [vmem:[#allocation2 + $0xb4] sm:$0xe] }
  0xc7   : > { %12137 = vmatmul.mubr.msk.bf16.gmra.mrb[28].mxu0 %vm1391_vm7, %v11024_v1  ;;  %v1910_v1 = vld [vmem:[#allocation2 + $0x9c] sm:$0xe] }
  0xc8   : > { %12142 = vmatprep.mubr.msk.bf16.mxu0 %vm1391_vm7, %v11041_v63  ;;  %v11085_v63 = vrot.slane %v1909_v36, 9  ;;  %v14132_v36 = vsel %vm14095_vm15, %v2029_v17, %v2030_v38 }
  0xc9   : > { %v11101_v55 = vcombine.low %v14121_v16, %v14132_v36  ;;  %v13258_v16 = vld [vmem:[#allocation2 + $0xc] sm:$0xff]  }
  0xca   : > { %v14127_v24 = vsel %vm14095_vm15, %v11085_v63, %v2034_v42  ;;  %v14140_v63 = vsel %vm14095_vm15, %v2036_v47, %v2037_v29  ;;  %v11088_v47 = vrot.slane %v1912_v51, 9 }
  0xcb   : > { %v11102_v38 = vcombine.low %v14127_v24, %v14140_v63  ;;  %v13260_v24 = vld [vmem:[#allocation2 + $0x24] sm:$0xff]   ;;  %v14334_v63 = vld [vmem:[#allocation2 + $0x34] sm:$0xf] }
  0xcf   : > { %12143 = vmatmul.mubr.msk.bf16.vlgmr.msra.gmra.mrb[0].mxu0 %vm1391_vm7, %v11042_v9  ;;  %v13341_v9 = vld [vmem:[#allocation2 + $0x30] sm:$0xf] }
  0xd0   : > { %12175 = vmatpush3.bf16.msra.mxu0 %v2159_v23  ;;  %12146 = vmatprep.mubr.msk.bf16.mxu0 %vm1391_vm7, %v11043_v12  ;;  %v11045_v4 = vcombine.low %v13341_v9, %v14112_v6  ;;  %v14117_v12 = vsel %vm14095_vm15, %v2022_v19, %v2023_v13  ;;  %v1911_v23 = vld [vmem:[#allocation2 + $0xa8] sm:$0xe]  ;;  %v11086_v13 = vrot.slane %v1910_v1, 9  ;;  %v2041_v19 = vrot.slane %v14002_v53, 5 }
  0xd1   : > { %13233 = vmatprep.subr.msk.bf16.mxu0 %vm1440_vm0, %v14090_v3  ;;  %v11100_v15 = vcombine.low %v14104_v44, %v14117_v12  ;;  %v11087_v42 = vrot.slane %v1911_v23, 9  ;;  %v2051_v9 = vrot.slane %v14034_v46, 5  ;;  %v2050_v23 = vrot.slane %v2048_v56, 4  ;;  %v902_v44 = vld [vmem:[#allocation2 + $0xc8] sm:$0x1] }
  0xd2   : > { %v14148_v1 = vsel %vm14095_vm15, %v11086_v13, %v2041_v19  ;;  %v2043_v20 = vrot.slane %v2041_v19, 4  ;;  %v2058_v13 = vrot.slane %v14052_v2, 5  ;;  %v1960_v53 = vrot.slane %v13345_v45, 5 }
  0xd3   : > { %v14154_v17 = vsel %vm14095_vm15, %v11087_v42, %v2048_v56  ;;  %v14166_v46 = vsel %vm14095_vm15, %v2050_v23, %v2051_v9  ;;  %v13342_v42 = vld [vmem:[#allocation2 + $0x3c] sm:$0xf]  ;;  %v14172_v56 = vld [vmem:[#allocation2 + $0x40] sm:$0xf] }
  0xd4   : > { %v14159_v29 = vsel %vm14095_vm15, %v2043_v20, %v2044_v50  ;;  %v11046_v50 = vcombine.low %v13342_v42, %v14172_v56  ;;  %v11104_v2 = vcombine.low %v14154_v17, %v14166_v46  ;;  %v11047_v20 = vcombine.low %v13816_v18, %v13826_v31  ;;  %v366_v31 = vld [vmem:[%s13674_s10 + $0xf0] sm:$0xff] }
  0xd5   : > { %v11103_v19 = vcombine.low %v14148_v1, %v14159_v29  ;;  %v11050_v18 = vcombine.low %v13887_v21, %v13893_v37  ;;  %v1950_v21 = vrot.slane %v14072_v62, 5  ;;  %v3441_v1 = vld [vmem:[#allocation2 + $0x30] sm:$0xe]  ;;  %v3525_v17 = vrot.slane %v14334_v63, 5 }
  0xd6   : > { %v11191_v29 = vrot.slane %v3441_v1, 9  ;;  %v14406_v1 = vld [vmem:[#allocation2 + $0x7c] sm:$0xf] }
  0xd7   : > { %12147 = vmatmul.mubr.msk.bf16.gmra.mrb[4].mxu0 %vm1391_vm7, %v11044_v59  ;;  %v2055_v59 = vrot.slane %v14056_v11, 5  ;;  %v1901_v11 = vld [vmem:[#allocation2 + $0x30] sm:$0xe]  ;;  %v3527_v46 = vrot.slane %v3525_v17, 4 }
  0xd8   : > { %12150 = vmatprep.mubr.msk.bf16.mxu0 %vm1391_vm7, %v11045_v4 }
  0xd9   : > { %v14170_v4 = vsel %vm14095_vm15, %v11088_v47, %v2055_v59  ;;  %v2057_v51 = vrot.slane %v2055_v59, 4  ;;  %v11048_v47 = vcombine.low %v13840_v58, %v13848_v8  ;;  %v11049_v59 = vcombine.low %v13858_v32, %v13868_v52 }
  0xda   : > { %v11766_v58 = vpack.c.bf16 %v366_v31, %v366_v31  ;;  %v1952_v31 = vrot.slane %v1950_v21, 4 }
  0xdb   : > { %v14181_v9 = vsel %vm14095_vm15, %v2057_v51, %v2058_v13  ;;  %v367_v13 = vld [vmem:[%s13674_s10 + $0xf8] sm:$0xff] }
  0xdc   : > { %v11105_v23 = vcombine.low %v14170_v4, %v14181_v9  ;;  %v11767_v8 = vpack.c.bf16 %v367_v13, %v367_v13  ;;  %v723_v32 = vshrl.u32 %v11766_v58, 16  ;;  %v726_v26 = vshll.u32 %v11766_v58, 16  ;;  %v1898_v58 = vld [vmem:[#allocation2 + $0xc] sm:$0xe]  ;;  %v13261_v4 = vld [vmem:[#allocation2 + $0x30] sm:$0xff]   ;;  %v13262_v9 = vld [vmem:[#allocation2 + $0x3c] sm:$0xff]  }
  0xde   : > { %v731_v51 = vshrl.u32 %v11767_v8, 16  ;;  %v725_v5 = vrot.slane %v723_v32, 7  ;;  %v734_v42 = vshll.u32 %v11767_v8, 16  ;;  %v1899_v8 = vld [vmem:[#allocation2 + $0x18] sm:$0xe]  ;;  %v1964_v32 = vrot.slane %v14080_v10, 5 }
  0xdf   : > { %12151 = vmatmul.mubr.msk.bf16.gmra.mrb[8].mxu0 %vm1391_vm7, %v11046_v50  ;;  %v1897_v50 = vld [vmem:[#allocation2] sm:$0xe] }
  0xe0   : > { %12154 = vmatprep.mubr.msk.bf16.mxu0 %vm1391_vm7, %v11047_v20  ;;  %v728_v20 = vor.u32 %v726_v26, %v725_v5  ;;  %v1966_v26 = vrot.slane %v1964_v32, 4 }
  0xe7   : > { %12155 = vmatmul.mubr.msk.bf16.gmra.mrb[12].mxu0 %vm1391_vm7, %v11048_v47  ;;  %v729_v47 = vrot.slane %v725_v5, 4  ;;  %v11075_v5 = vrot.slane %v1899_v8, 9  ;;  %v1902_v8 = vld [vmem:[#allocation2 + $0x3c] sm:$0xe] }
  0xe8   : > { %12158 = vmatprep.mubr.msk.bf16.mxu0 %vm1391_vm7, %v11049_v59  ;;  %v898_v59 = vld [vmem:[#allocation2 + $0xc0] sm:$0xf] }
  0xe9   : > { %v899_v49 = vsel %vm13701_vm12, %v728_v20, %v898_v59  ;;  %v1900_v20 = vld [vmem:[#allocation2 + $0x24] sm:$0xe] }
  0xea   : > { %900 = vst [vmem:[#allocation2 + $0xc0] sm:$0xf] %v899_v49 }
  0xef   : > { %12159 = vmatmul.mubr.msk.bf16.gmra.mrb[16].mxu0 %vm1391_vm7, %v11050_v18  ;;  %v11073_v18 = vrot.slane %v1897_v50, 9  ;;  %v1968_v50 = vsel %vm14095_vm15, %v1966_v26, %v1967_v48  ;;  %v13350_v26 = vld [vmem:[#allocation2 + $0x44] sm:$0x1] }
  0xf0   : > { %12162 = vmatprep.mubr.msk.bf16.mxu0 %vm1391_vm7, %v11051_v28  ;;  %v14211_v28 = vrot.slane %v731_v51, 7  ;;  %v11074_v51 = vrot.slane %v1898_v58, 9  ;;  %v1988_v43 = vrot.slane %v13350_v26, 5 }
  0xf1   : > { %v1951_v62 = vsel %vm14095_vm15, %v11073_v18, %v1950_v21  ;;  %v1971_v21 = vrot.slane %v14107_v57, 5  ;;  %v2517_v18 = vsel %vm1440_vm0, %v14090_v3, 0  ;;  %v11077_v57 = vrot.slane %v1901_v11, 9 }
  0xf2   : > { %v736_v54 = vor.u32 %v734_v42, %v14211_v28  ;;  %v1965_v42 = vsel %vm14095_vm15, %v11075_v5, %v1964_v32  ;;  %v13349_v32 = vld [vmem:[#allocation2 + $0x4c] sm:$0xf] }
  0xf3   : > { %v1992_v45 = vrot.slane %v13349_v32, 5  ;;  %v1906_v32 = vld [vmem:[#allocation2 + $0x6c] sm:$0xe] }
  0xf4   : > { %v737_v34 = vsel %vm13695_vm11, %v729_v47, %v736_v54  ;;  %v11092_v47 = vcombine.low %v1965_v42, %v1968_v50  ;;  %v11076_v54 = vrot.slane %v1900_v20, 9  ;;  %v13352_v50 = vld [vmem:[#allocation2 + $0x58] sm:$0xf] }
  0xf5   : > { %901 = vst.msk [vmem:[#allocation2 + $0xc4] sm:$0xf] %vm280_vm1, %v737_v34  ;;  %v13348_v34 = vld [vmem:[#allocation2 + $0x38] sm:$0x1]  ;;  %v1994_v48 = vrot.slane %v1992_v45, 4  ;;  %v1999_v20 = vrot.slane %v13352_v50, 5 }
  0xf6   : > { %v1981_v49 = vrot.slane %v13348_v34, 5  ;;  %v1972_v6 = vsel %vm14095_vm15, %v11076_v54, %v1971_v21  ;;  %v1905_v54 = vld [vmem:[#allocation2 + $0x60] sm:$0xe]  ;;  %v2712_v50 = vld [vmem:[#allocation2 + $0xc] sm:$0xf] }
  0xf7   : > { %12163 = vmatmul.mubr.msk.bf16.gmra.mrb[20].mxu0 %vm1391_vm7, %v11052_v27  ;;  %v1953_v27 = vrot.slane %v13344_v14, 5  ;;  %v1973_v14 = vrot.slane %v1971_v21, 4  ;;  %v11081_v34 = vrot.slane %v1905_v54, 9  ;;  %v2761_v54 = vshrl.u32 %v2712_v50, 16 }
  0xf8   : > { %12166 = vmatprep.mubr.msk.bf16.mxu0 %vm1391_vm7, %v11053_v60  ;;  %v1957_v60 = vrot.slane %v14077_v7, 5 }
  0xf9   : > { %v1954_v13 = vsel %vm14095_vm15, %v1952_v31, %v1953_v27  ;;  %v13347_v27 = vld [vmem:[#allocation2 + $0x2c] sm:$0x1]  ;;  %v1980_v31 = vrot.slane %v1978_v39, 4 }
  0xfa   : > { %v1959_v7 = vrot.slane %v1957_v60, 4  ;;  %v1974_v59 = vrot.slane %v13347_v27, 5 }
  0xfb   : > { %v1982_v58 = vsel %vm14095_vm15, %v1980_v31, %v1981_v49 }
  0xfc   : > { %v1961_v10 = vsel %vm14095_vm15, %v1959_v7, %v1960_v53  ;;  %v1975_v3 = vsel %vm14095_vm15, %v1973_v14, %v1974_v59  ;;  %v1903_v53 = vld [vmem:[#allocation2 + $0x48] sm:$0xe]  ;;  %v11078_v7 = vrot.slane %v1902_v8, 9 }
  0xff   : > { %12167 = vmatmul.mubr.msk.bf16.gmra.mrb[24].mxu0 %vm1391_vm7, %v11054_v61  ;;  %v11090_v61 = vcombine.low %v1951_v62, %v1954_v13  ;;  %v1985_v62 = vrot.slane %v14172_v56, 5  ;;  %v1979_v13 = vsel %vm14095_vm15, %v11077_v57, %v1978_v39  ;;  %v11079_v56 = vrot.slane %v1903_v53, 9  ;;  %v13353_v57 = vld [vmem:[#allocation2 + $0x5c] sm:$0x1] }
 0x100   : > { %12170 = vmatprep.mubr.msk.bf16.mxu0 %vm1391_vm7, %v11055_v0  ;;  %v1958_v0 = vsel %vm14095_vm15, %v11074_v51, %v1957_v60  ;;  %v14253_v60 = vld [vmem:[%s17338_s1 + $0x8] sm:$0x3]  ;;  %v11094_v51 = vcombine.low %v1979_v13, %v1982_v58  ;;  %v2002_v31 = vrot.slane %v13353_v57, 5  ;;  %v2013_v13 = vrot.slane %v13893_v37, 5 }
 0x101   : > { %v1987_v5 = vrot.slane %v1985_v62, 4  ;;  %v1986_v21 = vsel %vm14095_vm15, %v11078_v7, %v1985_v62  ;;  %v1993_v39 = vsel %vm14095_vm15, %v11079_v56, %v1992_v45  ;;  %v2016_v7 = vrot.slane %v13895_v40, 5  ;;  %v3443_v56 = vld [vmem:[#allocation2 + $0x48] sm:$0xe]  ;;  %v14378_v57 = vld [vmem:[#allocation2 + $0x68] sm:$0x1] }
 0x102   : > { %v738_v40 = vrot.slane %v14211_v28, 4  ;;  %v3243_v36 = vsel %vm1440_vm0, %v14253_v60, 0 }
 0x103   : > { %v1989_v42 = vsel %vm14095_vm15, %v1987_v5, %v1988_v43  ;;  %v14356_v43 = vld [vmem:[#allocation2 + $0x50] sm:$0x1] }
 0x104   : > { %v11095_v14 = vcombine.low %v1986_v21, %v1989_v42  ;;  %v903_v12 = vsel %vm13688_vm10, %v738_v40, %v902_v44  ;;  %v13263_v42 = vld [vmem:[#allocation2 + $0x48] sm:$0xff]   ;;  %v14400_v44 = vld [vmem:[#allocation2 + $0x20] sm:$0x1] }
 0x105   : > { %904 = vst [vmem:[#allocation2 + $0xc8] sm:$0x1] %v903_v12 }
 0x107   : > { %12171 = vmatmul.mubr.msk.bf16.gmra.mrb[28].mxu0 %vm1391_vm7, %v11056_v35  ;;  %v11091_v35 = vcombine.low %v1958_v0, %v1961_v10  ;;  %v13351_v0 = vld [vmem:[#allocation2 + $0x50] sm:$0x1] }
 0x108   : > { %12176 = vmatprep.mubr.msk.bf16.mxu0 %vm1391_vm7, %v11090_v61  ;;  %v11093_v61 = vcombine.low %v1972_v6, %v1975_v3  ;;  %v1995_v10 = vrot.slane %v13351_v0, 5  ;;  %v13354_v6 = vld [vmem:[#allocation2 + $0x68] sm:$0x1]  ;;  %v3542_v0 = vrot.slane %v14356_v43, 5 }
 0x109   : > { %v2009_v3 = vrot.slane %v13354_v6, 5 }
 0x10a   : > { %v1996_v11 = vsel %vm14095_vm15, %v1994_v48, %v1995_v10  ;;  %v11193_v10 = vrot.slane %v3443_v56, 9  ;;  %v14413_v56 = vld [vmem:[#allocation2 + $0x28] sm:$0xf] }
 0x10b   : > { %v11096_v27 = vcombine.low %v1993_v39, %v1996_v11  ;;  %v13264_v39 = vld [vmem:[#allocation2 + $0x54] sm:$0xff]   ;;  %v14365_v11 = vld [vmem:[#allocation2 + $0x10] sm:$0xf] }
 0x10f   : > { %12177 = vmatmul.mubr.msk.bf16.vlgmr.msra.gmra.mrb[0].mxu0 %vm1391_vm7, %v11091_v35  ;;  %v1904_v35 = vld [vmem:[#allocation2 + $0x54] sm:$0xe] }
 0x110   : > { %12209 = vmatpush3.bf16.msra.mxu0 %v2517_v18  ;;  %12180 = vmatprep.mubr.msk.bf16.mxu0 %vm1391_vm7, %v11092_v47  ;;  %v2006_v47 = vrot.slane %v13868_v52, 5  ;;  %v11080_v59 = vrot.slane %v1904_v35, 9  ;;  %v2001_v18 = vrot.slane %v1999_v20, 4 }
 0x111   : > { %13234 = vmatprep.subr.msk.bf16.mxu0 %vm1440_vm0, %v14253_v60  ;;  %v14354_v60 = vld [vmem:[#allocation2 + $0x4c] sm:$0xf] }
 0x112   : > { %v2008_v49 = vrot.slane %v2006_v47, 4  ;;  %v2000_v62 = vsel %vm14095_vm15, %v11080_v59, %v1999_v20  ;;  %v2003_v52 = vsel %vm14095_vm15, %v2001_v18, %v2002_v31  ;;  %v2007_v58 = vsel %vm14095_vm15, %v11081_v34, %v2006_v47  ;;  %v14376_v18 = vld [vmem:[#allocation2 + $0x64] sm:$0xf]  ;;  %v3445_v31 = vld [vmem:[#allocation2 + $0x60] sm:$0xe] }
 0x113   : > { %v11097_v45 = vcombine.low %v2000_v62, %v2003_v52  ;;  %v3539_v48 = vrot.slane %v14354_v60, 5  ;;  %v2774_v59 = vshrl.u32 %v14365_v11, 16  ;;  %v3553_v34 = vrot.slane %v14376_v18, 5  ;;  %v2715_v62 = vld [vmem:[#allocation2 + $0x18] sm:$0xf] }
 0x114   : > { %v2010_v8 = vsel %vm14095_vm15, %v2008_v49, %v2009_v3  ;;  %v3556_v49 = vrot.slane %v14378_v57, 5  ;;  %v11195_v6 = vrot.slane %v3445_v31, 9  ;;  %v2763_v3 = vrot.slane %v2761_v54, 4  ;;  %v14383_v52 = vld [vmem:[#allocation2 + $0x1c] sm:$0xf] }
 0x115   : > { %v11098_v53 = vcombine.low %v2007_v58, %v2010_v8  ;;  %v3541_v21 = vrot.slane %v3539_v48, 4  ;;  %v14363_v20 = vsel %vm14095_vm15, %v11193_v10, %v3539_v48  ;;  %v13265_v58 = vld [vmem:[#allocation2 + $0x60] sm:$0xff]   ;;  %v14385_v8 = vld [vmem:[#allocation2 + $0x14] sm:$0x1]  ;;  %v2794_v12 = vshll.u32 %v14383_v52, 16  ;;  %v13267_v54 = vld [vmem:[#allocation2 + $0x78] sm:$0xff]  }
 0x116   : > { %17475 = vst [vmem:[#allocation9_spill] sm:$0xff] %v14363_v20  ;;  %v2780_v40 = vshll.u32 %v14385_v8, 16  ;;  %v2846_v47 = vshrl.u32 %v14334_v63, 16  ;;  %v14558_v20 = vld [vmem:[#allocation2 + $0x58] sm:$0xf] }
 0x117   : > { %12181 = vmatmul.mubr.msk.bf16.gmra.mrb[4].mxu0 %vm1391_vm7, %v11093_v61  ;;  %v11082_v61 = vrot.slane %v1906_v32, 9  ;;  %v14369_v35 = vsel %vm14095_vm15, %v3541_v21, %v3542_v0  ;;  %v14417_v21 = vrot.slane %v2794_v12, 5  ;;  %v14447_v12 = vld [vmem:[#allocation2 + $0x98] sm:$0x1] }
 0x118   : > { %12184 = vmatprep.mubr.msk.bf16.mxu0 %vm1391_vm7, %v11094_v51  ;;  %v2015_v51 = vrot.slane %v2013_v13, 4  ;;  %17476 = vst [vmem:[#allocation10_spill] sm:$0xff] %v14369_v35  ;;  %v14415_v10 = vrot.slane %v2780_v40, 5 }
 0x119   : > { %v2014_v37 = vsel %vm14095_vm15, %v11082_v61, %v2013_v13  ;;  %v3555_v13 = vrot.slane %v3553_v34, 4  ;;  %v14391_v61 = vsel %vm14095_vm15, %v11195_v6, %v3553_v34  ;;  %v13268_v34 = vld [vmem:[#allocation2 + $0x84] sm:$0xff]   ;;  %v2818_v6 = vshll.u32 %v14413_v56, 16 }
 0x11a   : > { %v2017_v5 = vsel %vm14095_vm15, %v2015_v51, %v2016_v7  ;;  %17477 = vst [vmem:[#allocation11_spill] sm:$0xff] %v14391_v61  ;;  %v13266_v51 = vld [vmem:[#allocation2 + $0x6c] sm:$0xff]  }
 0x11b   : > { %v11099_v26 = vcombine.low %v2014_v37, %v2017_v5  ;;  %v14395_v7 = vsel %vm14095_vm15, %v3555_v13, %v3556_v49  ;;  %v2785_v37 = vshrl.u32 %v2715_v62, 16  ;;  %v2788_v5 = vshll.u32 %v2715_v62, 16 }
 0x11c   : > { %17478 = vst [vmem:[#allocation12_spill] sm:$0xff] %v14395_v7 }
 0x11f   : > { %12185 = vmatmul.mubr.msk.bf16.gmra.mrb[8].mxu0 %vm1391_vm7, %v11095_v14  ;;  %v2764_v14 = vshll.u32 %v2712_v50, 16  ;;  %v2721_v50 = vld [vmem:[#allocation2 + $0x30] sm:$0xf] }
 0x120   : > { %12188 = vmatprep.mubr.msk.bf16.mxu0 %vm1391_vm7, %v11096_v27  ;;  %v2770_v27 = vshll.u32 %v14365_v11, 16 }
 0x121   : > { %v2766_v32 = vrot.slane %v2764_v14, 5 }
 0x127   : > { %12189 = vmatmul.mubr.msk.bf16.gmra.mrb[12].mxu0 %vm1391_vm7, %v11097_v45  ;;  %v14387_v45 = vrot.slane %v2770_v27, 5 }
 0x128   : > { %12192 = vmatprep.mubr.msk.bf16.mxu0 %vm1391_vm7, %v11098_v53  ;;  %v2776_v53 = vrot.slane %v2774_v59, 4 }
 0x12f   : > { %12193 = vmatmul.mubr.msk.bf16.gmra.mrb[16].mxu0 %vm1391_vm7, %v11099_v26 }
 0x130   : > { %12196 = vmatprep.mubr.msk.bf16.mxu0 %vm1391_vm7, %v11100_v15  ;;  %v13259_v15 = vld [vmem:[#allocation2 + $0x18] sm:$0xff]  }
 0x137   : > { %12197 = vmatmul.mubr.msk.bf16.gmra.mrb[20].mxu0 %vm1391_vm7, %v11101_v55  ;;  %v14331_v55 = vld [vmem:[%s17338_s1 + $0xa] sm:$0x3] }
 0x138   : > { %12200 = vmatprep.mubr.msk.bf16.mxu0 %vm1391_vm7, %v11102_v38  ;;  %v14337_v38 = vld [vmem:[#allocation2 + $0x38] sm:$0x1] }
 0x13f   : > { %12201 = vmatmul.mubr.msk.bf16.gmra.mrb[24].mxu0 %vm1391_vm7, %v11103_v19  ;;  %v3528_v19 = vrot.slane %v14337_v38, 5 }
 0x140   : > { %12204 = vmatprep.mubr.msk.bf16.mxu0 %vm1391_vm7, %v11104_v2  ;;  %v14345_v2 = vsel %vm14095_vm15, %v11191_v29, %v3525_v17  ;;  %v14408_v17 = vld [vmem:[#allocation2 + $0x80] sm:$0x1]  ;;  %v3447_v29 = vld [vmem:[#allocation2 + $0x78] sm:$0xe] }
 0x141   : > { %17473 = vst [vmem:[#allocation7_spill] sm:$0xff] %v14345_v2  ;;  %v11197_v0 = vrot.slane %v3447_v29, 9  ;;  %v2890_v2 = vshll.u32 %v14354_v60, 16 }
 0x147   : > { %12205 = vmatmul.mubr.msk.bf16.gmra.mrb[28].mxu0 %vm1391_vm7, %v11105_v23  ;;  %v14349_v23 = vsel %vm14095_vm15, %v3527_v46, %v3528_v19  ;;  %v3567_v19 = vrot.slane %v14406_v1, 5  ;;  %v3570_v46 = vrot.slane %v14408_v17, 5 }
 0x148   : > { %12210 = vmatprep.mubr.msk.bf16.mxu0 %vm1391_vm7, %v13258_v16  ;;  %17474 = vst [vmem:[#allocation8_spill] sm:$0xff] %v14349_v23  ;;  %v2718_v16 = vld [vmem:[#allocation2 + $0x24] sm:$0xf] }
 0x149   : > { %v2809_v48 = vshrl.u32 %v2718_v16, 16  ;;  %v14428_v31 = vsel %vm14095_vm15, %v11197_v0, %v3567_v19  ;;  %v2812_v49 = vshll.u32 %v2718_v16, 16  ;;  %v3448_v16 = vld [vmem:[#allocation2 + $0x84] sm:$0xe]  ;;  %v14454_v0 = vrot.slane %v2818_v6, 5 }
 0x14a   : > { %17479 = vst [vmem:[#allocation13_spill] sm:$0xff] %v14428_v31  ;;  %v11198_v29 = vrot.slane %v3448_v16, 9  ;;  %v2842_v16 = vshll.u32 %v14334_v63, 16  ;;  %v14539_v31 = vld [vmem:[#allocation2 + $0xb8] sm:$0xf] }
 0x14b   : > { %v14436_v13 = vrot.slane %v2809_v48, 4  ;;  %v3584_v48 = vrot.slane %v14447_v12, 5 }
 0x14f   : > { %12211 = vmatmul.mubr.msk.bf16.vlgmr.msra.gmra.mrb[0].mxu0 %vm1391_vm7, %v13259_v15  ;;  %v2767_v15 = vor.u32 %v2766_v32, %v2763_v3  ;;  %v2822_v3 = vshrl.u32 %v14413_v56, 16  ;;  %v2836_v32 = vshll.u32 %v2721_v50, 16 }
 0x150   : > { %12243 = vmatpush3.bf16.msra.mxu0 %v3243_v36  ;;  %12214 = vmatprep.mubr.msk.bf16.mxu0 %vm1391_vm7, %v13260_v24  ;;  %v2777_v24 = vor.u32 %v2776_v53, %v14387_v45  ;;  %v2798_v36 = vshrl.u32 %v14383_v52, 16 }
 0x151   : > { %13235 = vmatprep.subr.msk.bf16.mxu0 %vm1440_vm0, %v14331_v55  ;;  %v14420_v14 = vrot.slane %v2767_v15, 4 }
 0x152   : > { %v14422_v27 = vrot.slane %v2777_v24, 4  ;;  %v14424_v59 = vrot.slane %v2798_v36, 4  ;;  %v2814_v36 = vrot.slane %v2812_v49, 5  ;;  %v14460_v49 = vld [vmem:[#allocation2 + $0x2c] sm:$0x1] }
 0x153   : > { %v2773_v63 = vsel %vm13682_vm9, %v14420_v14, %v14387_v45 }
 0x154   : > { %v2783_v45 = vsel %vm13682_vm9, %v14422_v27, %v14415_v10 }
 0x157   : > { %12215 = vmatmul.mubr.msk.bf16.gmra.mrb[4].mxu0 %vm1391_vm7, %v13261_v4  ;;  %v2787_v4 = vrot.slane %v2785_v37, 4  ;;  %v14442_v37 = vld [vmem:[#allocation2 + $0x8c] sm:$0x1] }
 0x158   : > { %12218 = vmatprep.mubr.msk.bf16.mxu0 %vm1391_vm7, %v13262_v9  ;;  %v2790_v9 = vrot.slane %v2788_v5, 5  ;;  %v14444_v5 = vld [vmem:[#allocation2 + $0x94] sm:$0xf]  ;;  %v3577_v24 = vrot.slane %v14442_v37, 5 }
 0x15a   : > { %v2791_v40 = vor.u32 %v2790_v9, %v2787_v4 }
 0x15f   : > { %12219 = vmatmul.mubr.msk.bf16.gmra.mrb[8].mxu0 %vm1391_vm7, %v13263_v42  ;;  %v2804_v42 = vshll.u32 %v14400_v44, 16 }
 0x160   : > { %12222 = vmatprep.mubr.msk.bf16.mxu0 %vm1391_vm7, %v13264_v39  ;;  %v3569_v39 = vrot.slane %v3567_v19, 4  ;;  %v3449_v19 = vld [vmem:[#allocation2 + $0x90] sm:$0xe] }
 0x161   : > { %v11199_v9 = vrot.slane %v3449_v19, 9  ;;  %v2801_v19 = vor.u32 %v14424_v59, %v14417_v21  ;;  %v14501_v59 = vrot.slane %v2842_v16, 5 }
 0x162   : > { %v14434_v62 = vsel %vm14095_vm15, %v3569_v39, %v3570_v46  ;;  %v3581_v46 = vrot.slane %v14444_v5, 5 }
 0x163   : > { %17480 = vst [vmem:[#allocation14_spill] sm:$0xff] %v14434_v62  ;;  %v14510_v30 = vrot.slane %v2801_v19, 4 }
 0x164   : > { %v3583_v26 = vrot.slane %v3581_v46, 4 }
 0x167   : > { %12223 = vmatmul.mubr.msk.bf16.gmra.mrb[12].mxu0 %vm1391_vm7, %v13265_v58  ;;  %v2833_v58 = vshrl.u32 %v2721_v50, 16  ;;  %v2824_v50 = vrot.slane %v2822_v3, 4  ;;  %v14470_v3 = vsel %vm14095_vm15, %v11199_v9, %v3581_v46  ;;  %v2724_v46 = vld [vmem:[#allocation2 + $0x3c] sm:$0xf] }
 0x168   : > { %12226 = vmatprep.mubr.msk.bf16.mxu0 %vm1391_vm7, %v13266_v51  ;;  %v14440_v51 = vld [vmem:[#allocation2 + $0x88] sm:$0xf]  ;;  %17483 = vst [vmem:[#allocation17_spill] sm:$0xff] %v14470_v3 }
 0x169   : > { %v3574_v15 = vrot.slane %v14440_v51, 5  ;;  %v2835_v39 = vrot.slane %v2833_v58, 4  ;;  %v13270_v58 = vld [vmem:[#allocation2 + $0x9c] sm:$0xff]   ;;  %v2825_v9 = vor.u32 %v2824_v50, %v14454_v0  ;;  %v2860_v50 = vshll.u32 %v2724_v46, 16 }
 0x16b   : > { %v3576_v4 = vrot.slane %v3574_v15, 4  ;;  %v14458_v53 = vsel %vm14095_vm15, %v11198_v29, %v3574_v15  ;;  %v14478_v29 = vsel %vm14095_vm15, %v3583_v26, %v3584_v48  ;;  %v2828_v26 = vshll.u32 %v14460_v49, 16  ;;  %v14494_v15 = vld [vmem:[#allocation2 + $0x40] sm:$0xf] }
 0x16c   : > { %17481 = vst [vmem:[#allocation15_spill] sm:$0xff] %v14458_v53  ;;  %17484 = vst [vmem:[#allocation18_spill] sm:$0xff] %v14478_v29  ;;  %v2852_v48 = vshll.u32 %v14337_v38, 16  ;;  %v2857_v38 = vshrl.u32 %v2724_v46, 16  ;;  %v2866_v10 = vshll.u32 %v14494_v15, 16  ;;  %v2870_v27 = vshrl.u32 %v14494_v15, 16 }
 0x16d   : > { %v14466_v6 = vsel %vm14095_vm15, %v3576_v4, %v3577_v24  ;;  %v14484_v24 = vrot.slane %v2791_v40, 4  ;;  %v2815_v4 = vor.u32 %v2814_v36, %v14436_v13  ;;  %v2848_v40 = vrot.slane %v2846_v47, 4  ;;  %v14503_v13 = vld [vmem:[#allocation2 + $0xac] sm:$0xf]  ;;  %v14505_v36 = vld [vmem:[#allocation2 + $0xb0] sm:$0x1] }
 0x16e   : > { %17482 = vst [vmem:[#allocation16_spill] sm:$0xff] %v14466_v6  ;;  %v3598_v28 = vrot.slane %v14505_v36, 5  ;;  %v2727_v47 = vld [vmem:[#allocation2 + $0x48] sm:$0xf]  ;;  %v14516_v16 = vrot.slane %v2825_v9, 4  ;;  %v14523_v19 = vrot.slane %v2852_v48, 5 }
 0x16f   : > { %12227 = vmatmul.mubr.msk.bf16.gmra.mrb[16].mxu0 %vm1391_vm7, %v13267_v54  ;;  %v2838_v54 = vrot.slane %v2836_v32, 5  ;;  %v14472_v32 = vrot.slane %v2804_v42, 5  ;;  %v3451_v42 = vld [vmem:[#allocation2 + $0xa8] sm:$0xe]  ;;  %v2849_v29 = vor.u32 %v2848_v40, %v14501_v59  ;;  %v13272_v6 = vld [vmem:[#allocation2 + $0xb4] sm:$0xff]   ;;  %v2881_v53 = vshrl.u32 %v2727_v47, 16 }
 0x170   : > { %12230 = vmatprep.mubr.msk.bf16.mxu0 %vm1391_vm7, %v13268_v34  ;;  %v13269_v34 = vld [vmem:[#allocation2 + $0x90] sm:$0xff]   ;;  %v2872_v62 = vrot.slane %v2870_v27, 4  ;;  %v2884_v40 = vshll.u32 %v2727_v47, 16  ;;  %v3602_v47 = vrot.slane %v14539_v31, 5 }
 0x171   : > { %v2839_v14 = vor.u32 %v2838_v54, %v2835_v39  ;;  %v11201_v39 = vrot.slane %v3451_v42, 9  ;;  %v14514_v54 = vrot.slane %v2815_v4, 4  ;;  %v2859_v42 = vrot.slane %v2857_v38, 4  ;;  %v14543_v38 = vld [vmem:[#allocation2 + $0xc4] sm:$0xf] }
 0x172   : > { %v2862_v4 = vrot.slane %v2860_v50, 5  ;;  %v11156_v50 = vcombine.low %v2773_v63, %v2783_v45  ;;  %v3452_v27 = vld [vmem:[#allocation2 + $0xb4] sm:$0xe]  ;;  %v2883_v61 = vrot.slane %v2881_v53, 4  ;;  %v2886_v35 = vrot.slane %v2884_v40, 5 }
 0x173   : > { %v14520_v41 = vrot.slane %v2839_v14, 4  ;;  %v14535_v14 = vrot.slane %v2866_v10, 5  ;;  %v14550_v10 = vld [vmem:[#allocation2 + $0xc8] sm:$0x1]  ;;  %v11202_v48 = vrot.slane %v3452_v27, 9  ;;  %v13273_v27 = vld [vmem:[#allocation2 + $0xc0] sm:$0xff]  }
 0x174   : > { %v3612_v63 = vrot.slane %v14550_v10, 5  ;;  %v2863_v45 = vor.u32 %v2862_v4, %v2859_v42  ;;  %v2894_v4 = vshrl.u32 %v14354_v60, 16  ;;  %v2807_v60 = vsel %vm13682_vm9, %v14510_v30, %v14472_v32 }
 0x175   : > { %v2873_v23 = vor.u32 %v2872_v62, %v14535_v14 }
 0x176   : > { %v2864_v32 = vrot.slane %v2863_v45, 4 }
 0x177   : > { %12231 = vmatmul.mubr.msk.bf16.gmra.mrb[20].mxu0 %vm1391_vm7, %v13269_v34  ;;  %v3595_v34 = vrot.slane %v14503_v13, 5 }
 0x178   : > { %12234 = vmatprep.mubr.msk.bf16.mxu0 %vm1391_vm7, %v13270_v58  ;;  %v14518_v58 = vrot.slane %v2828_v26, 5  ;;  %v14533_v26 = vld [vmem:[#allocation2 + $0x44] sm:$0x1] }
 0x179   : > { %v3597_v46 = vrot.slane %v3595_v34, 4  ;;  %v14527_v3 = vsel %vm14095_vm15, %v11201_v39, %v3595_v34  ;;  %v14541_v34 = vld [vmem:[#allocation2 + $0xbc] sm:$0x1] }
 0x17a   : > { %17485 = vst [vmem:[#allocation19_spill] sm:$0xff] %v14527_v3  ;;  %v3605_v39 = vrot.slane %v14541_v34, 5  ;;  %v2876_v3 = vshll.u32 %v14533_v26, 16 }
 0x17b   : > { %v14531_v9 = vsel %vm14095_vm15, %v3597_v46, %v3598_v28  ;;  %v2797_v28 = vsel %vm13682_vm9, %v14484_v24, %v14417_v21  ;;  %v2850_v46 = vrot.slane %v2849_v29, 4  ;;  %v2730_v21 = vld [vmem:[#allocation2 + $0x54] sm:$0xf]  ;;  %v3604_v24 = vrot.slane %v3602_v47, 4 }
 0x17c   : > { %17486 = vst [vmem:[#allocation20_spill] sm:$0xff] %v14531_v9  ;;  %v3453_v9 = vld [vmem:[#allocation2 + $0xc0] sm:$0xe]  ;;  %v2908_v62 = vshll.u32 %v2730_v21, 16 }
 0x17d   : > { %v11203_v7 = vrot.slane %v3453_v9, 9  ;;  %v14568_v42 = vsel %vm14095_vm15, %v3604_v24, %v3605_v39  ;;  %v2905_v9 = vshrl.u32 %v2730_v21, 16  ;;  %v2918_v39 = vshrl.u32 %v14558_v20, 16 }
 0x17e   : > { %v2855_v30 = vsel %vm13682_vm9, %v2850_v46, %v14523_v19  ;;  %v2878_v21 = vrot.slane %v2876_v3, 5  ;;  %v14606_v24 = vrot.slane %v2890_v2, 5  ;;  %v11157_v3 = vcombine.low %v2797_v28, %v2807_v60  ;;  %v2739_v60 = vld [vmem:[#allocation2 + $0x78] sm:$0xf] }
 0x17f   : > { %12235 = vmatmul.mubr.msk.bf16.gmra.mrb[24].mxu0 %vm1391_vm7, %v13271_v33  ;;  %v3609_v33 = vrot.slane %v14543_v38, 5  ;;  %v2907_v40 = vrot.slane %v2905_v9, 4  ;;  %v3713_v2 = vsel %vm1440_vm0, %v14331_v55, 0 }
 0x180   : > { %12238 = vmatprep.mubr.msk.bf16.mxu0 %vm1391_vm7, %v13272_v6  ;;  %v14562_v6 = vsel %vm14095_vm15, %v11202_v48, %v3602_v47  ;;  %v2914_v47 = vshll.u32 %v14558_v20, 16 }
 0x181   : > { %v3611_v29 = vrot.slane %v3609_v33, 4  ;;  %v14572_v53 = vsel %vm14095_vm15, %v11203_v7, %v3609_v33  ;;  %v2821_v7 = vsel %vm13682_vm9, %v14514_v54, %v14454_v0  ;;  %v2831_v33 = vsel %vm13682_vm9, %v14516_v16, %v14518_v58  ;;  %v2733_v0 = vld [vmem:[#allocation2 + $0x60] sm:$0xf] }
 0x182   : > { %v2874_v54 = vrot.slane %v2873_v23, 4  ;;  %v2896_v16 = vrot.slane %v2894_v4, 4  ;;  %v2900_v58 = vshll.u32 %v14356_v43, 16  ;;  %v2929_v19 = vshrl.u32 %v2733_v0, 16 }
 0x183   : > { %v14579_v48 = vsel %vm14095_vm15, %v3611_v29, %v3612_v63  ;;  %v2845_v63 = vsel %vm13682_vm9, %v14520_v41, %v14501_v59  ;;  %v2887_v29 = vor.u32 %v2886_v35, %v2883_v61  ;;  %v2910_v41 = vrot.slane %v2908_v62, 5  ;;  %v2736_v62 = vld [vmem:[#allocation2 + $0x6c] sm:$0xf] }
 0x184   : > { %17487 = vst [vmem:[#allocation21_spill] sm:$0xff] %v14579_v48  ;;  %v14609_v59 = vrot.slane %v2914_v47, 5  ;;  %v14611_v48 = vld [vmem:[#allocation2 + $0x5c] sm:$0x1]  ;;  %v2932_v46 = vshll.u32 %v2733_v0, 16  ;;  %v2938_v35 = vshll.u32 %v14376_v18, 16  ;;  %v11158_v23 = vcombine.low %v2821_v7, %v2831_v33 }
 0x185   : > { %v2942_v61 = vshrl.u32 %v14376_v18, 16  ;;  %v2869_v43 = vsel %vm13682_vm9, %v2864_v32, %v14535_v14  ;;  %v14620_v45 = vrot.slane %v2887_v29, 4  ;;  %v2897_v4 = vor.u32 %v2896_v16, %v14606_v24  ;;  %v14625_v47 = vld [vmem:[#allocation2 + $0x70] sm:$0xf] }
 0x186   : > { %v14623_v9 = vrot.slane %v2900_v58, 5  ;;  %v2879_v18 = vsel %vm13682_vm9, %v2874_v54, %v2878_v21  ;;  %v2911_v28 = vor.u32 %v2910_v41, %v2907_v40  ;;  %v2931_v7 = vrot.slane %v2929_v19, 4 }
 0x187   : > { %12239 = vmatmul.mubr.msk.bf16.gmra.mrb[28].mxu0 %vm1391_vm7, %v13273_v27  ;;  %v2920_v27 = vrot.slane %v2918_v39, 4  ;;  %v2924_v39 = vshll.u32 %v14611_v48, 16  ;;  %v2934_v14 = vrot.slane %v2932_v46, 5  ;;  %v14631_v33 = vrot.slane %v2938_v35, 5 }
 0x188   : > { %12244 = vmatprep.mubr.msk.bf16.mxu0 %vm1391_vm7, %v11156_v50  ;;  %v11159_v50 = vcombine.low %v2845_v63, %v2855_v30  ;;  %v2944_v63 = vrot.slane %v2942_v61, 4  ;;  %v14636_v30 = vld [vmem:[%s17338_s1 + $0xc] sm:$0x3]  ;;  %v2953_v32 = vshrl.u32 %v2736_v62, 16  ;;  %v2956_v21 = vshll.u32 %v2736_v62, 16 }
 0x189   : > { %v2921_v55 = vor.u32 %v2920_v27, %v14609_v59  ;;  %v2962_v40 = vshll.u32 %v14625_v47, 16  ;;  %v2966_v29 = vshrl.u32 %v14625_v47, 16  ;;  %v11160_v0 = vcombine.low %v2869_v43, %v2879_v18 }
 0x18a   : > { %v2898_v54 = vrot.slane %v2897_v4, 4  ;;  %v2977_v16 = vshrl.u32 %v2739_v60, 16  ;;  %v2980_v58 = vshll.u32 %v2739_v60, 16  ;;  %v2912_v41 = vrot.slane %v2911_v28, 4 }
 0x18b   : > { %v2926_v27 = vrot.slane %v2924_v39, 5  ;;  %v2986_v19 = vshll.u32 %v14406_v1, 16  ;;  %v2990_v46 = vshrl.u32 %v14406_v1, 16  ;;  %v2922_v35 = vrot.slane %v2921_v55, 4  ;;  %v14657_v55 = vld [vmem:[#allocation2 + $0x74] sm:$0x1] }
 0x18c   : > { %v2935_v61 = vor.u32 %v2934_v14, %v2931_v7  ;;  %v2955_v43 = vrot.slane %v2953_v32, 4  ;;  %v2958_v4 = vrot.slane %v2956_v21, 5  ;;  %v14648_v62 = vrot.slane %v2962_v40, 5 }
 0x18d   : > { %v2968_v18 = vrot.slane %v2966_v29, 4  ;;  %v2893_v1 = vsel %vm13682_vm9, %v14620_v45, %v14606_v24  ;;  %v2903_v28 = vsel %vm13682_vm9, %v2898_v54, %v14623_v9  ;;  %v2979_v39 = vrot.slane %v2977_v16, 4 }
 0x18e   : > { %v2982_v60 = vrot.slane %v2980_v58, 5  ;;  %v2992_v7 = vrot.slane %v2990_v46, 4  ;;  %v2917_v32 = vsel %vm13682_vm9, %v2912_v41, %v14609_v59  ;;  %v2927_v24 = vsel %vm13682_vm9, %v2922_v35, %v2926_v27 }
 0x18f   : > { %12245 = vmatmul.mubr.msk.bf16.vlgmr.msra.gmra.mrb[0].mxu0 %vm1391_vm7, %v11157_v3  ;;  %v2945_v3 = vor.u32 %v2944_v63, %v14631_v33  ;;  %v2936_v45 = vrot.slane %v2935_v61, 4  ;;  %v2959_v40 = vor.u32 %v2958_v4, %v2955_v43  ;;  %v2969_v29 = vor.u32 %v2968_v18, %v14648_v62  ;;  %v2748_v43 = vld [vmem:[#allocation2 + $0x9c] sm:$0xf] }
 0x190   : > { %12277 = vmatpush3.bf16.msra.mxu0 %v3713_v2  ;;  %12248 = vmatprep.mubr.msk.bf16.mxu0 %vm1391_vm7, %v11158_v23  ;;  %v2948_v2 = vshll.u32 %v14378_v57, 16  ;;  %v2742_v23 = vld [vmem:[#allocation2 + $0x84] sm:$0xf]  ;;  %v14659_v57 = vrot.slane %v2986_v19, 5  ;;  %v2972_v54 = vshll.u32 %v14657_v55, 16  ;;  %v2996_v16 = vshll.u32 %v14408_v17, 16 }
 0x191   : > { %13236 = vmatprep.subr.msk.bf16.mxu0 %vm1440_vm0, %v14636_v30  ;;  %v3001_v14 = vshrl.u32 %v2742_v23, 16  ;;  %v3004_v63 = vshll.u32 %v2742_v23, 16  ;;  %v2946_v9 = vrot.slane %v2945_v3, 4  ;;  %v3010_v58 = vshll.u32 %v14440_v51, 16 }
 0x192   : > { %v2950_v21 = vrot.slane %v2948_v2, 5  ;;  %v3014_v59 = vshrl.u32 %v14440_v51, 16  ;;  %v2983_v41 = vor.u32 %v2982_v60, %v2979_v39  ;;  %v2993_v27 = vor.u32 %v2992_v7, %v14659_v57  ;;  %v14681_v60 = vld [vmem:[#allocation2 + $0xa0] sm:$0xf] }
 0x193   : > { %v3003_v19 = vrot.slane %v3001_v14, 4  ;;  %v3006_v46 = vrot.slane %v3004_v63, 5  ;;  %v11161_v35 = vcombine.low %v2893_v1, %v2903_v28  ;;  %v11162_v61 = vcombine.low %v2917_v32, %v2927_v24 }
 0x194   : > { %v2941_v3 = vsel %vm13682_vm9, %v2936_v45, %v14631_v33  ;;  %v2960_v17 = vrot.slane %v2959_v40, 4  ;;  %v2970_v2 = vrot.slane %v2969_v29, 4  ;;  %v2974_v23 = vrot.slane %v2972_v54, 5 }
 0x195   : > { %v14679_v51 = vrot.slane %v3010_v58, 5  ;;  %v3016_v4 = vrot.slane %v3014_v59, 4  ;;  %v2984_v1 = vrot.slane %v2983_v41, 4  ;;  %v2994_v28 = vrot.slane %v2993_v27, 4 }
 0x196   : > { %v2998_v7 = vrot.slane %v2996_v16, 5  ;;  %v3007_v14 = vor.u32 %v3006_v46, %v3003_v19  ;;  %v3034_v33 = vshll.u32 %v14444_v5, 16  ;;  %v3038_v63 = vshrl.u32 %v14444_v5, 16 }
 0x197   : > { %12249 = vmatmul.mubr.msk.bf16.gmra.mrb[4].mxu0 %vm1391_vm7, %v11159_v50  ;;  %v2745_v50 = vld [vmem:[#allocation2 + $0x90] sm:$0xf]  ;;  %v3049_v32 = vshrl.u32 %v2748_v43, 16  ;;  %v3052_v24 = vshll.u32 %v2748_v43, 16  ;;  %v2965_v45 = vsel %vm13682_vm9, %v2960_v17, %v14648_v62  ;;  %v3062_v40 = vshrl.u32 %v14681_v60, 16 }
 0x198   : > { %12252 = vmatprep.mubr.msk.bf16.mxu0 %vm1391_vm7, %v11160_v0  ;;  %v2951_v0 = vsel %vm13682_vm9, %v2946_v9, %v2950_v21  ;;  %v3025_v18 = vshrl.u32 %v2745_v50, 16  ;;  %v3028_v39 = vshll.u32 %v2745_v50, 16  ;;  %v2975_v21 = vsel %vm13682_vm9, %v2970_v2, %v2974_v23  ;;  %v2751_v2 = vld [vmem:[#allocation2 + $0xa8] sm:$0xf] }
 0x199   : > { %v3058_v9 = vshll.u32 %v14681_v60, 16  ;;  %v3017_v29 = vor.u32 %v3016_v4, %v14679_v51  ;;  %v3020_v5 = vshll.u32 %v14442_v37, 16  ;;  %v2989_v58 = vsel %vm13682_vm9, %v2984_v1, %v14659_v57 }
 0x19a   : > { %v3027_v54 = vrot.slane %v3025_v18, 4  ;;  %v3030_v16 = vrot.slane %v3028_v39, 5  ;;  %v2999_v62 = vsel %vm13682_vm9, %v2994_v28, %v2998_v7  ;;  %v3008_v59 = vrot.slane %v3007_v14, 4  ;;  %v2754_v14 = vld [vmem:[#allocation2 + $0xb4] sm:$0xf] }
 0x19b   : > { %v14701_v41 = vrot.slane %v3034_v33, 5  ;;  %v3040_v27 = vrot.slane %v3038_v63, 4  ;;  %v3051_v19 = vrot.slane %v3049_v32, 4  ;;  %v3054_v46 = vrot.slane %v3052_v24, 5 }
 0x19c   : > { %v11163_v50 = vcombine.low %v2941_v3, %v2951_v0  ;;  %v3060_v37 = vrot.slane %v3058_v9, 5  ;;  %v3064_v17 = vrot.slane %v3062_v40, 4  ;;  %v3018_v23 = vrot.slane %v3017_v29, 4 }
 0x19d   : > { %v3022_v43 = vrot.slane %v3020_v5, 5  ;;  %v3031_v4 = vor.u32 %v3030_v16, %v3027_v54  ;;  %v3044_v57 = vshll.u32 %v14447_v12, 16  ;;  %v11165_v18 = vcombine.low %v2989_v58, %v2999_v62 }
 0x19e   : > { %v3041_v39 = vor.u32 %v3040_v27, %v14701_v41  ;;  %v3055_v1 = vor.u32 %v3054_v46, %v3051_v19  ;;  %v3073_v7 = vshrl.u32 %v2751_v2, 16  ;;  %v3065_v3 = vor.u32 %v3064_v17, %v3060_v37  ;;  %v2757_v17 = vld [vmem:[#allocation2 + $0xc0] sm:$0xf] }
 0x19f   : > { %12253 = vmatmul.mubr.msk.bf16.gmra.mrb[8].mxu0 %vm1391_vm7, %v11161_v35  ;;  %v11164_v35 = vcombine.low %v2965_v45, %v2975_v21  ;;  %v3076_v0 = vshll.u32 %v2751_v2, 16  ;;  %v3082_v33 = vshll.u32 %v14503_v13, 16  ;;  %v3086_v63 = vshrl.u32 %v14503_v13, 16 }
 0x1a0   : > { %12256 = vmatprep.mubr.msk.bf16.mxu0 %vm1391_vm7, %v11162_v61  ;;  %v14703_v61 = vld [vmem:[#allocation2 + $0xa4] sm:$0x1]  ;;  %v3013_v12 = vsel %vm13682_vm9, %v3008_v59, %v14679_v51  ;;  %v3023_v32 = vsel %vm13682_vm9, %v3018_v23, %v3022_v43  ;;  %v3032_v24 = vrot.slane %v3031_v4, 4  ;;  %v3046_v45 = vrot.slane %v3044_v57, 5 }
 0x1a1   : > { %v3068_v28 = vshll.u32 %v14703_v61, 16  ;;  %v3097_v21 = vshrl.u32 %v2754_v14, 16  ;;  %v3100_v9 = vshll.u32 %v2754_v14, 16  ;;  %v3106_v40 = vshll.u32 %v14539_v31, 16 }
 0x1a2   : > { %v3110_v29 = vshrl.u32 %v14539_v31, 16  ;;  %v3042_v5 = vrot.slane %v3041_v39, 4  ;;  %v3056_v54 = vrot.slane %v3055_v1, 4  ;;  %v3075_v16 = vrot.slane %v3073_v7, 4 }
 0x1a3   : > { %v3070_v13 = vrot.slane %v3068_v28, 5  ;;  %v3066_v58 = vrot.slane %v3065_v3, 4  ;;  %v3078_v62 = vrot.slane %v3076_v0, 5  ;;  %v3084_v27 = vrot.slane %v3082_v33, 5 }
 0x1a4   : > { %v3088_v19 = vrot.slane %v3086_v63, 4  ;;  %v11166_v51 = vcombine.low %v3013_v12, %v3023_v32  ;;  %v3099_v59 = vrot.slane %v3097_v21, 4  ;;  %v3102_v46 = vrot.slane %v3100_v9, 5 }
 0x1a5   : > { %v3037_v2 = vsel %vm13682_vm9, %v3032_v24, %v14701_v41  ;;  %v3047_v31 = vsel %vm13682_vm9, %v3042_v5, %v3046_v45  ;;  %v3092_v23 = vshll.u32 %v14505_v36, 16  ;;  %v3061_v43 = vsel %vm13682_vm9, %v3056_v54, %v3060_v37 }
 0x1a6   : > { %v3071_v4 = vsel %vm13682_vm9, %v3066_v58, %v3070_v13  ;;  %v3079_v57 = vor.u32 %v3078_v62, %v3075_v16  ;;  %v3089_v39 = vor.u32 %v3088_v19, %v3084_v27  ;;  %v3121_v1 = vshrl.u32 %v2757_v17, 16  ;;  %v3438_v62 = vld [vmem:[#allocation2 + $0xc] sm:$0xe] }
 0x1a7   : > { %12257 = vmatmul.mubr.msk.bf16.gmra.mrb[12].mxu0 %vm1391_vm7, %v11163_v50  ;;  %v3108_v50 = vrot.slane %v3106_v40, 5  ;;  %v3124_v28 = vshll.u32 %v2757_v17, 16  ;;  %v3130_v41 = vshll.u32 %v14543_v38, 16  ;;  %v3134_v7 = vshrl.u32 %v14543_v38, 16 }
 0x1a8   : > { %12260 = vmatprep.mubr.msk.bf16.mxu0 %vm1391_vm7, %v11164_v35  ;;  %v3112_v35 = vrot.slane %v3110_v29, 4  ;;  %v3103_v14 = vor.u32 %v3102_v46, %v3099_v59  ;;  %v11167_v3 = vcombine.low %v3037_v2, %v3047_v31  ;;  %v11168_v0 = vcombine.low %v3061_v43, %v3071_v4  ;;  %v3439_v43 = vld [vmem:[#allocation2 + $0x18] sm:$0xe]  ;;  %v3440_v4 = vld [vmem:[#allocation2 + $0x24] sm:$0xe] }
 0x1a9   : > { %v3080_v37 = vrot.slane %v3079_v57, 4  ;;  %v3090_v33 = vrot.slane %v3089_v39, 4  ;;  %v3094_v63 = vrot.slane %v3092_v23, 5  ;;  %v3123_v12 = vrot.slane %v3121_v1, 4 }
 0x1aa   : > { %v3113_v36 = vor.u32 %v3112_v35, %v3108_v50  ;;  %v3126_v32 = vrot.slane %v3124_v28, 5  ;;  %v3132_v24 = vrot.slane %v3130_v41, 5  ;;  %v3136_v45 = vrot.slane %v3134_v7, 4 }
 0x1ab   : > { %v3104_v21 = vrot.slane %v3103_v14, 4  ;;  %v3085_v38 = vsel %vm13682_vm9, %v3080_v37, %v3084_v27  ;;  %v3140_v54 = vshll.u32 %v14550_v10, 16  ;;  %v3504_v58 = vrot.slane %v14365_v11, 5 }
 0x1ac   : > { %v3114_v9 = vrot.slane %v3113_v36, 4  ;;  %v3127_v29 = vor.u32 %v3126_v32, %v3123_v12  ;;  %v3137_v5 = vor.u32 %v3136_v45, %v3132_v24  ;;  %v11188_v35 = vrot.slane %v3438_v62, 9 }
 0x1ad   : > { %v3109_v13 = vsel %vm13682_vm9, %v3104_v21, %v3108_v50  ;;  %v3142_v46 = vrot.slane %v3140_v54, 5  ;;  %v3506_v17 = vrot.slane %v3504_v58, 4  ;;  %v3507_v2 = vrot.slane %v14385_v8, 5 }
 0x1ae   : > { %v3138_v59 = vrot.slane %v3137_v5, 4  ;;  %v3511_v50 = vrot.slane %v14383_v52, 5  ;;  %v3505_v31 = vsel %vm14095_vm15, %v11188_v35, %v3504_v58  ;;  %v3518_v8 = vrot.slane %v14413_v56, 5 }
 0x1af   : > { %12261 = vmatmul.mubr.msk.bf16.gmra.mrb[16].mxu0 %vm1391_vm7, %v11165_v18  ;;  %v3116_v18 = vshll.u32 %v14541_v34, 16  ;;  %v3095_v34 = vsel %vm13682_vm9, %v3090_v33, %v3094_v63  ;;  %v3508_v23 = vsel %vm14095_vm15, %v3506_v17, %v3507_v2  ;;  %v11189_v1 = vrot.slane %v3439_v43, 9  ;;  %v17494_v17 = vld [vmem:[#allocation11_spill] sm:$0xff]  ;;  %v17495_v2 = vld [vmem:[#allocation12_spill] sm:$0xff]  ;;  %v17497_v43 = vld [vmem:[#allocation13_spill] sm:$0xff] }
 0x1b0   : > { %12264 = vmatprep.mubr.msk.bf16.mxu0 %vm1391_vm7, %v11166_v51  ;;  %v11169_v19 = vcombine.low %v3085_v38, %v3095_v34  ;;  %v3128_v51 = vrot.slane %v3127_v29, 4  ;;  %v3143_v11 = vsel %vm13682_vm9, %v3138_v59, %v3142_v46  ;;  %v11205_v39 = vcombine.low %v3505_v31, %v3508_v23  ;;  %v17488_v34 = vld [vmem:[#allocation7_spill] sm:$0xff]  ;;  %v17489_v29 = vld [vmem:[#allocation8_spill] sm:$0xff] }
 0x1b1   : > { %v3118_v40 = vrot.slane %v3116_v18, 5  ;;  %v3513_v28 = vrot.slane %v3511_v50, 4  ;;  %v3514_v41 = vrot.slane %v14400_v44, 5  ;;  %v11190_v7 = vrot.slane %v3440_v4, 9 }
 0x1b2   : > { %v3133_v10 = vsel %vm13682_vm9, %v3128_v51, %v3132_v24  ;;  %v3520_v14 = vrot.slane %v3518_v8, 4  ;;  %v3521_v52 = vrot.slane %v14460_v49, 5  ;;  %v3512_v36 = vsel %vm14095_vm15, %v11189_v1, %v3511_v50  ;;  %v11270_v24 = vld [vmem:[%s17338_s1 + $0xe] sm:$0x3]  ;;  %v17492_v51 = vld [vmem:[#allocation10_spill] sm:$0xff] }
 0x1b3   : > { %v3119_v16 = vsel %vm13682_vm9, %v3114_v9, %v3118_v40  ;;  %v11171_v57 = vcombine.low %v3133_v10, %v3143_v11  ;;  %v3515_v56 = vsel %vm14095_vm15, %v3513_v28, %v3514_v41  ;;  %v3519_v18 = vsel %vm14095_vm15, %v11190_v7, %v3518_v8  ;;  %v3450_v11 = vld [vmem:[#allocation2 + $0x9c] sm:$0xe]  ;;  %v17498_v8 = vld [vmem:[#allocation14_spill] sm:$0xff] }
 0x1b4   : > { %v11170_v27 = vcombine.low %v3109_v13, %v3119_v16  ;;  %v3522_v44 = vsel %vm14095_vm15, %v3520_v14, %v3521_v52  ;;  %v11206_v49 = vcombine.low %v3512_v36, %v3515_v56  ;;  %v4072_v33 = vsel %vm1440_vm0, %v14636_v30, 0  ;;  %v3446_v16 = vld [vmem:[#allocation2 + $0x6c] sm:$0xe]  ;;  %v17503_v7 = vld [vmem:[#allocation17_spill] sm:$0xff]  ;;  %v17504_v14 = vld [vmem:[#allocation18_spill] sm:$0xff] }
 0x1b5   : > { %v11207_v37 = vcombine.low %v3519_v18, %v3522_v44  ;;  %v3535_v32 = vrot.slane %v14533_v26, 5  ;;  %v3546_v30 = vrot.slane %v14558_v20, 5  ;;  %v3444_v26 = vld [vmem:[#allocation2 + $0x54] sm:$0xe]  ;;  %v3549_v38 = vrot.slane %v14611_v48, 5  ;;  %v17506_v52 = vld [vmem:[#allocation19_spill] sm:$0xff] }
 0x1b6   : > { %v11194_v9 = vrot.slane %v3444_v26, 9  ;;  %v17490_v5 = vcombine.low %v17488_v34, %v17489_v29  ;;  %v3560_v13 = vrot.slane %v14625_v47, 5  ;;  %v11196_v62 = vrot.slane %v3446_v16, 9  ;;  %v17507_v36 = vld [vmem:[#allocation20_spill] sm:$0xff]  ;;  %v13274_v44 = vld [vmem:[#allocation2 + $0x18] sm:$0xff]  }
 0x1b7   : > { %12265 = vmatmul.mubr.msk.bf16.gmra.mrb[20].mxu0 %vm1391_vm7, %v11167_v3  ;;  %v3532_v3 = vrot.slane %v14494_v15, 5  ;;  %v3548_v40 = vrot.slane %v3546_v30, 4  ;;  %v3563_v48 = vrot.slane %v14657_v55, 5  ;;  %v17496_v10 = vcombine.low %v17494_v17, %v17495_v2  ;;  %v13279_v26 = vld [vmem:[#allocation2 + $0x54] sm:$0xff]   ;;  %v14873_v34 = vld [vmem:[#allocation2 + $0x70] sm:$0xf] }
 0x1b8   : > { %12268 = vmatprep.mubr.msk.bf16.mxu0 %vm1391_vm7, %v11168_v0  ;;  %v3442_v0 = vld [vmem:[#allocation2 + $0x3c] sm:$0xe]  ;;  %v3547_v54 = vsel %vm14095_vm15, %v11194_v9, %v3546_v30  ;;  %v3561_v46 = vsel %vm14095_vm15, %v11196_v62, %v3560_v13  ;;  %v3588_v55 = vrot.slane %v14681_v60, 5  ;;  %v11200_v50 = vrot.slane %v3450_v11, 9  ;;  %v13280_v9 = vld [vmem:[#allocation2 + $0x60] sm:$0xff]  }
 0x1b9   : > { %v11192_v63 = vrot.slane %v3442_v0, 9  ;;  %v3534_v12 = vrot.slane %v3532_v3, 4  ;;  %v3550_v20 = vsel %vm14095_vm15, %v3548_v40, %v3549_v38  ;;  %v3591_v23 = vrot.slane %v14703_v61, 5  ;;  %v14875_v29 = vld [vmem:[#allocation2 + $0x74] sm:$0x1] }
 0x1ba   : > { %v11211_v58 = vcombine.low %v3547_v54, %v3550_v20  ;;  %v3590_v31 = vrot.slane %v3588_v55, 4  ;;  %v17499_v4 = vcombine.low %v17497_v43, %v17498_v8  ;;  %v3589_v28 = vsel %vm14095_vm15, %v11200_v50, %v3588_v55  ;;  %v4267_v62 = vld [vmem:[#allocation2 + $0x18] sm:$0xf]  ;;  %v14897_v55 = vld [vmem:[#allocation2 + $0x8c] sm:$0x1] }
 0x1bb   : > { %v3533_v15 = vsel %vm14095_vm15, %v11192_v63, %v3532_v3  ;;  %v3536_v45 = vsel %vm14095_vm15, %v3534_v12, %v3535_v32  ;;  %v17505_v61 = vcombine.low %v17503_v7, %v17504_v14  ;;  %v17508_v56 = vcombine.low %v17506_v52, %v17507_v36  ;;  %v17510_v3 = vld [vmem:[#allocation21_spill] sm:$0xff]  ;;  %v14848_v63 = vld [vmem:[%s17338_s1 + $0x10] sm:$0x3]  ;;  %v4998_v32 = vld [vmem:[#allocation2 + $0x54] sm:$0xe] }
 0x1bc   : > { %v11209_v21 = vcombine.low %v3533_v15, %v3536_v45  ;;  %v3592_v60 = vsel %vm14095_vm15, %v3590_v31, %v3591_v23  ;;  %v17509_v18 = vcombine.low %v14562_v6, %v14568_v42  ;;  %v17511_v0 = vcombine.low %v14572_v53, %v17510_v3  ;;  %v13277_v6 = vld [vmem:[#allocation2 + $0x3c] sm:$0xff]   ;;  %v13278_v42 = vld [vmem:[#allocation2 + $0x48] sm:$0xff]   ;;  %v14855_v53 = vld [vmem:[#allocation2 + $0x58] sm:$0xf] }
 0x1bd   : > { %v11217_v41 = vcombine.low %v3589_v28, %v3592_v60  ;;  %v14857_v12 = vld [vmem:[#allocation2 + $0x5c] sm:$0x1]  ;;  %v11308_v45 = vrot.slane %v4998_v32, 9  ;;  %v5108_v54 = vrot.slane %v14873_v34, 5  ;;  %v5111_v20 = vrot.slane %v14875_v29, 5 }
 0x1be   : > { %v5097_v15 = vrot.slane %v14857_v12, 5  ;;  %v5002_v31 = vld [vmem:[#allocation2 + $0x84] sm:$0xe]  ;;  %v5125_v43 = vrot.slane %v14897_v55, 5  ;;  %v14902_v8 = vld [vmem:[#allocation2 + $0x28] sm:$0xf] }
 0x1bf   : > { %12269 = vmatmul.mubr.msk.bf16.gmra.mrb[24].mxu0 %vm1391_vm7, %v11169_v19  ;;  %v3562_v19 = vrot.slane %v3560_v13, 4  ;;  %v5110_v16 = vrot.slane %v5108_v54, 4  ;;  %v14904_v28 = vld [vmem:[#allocation2 + $0x20] sm:$0x1]  ;;  %v15010_v3 = vld [vmem:[#allocation2 + $0xd4] sm:$0x1] }
 0x1c0   : > { %12272 = vmatprep.mubr.msk.bf16.mxu0 %vm1391_vm7, %v11170_v27  ;;  %v17491_v27 = vld [vmem:[#allocation9_spill] sm:$0xff]  ;;  %v14927_v32 = vld [vmem:[#allocation2 + $0xa0] sm:$0xf] }
 0x1c1   : > { %v17493_v59 = vcombine.low %v17491_v27, %v17492_v51  ;;  %v3564_v35 = vsel %vm14095_vm15, %v3562_v19, %v3563_v48  ;;  %v13282_v48 = vld [vmem:[#allocation2 + $0x78] sm:$0xff]   ;;  %v14888_v51 = vsel %vm14095_vm15, %v5110_v16, %v5111_v20 }
 0x1c2   : > { %v11213_v47 = vcombine.low %v3561_v46, %v3564_v35  ;;  %v14884_v27 = vld [vmem:[#allocation2 + $0x1c] sm:$0xf]  ;;  %17512 = vst [vmem:[#allocation7_spill] sm:$0xff] %v14888_v51  ;;  %v4316_v35 = vshrl.u32 %v4267_v62, 16  ;;  %v13289_v46 = vld [vmem:[#allocation2 + $0xcc] sm:$0xff]  }
 0x1c3   : > { %v4325_v17 = vshll.u32 %v14884_v27, 16  ;;  %v4329_v2 = vshrl.u32 %v14884_v27, 16  ;;  %v13285_v16 = vld [vmem:[#allocation2 + $0x9c] sm:$0xff]  }
 0x1c5   : > { %v4331_v7 = vrot.slane %v4329_v2, 4 }
 0x1c7   : > { %12273 = vmatmul.mubr.msk.bf16.gmra.mrb[28].mxu0 %vm1391_vm7, %v11171_v57  ;;  %v17500_v57 = vld [vmem:[#allocation15_spill] sm:$0xff] }
 0x1c8   : > { %12278 = vmatprep.mubr.msk.bf16.mxu0 %vm1391_vm7, %v11205_v39  ;;  %v17501_v39 = vld [vmem:[#allocation16_spill] sm:$0xff] }
 0x1c9   : > { %v17502_v1 = vcombine.low %v17500_v57, %v17501_v39  ;;  %v4318_v57 = vrot.slane %v4316_v35, 4 }
 0x1cf   : > { %12279 = vmatmul.mubr.msk.bf16.vlgmr.msra.gmra.mrb[0].mxu0 %vm1391_vm7, %v11206_v49  ;;  %v13275_v49 = vld [vmem:[#allocation2 + $0x24] sm:$0xff]  }
 0x1d0   : > { %12311 = vmatpush3.bf16.msra.mxu0 %v4072_v33  ;;  %12282 = vmatprep.mubr.msk.bf16.mxu0 %vm1391_vm7, %v11207_v37  ;;  %v13276_v37 = vld [vmem:[#allocation2 + $0x30] sm:$0xff]   ;;  %v4798_v33 = vsel %vm1440_vm0, %v11270_v24, 0 }
 0x1d1   : > { %13237 = vmatprep.subr.msk.bf16.mxu0 %vm1440_vm0, %v11270_v24  ;;  %v5094_v24 = vrot.slane %v14855_v53, 5 }
 0x1d3   : > { %v5096_v30 = vrot.slane %v5094_v24, 4 }
 0x1d5   : > { %v14868_v40 = vsel %vm14095_vm15, %v5096_v30, %v5097_v15  ;;  %v5004_v30 = vld [vmem:[#allocation2 + $0x9c] sm:$0xe] }
 0x1d7   : > { %12283 = vmatmul.mubr.msk.bf16.gmra.mrb[4].mxu0 %vm1391_vm7, %v17490_v5  ;;  %v5000_v5 = vld [vmem:[#allocation2 + $0x6c] sm:$0xe] }
 0x1d8   : > { %12286 = vmatprep.mubr.msk.bf16.mxu0 %vm1391_vm7, %v11209_v21  ;;  %v14864_v21 = vsel %vm14095_vm15, %v11308_v45, %v5094_v24  ;;  %v11310_v13 = vrot.slane %v5000_v5, 9  ;;  %v14929_v24 = vld [vmem:[#allocation2 + $0xa4] sm:$0x1] }
 0x1da   : > { %v14882_v19 = vsel %vm14095_vm15, %v11310_v13, %v5108_v54  ;;  %v11314_v13 = vrot.slane %v5004_v30, 9 }
 0x1df   : > { %12287 = vmatmul.mubr.msk.bf16.gmra.mrb[8].mxu0 %vm1391_vm7, %v17493_v59  ;;  %v4270_v59 = vld [vmem:[#allocation2 + $0x24] sm:$0xf] }
 0x1e0   : > { %12290 = vmatprep.mubr.msk.bf16.mxu0 %vm1391_vm7, %v11211_v58  ;;  %v13281_v58 = vld [vmem:[#allocation2 + $0x6c] sm:$0xff]   ;;  %v4340_v11 = vshrl.u32 %v4270_v59, 16  ;;  %v4343_v50 = vshll.u32 %v4270_v59, 16 }
 0x1e2   : > { %v4342_v52 = vrot.slane %v4340_v11, 4  ;;  %v4345_v36 = vrot.slane %v4343_v50, 5  ;;  %v13286_v11 = vld [vmem:[#allocation2 + $0xa8] sm:$0xff]  }
 0x1e4   : > { %v4346_v15 = vor.u32 %v4345_v36, %v4342_v52 }
 0x1e7   : > { %12291 = vmatmul.mubr.msk.bf16.gmra.mrb[12].mxu0 %vm1391_vm7, %v17496_v10  ;;  %v14895_v10 = vld [vmem:[#allocation2 + $0x88] sm:$0xf] }
 0x1e8   : > { %12294 = vmatprep.mubr.msk.bf16.mxu0 %vm1391_vm7, %v11213_v47  ;;  %v4319_v47 = vshll.u32 %v4267_v62, 16  ;;  %v5122_v23 = vrot.slane %v14895_v10, 5 }
 0x1ea   : > { %v5124_v39 = vrot.slane %v5122_v23, 4  ;;  %v4321_v60 = vrot.slane %v4319_v47, 5  ;;  %v4276_v47 = vld [vmem:[#allocation2 + $0x3c] sm:$0xf] }
 0x1eb   : > { %v4391_v52 = vshll.u32 %v4276_v47, 16 }
 0x1ef   : > { %12295 = vmatmul.mubr.msk.bf16.gmra.mrb[16].mxu0 %vm1391_vm7, %v17499_v4  ;;  %v11312_v4 = vrot.slane %v5002_v31, 9 }
 0x1f0   : > { %12298 = vmatprep.mubr.msk.bf16.mxu0 %vm1391_vm7, %v17502_v1  ;;  %v13283_v1 = vld [vmem:[#allocation2 + $0x84] sm:$0xff]  }
 0x1f1   : > { %v14910_v14 = vsel %vm14095_vm15, %v11312_v4, %v5122_v23  ;;  %v14945_v23 = vrot.slane %v4346_v15, 4  ;;  %v5006_v15 = vld [vmem:[#allocation2 + $0xb4] sm:$0xe] }
 0x1f2   : > { %17513 = vst [vmem:[#allocation8_spill] sm:$0xff] %v14910_v14 }
 0x1f7   : > { %12299 = vmatmul.mubr.msk.bf16.gmra.mrb[20].mxu0 %vm1391_vm7, %v17505_v61  ;;  %v13284_v61 = vld [vmem:[#allocation2 + $0x90] sm:$0xff]  }
 0x1f8   : > { %12302 = vmatprep.mubr.msk.bf16.mxu0 %vm1391_vm7, %v11217_v41  ;;  %v14906_v41 = vrot.slane %v4325_v17, 5  ;;  %v14939_v17 = vld [vmem:[#allocation2 + $0x40] sm:$0xf] }
 0x1f9   : > { %v4397_v36 = vshll.u32 %v14939_v17, 16 }
 0x1ff   : > { %12303 = vmatmul.mubr.msk.bf16.gmra.mrb[24].mxu0 %vm1391_vm7, %v17508_v56  ;;  %v4349_v56 = vshll.u32 %v14902_v8, 16 }
 0x200   : > { %12306 = vmatprep.mubr.msk.bf16.mxu0 %vm1391_vm7, %v17509_v18  ;;  %v14915_v18 = vsel %vm14095_vm15, %v5124_v39, %v5125_v43 }
 0x201   : > { %17514 = vst [vmem:[#allocation9_spill] sm:$0xff] %v14915_v18  ;;  %v14932_v45 = vrot.slane %v4349_v56, 5 }
 0x207   : > { %12307 = vmatmul.mubr.msk.bf16.gmra.mrb[28].mxu0 %vm1391_vm7, %v17511_v0  ;;  %v4335_v0 = vshll.u32 %v14904_v28, 16 }
 0x208   : > { %12312 = vmatprep.mubr.msk.bf16.mxu0 %vm1391_vm7, %v13274_v44  ;;  %v4353_v44 = vshrl.u32 %v14902_v8, 16 }
 0x209   : > { %v4337_v31 = vrot.slane %v4335_v0, 5  ;;  %v14961_v0 = vld [vmem:[#allocation2 + $0xb8] sm:$0xf] }
 0x20a   : > { %v4355_v5 = vrot.slane %v4353_v44, 4  ;;  %v4401_v44 = vshrl.u32 %v14939_v17, 16  ;;  %v5150_v30 = vrot.slane %v14961_v0, 5 }
 0x20c   : > { %v4356_v4 = vor.u32 %v4355_v5, %v14932_v45 }
 0x20e   : > { %v14975_v5 = vrot.slane %v4356_v4, 4  ;;  %v13288_v4 = vld [vmem:[#allocation2 + $0xc0] sm:$0xff]  }
 0x20f   : > { %12313 = vmatmul.mubr.msk.bf16.vlgmr.msra.gmra.mrb[0].mxu0 %vm1391_vm7, %v13275_v49  ;;  %v14921_v49 = vld [vmem:[#allocation2 + $0x2c] sm:$0x1] }
 0x210   : > { %12345 = vmatpush3.bf16.msra.mxu0 %v4798_v33  ;;  %12316 = vmatprep.mubr.msk.bf16.mxu0 %vm1391_vm7, %v13276_v37  ;;  %v4273_v37 = vld [vmem:[#allocation2 + $0x30] sm:$0xf]  ;;  %v4322_v33 = vor.u32 %v4321_v60, %v4318_v57  ;;  %v14954_v60 = vld [vmem:[#allocation2 + $0x38] sm:$0x1] }
 0x211   : > { %13238 = vmatprep.subr.msk.bf16.mxu0 %vm1440_vm0, %v14848_v63  ;;  %v4364_v54 = vshrl.u32 %v4273_v37, 16  ;;  %v4367_v20 = vshll.u32 %v4273_v37, 16  ;;  %v14963_v37 = vld [vmem:[#allocation2 + $0xbc] sm:$0x1] }
 0x212   : > { %v4323_v59 = vrot.slane %v4322_v33, 4 }
 0x213   : > { %v4366_v57 = vrot.slane %v4364_v54, 4  ;;  %v4369_v39 = vrot.slane %v4367_v20, 5  ;;  %v4279_v20 = vld [vmem:[#allocation2 + $0x48] sm:$0xf] }
 0x214   : > { %v4328_v33 = vsel %vm13682_vm9, %v4323_v59, %v14906_v41  ;;  %v13287_v59 = vld [vmem:[#allocation2 + $0xb4] sm:$0xff]  }
 0x215   : > { %v4370_v54 = vor.u32 %v4369_v39, %v4366_v57  ;;  %v4412_v39 = vshrl.u32 %v4279_v20, 16 }
 0x217   : > { %12317 = vmatmul.mubr.msk.bf16.gmra.mrb[4].mxu0 %vm1391_vm7, %v13277_v6  ;;  %v4332_v6 = vor.u32 %v4331_v7, %v14906_v41  ;;  %v14978_v41 = vld [vmem:[#allocation2 + $0x4c] sm:$0xf] }
 0x218   : > { %12320 = vmatprep.mubr.msk.bf16.mxu0 %vm1391_vm7, %v13278_v42  ;;  %v14925_v42 = vld [vmem:[#allocation2 + $0x34] sm:$0xf] }
 0x219   : > { %v4373_v62 = vshll.u32 %v14925_v42, 16  ;;  %v4377_v35 = vshrl.u32 %v14925_v42, 16  ;;  %v4333_v50 = vrot.slane %v4332_v6, 4 }
 0x21b   : > { %v14956_v7 = vrot.slane %v4373_v62, 5  ;;  %v4379_v56 = vrot.slane %v4377_v35, 4 }
 0x21d   : > { %v4380_v35 = vor.u32 %v4379_v56, %v14956_v7  ;;  %v4421_v56 = vshll.u32 %v14978_v41, 16 }
 0x21f   : > { %12321 = vmatmul.mubr.msk.bf16.gmra.mrb[8].mxu0 %vm1391_vm7, %v13279_v26  ;;  %v5136_v26 = vrot.slane %v14927_v32, 5 }
 0x220   : > { %12324 = vmatprep.mubr.msk.bf16.mxu0 %vm1391_vm7, %v13280_v9  ;;  %v5139_v9 = vrot.slane %v14929_v24, 5 }
 0x221   : > { %v14943_v2 = vsel %vm14095_vm15, %v11314_v13, %v5136_v26  ;;  %v11316_v13 = vrot.slane %v5006_v15, 9 }
 0x222   : > { %17515 = vst [vmem:[#allocation10_spill] sm:$0xff] %v14943_v2 }
 0x227   : > { %12325 = vmatmul.mubr.msk.bf16.gmra.mrb[12].mxu0 %vm1391_vm7, %v13281_v58  ;;  %v4359_v58 = vshll.u32 %v14921_v49, 16 }
 0x228   : > { %12328 = vmatprep.mubr.msk.bf16.mxu0 %vm1391_vm7, %v13282_v48  ;;  %v5138_v48 = vrot.slane %v5136_v26, 4  ;;  %v5153_v26 = vrot.slane %v14963_v37, 5 }
 0x229   : > { %v14969_v6 = vrot.slane %v4359_v58, 5  ;;  %v5152_v58 = vrot.slane %v5150_v30, 4 }
 0x22a   : > { %v14949_v43 = vsel %vm14095_vm15, %v5138_v48, %v5139_v9  ;;  %v4338_v9 = vsel %vm13682_vm9, %v4333_v50, %v4337_v31  ;;  %v4393_v48 = vrot.slane %v4391_v52, 5  ;;  %v4403_v50 = vrot.slane %v4401_v44, 4  ;;  %v4282_v52 = vld [vmem:[#allocation2 + $0x54] sm:$0xf] }
 0x22b   : > { %17516 = vst [vmem:[#allocation11_spill] sm:$0xff] %v14949_v43  ;;  %v14987_v31 = vsel %vm14095_vm15, %v11316_v13, %v5150_v30  ;;  %v11271_v57 = vcombine.low %v4328_v33, %v4338_v9  ;;  %v14991_v15 = vsel %vm14095_vm15, %v5152_v58, %v5153_v26  ;;  %v4425_v44 = vshrl.u32 %v14978_v41, 16  ;;  %v15015_v30 = vld [vmem:[#allocation2 + $0x50] sm:$0x1] }
 0x22c   : > { %17517 = vst [vmem:[#allocation12_spill] sm:$0xff] %v14987_v31  ;;  %17518 = vst [vmem:[#allocation13_spill] sm:$0xff] %v14991_v15  ;;  %v4371_v33 = vrot.slane %v4370_v54, 4  ;;  %v4362_v26 = vsel %vm13682_vm9, %v14975_v5, %v14969_v6  ;;  %v4436_v58 = vshrl.u32 %v4282_v52, 16  ;;  %v4414_v54 = vrot.slane %v4412_v39, 4 }
 0x22d   : > { %v15017_v6 = vrot.slane %v4421_v56, 5  ;;  %v4427_v5 = vrot.slane %v4425_v44, 4  ;;  %v4445_v31 = vshll.u32 %v14855_v53, 16  ;;  %v4449_v56 = vshrl.u32 %v14855_v53, 16  ;;  %v4285_v44 = vld [vmem:[#allocation2 + $0x60] sm:$0xf] }
 0x22e   : > { %v4376_v38 = vsel %vm13682_vm9, %v4371_v33, %v14956_v7  ;;  %v4460_v2 = vshrl.u32 %v4285_v44, 16  ;;  %v4463_v18 = vshll.u32 %v4285_v44, 16 }
 0x22f   : > { %12329 = vmatmul.mubr.msk.bf16.gmra.mrb[16].mxu0 %vm1391_vm7, %v13283_v1  ;;  %v15008_v1 = vld [vmem:[#allocation2 + $0xd0] sm:$0xf] }
 0x230   : > { %12332 = vmatprep.mubr.msk.bf16.mxu0 %vm1391_vm7, %v13284_v61  ;;  %v4388_v61 = vshrl.u32 %v4276_v47, 16  ;;  %v14981_v47 = vld [vmem:[#allocation2 + $0x44] sm:$0x1] }
 0x231   : > { %v4407_v13 = vshll.u32 %v14981_v47, 16 }
 0x232   : > { %v4390_v62 = vrot.slane %v4388_v61, 4  ;;  %v4415_v61 = vshll.u32 %v4279_v20, 16 }
 0x233   : > { %v15024_v39 = vrot.slane %v4407_v13, 5 }
 0x234   : > { %v4394_v20 = vor.u32 %v4393_v48, %v4390_v62  ;;  %v5008_v62 = vld [vmem:[#allocation2 + $0xcc] sm:$0xe]  ;;  %v5164_v48 = vrot.slane %v15008_v1, 5 }
 0x237   : > { %12333 = vmatmul.mubr.msk.bf16.gmra.mrb[20].mxu0 %vm1391_vm7, %v13285_v16  ;;  %v4383_v16 = vshll.u32 %v14954_v60, 16 }
 0x238   : > { %12336 = vmatprep.mubr.msk.bf16.mxu0 %vm1391_vm7, %v13286_v11  ;;  %v14983_v11 = vrot.slane %v4397_v36, 5  ;;  %v4352_v36 = vsel %vm13682_vm9, %v14945_v23, %v14932_v45  ;;  %v4381_v45 = vrot.slane %v4380_v35, 4  ;;  %v4439_v35 = vshll.u32 %v4282_v52, 16  ;;  %v15030_v52 = vld [vmem:[#allocation2 + $0x64] sm:$0xf] }
 0x239   : > { %v4385_v9 = vrot.slane %v4383_v16, 5  ;;  %v4417_v16 = vrot.slane %v4415_v61, 5  ;;  %v5166_v61 = vrot.slane %v5164_v48, 4 }
 0x23a   : > { %v4404_v23 = vor.u32 %v4403_v50, %v14983_v11  ;;  %v11318_v50 = vrot.slane %v5008_v62, 9  ;;  %v4441_v53 = vrot.slane %v4439_v35, 5 }
 0x23b   : > { %v4386_v15 = vsel %vm13682_vm9, %v4381_v45, %v4385_v9  ;;  %v4418_v33 = vor.u32 %v4417_v16, %v4414_v54  ;;  %v4428_v9 = vor.u32 %v4427_v5, %v15017_v6  ;;  %v4438_v45 = vrot.slane %v4436_v58, 4 }
 0x23c   : > { %v15034_v62 = vsel %vm14095_vm15, %v11318_v50, %v5164_v48  ;;  %v15036_v7 = vrot.slane %v4404_v23, 4  ;;  %v4469_v48 = vshll.u32 %v15030_v52, 16  ;;  %v4473_v23 = vshrl.u32 %v15030_v52, 16 }
 0x23d   : > { %17519 = vst [vmem:[#allocation14_spill] sm:$0xff] %v15034_v62  ;;  %v11272_v54 = vcombine.low %v4352_v36, %v4362_v26  ;;  %v5268_v16 = vsel %vm1440_vm0, %v14848_v63, 0  ;;  %v4451_v5 = vrot.slane %v4449_v56, 4  ;;  %v11273_v58 = vcombine.low %v4376_v38, %v4386_v15  ;;  %v15062_v26 = vld [vmem:[#allocation2 + $0x68] sm:$0x1] }
 0x23e   : > { %v4288_v63 = vld [vmem:[#allocation2 + $0x6c] sm:$0xf]  ;;  %v4429_v50 = vrot.slane %v4428_v9, 4  ;;  %v4291_v38 = vld [vmem:[#allocation2 + $0x78] sm:$0xf]  ;;  %v4462_v15 = vrot.slane %v4460_v2, 4 }
 0x23f   : > { %12337 = vmatmul.mubr.msk.bf16.gmra.mrb[24].mxu0 %vm1391_vm7, %v13287_v59  ;;  %v5167_v59 = vrot.slane %v15010_v3, 5  ;;  %v4465_v56 = vrot.slane %v4463_v18, 5  ;;  %v15065_v44 = vrot.slane %v4469_v48, 5  ;;  %v4497_v9 = vshrl.u32 %v14873_v34, 16  ;;  %v4294_v62 = vld [vmem:[#allocation2 + $0x84] sm:$0xf] }
 0x240   : > { %12340 = vmatprep.mubr.msk.bf16.mxu0 %vm1391_vm7, %v13288_v4  ;;  %v15022_v4 = vrot.slane %v4394_v20, 4  ;;  %v4431_v20 = vshll.u32 %v15015_v30, 16 }
 0x241   : > { %v15041_v13 = vsel %vm14095_vm15, %v5166_v61, %v5167_v59  ;;  %v15051_v59 = vrot.slane %v4445_v31, 5  ;;  %v4419_v31 = vrot.slane %v4418_v33, 4  ;;  %v4442_v61 = vor.u32 %v4441_v53, %v4438_v45 }
 0x242   : > { %17520 = vst [vmem:[#allocation15_spill] sm:$0xff] %v15041_v13  ;;  %v4400_v35 = vsel %vm13682_vm9, %v15022_v4, %v14983_v11  ;;  %v4433_v36 = vrot.slane %v4431_v20, 5  ;;  %v4475_v11 = vrot.slane %v4473_v23, 4  ;;  %v15067_v4 = vld [vmem:[#allocation2 + $0x7c] sm:$0xf]  ;;  %v4487_v20 = vshll.u32 %v4288_v63, 16 }
 0x243   : > { %v4452_v43 = vor.u32 %v4451_v5, %v15051_v59  ;;  %v4493_v33 = vshll.u32 %v14873_v34, 16  ;;  %v4508_v45 = vshrl.u32 %v4291_v38, 16  ;;  %v4424_v18 = vsel %vm13682_vm9, %v4419_v31, %v15017_v6 }
 0x244   : > { %v4434_v2 = vsel %vm13682_vm9, %v4429_v50, %v4433_v36  ;;  %v4517_v53 = vshll.u32 %v15067_v4, 16  ;;  %v4521_v48 = vshrl.u32 %v15067_v4, 16  ;;  %v4443_v23 = vrot.slane %v4442_v61, 4  ;;  %v15085_v61 = vld [vmem:[#allocation2 + $0x80] sm:$0x1] }
 0x245   : > { %v4476_v13 = vor.u32 %v4475_v11, %v15065_v44  ;;  %v4453_v34 = vrot.slane %v4452_v43, 4  ;;  %v4489_v51 = vrot.slane %v4487_v20, 5  ;;  %v15083_v6 = vrot.slane %v4493_v33, 5 }
 0x246   : > { %v4499_v36 = vrot.slane %v4497_v9, 4  ;;  %v4510_v31 = vrot.slane %v4508_v45, 4  ;;  %v4535_v11 = vshll.u32 %v4294_v62, 16  ;;  %v4448_v20 = vsel %vm13682_vm9, %v4443_v23, %v15051_v59 }
 0x247   : > { %12341 = vmatmul.mubr.msk.bf16.gmra.mrb[28].mxu0 %vm1391_vm7, %v13289_v46  ;;  %v4410_v46 = vsel %vm13682_vm9, %v15036_v7, %v15024_v39  ;;  %v4479_v39 = vshll.u32 %v15062_v26, 16  ;;  %v4484_v7 = vshrl.u32 %v4288_v63, 16  ;;  %v4466_v63 = vor.u32 %v4465_v56, %v4462_v15 }
 0x248   : > { %12346 = vmatprep.mubr.msk.bf16.mxu0 %vm1391_vm7, %v11271_v57  ;;  %v4455_v57 = vshll.u32 %v14857_v12, 16  ;;  %v4511_v12 = vshll.u32 %v4291_v38, 16  ;;  %v4523_v15 = vrot.slane %v4521_v48, 4  ;;  %v4532_v56 = vshrl.u32 %v4294_v62, 16 }
 0x249   : > { %v4481_v38 = vrot.slane %v4479_v39, 5  ;;  %v4486_v14 = vrot.slane %v4484_v7, 4  ;;  %v4477_v43 = vrot.slane %v4476_v13, 4  ;;  %v4541_v39 = vshll.u32 %v14895_v10, 16 }
 0x24a   : > { %v4457_v5 = vrot.slane %v4455_v57, 5  ;;  %v4513_v50 = vrot.slane %v4511_v12, 5  ;;  %v15087_v57 = vrot.slane %v4517_v53, 5  ;;  %v11274_v7 = vcombine.low %v4400_v35, %v4410_v46  ;;  %v4297_v12 = vld [vmem:[#allocation2 + $0x90] sm:$0xf] }
 0x24b   : > { %v4490_v9 = vor.u32 %v4489_v51, %v4486_v14  ;;  %v4500_v45 = vor.u32 %v4499_v36, %v15083_v6  ;;  %v4503_v62 = vshll.u32 %v14875_v29, 16  ;;  %v4527_v13 = vshll.u32 %v15085_v61, 16  ;;  %v15099_v53 = vld [vmem:[#allocation2 + $0x94] sm:$0xf] }
 0x24c   : > { %v4458_v33 = vsel %vm13682_vm9, %v4453_v34, %v4457_v5  ;;  %v4524_v35 = vor.u32 %v4523_v15, %v15087_v57  ;;  %v4534_v46 = vrot.slane %v4532_v56, 4  ;;  %v4482_v51 = vsel %vm13682_vm9, %v4477_v43, %v4481_v38  ;;  %v4300_v56 = vld [vmem:[#allocation2 + $0x9c] sm:$0xf] }
 0x24d   : > { %v15107_v14 = vrot.slane %v4541_v39, 5  ;;  %v4559_v48 = vshll.u32 %v4297_v12, 16  ;;  %v4565_v23 = vshll.u32 %v15099_v53, 16  ;;  %v4569_v5 = vshrl.u32 %v15099_v53, 16  ;;  %v15115_v39 = vld [vmem:[#allocation2 + $0x98] sm:$0x1] }
 0x24e   : > { %v4501_v34 = vrot.slane %v4500_v45, 4  ;;  %v4505_v36 = vrot.slane %v4503_v62, 5  ;;  %v4551_v15 = vshll.u32 %v14897_v55, 16  ;;  %v4580_v55 = vshrl.u32 %v4300_v56, 16 }
 0x24f   : > { %12347 = vmatmul.mubr.msk.bf16.vlgmr.msra.gmra.mrb[0].mxu0 %vm1391_vm7, %v11272_v54  ;;  %v4467_v54 = vrot.slane %v4466_v63, 4  ;;  %v4491_v63 = vrot.slane %v4490_v9, 4  ;;  %v4583_v62 = vshll.u32 %v4300_v56, 16  ;;  %v15146_v56 = vld [vmem:[#allocation2 + $0xb0] sm:$0x1] }
 0x250   : > { %12379 = vmatpush3.bf16.msra.mxu0 %v5268_v16  ;;  %12350 = vmatprep.mubr.msk.bf16.mxu0 %vm1391_vm7, %v11273_v58  ;;  %v4545_v16 = vshrl.u32 %v14895_v10, 16  ;;  %v11275_v58 = vcombine.low %v4424_v18, %v4434_v2  ;;  %v4514_v10 = vor.u32 %v4513_v50, %v4510_v31  ;;  %v4537_v18 = vrot.slane %v4535_v11, 5 }
 0x251   : > { %v4472_v59 = vsel %vm13682_vm9, %v4467_v54, %v15065_v44  ;;  %v4556_v2 = vshrl.u32 %v4297_v12, 16  ;;  %v4529_v44 = vrot.slane %v4527_v13, 5  ;;  %v4525_v50 = vrot.slane %v4524_v35, 4 }
 0x252   : > { %v4547_v29 = vrot.slane %v4545_v16, 4  ;;  %v4515_v31 = vrot.slane %v4514_v10, 4  ;;  %v4538_v38 = vor.u32 %v4537_v18, %v4534_v46  ;;  %v11276_v11 = vcombine.low %v4448_v20, %v4458_v33  ;;  %v4303_v20 = vld [vmem:[#allocation2 + $0xa8] sm:$0xf]  ;;  %v15124_v33 = vld [vmem:[#allocation2 + $0xac] sm:$0xf] }
 0x253   : > { %v11277_v54 = vcombine.low %v4472_v59, %v4482_v51  ;;  %v4558_v16 = vrot.slane %v4556_v2, 4  ;;  %v15117_v12 = vrot.slane %v4565_v23, 5  ;;  %v4496_v9 = vsel %vm13682_vm9, %v4491_v63, %v15083_v6 }
 0x254   : > { %v4548_v43 = vor.u32 %v4547_v29, %v15107_v14  ;;  %v4506_v45 = vsel %vm13682_vm9, %v4501_v34, %v4505_v36  ;;  %v4520_v13 = vsel %vm13682_vm9, %v4515_v31, %v15087_v57  ;;  %v4530_v10 = vsel %vm13682_vm9, %v4525_v50, %v4529_v44 }
 0x255   : > { %v4539_v35 = vrot.slane %v4538_v38, 4  ;;  %v4553_v46 = vrot.slane %v4551_v15, 5  ;;  %v4575_v6 = vshll.u32 %v15115_v39, 16  ;;  %v4589_v59 = vshll.u32 %v14927_v32, 16 }
 0x256   : > { %v4549_v18 = vrot.slane %v4548_v43, 4  ;;  %v4593_v51 = vshrl.u32 %v14927_v32, 16  ;;  %v4604_v29 = vshrl.u32 %v4303_v20, 16  ;;  %v4607_v2 = vshll.u32 %v4303_v20, 16 }
 0x257   : > { %12351 = vmatmul.mubr.msk.bf16.gmra.mrb[4].mxu0 %vm1391_vm7, %v11274_v7  ;;  %v4561_v7 = vrot.slane %v4559_v48, 5  ;;  %v4613_v48 = vshll.u32 %v15124_v33, 16  ;;  %v4617_v57 = vshrl.u32 %v15124_v33, 16  ;;  %v4582_v63 = vrot.slane %v4580_v55, 4 }
 0x258   : > { %12354 = vmatprep.mubr.msk.bf16.mxu0 %vm1391_vm7, %v11275_v58  ;;  %v4571_v58 = vrot.slane %v4569_v5, 4  ;;  %v4585_v34 = vrot.slane %v4583_v62, 5  ;;  %v11278_v36 = vcombine.low %v4496_v9, %v4506_v45  ;;  %v11279_v44 = vcombine.low %v4520_v13, %v4530_v10 }
 0x259   : > { %v4562_v23 = vor.u32 %v4561_v7, %v4558_v16  ;;  %v4544_v32 = vsel %vm13682_vm9, %v4539_v35, %v15107_v14  ;;  %v4554_v31 = vsel %vm13682_vm9, %v4549_v18, %v4553_v46  ;;  %v4577_v50 = vrot.slane %v4575_v6, 5  ;;  %v4306_v7 = vld [vmem:[#allocation2 + $0xb4] sm:$0xf]  ;;  %v4309_v35 = vld [vmem:[#allocation2 + $0xc0] sm:$0xf] }
 0x25a   : > { %v4572_v5 = vor.u32 %v4571_v58, %v15117_v12  ;;  %v15144_v38 = vrot.slane %v4589_v59, 5  ;;  %v4595_v15 = vrot.slane %v4593_v51, 4  ;;  %v4615_v43 = vrot.slane %v4613_v48, 5  ;;  %v15151_v46 = vld [vmem:[#allocation2 + $0xc4] sm:$0xf] }
 0x25b   : > { %v4619_v16 = vrot.slane %v4617_v57, 4  ;;  %v4563_v58 = vrot.slane %v4562_v23, 4  ;;  %v4586_v45 = vor.u32 %v4585_v34, %v4582_v63  ;;  %v4599_v55 = vshll.u32 %v14929_v24, 16 }
 0x25c   : > { %v4573_v9 = vrot.slane %v4572_v5, 4  ;;  %v4623_v14 = vshll.u32 %v15146_v56, 16  ;;  %v11280_v62 = vcombine.low %v4544_v32, %v4554_v31  ;;  %v4596_v20 = vor.u32 %v4595_v15, %v15144_v38 }
 0x25d   : > { %v4628_v13 = vshrl.u32 %v4306_v7, 16  ;;  %v4631_v10 = vshll.u32 %v4306_v7, 16  ;;  %v4620_v6 = vor.u32 %v4619_v16, %v4615_v43  ;;  %v4637_v59 = vshll.u32 %v14961_v0, 16 }
 0x25e   : > { %v4641_v51 = vshrl.u32 %v14961_v0, 16  ;;  %v4568_v24 = vsel %vm13682_vm9, %v4563_v58, %v15117_v12  ;;  %v4601_v48 = vrot.slane %v4599_v55, 5  ;;  %v4652_v57 = vshrl.u32 %v4309_v35, 16  ;;  %v4312_v58 = vld [vmem:[#allocation2 + $0xcc] sm:$0xf] }
 0x25f   : > { %12355 = vmatmul.mubr.msk.bf16.gmra.mrb[8].mxu0 %vm1391_vm7, %v11276_v11  ;;  %v4606_v11 = vrot.slane %v4604_v29, 4  ;;  %v4578_v29 = vsel %vm13682_vm9, %v4573_v9, %v4577_v50  ;;  %v4655_v23 = vshll.u32 %v4309_v35, 16  ;;  %v4661_v5 = vshll.u32 %v15151_v46, 16 }
 0x260   : > { %12358 = vmatprep.mubr.msk.bf16.mxu0 %vm1391_vm7, %v11277_v54  ;;  %v4609_v54 = vrot.slane %v4607_v2, 5  ;;  %v4587_v2 = vrot.slane %v4586_v45, 4  ;;  %v4665_v63 = vshrl.u32 %v15151_v46, 16  ;;  %v4597_v34 = vrot.slane %v4596_v20, 4 }
 0x261   : > { %v4630_v0 = vrot.slane %v4628_v13, 4  ;;  %v4633_v32 = vrot.slane %v4631_v10, 5  ;;  %v4621_v31 = vrot.slane %v4620_v6, 4  ;;  %v4639_v15 = vrot.slane %v4637_v59, 5 }
 0x262   : > { %v4610_v18 = vor.u32 %v4609_v54, %v4606_v11  ;;  %v4643_v11 = vrot.slane %v4641_v51, 4  ;;  %v11281_v12 = vcombine.low %v4568_v24, %v4578_v29  ;;  %v4654_v54 = vrot.slane %v4652_v57, 4 }
 0x263   : > { %v4657_v16 = vrot.slane %v4655_v23, 5  ;;  %v4663_v50 = vrot.slane %v4661_v5, 5  ;;  %v4667_v7 = vrot.slane %v4665_v63, 4  ;;  %v4592_v9 = vsel %vm13682_vm9, %v4587_v2, %v15144_v38 }
 0x264   : > { %v4602_v45 = vsel %vm13682_vm9, %v4597_v34, %v4601_v48  ;;  %v4634_v55 = vor.u32 %v4633_v32, %v4630_v0  ;;  %v4644_v10 = vor.u32 %v4643_v11, %v4639_v15  ;;  %v4647_v35 = vshll.u32 %v14963_v37, 16 }
 0x265   : > { %v4676_v38 = vshrl.u32 %v4312_v58, 16  ;;  %v4685_v6 = vshll.u32 %v15008_v1, 16  ;;  %v4689_v59 = vshrl.u32 %v15008_v1, 16  ;;  %v4658_v51 = vor.u32 %v4657_v16, %v4654_v54 }
 0x266   : > { %v4668_v24 = vor.u32 %v4667_v7, %v4663_v50  ;;  %v11282_v29 = vcombine.low %v4592_v9, %v4602_v45  ;;  %v4635_v2 = vrot.slane %v4634_v55, 4  ;;  %v4645_v48 = vrot.slane %v4644_v10, 4  ;;  %v4993_v7 = vld [vmem:[#allocation2 + $0x18] sm:$0xe] }
 0x267   : > { %12359 = vmatmul.mubr.msk.bf16.gmra.mrb[12].mxu0 %vm1391_vm7, %v11278_v36  ;;  %v4625_v36 = vrot.slane %v4623_v14, 5  ;;  %v15169_v14 = vld [vmem:[#allocation2 + $0xc8] sm:$0x1]  ;;  %v4649_v57 = vrot.slane %v4647_v35, 5  ;;  %v4678_v23 = vrot.slane %v4676_v38, 4  ;;  %v4687_v37 = vrot.slane %v4685_v6, 5 }
 0x268   : > { %12362 = vmatprep.mubr.msk.bf16.mxu0 %vm1391_vm7, %v11279_v44  ;;  %v4611_v44 = vrot.slane %v4610_v18, 4  ;;  %v4679_v18 = vshll.u32 %v4312_v58, 16  ;;  %v4691_v63 = vrot.slane %v4689_v59, 4  ;;  %v4659_v34 = vrot.slane %v4658_v51, 4  ;;  %v4995_v6 = vld [vmem:[#allocation2 + $0x30] sm:$0xe] }
 0x269   : > { %v4626_v13 = vsel %vm13682_vm9, %v4621_v31, %v4625_v36  ;;  %v4669_v36 = vrot.slane %v4668_v24, 4  ;;  %v4640_v1 = vsel %vm13682_vm9, %v4635_v2, %v4639_v15  ;;  %v4650_v32 = vsel %vm13682_vm9, %v4645_v48, %v4649_v57 }
 0x26a   : > { %v4616_v20 = vsel %vm13682_vm9, %v4611_v44, %v4615_v43  ;;  %v4681_v5 = vrot.slane %v4679_v18, 5  ;;  %v4692_v31 = vor.u32 %v4691_v63, %v4687_v37  ;;  %v4695_v11 = vshll.u32 %v15010_v3, 16  ;;  %v4994_v18 = vld [vmem:[#allocation2 + $0x24] sm:$0xe] }
 0x26b   : > { %v11283_v43 = vcombine.low %v4616_v20, %v4626_v13  ;;  %v5059_v16 = vrot.slane %v14884_v27, 5  ;;  %v11284_v58 = vcombine.low %v4640_v1, %v4650_v32  ;;  %v11303_v20 = vrot.slane %v4993_v7, 9 }
 0x26c   : > { %v4682_v44 = vor.u32 %v4681_v5, %v4678_v23  ;;  %v4693_v45 = vrot.slane %v4692_v31, 4  ;;  %v4697_v55 = vrot.slane %v4695_v11, 5  ;;  %v5062_v10 = vrot.slane %v14904_v28, 5  ;;  %v4996_v5 = vld [vmem:[#allocation2 + $0x3c] sm:$0xe] }
 0x26d   : > { %v5061_v13 = vrot.slane %v5059_v16, 4  ;;  %v5060_v35 = vsel %vm14095_vm15, %v11303_v20, %v5059_v16  ;;  %v5073_v28 = vrot.slane %v14925_v42, 5  ;;  %v11304_v24 = vrot.slane %v4994_v18, 9 }
 0x26e   : > { %v4683_v9 = vrot.slane %v4682_v44, 4  ;;  %v4698_v27 = vsel %vm13682_vm9, %v4693_v45, %v4697_v55  ;;  %v5080_v57 = vrot.slane %v14939_v17, 5  ;;  %v5083_v1 = vrot.slane %v14981_v47, 5 }
 0x26f   : > { %12363 = vmatmul.mubr.msk.bf16.gmra.mrb[16].mxu0 %vm1391_vm7, %v11280_v62  ;;  %v4671_v62 = vshll.u32 %v15169_v14, 16  ;;  %v5063_v38 = vsel %vm14095_vm15, %v5061_v13, %v5062_v10  ;;  %v5075_v2 = vrot.slane %v5073_v28, 4  ;;  %v5090_v17 = vrot.slane %v15015_v30, 5 }
 0x270   : > { %12366 = vmatprep.mubr.msk.bf16.mxu0 %vm1391_vm7, %v11281_v12  ;;  %v4664_v12 = vsel %vm13682_vm9, %v4659_v34, %v4663_v50  ;;  %v4688_v3 = vsel %vm13682_vm9, %v4683_v9, %v4687_v37  ;;  %v5066_v50 = vrot.slane %v14902_v8, 5  ;;  %v11320_v51 = vcombine.low %v5060_v35, %v5063_v38  ;;  %v4997_v37 = vld [vmem:[#allocation2 + $0x48] sm:$0xe]  ;;  %v5003_v35 = vld [vmem:[#allocation2 + $0x90] sm:$0xe] }
 0x271   : > { %v4673_v0 = vrot.slane %v4671_v62, 5  ;;  %v11286_v59 = vcombine.low %v4688_v3, %v4698_v27  ;;  %v5076_v8 = vrot.slane %v14954_v60, 5  ;;  %v5087_v60 = vrot.slane %v14978_v41, 5 }
 0x272   : > { %v5068_v62 = vrot.slane %v5066_v50, 4  ;;  %v5067_v48 = vsel %vm14095_vm15, %v11304_v24, %v5066_v50  ;;  %v11307_v32 = vrot.slane %v4997_v37, 9  ;;  %v5115_v55 = vrot.slane %v15067_v4, 5 }
 0x273   : > { %v4674_v54 = vsel %vm13682_vm9, %v4669_v36, %v4673_v0  ;;  %v11306_v36 = vrot.slane %v4996_v5, 9  ;;  %v5082_v0 = vrot.slane %v5080_v57, 4  ;;  %v5089_v44 = vrot.slane %v5087_v60, 4  ;;  %v17527_v5 = vld [vmem:[#allocation10_spill] sm:$0xff] }
 0x274   : > { %v11285_v15 = vcombine.low %v4664_v12, %v4674_v54  ;;  %v5088_v11 = vsel %vm14095_vm15, %v11307_v32, %v5087_v60  ;;  %v5101_v12 = vrot.slane %v15030_v52, 5  ;;  %v4999_v54 = vld [vmem:[#allocation2 + $0x60] sm:$0xe]  ;;  %v5001_v52 = vld [vmem:[#allocation2 + $0x78] sm:$0xe]  ;;  %v5117_v10 = vrot.slane %v5115_v55, 4 }
 0x275   : > { %v5081_v31 = vsel %vm14095_vm15, %v11306_v36, %v5080_v57  ;;  %v5084_v41 = vsel %vm14095_vm15, %v5082_v0, %v5083_v1  ;;  %v5091_v47 = vsel %vm14095_vm15, %v5089_v44, %v5090_v17  ;;  %v11309_v7 = vrot.slane %v4999_v54, 9  ;;  %v17528_v60 = vld [vmem:[#allocation11_spill] sm:$0xff]  ;;  %v17530_v36 = vld [vmem:[#allocation12_spill] sm:$0xff]  ;;  %v17531_v0 = vld [vmem:[#allocation13_spill] sm:$0xff] }
 0x276   : > { %v11323_v30 = vcombine.low %v5081_v31, %v5084_v41  ;;  %v11324_v16 = vcombine.low %v5088_v11, %v5091_v47  ;;  %v11311_v13 = vrot.slane %v5001_v52, 9  ;;  %v5118_v3 = vrot.slane %v15085_v61, 5  ;;  %v17534_v32 = vld [vmem:[#allocation15_spill] sm:$0xff]  ;;  %v6156_v17 = vld [vmem:[#allocation3] sm:$0xf] }
 0x277   : > { %12367 = vmatmul.mubr.msk.bf16.gmra.mrb[20].mxu0 %vm1391_vm7, %v11282_v29  ;;  %v5069_v29 = vrot.slane %v14921_v49, 5  ;;  %v5077_v49 = vsel %vm14095_vm15, %v5075_v2, %v5076_v8  ;;  %v5102_v9 = vsel %vm14095_vm15, %v11309_v7, %v5101_v12  ;;  %v5129_v4 = vrot.slane %v15099_v53, 5  ;;  %v6157_v31 = vld [vmem:[#allocation3 + $0x4] sm:$0xf] }
 0x278   : > { %12370 = vmatprep.mubr.msk.bf16.mxu0 %vm1391_vm7, %v11283_v43  ;;  %v11305_v43 = vrot.slane %v4995_v6, 9  ;;  %v5116_v27 = vsel %vm14095_vm15, %v11311_v13, %v5115_v55  ;;  %v5119_v50 = vsel %vm14095_vm15, %v5117_v10, %v5118_v3  ;;  %v11313_v18 = vrot.slane %v5003_v35, 9 }
 0x279   : > { %v5070_v42 = vsel %vm14095_vm15, %v5068_v62, %v5069_v29  ;;  %v11328_v38 = vcombine.low %v5116_v27, %v5119_v50  ;;  %v5132_v61 = vrot.slane %v15115_v39, 5  ;;  %v5143_v53 = vrot.slane %v15124_v33, 5  ;;  %v15306_v50 = vld [vmem:[%s17341_s4] sm:$0x3] }
 0x27a   : > { %v5074_v23 = vsel %vm14095_vm15, %v11305_v43, %v5073_v28  ;;  %v11321_v63 = vcombine.low %v5067_v48, %v5070_v42  ;;  %v5131_v28 = vrot.slane %v5129_v4, 4  ;;  %v5130_v6 = vsel %vm14095_vm15, %v11313_v18, %v5129_v4  ;;  %v17524_v43 = vld [vmem:[#allocation8_spill] sm:$0xff]  ;;  %v5007_v42 = vld [vmem:[#allocation2 + $0xc0] sm:$0xe]  ;;  %v15313_v4 = vld [vmem:[%s17339_s2] ss:$0 sm:$0xff] }
 0x27b   : > { %v11322_v34 = vcombine.low %v5074_v23, %v5077_v49  ;;  %v5145_v29 = vrot.slane %v5143_v53, 4  ;;  %v5146_v39 = vrot.slane %v15146_v56, 5  ;;  %v5157_v33 = vrot.slane %v15151_v46, 5 }
 0x27c   : > { %v11317_v23 = vrot.slane %v5007_v42, 9  ;;  %v5160_v56 = vrot.slane %v15169_v14, 5  ;;  %v17529_v37 = vcombine.low %v17527_v5, %v17528_v60  ;;  %v17532_v1 = vcombine.low %v17530_v36, %v17531_v0  ;;  %v17533_v14 = vld [vmem:[#allocation14_spill] sm:$0xff] }
 0x27d   : > { %v5147_v48 = vsel %vm14095_vm15, %v5145_v29, %v5146_v39  ;;  %v5159_v49 = vrot.slane %v5157_v33, 4  ;;  %v17535_v44 = vcombine.low %v17533_v14, %v17534_v32  ;;  %v6206_v41 = vshrl.u32 %v6156_v17, 16  ;;  %v6051_v14 = vld [vmem:[#allocation3 + $0x18] sm:$0xf] }
 0x27e   : > { %v6209_v11 = vshll.u32 %v6156_v17, 16  ;;  %v6215_v47 = vshll.u32 %v6157_v31, 16 }
 0x27f   : > { %12371 = vmatmul.mubr.msk.bf16.gmra.mrb[24].mxu0 %vm1391_vm7, %v11284_v58  ;;  %v5103_v58 = vrot.slane %v5101_v12, 4  ;;  %v6219_v12 = vshrl.u32 %v6157_v31, 16  ;;  %v6208_v54 = vrot.slane %v6206_v41, 4 }
 0x280   : > { %12374 = vmatprep.mubr.msk.bf16.mxu0 %vm1391_vm7, %v11285_v15  ;;  %v5104_v15 = vrot.slane %v15062_v26, 5  ;;  %v17521_v26 = vcombine.low %v14864_v21, %v14868_v40  ;;  %v17522_v21 = vld [vmem:[#allocation7_spill] sm:$0xff] }
 0x281   : > { %v17523_v40 = vcombine.low %v14882_v19, %v17522_v21  ;;  %v17525_v19 = vld [vmem:[#allocation9_spill] sm:$0xff]  ;;  %v6221_v7 = vrot.slane %v6219_v12, 4 }
 0x282   : > { %v5105_v45 = vsel %vm14095_vm15, %v5103_v58, %v5104_v15  ;;  %v17526_v2 = vcombine.low %v17524_v43, %v17525_v19  ;;  %v6189_v58 = vld [vmem:[#allocation3 + $0x8] sm:$0x1]  ;;  %v11386_v15 = vld [vmem:[%s17341_s4 + $0x2] sm:$0x3] }
 0x283   : > { %v11326_v20 = vcombine.low %v5102_v9, %v5105_v45  ;;  %v6225_v55 = vshll.u32 %v6189_v58, 16  ;;  %13239 = vmatprep.subr.msk.bf16.mxu1 %vm1440_vm0, %v11386_v15  ;;  %v6688_v10 = vsel %vm1440_vm0, %v11386_v15, 0 }
 0x284   : > { %12413 = vmatpush3.bf16.msra.mxu1 %v6688_v10 }
 0x285   : > { %v6227_v13 = vrot.slane %v6225_v55, 5  ;;  %13240 = vmatprep.subr.msk.bf16.mxu1 %vm1440_vm0, %v15306_v50 }
 0x287   : > { %12375 = vmatmul.mubr.msk.bf16.gmra.mrb[28].mxu0 %vm1391_vm7, %v11286_v59  ;;  %v5133_v59 = vsel %vm14095_vm15, %v5131_v28, %v5132_v61 }
 0x288   : > { %12380 = vmatprep.mubr.msk.bf16.mxu0 %vm1391_vm7, %v11320_v51  ;;  %v5005_v51 = vld [vmem:[#allocation2 + $0xa8] sm:$0xe]  ;;  %v11330_v24 = vcombine.low %v5130_v6, %v5133_v59 }
 0x289   : > { %v11315_v62 = vrot.slane %v5005_v51, 9 }
 0x28b   : > { %v5144_v8 = vsel %vm14095_vm15, %v11315_v62, %v5143_v53 }
 0x28c   : > { %v11332_v57 = vcombine.low %v5144_v8, %v5147_v48 }
 0x28f   : > { %12381 = vmatmul.mubr.msk.bf16.vlgmr.msra.gmra.mrb[0].mxu0 %vm1391_vm7, %v11321_v63  ;;  %v5158_v63 = vsel %vm14095_vm15, %v11317_v23, %v5157_v33 }
 0x290   : > { %12384 = vmatprep.mubr.msk.bf16.mxu0 %vm1391_vm7, %v11322_v34  ;;  %v5161_v34 = vsel %vm14095_vm15, %v5159_v49, %v5160_v56 }
 0x291   : > { %v11334_v46 = vcombine.low %v5158_v63, %v5161_v34 }
 0x297   : > { %12385 = vmatmul.mubr.msk.bf16.gmra.mrb[4].mxu0 %vm1391_vm7, %v11323_v30  ;;  %v6211_v30 = vrot.slane %v6209_v11, 5 }
 0x298   : > { %12388 = vmatprep.mubr.msk.bf16.mxu0 %vm1391_vm7, %v11324_v16  ;;  %v6217_v16 = vrot.slane %v6215_v47, 5  ;;  %v6044_v47 = vld [vmem:[#allocation3 + $0xc] sm:$0xf] }
 0x299   : > { %v6212_v9 = vor.u32 %v6211_v30, %v6208_v54 }
 0x29a   : > { %v6222_v45 = vor.u32 %v6221_v7, %v6217_v16  ;;  %v6055_v7 = vld [vmem:[#allocation3 + $0x20] sm:$0x1] }
 0x29b   : > { %v6213_v52 = vrot.slane %v6212_v9, 4 }
 0x29d   : > { %v6218_v3 = vsel %vm13682_vm9, %v6213_v52, %v6217_v16 }
 0x29f   : > { %12389 = vmatmul.mubr.msk.bf16.gmra.mrb[8].mxu0 %vm1391_vm7, %v17521_v26 }
 0x2a0   : > { %12392 = vmatprep.mubr.msk.bf16.mxu0 %vm1391_vm7, %v11326_v20  ;;  %v6223_v20 = vrot.slane %v6222_v45, 4 }
 0x2a2   : > { %v6228_v26 = vsel %vm13682_vm9, %v6223_v20, %v6227_v13  ;;  %v6048_v20 = vld [vmem:[#allocation3 + $0x14] sm:$0x1] }
 0x2a3   : > { %v11387_v27 = vcombine.low %v6218_v3, %v6228_v26 }
 0x2a5   : > { %12414 = vmatprep.mubr.msk.bf16.mxu1 %vm1391_vm7, %v11387_v27 }
 0x2a7   : > { %12393 = vmatmul.mubr.msk.bf16.gmra.mrb[12].mxu0 %vm1391_vm7, %v17523_v40 }
 0x2a8   : > { %12396 = vmatprep.mubr.msk.bf16.mxu0 %vm1391_vm7, %v11328_v38  ;;  %v15318_v38 = vld [vmem:[%s17340_s3] ss:$0 sm:$0xff] }
 0x2af   : > { %12397 = vmatmul.mubr.msk.bf16.gmra.mrb[16].mxu0 %vm1391_vm7, %v17526_v2 }
 0x2b0   : > { %12400 = vmatprep.mubr.msk.bf16.mxu0 %vm1391_vm7, %v11330_v24 }
 0x2b7   : > { %12401 = vmatmul.mubr.msk.bf16.gmra.mrb[20].mxu0 %vm1391_vm7, %v17529_v37 }
 0x2b8   : > { %12404 = vmatprep.mubr.msk.bf16.mxu0 %vm1391_vm7, %v11332_v57 }
 0x2bf   : > { %12405 = vmatmul.mubr.msk.bf16.gmra.mrb[24].mxu0 %vm1391_vm7, %v17532_v1 }
 0x2c0   : > { %12408 = vmatprep.mubr.msk.bf16.mxu0 %vm1391_vm7, %v11334_v46 }
 0x2c7   : > { %12409 = vmatmul.mubr.msk.bf16.gmra.mrb[28].mxu0 %vm1391_vm7, %v17535_v44 }
 0x362   : > { %v12382_v35 = vpop.f32.mrb[0].mxu0 }
 0x363   : > { %v5472_v18 = vmul.f32 %v12382_v35, %v15313_v4  ;;  %v5304_v28 = vpop.f32.mrb[1].mxu0 }
 0x364   : > { %v5470_v61 = vmul.f32 %v15313_v4, %v5304_v28  ;;  %v12383_v21 = vpop.f32.mrb[2].mxu0 }
 0x365   : > { %v5511_v40 = vadd.f32 %v15318_v38, %v5472_v18  ;;  %v5473_v6 = vmul.f32 %v12383_v21, %v15313_v4  ;;  %v5307_v59 = vpop.f32.mrb[3].mxu0 }
 0x366   : > { %v5509_v53 = vadd.f32 %v15318_v38, %v5470_v61  ;;  %v5471_v51 = vmul.f32 %v15313_v4, %v5307_v59 }
 0x367   : > { %v5543_v24 = vmax.f32 %v5511_v40, 0.0  ;;  %v5512_v62 = vadd.f32 %v15318_v38, %v5473_v6 }
 0x368   : > { %v5541_v29 = vmax.f32 %v5509_v53, 0.0  ;;  %v5510_v39 = vadd.f32 %v15318_v38, %v5471_v51 }
 0x369   : > { %v11770_v43 = vpack.c.bf16 %v5543_v24, %v5543_v24  ;;  %v5544_v19 = vmax.f32 %v5512_v62, 0.0 }
 0x36a   : > { %v11768_v2 = vpack.c.bf16 %v5541_v29, %v5541_v29  ;;  %v5542_v8 = vmax.f32 %v5510_v39, 0.0  ;;  %v12386_v48 = vpop.f32.mrb[4].mxu0 }
 0x36b   : > { %v5741_v33 = vshrl.u32 %v11770_v43, 16  ;;  %v5744_v42 = vshll.u32 %v11770_v43, 16  ;;  %v11771_v57 = vpack.c.bf16 %v5544_v19, %v5544_v19  ;;  %v5476_v23 = vmul.f32 %v12386_v48, %v15313_v4  ;;  %v5320_v49 = vpop.f32.mrb[5].mxu0  ;;  %v6065_v48 = vld [vmem:[#allocation3 + $0x30] sm:$0xf] }
 0x36c   : > { %v5724_v56 = vshrl.u32 %v11768_v2, 16  ;;  %v5727_v5 = vshll.u32 %v11768_v2, 16  ;;  %v11769_v60 = vpack.c.bf16 %v5542_v8, %v5542_v8  ;;  %v5474_v37 = vmul.f32 %v15313_v4, %v5320_v49  ;;  %v12387_v63 = vpop.f32.mrb[6].mxu0 }
 0x36d   : > { %v5743_v34 = vrot.slane %v5741_v33, 7  ;;  %v5749_v46 = vshrl.u32 %v11771_v57, 16  ;;  %v5752_v36 = vshll.u32 %v11771_v57, 16  ;;  %v5515_v0 = vadd.f32 %v15318_v38, %v5476_v23  ;;  %v5323_v1 = vpop.f32.mrb[7].mxu0 }
 0x36e   : > { %v5726_v32 = vrot.slane %v5724_v56, 7  ;;  %v5732_v44 = vshrl.u32 %v11769_v60, 16  ;;  %v5735_v17 = vshll.u32 %v11769_v60, 16  ;;  %v5513_v31 = vadd.f32 %v15318_v38, %v5474_v37 }
 0x36f   : > { %v5746_v41 = vor.u32 %v5744_v42, %v5743_v34  ;;  %v5747_v11 = vrot.slane %v5743_v34, 4  ;;  %v5751_v12 = vrot.slane %v5749_v46, 7  ;;  %v5547_v54 = vmax.f32 %v5515_v0, 0.0 }
 0x370   : > { %v5729_v30 = vor.u32 %v5727_v5, %v5726_v32  ;;  %v5730_v16 = vrot.slane %v5726_v32, 4  ;;  %v5734_v58 = vrot.slane %v5732_v44, 7  ;;  %v5545_v15 = vmax.f32 %v5513_v31, 0.0  ;;  %v6058_v5 = vld [vmem:[#allocation3 + $0x24] sm:$0xf] }
 0x371   : > { %v6052_v45 = vsel %vm13701_vm12, %v5746_v41, %v6051_v14  ;;  %v5754_v55 = vor.u32 %v5752_v36, %v5751_v12  ;;  %v5756_v52 = vrot.slane %v5751_v12, 4  ;;  %v11774_v13 = vpack.c.bf16 %v5547_v54, %v5547_v54 }
 0x372   : > { %6053 = vst [vmem:[#allocation3 + $0x18] sm:$0xf] %v6052_v45  ;;  %v6045_v10 = vsel %vm13701_vm12, %v5729_v30, %v6044_v47  ;;  %v5737_v3 = vor.u32 %v5735_v17, %v5734_v58  ;;  %v5739_v26 = vrot.slane %v5734_v58, 4  ;;  %v11772_v27 = vpack.c.bf16 %v5545_v15, %v5545_v15  ;;  %v12390_v35 = vpop.f32.mrb[8].mxu0 }
 0x373   : > { %6046 = vst [vmem:[#allocation3 + $0xc] sm:$0xf] %v6045_v10  ;;  %v5755_v28 = vsel %vm13695_vm11, %v5747_v11, %v5754_v55  ;;  %v6056_v21 = vsel %vm13688_vm10, %v5756_v52, %v6055_v7  ;;  %v5775_v40 = vshrl.u32 %v11774_v13, 16  ;;  %v5778_v6 = vshll.u32 %v11774_v13, 16  ;;  %v5336_v59 = vpop.f32.mrb[9].mxu0 }
 0x374   : > { %6054 = vst.msk [vmem:[#allocation3 + $0x1c] sm:$0xf] %vm280_vm1, %v5755_v28  ;;  %6057 = vst [vmem:[#allocation3 + $0x20] sm:$0x1] %v6056_v21  ;;  %v5738_v53 = vsel %vm13695_vm11, %v5730_v16, %v5737_v3  ;;  %v6049_v51 = vsel %vm13688_vm10, %v5739_v26, %v6048_v20  ;;  %v5758_v24 = vshrl.u32 %v11772_v27, 16  ;;  %v5761_v62 = vshll.u32 %v11772_v27, 16 }
 0x375   : > { %v12391_v29 = vpop.f32.mrb[10].mxu0  ;;  %6047 = vst.msk [vmem:[#allocation3 + $0x10] sm:$0xf] %vm280_vm1, %v5738_v53  ;;  %6050 = vst [vmem:[#allocation3 + $0x14] sm:$0x1] %v6049_v51  ;;  %v15346_v39 = vrot.slane %v5775_v40, 7  ;;  %v5477_v43 = vmul.f32 %v12387_v63, %v15313_v4  ;;  %v5475_v19 = vmul.f32 %v15313_v4, %v5323_v1  ;;  %v5480_v2 = vmul.f32 %v12390_v35, %v15313_v4 }
 0x376   : > { %v5339_v8 = vpop.f32.mrb[11].mxu0  ;;  %v15351_v33 = vrot.slane %v5758_v24, 7  ;;  %v5478_v42 = vmul.f32 %v15313_v4, %v5336_v59  ;;  %v5481_v57 = vmul.f32 %v12391_v29, %v15313_v4  ;;  %v6069_v26 = vld [vmem:[#allocation3 + $0x38] sm:$0x1]  ;;  %v6062_v27 = vld [vmem:[#allocation3 + $0x2c] sm:$0x1] }
 0x377   : > { %v5479_v23 = vmul.f32 %v15313_v4, %v5339_v8  ;;  %v5780_v49 = vor.u32 %v5778_v6, %v15346_v39  ;;  %v5781_v56 = vrot.slane %v15346_v39, 4  ;;  %v5516_v60 = vadd.f32 %v15318_v38, %v5477_v43  ;;  %v6079_v53 = vld [vmem:[#allocation3 + $0x48] sm:$0xf] }
 0x378   : > { %v5514_v37 = vadd.f32 %v15318_v38, %v5475_v19  ;;  %v5763_v63 = vor.u32 %v5761_v62, %v15351_v33  ;;  %v5764_v34 = vrot.slane %v15351_v33, 4  ;;  %v5519_v46 = vadd.f32 %v15318_v38, %v5480_v2  ;;  %v6072_v33 = vld [vmem:[#allocation3 + $0x3c] sm:$0xf] }
 0x379   : > { %v5517_v36 = vadd.f32 %v15318_v38, %v5478_v42  ;;  %v6066_v0 = vsel %vm13701_vm12, %v5780_v49, %v6065_v48  ;;  %v5548_v1 = vmax.f32 %v5516_v60, 0.0  ;;  %v5520_v32 = vadd.f32 %v15318_v38, %v5481_v57 }
 0x37a   : > { %v5546_v14 = vmax.f32 %v5514_v37, 0.0  ;;  %6067 = vst [vmem:[#allocation3 + $0x30] sm:$0xf] %v6066_v0  ;;  %v6059_v44 = vsel %vm13701_vm12, %v5763_v63, %v6058_v5  ;;  %v5551_v17 = vmax.f32 %v5519_v46, 0.0  ;;  %v5518_v41 = vadd.f32 %v15318_v38, %v5479_v23  ;;  %v12394_v11 = vpop.f32.mrb[12].mxu0 }
 0x37b   : > { %v5549_v31 = vmax.f32 %v5517_v36, 0.0  ;;  %6060 = vst [vmem:[#allocation3 + $0x24] sm:$0xf] %v6059_v44  ;;  %v11775_v47 = vpack.c.bf16 %v5548_v1, %v5548_v1  ;;  %v5552_v54 = vmax.f32 %v5520_v32, 0.0  ;;  %v5484_v30 = vmul.f32 %v12394_v11, %v15313_v4  ;;  %v5352_v16 = vpop.f32.mrb[13].mxu0 }
 0x37c   : > { %v11773_v12 = vpack.c.bf16 %v5546_v14, %v5546_v14  ;;  %v11778_v7 = vpack.c.bf16 %v5551_v17, %v5551_v17  ;;  %v5550_v15 = vmax.f32 %v5518_v41, 0.0  ;;  %v5482_v45 = vmul.f32 %v15313_v4, %v5352_v16  ;;  %v12395_v55 = vpop.f32.mrb[14].mxu0 }
 0x37d   : > { %v11776_v58 = vpack.c.bf16 %v5549_v31, %v5549_v31  ;;  %v5783_v52 = vshrl.u32 %v11775_v47, 16  ;;  %v5786_v20 = vshll.u32 %v11775_v47, 16  ;;  %v5355_v3 = vpop.f32.mrb[15].mxu0  ;;  %v11779_v51 = vpack.c.bf16 %v5552_v54, %v5552_v54  ;;  %v6083_v47 = vld [vmem:[#allocation3 + $0x50] sm:$0x1] }
 0x37e   : > { %v5766_v13 = vshrl.u32 %v11773_v12, 16  ;;  %v5769_v10 = vshll.u32 %v11773_v12, 16  ;;  %v5809_v35 = vshrl.u32 %v11778_v7, 16  ;;  %v5812_v28 = vshll.u32 %v11778_v7, 16 }
 0x37f   : > { %v5792_v21 = vshrl.u32 %v11776_v58, 16  ;;  %v5795_v40 = vshll.u32 %v11776_v58, 16  ;;  %v5785_v6 = vrot.slane %v5783_v52, 7  ;;  %v11777_v24 = vpack.c.bf16 %v5550_v15, %v5550_v15 }
 0x380   : > { %v5768_v59 = vrot.slane %v5766_v13, 7  ;;  %v5811_v62 = vrot.slane %v5809_v35, 7  ;;  %v5523_v39 = vadd.f32 %v15318_v38, %v5484_v30  ;;  %v5521_v43 = vadd.f32 %v15318_v38, %v5482_v45 }
 0x381   : > { %v5794_v29 = vrot.slane %v5792_v21, 7  ;;  %v5788_v19 = vor.u32 %v5786_v20, %v5785_v6  ;;  %v5790_v2 = vrot.slane %v5785_v6, 4  ;;  %v5817_v1 = vshrl.u32 %v11779_v51, 16  ;;  %v6076_v20 = vld [vmem:[#allocation3 + $0x44] sm:$0x1] }
 0x382   : > { %v5771_v8 = vor.u32 %v5769_v10, %v5768_v59  ;;  %v5773_v48 = vrot.slane %v5768_v59, 4  ;;  %v5814_v42 = vor.u32 %v5812_v28, %v5811_v62  ;;  %v5815_v57 = vrot.slane %v5811_v62, 4  ;;  %v12398_v5 = vpop.f32.mrb[16].mxu0 }
 0x383   : > { %v5797_v23 = vor.u32 %v5795_v40, %v5794_v29  ;;  %v5798_v49 = vrot.slane %v5794_v29, 4  ;;  %v5789_v60 = vsel %vm13695_vm11, %v5781_v56, %v5788_v19  ;;  %v6070_v37 = vsel %vm13688_vm10, %v5790_v2, %v6069_v26  ;;  %v5368_v36 = vpop.f32.mrb[17].mxu0  ;;  %v6093_v29 = vld [vmem:[#allocation3 + $0x60] sm:$0xf] }
 0x384   : > { %v5772_v63 = vsel %vm13695_vm11, %v5764_v34, %v5771_v8  ;;  %v6063_v46 = vsel %vm13688_vm10, %v5773_v48, %v6062_v27  ;;  %6068 = vst.msk [vmem:[#allocation3 + $0x34] sm:$0xf] %vm280_vm1, %v5789_v60  ;;  %6071 = vst [vmem:[#allocation3 + $0x38] sm:$0x1] %v6070_v37  ;;  %v6080_v0 = vsel %vm13701_vm12, %v5814_v42, %v6079_v53  ;;  %v5820_v14 = vshll.u32 %v11779_v51, 16  ;;  %v12399_v32 = vpop.f32.mrb[18].mxu0 }
 0x385   : > { %6061 = vst.msk [vmem:[#allocation3 + $0x28] sm:$0xf] %vm280_vm1, %v5772_v63  ;;  %6064 = vst [vmem:[#allocation3 + $0x2c] sm:$0x1] %v6063_v46  ;;  %v6073_v56 = vsel %vm13701_vm12, %v5797_v23, %v6072_v33  ;;  %v5800_v34 = vshrl.u32 %v11777_v24, 16  ;;  %v5803_v44 = vshll.u32 %v11777_v24, 16  ;;  %v5485_v12 = vmul.f32 %v12395_v55, %v15313_v4 }
 0x386   : > { %6081 = vst [vmem:[#allocation3 + $0x48] sm:$0xf] %v6080_v0  ;;  %6074 = vst [vmem:[#allocation3 + $0x3c] sm:$0xf] %v6073_v56  ;;  %v5555_v17 = vmax.f32 %v5523_v39, 0.0  ;;  %v5553_v31 = vmax.f32 %v5521_v43, 0.0  ;;  %v5483_v54 = vmul.f32 %v15313_v4, %v5355_v3  ;;  %v5488_v30 = vmul.f32 %v12398_v5, %v15313_v4 }
 0x387   : > { %v15388_v41 = vpop.f32.mrb[19].mxu0  ;;  %v5819_v11 = vrot.slane %v5817_v1, 7  ;;  %v5802_v16 = vrot.slane %v5800_v34, 7  ;;  %v5486_v15 = vmul.f32 %v15313_v4, %v5368_v36  ;;  %v5524_v13 = vadd.f32 %v15318_v38, %v5485_v12  ;;  %v6086_v42 = vld [vmem:[#allocation3 + $0x54] sm:$0xf] }
 0x388   : > { %v11782_v7 = vpack.c.bf16 %v5555_v17, %v5555_v17  ;;  %v11780_v58 = vpack.c.bf16 %v5553_v31, %v5553_v31  ;;  %v5522_v10 = vadd.f32 %v15318_v38, %v5483_v54  ;;  %v5527_v19 = vadd.f32 %v15318_v38, %v5488_v30  ;;  %v15417_v46 = vld [vmem:[#allocation3 + $0xc] sm:$0xf]  ;;  %v6097_v31 = vld [vmem:[#allocation3 + $0x68] sm:$0x1] }
 0x389   : > { %v5822_v45 = vor.u32 %v5820_v14, %v5819_v11  ;;  %v5824_v52 = vrot.slane %v5819_v11, 4  ;;  %v5805_v26 = vor.u32 %v5803_v44, %v5802_v16  ;;  %v5807_v27 = vrot.slane %v5802_v16, 4 }
 0x38a   : > { %v5843_v35 = vshrl.u32 %v11782_v7, 16  ;;  %v5846_v55 = vshll.u32 %v11782_v7, 16  ;;  %v5826_v21 = vshrl.u32 %v11780_v58, 16  ;;  %v5829_v40 = vshll.u32 %v11780_v58, 16  ;;  %v15400_v6 = vpop.f32.mrb[20].mxu0 }
 0x38b   : > { %v5823_v3 = vsel %vm13695_vm11, %v5815_v57, %v5822_v45  ;;  %v6084_v28 = vsel %vm13688_vm10, %v5824_v52, %v6083_v47  ;;  %v5806_v59 = vsel %vm13695_vm11, %v5798_v49, %v5805_v26  ;;  %v6077_v53 = vsel %vm13688_vm10, %v5807_v27, %v6076_v20  ;;  %v15407_v62 = vpop.f32.mrb[21].mxu0  ;;  %v6090_v52 = vld [vmem:[#allocation3 + $0x5c] sm:$0x1] }
 0x38c   : > { %6082 = vst.msk [vmem:[#allocation3 + $0x4c] sm:$0xf] %vm280_vm1, %v5823_v3  ;;  %6085 = vst [vmem:[#allocation3 + $0x50] sm:$0x1] %v6084_v28  ;;  %v5845_v51 = vrot.slane %v5843_v35, 7  ;;  %v5556_v24 = vmax.f32 %v5524_v13, 0.0  ;;  %v5525_v2 = vadd.f32 %v15318_v38, %v5486_v15  ;;  %v5489_v23 = vmul.f32 %v12399_v32, %v15313_v4 }
 0x38d   : > { %6075 = vst.msk [vmem:[#allocation3 + $0x40] sm:$0xf] %vm280_vm1, %v5806_v59  ;;  %6078 = vst [vmem:[#allocation3 + $0x44] sm:$0x1] %v6077_v53  ;;  %v5828_v39 = vrot.slane %v5826_v21, 7  ;;  %v5554_v43 = vmax.f32 %v5522_v10, 0.0  ;;  %v5487_v12 = vmul.f32 %v15313_v4, %v15388_v41 }
 0x38e   : > { %v15412_v8 = vpop.f32.mrb[22].mxu0  ;;  %v5848_v48 = vor.u32 %v5846_v55, %v5845_v51  ;;  %v5849_v33 = vrot.slane %v5845_v51, 4  ;;  %v11783_v57 = vpack.c.bf16 %v5556_v24, %v5556_v24  ;;  %v5559_v63 = vmax.f32 %v5527_v19, 0.0  ;;  %v6107_v21 = vld [vmem:[#allocation3 + $0x78] sm:$0xf] }
 0x38f   : > { %v15415_v49 = vpop.f32.mrb[23].mxu0  ;;  %v5831_v5 = vor.u32 %v5829_v40, %v5828_v39  ;;  %v5832_v60 = vrot.slane %v5828_v39, 4  ;;  %v11781_v37 = vpack.c.bf16 %v5554_v43, %v5554_v43  ;;  %v5557_v1 = vmax.f32 %v5525_v2, 0.0  ;;  %v6159_v53 = vld [vmem:[#allocation3 + $0x10] sm:$0xf] }
 0x390   : > { %v6094_v36 = vsel %vm13701_vm12, %v5848_v48, %v6093_v29  ;;  %v5851_v0 = vshrl.u32 %v11783_v57, 16  ;;  %v5854_v56 = vshll.u32 %v11783_v57, 16  ;;  %v11786_v44 = vpack.c.bf16 %v5559_v63, %v5559_v63  ;;  %v6100_v43 = vld [vmem:[#allocation3 + $0x6c] sm:$0xf] }
 0x391   : > { %6095 = vst [vmem:[#allocation3 + $0x60] sm:$0xf] %v6094_v36  ;;  %v6087_v14 = vsel %vm13701_vm12, %v5831_v5, %v6086_v42  ;;  %v5834_v34 = vshrl.u32 %v11781_v37, 16  ;;  %v5837_v32 = vshll.u32 %v11781_v37, 16  ;;  %v11784_v11 = vpack.c.bf16 %v5557_v1, %v5557_v1  ;;  %v6161_v1 = vld [vmem:[#allocation3 + $0x1c] sm:$0xf] }
 0x392   : > { %6088 = vst [vmem:[#allocation3 + $0x54] sm:$0xf] %v6087_v14  ;;  %v5853_v17 = vrot.slane %v5851_v0, 7  ;;  %v5528_v47 = vadd.f32 %v15318_v38, %v5489_v23  ;;  %v5877_v30 = vshrl.u32 %v11786_v44, 16  ;;  %v5880_v16 = vshll.u32 %v11786_v44, 16  ;;  %v15427_v58 = vpop.f32.mrb[24].mxu0 }
 0x393   : > { %v5836_v54 = vrot.slane %v5834_v34, 7  ;;  %v6230_v7 = vshrl.u32 %v15417_v46, 16  ;;  %v5860_v20 = vshrl.u32 %v11784_v11, 16  ;;  %v5863_v13 = vshll.u32 %v11784_v11, 16  ;;  %v15429_v10 = vpop.f32.mrb[25].mxu0 }
 0x394   : > { %v5856_v15 = vor.u32 %v5854_v56, %v5853_v17  ;;  %v5858_v45 = vrot.slane %v5853_v17, 4  ;;  %v15431_v35 = vrot.slane %v5877_v30, 7  ;;  %v5560_v55 = vmax.f32 %v5528_v47, 0.0  ;;  %v15433_v41 = vpop.f32.mrb[26].mxu0  ;;  %v6160_v56 = vld [vmem:[#allocation3 + $0x18] sm:$0xf] }
 0x395   : > { %v5839_v26 = vor.u32 %v5837_v32, %v5836_v54  ;;  %v5841_v27 = vrot.slane %v5836_v54, 4  ;;  %v15439_v40 = vrot.slane %v5860_v20, 7  ;;  %v5526_v59 = vadd.f32 %v15318_v38, %v5487_v12  ;;  %v15442_v51 = vpop.f32.mrb[27].mxu0 }
 0x396   : > { %v5857_v3 = vsel %vm13695_vm11, %v5849_v33, %v5856_v15  ;;  %v6098_v28 = vsel %vm13688_vm10, %v5858_v45, %v6097_v31  ;;  %v5882_v39 = vor.u32 %v5880_v16, %v15431_v35  ;;  %v11787_v2 = vpack.c.bf16 %v5560_v55, %v5560_v55  ;;  %v6190_v33 = vld [vmem:[#allocation3 + $0x14] sm:$0x1] }
 0x397   : > { %6096 = vst.msk [vmem:[#allocation3 + $0x64] sm:$0xf] %vm280_vm1, %v5857_v3  ;;  %6099 = vst [vmem:[#allocation3 + $0x68] sm:$0x1] %v6098_v28  ;;  %v5840_v24 = vsel %vm13695_vm11, %v5832_v60, %v5839_v26  ;;  %v6091_v29 = vsel %vm13688_vm10, %v5841_v27, %v6090_v52  ;;  %v5865_v19 = vor.u32 %v5863_v13, %v15439_v40  ;;  %v5558_v48 = vmax.f32 %v5526_v59, 0.0 }
 0x398   : > { %6089 = vst.msk [vmem:[#allocation3 + $0x58] sm:$0xf] %vm280_vm1, %v5840_v24  ;;  %6092 = vst [vmem:[#allocation3 + $0x5c] sm:$0x1] %v6091_v29  ;;  %v15454_v42 = vsel %vm1440_vm0, %v15306_v50, 0  ;;  %v6108_v57 = vsel %vm13701_vm12, %v5882_v39, %v6107_v21  ;;  %v6232_v23 = vrot.slane %v6230_v7, 4 }
 0x399   : > { %v6233_v5 = vshll.u32 %v15417_v46, 16  ;;  %v6239_v60 = vshll.u32 %v6159_v53, 16  ;;  %v5883_v37 = vrot.slane %v15431_v35, 4  ;;  %6109 = vst [vmem:[#allocation3 + $0x78] sm:$0xf] %v6108_v57  ;;  %v6101_v63 = vsel %vm13701_vm12, %v5865_v19, %v6100_v43 }
 0x39a   : > { %v5885_v36 = vshrl.u32 %v11787_v2, 16  ;;  %v11785_v0 = vpack.c.bf16 %v5558_v48, %v5558_v48  ;;  %6102 = vst [vmem:[#allocation3 + $0x6c] sm:$0xf] %v6101_v63  ;;  %v6111_v50 = vld [vmem:[#allocation3 + $0x80] sm:$0x1]  ;;  %v6243_v32 = vshrl.u32 %v6159_v53, 16  ;;  %v5492_v63 = vmul.f32 %v15400_v6, %v15313_v4 }
 0x39b   : > { %v6235_v14 = vrot.slane %v6233_v5, 5  ;;  %v6241_v34 = vrot.slane %v6239_v60, 5  ;;  %v6249_v44 = vshll.u32 %v6190_v33, 16  ;;  %v15462_v17 = vpop.f32.mrb[28].mxu0  ;;  %v5866_v46 = vrot.slane %v15439_v40, 4 }
 0x39c   : > { %v5887_v31 = vrot.slane %v5885_v36, 7  ;;  %v5888_v11 = vshll.u32 %v11787_v2, 16  ;;  %v5868_v47 = vshrl.u32 %v11785_v0, 16  ;;  %v15465_v12 = vpop.f32.mrb[29].mxu0  ;;  %v5871_v54 = vshll.u32 %v11785_v0, 16 }
 0x39d   : > { %v6236_v30 = vor.u32 %v6235_v14, %v6232_v23  ;;  %v6245_v16 = vrot.slane %v6243_v32, 4  ;;  %v6251_v7 = vrot.slane %v6249_v44, 5  ;;  %v15467_v15 = vpop.f32.mrb[30].mxu0  ;;  %v6254_v13 = vshrl.u32 %v6160_v56, 16  ;;  %v6104_v27 = vld [vmem:[#allocation3 + $0x74] sm:$0x1] }
 0x39e   : > { %v5890_v45 = vor.u32 %v5888_v11, %v5887_v31  ;;  %v5892_v52 = vrot.slane %v5887_v31, 4  ;;  %v5870_v20 = vrot.slane %v5868_v47, 7  ;;  %v15469_v26 = vpop.f32.mrb[31].mxu0  ;;  %v6257_v3 = vshll.u32 %v6160_v56, 16  ;;  %v6191_v24 = vld [vmem:[#allocation3 + $0x20] sm:$0x1] }
 0x39f   : > { %v6237_v35 = vrot.slane %v6236_v30, 4  ;;  %v6246_v55 = vor.u32 %v6245_v16, %v6241_v34  ;;  %v6263_v28 = vshll.u32 %v6161_v1, 16  ;;  %v6256_v43 = vrot.slane %v6254_v13, 4  ;;  %v6162_v23 = vld [vmem:[#allocation3 + $0x24] sm:$0xf] }
 0x3a0   : > { %v5891_v21 = vsel %vm13695_vm11, %v5883_v37, %v5890_v45  ;;  %v6112_v40 = vsel %vm13688_vm10, %v5892_v52, %v6111_v50  ;;  %v5873_v59 = vor.u32 %v5871_v54, %v5870_v20  ;;  %v5875_v53 = vrot.slane %v5870_v20, 4  ;;  %v15490_v36 = vld [vmem:[%s17341_s4 + $0x4] sm:$0x3]  ;;  %v15502_v11 = vld [vmem:[#allocation3 + $0x28] sm:$0xf] }
 0x3a1   : > { %6110 = vst.msk [vmem:[#allocation3 + $0x7c] sm:$0xf] %vm280_vm1, %v5891_v21  ;;  %6113 = vst [vmem:[#allocation3 + $0x80] sm:$0x1] %v6112_v40  ;;  %v6242_v29 = vsel %vm13682_vm9, %v6237_v35, %v6241_v34  ;;  %v6247_v39 = vrot.slane %v6246_v55, 4  ;;  %v6259_v19 = vrot.slane %v6257_v3, 5  ;;  %v5493_v50 = vmul.f32 %v15412_v8, %v15313_v4 }
 0x3a2   : > { %v5874_v2 = vsel %vm13695_vm11, %v5866_v46, %v5873_v59  ;;  %v6105_v48 = vsel %vm13688_vm10, %v5875_v53, %v6104_v27  ;;  %v6265_v33 = vrot.slane %v6263_v28, 5  ;;  %v6267_v57 = vshrl.u32 %v6161_v1, 16  ;;  %v6121_v53 = vld [vmem:[#allocation3 + $0x90] sm:$0xf] }
 0x3a3   : > { %6103 = vst.msk [vmem:[#allocation3 + $0x70] sm:$0xf] %vm280_vm1, %v5874_v2  ;;  %6106 = vst [vmem:[#allocation3 + $0x74] sm:$0x1] %v6105_v48  ;;  %v6252_v5 = vsel %vm13682_vm9, %v6247_v39, %v6251_v7  ;;  %v6260_v60 = vor.u32 %v6259_v19, %v6256_v43  ;;  %v6273_v37 = vshll.u32 %v6191_v24, 16  ;;  %v5490_v1 = vmul.f32 %v15313_v4, %v15407_v62 }
 0x3a4   : > { %v11388_v0 = vcombine.low %v6242_v29, %v6252_v5  ;;  %v6269_v56 = vrot.slane %v6267_v57, 4  ;;  %v5531_v32 = vadd.f32 %v15318_v38, %v5492_v63  ;;  %v5491_v6 = vmul.f32 %v15313_v4, %v15415_v49  ;;  %v6114_v2 = vld [vmem:[#allocation3 + $0x84] sm:$0xf] }
 0x3a5   : > { %v6261_v14 = vrot.slane %v6260_v60, 4  ;;  %v6275_v34 = vrot.slane %v6273_v37, 5  ;;  %v5529_v46 = vadd.f32 %v15318_v38, %v5490_v1  ;;  %v5532_v31 = vadd.f32 %v15318_v38, %v5493_v50  ;;  %v6125_v60 = vld [vmem:[#allocation3 + $0x98] sm:$0x1]  ;;  %v6118_v50 = vld [vmem:[#allocation3 + $0x8c] sm:$0x1] }
 0x3a6   : > { %12415 = vmatmul.mubr.msk.bf16.vlgmr.msra.gmra.mrb[0].mxu1 %vm1391_vm7, %v11388_v0  ;;  %v6270_v44 = vor.u32 %v6269_v56, %v6265_v33  ;;  %v6278_v62 = vshrl.u32 %v6162_v23, 16  ;;  %v5563_v47 = vmax.f32 %v5531_v32, 0.0  ;;  %v5530_v54 = vadd.f32 %v15318_v38, %v5491_v6 }
 0x3a7   : > { %12447 = vmatpush3.bf16.msra.mxu1 %v15454_v42  ;;  %v6266_v8 = vsel %vm13682_vm9, %v6261_v14, %v6265_v33  ;;  %v6281_v30 = vshll.u32 %v6162_v23, 16  ;;  %v5561_v16 = vmax.f32 %v5529_v46, 0.0  ;;  %v5564_v7 = vmax.f32 %v5532_v31, 0.0  ;;  %v6192_v46 = vld [vmem:[#allocation3 + $0x2c] sm:$0x1] }
 0x3a8   : > { %v6271_v49 = vrot.slane %v6270_v44, 4  ;;  %v6280_v45 = vrot.slane %v6278_v62, 4  ;;  %13241 = vmatprep.subr.msk.bf16.mxu1 %vm1440_vm0, %v15490_v36  ;;  %v11790_v52 = vpack.c.bf16 %v5563_v47, %v5563_v47  ;;  %v5562_v20 = vmax.f32 %v5530_v54, 0.0  ;;  %v15515_v31 = vld [vmem:[#allocation3 + $0x30] sm:$0xf] }
 0x3a9   : > { %v6283_v13 = vrot.slane %v6281_v30, 5  ;;  %v6287_v27 = vshll.u32 %v15502_v11, 16  ;;  %v11788_v35 = vpack.c.bf16 %v5561_v16, %v5561_v16  ;;  %v11791_v55 = vpack.c.bf16 %v5564_v7, %v5564_v7  ;;  %v15521_v30 = vld [vmem:[#allocation3 + $0x34] sm:$0xf] }
 0x3aa   : > { %v6276_v42 = vsel %vm13682_vm9, %v6271_v49, %v6275_v34  ;;  %v6291_v3 = vshrl.u32 %v15502_v11, 16  ;;  %v5911_v21 = vshrl.u32 %v11790_v52, 16  ;;  %v5914_v40 = vshll.u32 %v11790_v52, 16  ;;  %v6193_v52 = vld [vmem:[#allocation3 + $0x38] sm:$0x1] }
 0x3ab   : > { %v11389_v28 = vcombine.low %v6266_v8, %v6276_v42  ;;  %v11789_v59 = vpack.c.bf16 %v5562_v20, %v5562_v20  ;;  %v5894_v24 = vshrl.u32 %v11788_v35, 16  ;;  %v5897_v29 = vshll.u32 %v11788_v35, 16 }
 0x3ac   : > { %v5919_v39 = vshrl.u32 %v11791_v55, 16  ;;  %v5922_v43 = vshll.u32 %v11791_v55, 16  ;;  %v5913_v19 = vrot.slane %v5911_v21, 7  ;;  %v6284_v57 = vor.u32 %v6283_v13, %v6280_v45  ;;  %v15539_v21 = vld [vmem:[#allocation3 + $0x3c] sm:$0xf] }
 0x3ad   : > { %12418 = vmatprep.mubr.msk.bf16.mxu1 %vm1391_vm7, %v11389_v28  ;;  %v5902_v48 = vshrl.u32 %v11789_v59, 16  ;;  %v5905_v33 = vshll.u32 %v11789_v59, 16  ;;  %v5896_v23 = vrot.slane %v5894_v24, 7  ;;  %v6289_v37 = vrot.slane %v6287_v27, 5 }
 0x3ae   : > { %v5921_v5 = vrot.slane %v5919_v39, 7  ;;  %v6293_v63 = vrot.slane %v6291_v3, 4  ;;  %v5916_v0 = vor.u32 %v5914_v40, %v5913_v19  ;;  %v5917_v56 = vrot.slane %v5913_v19, 4 }
 0x3af   : > { %v5904_v1 = vrot.slane %v5902_v48, 7  ;;  %v6285_v14 = vrot.slane %v6284_v57, 4  ;;  %v5899_v34 = vor.u32 %v5897_v29, %v5896_v23  ;;  %v5900_v32 = vrot.slane %v5896_v23, 4 }
 0x3b0   : > { %v5924_v6 = vor.u32 %v5922_v43, %v5921_v5  ;;  %v5926_v44 = vrot.slane %v5921_v5, 4  ;;  %v6122_v62 = vsel %vm13701_vm12, %v5916_v0, %v6121_v53  ;;  %v6294_v45 = vor.u32 %v6293_v63, %v6289_v37 }
 0x3b1   : > { %v5907_v8 = vor.u32 %v5905_v33, %v5904_v1  ;;  %v5909_v47 = vrot.slane %v5904_v1, 4  ;;  %v6290_v54 = vsel %vm13682_vm9, %v6285_v14, %v6289_v37  ;;  %6123 = vst [vmem:[#allocation3 + $0x90] sm:$0xf] %v6122_v62  ;;  %v6115_v49 = vsel %vm13701_vm12, %v5899_v34, %v6114_v2 }
 0x3b2   : > { %v5925_v16 = vsel %vm13695_vm11, %v5917_v56, %v5924_v6  ;;  %v6126_v7 = vsel %vm13688_vm10, %v5926_v44, %v6125_v60  ;;  %6116 = vst [vmem:[#allocation3 + $0x84] sm:$0xf] %v6115_v49  ;;  %v6297_v27 = vshll.u32 %v6192_v46, 16  ;;  %v6302_v42 = vshrl.u32 %v15515_v31, 16  ;;  %v15562_v46 = vld [vmem:[#allocation3 + $0x40] sm:$0xf] }
 0x3b3   : > { %6124 = vst.msk [vmem:[#allocation3 + $0x94] sm:$0xf] %vm280_vm1, %v5925_v16  ;;  %6127 = vst [vmem:[#allocation3 + $0x98] sm:$0x1] %v6126_v7  ;;  %v5908_v20 = vsel %vm13695_vm11, %v5900_v32, %v5907_v8  ;;  %v6119_v13 = vsel %vm13688_vm10, %v5909_v47, %v6118_v50  ;;  %v6295_v35 = vrot.slane %v6294_v45, 4  ;;  %v6305_v55 = vshll.u32 %v15515_v31, 16 }
 0x3b4   : > { %6117 = vst.msk [vmem:[#allocation3 + $0x88] sm:$0xf] %vm280_vm1, %v5908_v20  ;;  %6120 = vst [vmem:[#allocation3 + $0x8c] sm:$0x1] %v6119_v13  ;;  %v6311_v3 = vshll.u32 %v15521_v30, 16  ;;  %v6315_v28 = vshrl.u32 %v15521_v30, 16  ;;  %v5496_v24 = vmul.f32 %v15427_v58, %v15313_v4  ;;  %v5494_v19 = vmul.f32 %v15313_v4, %v15429_v10 }
 0x3b5   : > { %v6299_v40 = vrot.slane %v6297_v27, 5  ;;  %v6304_v59 = vrot.slane %v6302_v42, 4  ;;  %v6321_v53 = vshll.u32 %v6193_v52, 16  ;;  %v6307_v29 = vrot.slane %v6305_v55, 5  ;;  %v6135_v16 = vld [vmem:[#allocation3 + $0xa8] sm:$0xf] }
 0x3b6   : > { %v6313_v39 = vrot.slane %v6311_v3, 5  ;;  %v6317_v43 = vrot.slane %v6315_v28, 4  ;;  %v5535_v33 = vadd.f32 %v15318_v38, %v5496_v24  ;;  %v5497_v57 = vmul.f32 %v15433_v41, %v15313_v4  ;;  %v6128_v13 = vld [vmem:[#allocation3 + $0x9c] sm:$0xf]  ;;  %v6139_v3 = vld [vmem:[#allocation3 + $0xb0] sm:$0x1] }
 0x3b7   : > { %v6300_v2 = vsel %vm13682_vm9, %v6295_v35, %v6299_v40  ;;  %v6323_v48 = vrot.slane %v6321_v53, 5  ;;  %v6308_v5 = vor.u32 %v6307_v29, %v6304_v59  ;;  %v5533_v58 = vadd.f32 %v15318_v38, %v5494_v19 }
 0x3b8   : > { %v11390_v23 = vcombine.low %v6290_v54, %v6300_v2  ;;  %v6318_v60 = vor.u32 %v6317_v43, %v6313_v39  ;;  %v5567_v37 = vmax.f32 %v5535_v33, 0.0  ;;  %v5536_v63 = vadd.f32 %v15318_v38, %v5497_v57  ;;  %v15569_v57 = vld [vmem:[#allocation3 + $0x48] sm:$0xf] }
 0x3b9   : > { %v5495_v10 = vmul.f32 %v15313_v4, %v15442_v51  ;;  %v6326_v0 = vshrl.u32 %v15539_v21, 16  ;;  %v6309_v56 = vrot.slane %v6308_v5, 4  ;;  %v5565_v50 = vmax.f32 %v5533_v58, 0.0 }
 0x3ba   : > { %12419 = vmatmul.mubr.msk.bf16.gmra.mrb[4].mxu1 %vm1391_vm7, %v11390_v23  ;;  %v6319_v1 = vrot.slane %v6318_v60, 4  ;;  %v6329_v41 = vshll.u32 %v15539_v21, 16  ;;  %v11794_v14 = vpack.c.bf16 %v5567_v37, %v5567_v37  ;;  %v5568_v34 = vmax.f32 %v5536_v63, 0.0 }
 0x3bb   : > { %v5534_v32 = vadd.f32 %v15318_v38, %v5495_v10  ;;  %v6328_v6 = vrot.slane %v6326_v0, 4  ;;  %v6314_v44 = vsel %vm13682_vm9, %v6309_v56, %v6313_v39  ;;  %v11792_v51 = vpack.c.bf16 %v5565_v50, %v5565_v50  ;;  %v15567_v39 = vld [vmem:[#allocation3 + $0x44] sm:$0x1]  ;;  %v15578_v56 = vld [vmem:[#allocation3 + $0x4c] sm:$0xf] }
 0x3bc   : > { %v6324_v4 = vsel %vm13682_vm9, %v6319_v1, %v6323_v48  ;;  %v6331_v62 = vrot.slane %v6329_v41, 5  ;;  %v5945_v47 = vshrl.u32 %v11794_v14, 16  ;;  %v5948_v54 = vshll.u32 %v11794_v14, 16  ;;  %v6132_v41 = vld [vmem:[#allocation3 + $0xa4] sm:$0x1] }
 0x3bd   : > { %v11391_v8 = vcombine.low %v6314_v44, %v6324_v4  ;;  %v11795_v49 = vpack.c.bf16 %v5568_v34, %v5568_v34  ;;  %v5928_v7 = vshrl.u32 %v11792_v51, 16  ;;  %v5931_v45 = vshll.u32 %v11792_v51, 16  ;;  %v15584_v14 = vld [vmem:[#allocation3 + $0x50] sm:$0x1] }
 0x3be   : > { %v5566_v52 = vmax.f32 %v5534_v32, 0.0  ;;  %v6332_v38 = vor.u32 %v6331_v62, %v6328_v6  ;;  %v5947_v20 = vrot.slane %v5945_v47, 7  ;;  %v6335_v35 = vshll.u32 %v15562_v46, 16 }
 0x3bf   : > { %12422 = vmatprep.mubr.msk.bf16.mxu1 %vm1391_vm7, %v11391_v8  ;;  %v5953_v27 = vshrl.u32 %v11795_v49, 16  ;;  %v5956_v42 = vshll.u32 %v11795_v49, 16  ;;  %v5930_v55 = vrot.slane %v5928_v7, 7  ;;  %v6339_v59 = vshrl.u32 %v15562_v46, 16 }
 0x3c0   : > { %v11793_v28 = vpack.c.bf16 %v5566_v52, %v5566_v52  ;;  %v6333_v40 = vrot.slane %v6332_v38, 4  ;;  %v5950_v53 = vor.u32 %v5948_v54, %v5947_v20  ;;  %v5951_v24 = vrot.slane %v5947_v20, 4 }
 0x3c1   : > { %v5955_v29 = vrot.slane %v5953_v27, 7  ;;  %v6337_v43 = vrot.slane %v6335_v35, 5  ;;  %v5933_v19 = vor.u32 %v5931_v45, %v5930_v55  ;;  %v5934_v2 = vrot.slane %v5930_v55, 4 }
 0x3c2   : > { %v5936_v48 = vshrl.u32 %v11793_v28, 16  ;;  %v5939_v33 = vshll.u32 %v11793_v28, 16  ;;  %v6136_v23 = vsel %vm13701_vm12, %v5950_v53, %v6135_v16  ;;  %v6341_v10 = vrot.slane %v6339_v59, 4 }
 0x3c3   : > { %v5958_v5 = vor.u32 %v5956_v42, %v5955_v29  ;;  %v5960_v60 = vrot.slane %v5955_v29, 4  ;;  %v6338_v58 = vsel %vm13682_vm9, %v6333_v40, %v6337_v43  ;;  %6137 = vst [vmem:[#allocation3 + $0xa8] sm:$0xf] %v6136_v23  ;;  %v6129_v37 = vsel %vm13701_vm12, %v5933_v19, %v6128_v13  ;;  %v13355_v13 = vld [vmem:[%s17339_s2] ss:$0 sm:$0xff] }
 0x3c4   : > { %v5938_v63 = vrot.slane %v5936_v48, 7  ;;  %v6345_v0 = vshll.u32 %v15567_v39, 16  ;;  %6130 = vst [vmem:[#allocation3 + $0x9c] sm:$0xf] %v6129_v37  ;;  %v6350_v34 = vshrl.u32 %v15569_v57, 16  ;;  %v6353_v32 = vshll.u32 %v15569_v57, 16 }
 0x3c5   : > { %v5959_v1 = vsel %vm13695_vm11, %v5951_v24, %v5958_v5  ;;  %v6140_v50 = vsel %vm13688_vm10, %v5960_v60, %v6139_v3  ;;  %v6342_v4 = vor.u32 %v6341_v10, %v6337_v43  ;;  %v6359_v47 = vshll.u32 %v15578_v56, 16  ;;  %v15601_v42 = vld [vmem:[#allocation3 + $0x54] sm:$0xf]  ;;  %v13356_v24 = vld [vmem:[%s17340_s3] ss:$0 sm:$0xff] }
 0x3c6   : > { %6138 = vst.msk [vmem:[#allocation3 + $0xac] sm:$0xf] %vm280_vm1, %v5959_v1  ;;  %6141 = vst [vmem:[#allocation3 + $0xb0] sm:$0x1] %v6140_v50  ;;  %v5941_v6 = vor.u32 %v5939_v33, %v5938_v63  ;;  %v5943_v44 = vrot.slane %v5938_v63, 4  ;;  %v6347_v51 = vrot.slane %v6345_v0, 5  ;;  %v5500_v27 = vmul.f32 %v13355_v13, %v15462_v17 }
 0x3c7   : > { %v6352_v62 = vrot.slane %v6350_v34, 4  ;;  %v6355_v8 = vrot.slane %v6353_v32, 5  ;;  %v6363_v54 = vshrl.u32 %v15578_v56, 16  ;;  %v6343_v7 = vrot.slane %v6342_v4, 4  ;;  %v15621_v32 = vld [vmem:[#allocation3 + $0x5c] sm:$0x1] }
 0x3c8   : > { %v5942_v49 = vsel %vm13695_vm11, %v5934_v2, %v5941_v6  ;;  %v6133_v16 = vsel %vm13688_vm10, %v5943_v44, %v6132_v41  ;;  %v6369_v45 = vshll.u32 %v15584_v14, 16  ;;  %v6361_v38 = vrot.slane %v6359_v47, 5  ;;  %v15611_v2 = vld [vmem:[#allocation3 + $0x58] sm:$0xf]  ;;  %v15623_v6 = vld [vmem:[#allocation3 + $0x60] sm:$0xf] }
 0x3c9   : > { %6131 = vst.msk [vmem:[#allocation3 + $0xa0] sm:$0xf] %vm280_vm1, %v5942_v49  ;;  %6134 = vst [vmem:[#allocation3 + $0xa4] sm:$0x1] %v6133_v16  ;;  %v6356_v52 = vor.u32 %v6355_v8, %v6352_v62  ;;  %v6365_v20 = vrot.slane %v6363_v54, 4  ;;  %v6348_v35 = vsel %vm13682_vm9, %v6343_v7, %v6347_v51  ;;  %v5498_v3 = vmul.f32 %v13355_v13, %v15465_v12 }
 0x3ca   : > { %v6371_v55 = vrot.slane %v6369_v45, 5  ;;  %v5501_v28 = vmul.f32 %v13355_v13, %v15467_v15  ;;  %v11392_v40 = vcombine.low %v6338_v58, %v6348_v35  ;;  %v5539_v29 = vadd.f32 %v13356_v24, %v5500_v27  ;;  %v6149_v7 = vld [vmem:[#allocation3 + $0xc0] sm:$0xf] }
 0x3cb   : > { %v6357_v59 = vrot.slane %v6356_v52, 4  ;;  %v6366_v53 = vor.u32 %v6365_v20, %v6361_v38  ;;  %v5537_v43 = vadd.f32 %v13356_v24, %v5498_v3  ;;  %v5499_v19 = vmul.f32 %v13355_v13, %v15469_v26  ;;  %v6142_v13 = vld [vmem:[#allocation3 + $0xb4] sm:$0xf] }
 0x3cc   : > { %v5540_v17 = vadd.f32 %v13356_v24, %v5501_v28  ;;  %v6374_v48 = vshrl.u32 %v15601_v42, 16  ;;  %12423 = vmatmul.mubr.msk.bf16.gmra.mrb[8].mxu1 %vm1391_vm7, %v11392_v40  ;;  %v5571_v33 = vmax.f32 %v5539_v29, 0.0  ;;  %v6377_v23 = vshll.u32 %v15601_v42, 16  ;;  %v6153_v40 = vld [vmem:[#allocation3 + $0xc8] sm:$0x1] }
 0x3cd   : > { %v6362_v12 = vsel %vm13682_vm9, %v6357_v59, %v6361_v38  ;;  %v6367_v15 = vrot.slane %v6366_v53, 4  ;;  %v5569_v5 = vmax.f32 %v5537_v43, 0.0  ;;  %v5538_v58 = vadd.f32 %v13356_v24, %v5499_v19  ;;  %v6146_v19 = vld [vmem:[#allocation3 + $0xbc] sm:$0x1] }
 0x3ce   : > { %v5572_v60 = vmax.f32 %v5540_v17, 0.0  ;;  %v6376_v37 = vrot.slane %v6374_v48, 4  ;;  %v11798_v63 = vpack.c.bf16 %v5571_v33, %v5571_v33  ;;  %v6379_v10 = vrot.slane %v6377_v23, 5  ;;  %v15636_v23 = vld [vmem:[#allocation3 + $0x64] sm:$0xf] }
 0x3cf   : > { %v6372_v26 = vsel %vm13682_vm9, %v6367_v15, %v6371_v55  ;;  %v6383_v0 = vshll.u32 %v15611_v2, 16  ;;  %v11796_v50 = vpack.c.bf16 %v5569_v5, %v5569_v5  ;;  %v5570_v34 = vmax.f32 %v5538_v58, 0.0  ;;  %v15638_v5 = vld [vmem:[#allocation3 + $0x68] sm:$0x1] }
 0x3d0   : > { %v11393_v1 = vcombine.low %v6362_v12, %v6372_v26  ;;  %v11799_v41 = vpack.c.bf16 %v5572_v60, %v5572_v60  ;;  %v5979_v44 = vshrl.u32 %v11798_v63, 16  ;;  %v5982_v4 = vshll.u32 %v11798_v63, 16  ;;  %v15646_v63 = vld [vmem:[#allocation3 + $0x6c] sm:$0xf] }
 0x3d1   : > { %v6380_v51 = vor.u32 %v6379_v10, %v6376_v37  ;;  %v15625_v62 = vrot.slane %v6383_v0, 5  ;;  %v5962_v8 = vshrl.u32 %v11796_v50, 16  ;;  %v5965_v47 = vshll.u32 %v11796_v50, 16  ;;  %v15648_v10 = vld [vmem:[#allocation3 + $0x70] sm:$0xf] }
 0x3d2   : > { %12426 = vmatprep.mubr.msk.bf16.mxu1 %vm1391_vm7, %v11393_v1  ;;  %v5987_v54 = vshrl.u32 %v11799_v41, 16  ;;  %v5990_v49 = vshll.u32 %v11799_v41, 16  ;;  %v5981_v16 = vrot.slane %v5979_v44, 7  ;;  %v11797_v45 = vpack.c.bf16 %v5570_v34, %v5570_v34 }
 0x3d3   : > { %v6381_v52 = vrot.slane %v6380_v51, 4  ;;  %v6387_v38 = vshrl.u32 %v15611_v2, 16  ;;  %v5964_v20 = vrot.slane %v5962_v8, 7  ;;  %v6393_v35 = vshll.u32 %v15621_v32, 16  ;;  %v15656_v51 = vld [vmem:[#allocation3 + $0x78] sm:$0xf] }
 0x3d4   : > { %v5989_v27 = vrot.slane %v5987_v54, 7  ;;  %v6398_v55 = vshrl.u32 %v15623_v6, 16  ;;  %v5984_v3 = vor.u32 %v5982_v4, %v5981_v16  ;;  %v5985_v28 = vrot.slane %v5981_v16, 4 }
 0x3d5   : > { %v5970_v59 = vshrl.u32 %v11797_v45, 16  ;;  %v5973_v53 = vshll.u32 %v11797_v45, 16  ;;  %v5967_v24 = vor.u32 %v5965_v47, %v5964_v20  ;;  %v5968_v29 = vrot.slane %v5964_v20, 4 }
 0x3d6   : > { %v5992_v43 = vor.u32 %v5990_v49, %v5989_v27  ;;  %v5994_v17 = vrot.slane %v5989_v27, 4  ;;  %v6150_v48 = vsel %vm13701_vm12, %v5984_v3, %v6149_v7  ;;  %v6386_v15 = vsel %vm13682_vm9, %v6381_v52, %v15625_v62  ;;  %v15664_v52 = vld [vmem:[#allocation3 + $0x74] sm:$0x1] }
 0x3d7   : > { %v5972_v12 = vrot.slane %v5970_v59, 7  ;;  %v6389_v33 = vrot.slane %v6387_v38, 4  ;;  %6151 = vst [vmem:[#allocation3 + $0xc0] sm:$0xf] %v6150_v48  ;;  %v6143_v60 = vsel %vm13701_vm12, %v5967_v24, %v6142_v13  ;;  %v6395_v26 = vrot.slane %v6393_v35, 5 }
 0x3d8   : > { %v5993_v58 = vsel %vm13695_vm11, %v5985_v28, %v5992_v43  ;;  %v6154_v37 = vsel %vm13688_vm10, %v5994_v17, %v6153_v40  ;;  %6144 = vst [vmem:[#allocation3 + $0xb4] sm:$0xf] %v6143_v60  ;;  %v6400_v50 = vrot.slane %v6398_v55, 4  ;;  %v6401_v41 = vshll.u32 %v15623_v6, 16  ;;  %v15666_v38 = vld [vmem:[#allocation3 + $0x7c] sm:$0xf] }
 0x3d9   : > { %6152 = vst.msk [vmem:[#allocation3 + $0xc4] sm:$0xf] %vm280_vm1, %v5993_v58  ;;  %6155 = vst [vmem:[#allocation3 + $0xc8] sm:$0x1] %v6154_v37  ;;  %v5975_v0 = vor.u32 %v5973_v53, %v5972_v12  ;;  %v5977_v1 = vrot.slane %v5972_v12, 4  ;;  %v6390_v9 = vor.u32 %v6389_v33, %v15625_v62  ;;  %v6407_v34 = vshll.u32 %v15636_v23, 16 }
 0x3da   : > { %v6411_v44 = vshrl.u32 %v15636_v23, 16  ;;  %v6417_v4 = vshll.u32 %v15638_v5, 16  ;;  %v6422_v62 = vshrl.u32 %v15646_v63, 16  ;;  %v6403_v49 = vrot.slane %v6401_v41, 5  ;;  %v15674_v53 = vld [vmem:[#allocation3 + $0x80] sm:$0x1] }
 0x3db   : > { %v5976_v8 = vsel %vm13695_vm11, %v5968_v29, %v5975_v0  ;;  %v6147_v47 = vsel %vm13688_vm10, %v5977_v1, %v6146_v19  ;;  %v6391_v54 = vrot.slane %v6390_v9, 4  ;;  %v6409_v16 = vrot.slane %v6407_v34, 5  ;;  %v15679_v48 = vld [vmem:[#allocation3 + $0x84] sm:$0xf]  ;;  %v15682_v58 = vld [vmem:[#allocation3 + $0x88] sm:$0xf] }
 0x3dc   : > { %6145 = vst.msk [vmem:[#allocation3 + $0xb8] sm:$0xf] %vm280_vm1, %v5976_v8  ;;  %6148 = vst [vmem:[#allocation3 + $0xbc] sm:$0x1] %v6147_v47  ;;  %v6413_v7 = vrot.slane %v6411_v44, 4  ;;  %v6419_v45 = vrot.slane %v6417_v4, 5  ;;  %v6404_v35 = vor.u32 %v6403_v49, %v6400_v50 }
 0x3dd   : > { %v6396_v18 = vsel %vm13682_vm9, %v6391_v54, %v6395_v26  ;;  %v6424_v20 = vrot.slane %v6422_v62, 4  ;;  %v6425_v61 = vshll.u32 %v15646_v63, 16  ;;  %v6431_v13 = vshll.u32 %v15648_v10, 16  ;;  %v15689_v44 = vld [vmem:[#allocation3 + $0x90] sm:$0xf] }
 0x3de   : > { %v11394_v27 = vcombine.low %v6386_v15, %v6396_v18  ;;  %v6414_v55 = vor.u32 %v6413_v7, %v6409_v16  ;;  %v6435_v3 = vshrl.u32 %v15648_v10, 16  ;;  %v6441_v59 = vshll.u32 %v15664_v52, 16  ;;  %v15692_v54 = vld [vmem:[#allocation3 + $0x8c] sm:$0x1] }
 0x3df   : > { %v6427_v28 = vrot.slane %v6425_v61, 5  ;;  %v6433_v40 = vrot.slane %v6431_v13, 5  ;;  %v6446_v24 = vshrl.u32 %v15656_v51, 16  ;;  %v6405_v29 = vrot.slane %v6404_v35, 4 }
 0x3e0   : > { %12427 = vmatmul.mubr.msk.bf16.gmra.mrb[12].mxu1 %vm1391_vm7, %v11394_v27  ;;  %v6415_v43 = vrot.slane %v6414_v55, 4  ;;  %v6437_v17 = vrot.slane %v6435_v3, 4  ;;  %v6449_v19 = vshll.u32 %v15656_v51, 16  ;;  %v6443_v15 = vrot.slane %v6441_v59, 5  ;;  %v15702_v27 = vld [vmem:[#allocation3 + $0x94] sm:$0xf] }
 0x3e1   : > { %v6428_v12 = vor.u32 %v6427_v28, %v6424_v20  ;;  %v6448_v33 = vrot.slane %v6446_v24, 4  ;;  %v6455_v60 = vshll.u32 %v15666_v38, 16  ;;  %v6410_v37 = vsel %vm13682_vm9, %v6405_v29, %v6409_v16 }
 0x3e2   : > { %v6420_v26 = vsel %vm13682_vm9, %v6415_v43, %v6419_v45  ;;  %v6438_v0 = vor.u32 %v6437_v17, %v6433_v40  ;;  %v6451_v1 = vrot.slane %v6449_v19, 5  ;;  %v6459_v34 = vshrl.u32 %v15666_v38, 16  ;;  %v15710_v19 = vld [vmem:[#allocation3 + $0x98] sm:$0x1] }
 0x3e3   : > { %v11395_v9 = vcombine.low %v6410_v37, %v6420_v26  ;;  %v6429_v50 = vrot.slane %v6428_v12, 4  ;;  %v6457_v41 = vrot.slane %v6455_v60, 5  ;;  %v6465_v47 = vshll.u32 %v15674_v53, 16 }
 0x3e4   : > { %v6439_v4 = vrot.slane %v6438_v0, 4  ;;  %v6452_v8 = vor.u32 %v6451_v1, %v6448_v33  ;;  %v6470_v62 = vshrl.u32 %v15679_v48, 16  ;;  %v6461_v16 = vrot.slane %v6459_v34, 4  ;;  %v15715_v0 = vld [vmem:[#allocation3 + $0x9c] sm:$0xf] }
 0x3e5   : > { %12430 = vmatprep.mubr.msk.bf16.mxu1 %vm1391_vm7, %v11395_v9  ;;  %v6434_v49 = vsel %vm13682_vm9, %v6429_v50, %v6433_v40  ;;  %v6473_v7 = vshll.u32 %v15679_v48, 16  ;;  %v6479_v45 = vshll.u32 %v15682_v58, 16  ;;  %v6467_v61 = vrot.slane %v6465_v47, 5  ;;  %v15719_v34 = vld [vmem:[#allocation3 + $0xa0] sm:$0xf] }
 0x3e6   : > { %v6444_v18 = vsel %vm13682_vm9, %v6439_v4, %v6443_v15  ;;  %v6453_v20 = vrot.slane %v6452_v8, 4  ;;  %v6472_v13 = vrot.slane %v6470_v62, 4  ;;  %v6462_v55 = vor.u32 %v6461_v16, %v6457_v41 }
 0x3e7   : > { %v11396_v35 = vcombine.low %v6434_v49, %v6444_v18  ;;  %v6475_v3 = vrot.slane %v6473_v7, 5  ;;  %v6481_v28 = vrot.slane %v6479_v45, 5  ;;  %v6483_v59 = vshrl.u32 %v15682_v58, 16  ;;  %v15722_v49 = vld [vmem:[#allocation3 + $0xa4] sm:$0x1] }
 0x3e8   : > { %v6458_v40 = vsel %vm13682_vm9, %v6453_v20, %v6457_v41  ;;  %v6489_v24 = vshll.u32 %v15692_v54, 16  ;;  %v6494_v29 = vshrl.u32 %v15689_v44, 16  ;;  %v6463_v43 = vrot.slane %v6462_v55, 4  ;;  %v15728_v20 = vld [vmem:[#allocation3 + $0xa8] sm:$0xf] }
 0x3e9   : > { %12431 = vmatmul.mubr.msk.bf16.gmra.mrb[16].mxu1 %vm1391_vm7, %v11396_v35  ;;  %v6476_v17 = vor.u32 %v6475_v3, %v6472_v13  ;;  %v6497_v12 = vshll.u32 %v15689_v44, 16  ;;  %v6503_v15 = vshll.u32 %v15702_v27, 16  ;;  %v6485_v33 = vrot.slane %v6483_v59, 4 }
 0x3ea   : > { %v6491_v60 = vrot.slane %v6489_v24, 5  ;;  %v6496_v37 = vrot.slane %v6494_v29, 4  ;;  %v6507_v26 = vshrl.u32 %v15702_v27, 16  ;;  %v6468_v1 = vsel %vm13682_vm9, %v6463_v43, %v6467_v61 }
 0x3eb   : > { %v6477_v9 = vrot.slane %v6476_v17, 4  ;;  %v6499_v50 = vrot.slane %v6497_v12, 5  ;;  %v6505_v41 = vrot.slane %v6503_v15, 5  ;;  %v11397_v4 = vcombine.low %v6458_v40, %v6468_v1  ;;  %v15738_v15 = vld [vmem:[#allocation3 + $0xb0] sm:$0x1] }
 0x3ec   : > { %v6486_v8 = vor.u32 %v6485_v33, %v6481_v28  ;;  %v6509_v47 = vrot.slane %v6507_v26, 4  ;;  %v6513_v62 = vshll.u32 %v15710_v19, 16  ;;  %v6518_v45 = vshrl.u32 %v15715_v0, 16  ;;  %v15740_v33 = vld [vmem:[#allocation3 + $0xb4] sm:$0xf] }
 0x3ed   : > { %v6482_v16 = vsel %vm13682_vm9, %v6477_v9, %v6481_v28  ;;  %v6500_v7 = vor.u32 %v6499_v50, %v6496_v37  ;;  %v6521_v18 = vshll.u32 %v15715_v0, 16  ;;  %12434 = vmatprep.mubr.msk.bf16.mxu1 %vm1391_vm7, %v11397_v4  ;;  %v6527_v55 = vshll.u32 %v15719_v34, 16  ;;  %v15733_v28 = vld [vmem:[#allocation3 + $0xac] sm:$0xf] }
 0x3ee   : > { %v6487_v61 = vrot.slane %v6486_v8, 4  ;;  %v6510_v13 = vor.u32 %v6509_v47, %v6505_v41  ;;  %v6515_v35 = vrot.slane %v6513_v62, 5  ;;  %v6520_v40 = vrot.slane %v6518_v45, 4  ;;  %v15748_v8 = vld [vmem:[#allocation3 + $0xb8] sm:$0xf] }
 0x3ef   : > { %v6501_v3 = vrot.slane %v6500_v7, 4  ;;  %v6523_v59 = vrot.slane %v6521_v18, 5  ;;  %v6531_v24 = vshrl.u32 %v15719_v34, 16  ;;  %v6529_v17 = vrot.slane %v6527_v55, 5 }
 0x3f0   : > { %v6492_v29 = vsel %vm13682_vm9, %v6487_v61, %v6491_v60  ;;  %v6511_v43 = vrot.slane %v6510_v13, 4  ;;  %v6537_v12 = vshll.u32 %v15722_v49, 16  ;;  %v6542_v4 = vshrl.u32 %v15728_v20, 16 }
 0x3f1   : > { %v11398_v37 = vcombine.low %v6482_v16, %v6492_v29  ;;  %v6524_v26 = vor.u32 %v6523_v59, %v6520_v40  ;;  %v6533_v1 = vrot.slane %v6531_v24, 4  ;;  %v6506_v9 = vsel %vm13682_vm9, %v6501_v3, %v6505_v41  ;;  %v15758_v29 = vld [vmem:[#allocation3 + $0xbc] sm:$0x1] }
 0x3f2   : > { %v6516_v50 = vsel %vm13682_vm9, %v6511_v43, %v6515_v35  ;;  %v6545_v60 = vshll.u32 %v15728_v20, 16  ;;  %v6551_v16 = vshll.u32 %v15733_v28, 16  ;;  %v6539_v45 = vrot.slane %v6537_v12, 5 }
 0x3f3   : > { %12435 = vmatmul.mubr.msk.bf16.gmra.mrb[20].mxu1 %vm1391_vm7, %v11398_v37  ;;  %v11399_v47 = vcombine.low %v6506_v9, %v6516_v50  ;;  %v6525_v62 = vrot.slane %v6524_v26, 4  ;;  %v6534_v7 = vor.u32 %v6533_v1, %v6529_v17  ;;  %v6544_v18 = vrot.slane %v6542_v4, 4 }
 0x3f4   : > { %v6547_v61 = vrot.slane %v6545_v60, 5  ;;  %v6555_v41 = vshrl.u32 %v15733_v28, 16  ;;  %v6553_v35 = vrot.slane %v6551_v16, 5  ;;  %v6561_v55 = vshll.u32 %v15738_v15, 16 }
 0x3f5   : > { %12438 = vmatprep.mubr.msk.bf16.mxu1 %vm1391_vm7, %v11399_v47  ;;  %v6535_v13 = vrot.slane %v6534_v7, 4  ;;  %v6566_v3 = vshrl.u32 %v15740_v33, 16  ;;  %v6530_v40 = vsel %vm13682_vm9, %v6525_v62, %v6529_v17  ;;  %v6569_v43 = vshll.u32 %v15740_v33, 16 }
 0x3f6   : > { %v6548_v59 = vor.u32 %v6547_v61, %v6544_v18  ;;  %v6557_v24 = vrot.slane %v6555_v41, 4  ;;  %v6575_v26 = vshll.u32 %v15748_v8, 16  ;;  %v6579_v1 = vshrl.u32 %v15748_v8, 16 }
 0x3f7   : > { %v6540_v12 = vsel %vm13682_vm9, %v6535_v13, %v6539_v45  ;;  %v6568_v37 = vrot.slane %v6566_v3, 4  ;;  %v6571_v60 = vrot.slane %v6569_v43, 5  ;;  %v6585_v62 = vshll.u32 %v15758_v29, 16  ;;  %v15771_v43 = vld [vmem:[#allocation3 + $0x4] sm:$0xf] }
 0x3f8   : > { %v11400_v9 = vcombine.low %v6530_v40, %v6540_v12  ;;  %v6549_v50 = vrot.slane %v6548_v59, 4  ;;  %v6558_v4 = vor.u32 %v6557_v24, %v6553_v35  ;;  %v6577_v47 = vrot.slane %v6575_v26, 5  ;;  %v13357_v24 = vld [vmem:[#allocation3] sm:$0xf] }
 0x3f9   : > { %v6581_v17 = vrot.slane %v6579_v1, 4  ;;  %v6563_v16 = vrot.slane %v6561_v55, 5  ;;  %v6572_v18 = vor.u32 %v6571_v60, %v6568_v37  ;;  %v6587_v59 = vrot.slane %v6585_v62, 5  ;;  %v7153_v62 = vld [vmem:[#allocation3 + $0x78] sm:$0xe] }
 0x3fa   : > { %v6559_v7 = vrot.slane %v6558_v4, 4  ;;  %v6554_v45 = vsel %vm13682_vm9, %v6549_v50, %v6553_v35  ;;  %v11419_v12 = vcombine.low %v13357_v24, %v15771_v43  ;;  %v11426_v37 = vcombine.low %v15601_v42, %v15611_v2 }
 0x3fb   : > { %12439 = vmatmul.mubr.msk.bf16.gmra.mrb[24].mxu1 %vm1391_vm7, %v11400_v9  ;;  %v6582_v61 = vor.u32 %v6581_v17, %v6577_v47  ;;  %v6573_v13 = vrot.slane %v6572_v18, 4  ;;  %v11427_v35 = vcombine.low %v15623_v6, %v15636_v23  ;;  %v11428_v26 = vcombine.low %v15646_v63, %v15648_v10  ;;  %v13364_v63 = vld [vmem:[#allocation3 + $0x8] sm:$0x1] }
 0x3fc   : > { %v6564_v41 = vsel %vm13682_vm9, %v6559_v7, %v6563_v16  ;;  %v11429_v9 = vcombine.low %v15656_v51, %v15666_v38  ;;  %v13359_v7 = vld [vmem:[#allocation3 + $0xc] sm:$0xf]  ;;  %v15799_v16 = vld [vmem:[#allocation3 + $0x10] sm:$0xf]  ;;  %v7242_v24 = vrot.slane %v15611_v2, 5  ;;  %v7287_v4 = vrot.slane %v15722_v49, 5 }
 0x3fd   : > { %v11401_v3 = vcombine.low %v6554_v45, %v6564_v41  ;;  %v6583_v40 = vrot.slane %v6582_v61, 4  ;;  %v6578_v55 = vsel %vm13682_vm9, %v6573_v13, %v6577_v47  ;;  %v11420_v18 = vcombine.low %v13359_v7, %v15799_v16  ;;  %v13361_v45 = vld [vmem:[#allocation3 + $0x18] sm:$0xf]  ;;  %v15804_v41 = vld [vmem:[#allocation3 + $0x1c] sm:$0xf] }
 0x3fe   : > { %v7402_v61 = vsel %vm1440_vm0, %v15490_v36, 0  ;;  %v11421_v13 = vcombine.low %v13361_v45, %v15804_v41  ;;  %v7152_v36 = vld [vmem:[#allocation3 + $0x6c] sm:$0xe]  ;;  %v7249_v7 = vrot.slane %v15636_v23, 5  ;;  %v7154_v47 = vld [vmem:[#allocation3 + $0x84] sm:$0xe]  ;;  %v17539_v42 = vcombine.low %v15679_v48, %v15682_v58 }
 0x3ff   : > { %12442 = vmatprep.mubr.msk.bf16.mxu1 %vm1391_vm7, %v11401_v3  ;;  %v6588_v1 = vsel %vm13682_vm9, %v6583_v40, %v6587_v59  ;;  %v15810_v3 = vld [vmem:[%s17341_s4 + $0x6] sm:$0x3]  ;;  %v7150_v40 = vld [vmem:[#allocation3 + $0x54] sm:$0xe]  ;;  %v7151_v59 = vld [vmem:[#allocation3 + $0x60] sm:$0xe]  ;;  %v17540_v2 = vcombine.low %v15689_v44, %v15702_v27  ;;  %v17541_v51 = vcombine.low %v15715_v0, %v15719_v34  ;;  %v17543_v0 = vcombine.low %v15740_v33, %v15748_v8 }
 0x400   : > { %v11402_v60 = vcombine.low %v6578_v55, %v6588_v1  ;;  %v11423_v1 = vcombine.low %v15515_v31, %v15521_v30  ;;  %v11459_v45 = vrot.slane %v7151_v59, 9  ;;  %v7256_v31 = vrot.slane %v15648_v10, 5  ;;  %v7143_v23 = vld [vmem:[#allocation3] sm:$0xe] }
 0x401   : > { %v7298_v49 = vrot.slane %v15748_v8, 5  ;;  %v7193_v6 = vrot.slane %v15771_v43, 5  ;;  %v7196_v10 = vrot.slane %v13364_v63, 5  ;;  %v7200_v44 = vrot.slane %v15799_v16, 5  ;;  %v13368_v8 = vld [vmem:[#allocation3 + $0x34] sm:$0xf] }
 0x402   : > { %v7146_v63 = vld [vmem:[#allocation3 + $0x24] sm:$0xe] }
 0x403   : > { %12443 = vmatmul.mubr.msk.bf16.gmra.mrb[28].mxu1 %vm1391_vm7, %v11402_v60  ;;  %v11458_v60 = vrot.slane %v7150_v40, 9  ;;  %v15834_v40 = vsel %vm14095_vm15, %v11459_v45, %v7249_v7  ;;  %v7155_v45 = vld [vmem:[#allocation3 + $0x90] sm:$0xe] }
 0x404   : > { %12448 = vmatprep.mubr.msk.bf16.mxu1 %vm1391_vm7, %v11419_v12  ;;  %v13363_v12 = vld [vmem:[#allocation3 + $0x24] sm:$0xf] }
 0x405   : > { %v11422_v55 = vcombine.low %v13363_v12, %v15502_v11  ;;  %v15825_v17 = vsel %vm14095_vm15, %v11458_v60, %v7242_v24  ;;  %v7251_v11 = vrot.slane %v7249_v7, 4  ;;  %v11460_v12 = vrot.slane %v7152_v36, 9 }
 0x406   : > { %v7258_v36 = vrot.slane %v7256_v31, 4  ;;  %v11461_v60 = vrot.slane %v7153_v62, 9  ;;  %v7280_v7 = vrot.slane %v15710_v19, 5 }
 0x407   : > { %v15852_v59 = vsel %vm14095_vm15, %v11460_v12, %v7256_v31  ;;  %v7277_v12 = vrot.slane %v15702_v27, 5  ;;  %v7156_v31 = vld [vmem:[#allocation3 + $0x9c] sm:$0xe]  ;;  %v7207_v27 = vrot.slane %v15804_v41, 5  ;;  %v13367_v41 = vld [vmem:[#allocation3 + $0x28] sm:$0xf] }
 0x40b   : > { %12449 = vmatmul.mubr.msk.bf16.vlgmr.msra.gmra.mrb[0].mxu1 %vm1391_vm7, %v11420_v18  ;;  %v7244_v18 = vrot.slane %v7242_v24, 4 }
 0x40c   : > { %12481 = vmatpush3.bf16.msra.mxu1 %v7402_v61  ;;  %12452 = vmatprep.mubr.msk.bf16.mxu1 %vm1391_vm7, %v11421_v13  ;;  %v7245_v61 = vrot.slane %v15621_v32, 5  ;;  %v7252_v13 = vrot.slane %v15638_v5, 5  ;;  %v7259_v32 = vrot.slane %v15664_v52, 5  ;;  %v7263_v5 = vrot.slane %v15666_v38, 5 }
 0x40d   : > { %13242 = vmatprep.subr.msk.bf16.mxu1 %vm1440_vm0, %v15810_v3  ;;  %v7266_v52 = vrot.slane %v15674_v53, 5  ;;  %v7279_v53 = vrot.slane %v7277_v12, 4  ;;  %v17542_v38 = vcombine.low %v15728_v20, %v15733_v28  ;;  %v7209_v20 = vrot.slane %v7207_v27, 4 }
 0x40e   : > { %v15830_v30 = vsel %vm14095_vm15, %v7244_v18, %v7245_v61  ;;  %v15842_v24 = vsel %vm14095_vm15, %v7251_v11, %v7252_v13  ;;  %v11424_v18 = vcombine.low %v15539_v21, %v15562_v46  ;;  %v7265_v61 = vrot.slane %v7263_v5, 4 }
 0x40f   : > { %v15856_v62 = vsel %vm14095_vm15, %v7258_v36, %v7259_v32  ;;  %v15860_v21 = vsel %vm14095_vm15, %v11461_v60, %v7263_v5  ;;  %v7270_v13 = vrot.slane %v15682_v58, 5  ;;  %v11462_v11 = vrot.slane %v7154_v47, 9  ;;  %v7157_v47 = vld [vmem:[#allocation3 + $0xa8] sm:$0xe] }
 0x410   : > { %v7273_v36 = vrot.slane %v15692_v54, 5  ;;  %v11463_v60 = vrot.slane %v7155_v45, 9  ;;  %v11464_v54 = vrot.slane %v7156_v31, 9  ;;  %v7291_v45 = vrot.slane %v15733_v28, 5  ;;  %v7158_v31 = vld [vmem:[#allocation3 + $0xb4] sm:$0xe] }
 0x411   : > { %v7272_v5 = vrot.slane %v7270_v13, 4  ;;  %v15893_v19 = vsel %vm14095_vm15, %v7279_v53, %v7280_v7  ;;  %v13365_v28 = vld [vmem:[#allocation3 + $0x14] sm:$0x1] }
 0x412   : > { %v15886_v32 = vsel %vm14095_vm15, %v11463_v60, %v7277_v12  ;;  %v7293_v50 = vrot.slane %v7291_v45, 4  ;;  %v7294_v12 = vrot.slane %v15738_v15, 5  ;;  %v11425_v60 = vcombine.low %v15569_v57, %v15578_v56 }
 0x413   : > { %12453 = vmatmul.mubr.msk.bf16.gmra.mrb[4].mxu1 %vm1391_vm7, %v11422_v55  ;;  %v15868_v55 = vsel %vm14095_vm15, %v7265_v61, %v7266_v52  ;;  %v7284_v61 = vrot.slane %v15719_v34, 5  ;;  %v15882_v52 = vsel %vm14095_vm15, %v7272_v5, %v7273_v36  ;;  %v11465_v36 = vrot.slane %v7157_v47, 9  ;;  %v7144_v34 = vld [vmem:[#allocation3 + $0xc] sm:$0xe] }
 0x414   : > { %12456 = vmatprep.mubr.msk.bf16.mxu1 %vm1391_vm7, %v11423_v1  ;;  %v15876_v1 = vsel %vm14095_vm15, %v11462_v11, %v7270_v13  ;;  %v15919_v57 = vsel %vm14095_vm15, %v7293_v50, %v7294_v12  ;;  %v7300_v47 = vrot.slane %v7298_v49, 4  ;;  %v11452_v12 = vrot.slane %v7144_v34, 9 }
 0x415   : > { %v7286_v11 = vrot.slane %v7284_v61, 4  ;;  %v15903_v13 = vsel %vm14095_vm15, %v11464_v54, %v7284_v61  ;;  %v15915_v15 = vsel %vm14095_vm15, %v11465_v36, %v7291_v45  ;;  %v11466_v61 = vrot.slane %v7158_v31, 9 }
 0x416   : > { %v7214_v31 = vrot.slane %v13367_v41, 5  ;;  %v17562_v53 = vcombine.low %v15876_v1, %v15882_v52 }
 0x417   : > { %v15907_v7 = vsel %vm14095_vm15, %v7286_v11, %v7287_v4  ;;  %v15927_v54 = vsel %vm14095_vm15, %v11466_v61, %v7298_v49  ;;  %v13366_v11 = vld [vmem:[#allocation3 + $0x20] sm:$0x1]  ;;  %v7221_v49 = vrot.slane %v13368_v8, 5  ;;  %v7201_v61 = vsel %vm14095_vm15, %v11452_v12, %v7200_v44  ;;  %v8693_v4 = vld [vmem:[#allocation3 + $0x9c] sm:$0xe] }
 0x418   : > { %v7210_v36 = vrot.slane %v13366_v11, 5 }
 0x41a   : > { %v7211_v33 = vsel %vm14095_vm15, %v7209_v20, %v7210_v36  ;;  %v7149_v36 = vld [vmem:[#allocation3 + $0x48] sm:$0xe] }
 0x41b   : > { %12457 = vmatmul.mubr.msk.bf16.gmra.mrb[8].mxu1 %vm1391_vm7, %v11424_v18  ;;  %v7301_v18 = vrot.slane %v15758_v29, 5  ;;  %v11451_v29 = vrot.slane %v7143_v23, 9  ;;  %v15992_v23 = vld [vmem:[%s17341_s4 + $0x8] sm:$0x3]  ;;  %v11457_v41 = vrot.slane %v7149_v36, 9 }
 0x41c   : > { %12460 = vmatprep.mubr.msk.bf16.mxu1 %vm1391_vm7, %v11425_v60  ;;  %v16070_v36 = vld [vmem:[#allocation3 + $0x64] sm:$0xf] }
 0x41d   : > { %v15931_v45 = vsel %vm14095_vm15, %v7300_v47, %v7301_v18  ;;  %v7194_v48 = vsel %vm14095_vm15, %v11451_v29, %v7193_v6  ;;  %v7760_v18 = vsel %vm1440_vm0, %v15810_v3, 0  ;;  %v13369_v29 = vld [vmem:[#allocation3 + $0x2c] sm:$0x1]  ;;  %v7147_v3 = vld [vmem:[#allocation3 + $0x30] sm:$0xe] }
 0x423   : > { %12461 = vmatmul.mubr.msk.bf16.gmra.mrb[12].mxu1 %vm1391_vm7, %v11426_v37  ;;  %v7195_v37 = vrot.slane %v7193_v6, 4  ;;  %v7216_v6 = vrot.slane %v7214_v31, 4 }
 0x424   : > { %12464 = vmatprep.mubr.msk.bf16.mxu1 %vm1391_vm7, %v11427_v35  ;;  %v7202_v35 = vrot.slane %v7200_v44, 4  ;;  %v7228_v44 = vrot.slane %v15562_v46, 5  ;;  %v7231_v46 = vrot.slane %v15567_v39, 5  ;;  %v16022_v39 = vld [vmem:[#allocation3 + $0x28] sm:$0xf] }
 0x425   : > { %v7197_v58 = vsel %vm14095_vm15, %v7195_v37, %v7196_v10  ;;  %v7223_v10 = vrot.slane %v7221_v49, 4  ;;  %v7217_v37 = vrot.slane %v13369_v29, 5 }
 0x426   : > { %v11468_v43 = vcombine.low %v7194_v48, %v7197_v58  ;;  %v11454_v48 = vrot.slane %v7146_v63, 9  ;;  %v17545_v63 = vcombine.low %v15834_v40, %v15842_v24 }
 0x427   : > { %v7218_v58 = vsel %vm14095_vm15, %v7216_v6, %v7217_v37  ;;  %v8684_v6 = vld [vmem:[#allocation3 + $0x30] sm:$0xe] }
 0x428   : > { %v11569_v24 = vrot.slane %v8684_v6, 9  ;;  %v8692_v6 = vld [vmem:[#allocation3 + $0x90] sm:$0xe] }
 0x429   : > { %v11577_v5 = vrot.slane %v8692_v6, 9 }
 0x42b   : > { %12465 = vmatmul.mubr.msk.bf16.gmra.mrb[16].mxu1 %vm1391_vm7, %v11428_v26  ;;  %v7203_v26 = vrot.slane %v13365_v28, 5 }
 0x42c   : > { %12468 = vmatprep.mubr.msk.bf16.mxu1 %vm1391_vm7, %v11429_v9  ;;  %v7145_v9 = vld [vmem:[#allocation3 + $0x18] sm:$0xe] }
 0x42d   : > { %v7204_v16 = vsel %vm14095_vm15, %v7202_v35, %v7203_v26  ;;  %v11453_v60 = vrot.slane %v7145_v9, 9  ;;  %v7235_v35 = vrot.slane %v15578_v56, 5  ;;  %v7230_v26 = vrot.slane %v7228_v44, 4  ;;  %v7148_v9 = vld [vmem:[#allocation3 + $0x3c] sm:$0xe] }
 0x42e   : > { %v11469_v47 = vcombine.low %v7201_v61, %v7204_v16  ;;  %v7238_v56 = vrot.slane %v15584_v14, 5  ;;  %v11456_v12 = vrot.slane %v7148_v9, 9  ;;  %v8683_v14 = vld [vmem:[#allocation3 + $0x24] sm:$0xe]  ;;  %v16024_v61 = vld [vmem:[#allocation3 + $0x2c] sm:$0x1] }
 0x42f   : > { %v7237_v11 = vrot.slane %v7235_v35, 4  ;;  %v7232_v16 = vsel %vm14095_vm15, %v7230_v26, %v7231_v46  ;;  %v7236_v8 = vsel %vm14095_vm15, %v11457_v41, %v7235_v35  ;;  %v11568_v29 = vrot.slane %v8683_v14, 9  ;;  %v8687_v46 = vld [vmem:[#allocation3 + $0x54] sm:$0xe] }
 0x433   : > { %12469 = vmatmul.mubr.msk.bf16.gmra.mrb[20].mxu1 %vm1391_vm7, %v17539_v42  ;;  %v7208_v42 = vsel %vm14095_vm15, %v11453_v60, %v7207_v27  ;;  %v11455_v27 = vrot.slane %v7147_v3, 9  ;;  %v7229_v60 = vsel %vm14095_vm15, %v11456_v12, %v7228_v44  ;;  %v8685_v3 = vld [vmem:[#allocation3 + $0x3c] sm:$0xe]  ;;  %v8686_v44 = vld [vmem:[#allocation3 + $0x48] sm:$0xe] }
 0x434   : > { %12472 = vmatprep.mubr.msk.bf16.mxu1 %vm1391_vm7, %v17540_v2  ;;  %v11470_v2 = vcombine.low %v7208_v42, %v7211_v33  ;;  %v11473_v33 = vcombine.low %v7229_v60, %v7232_v16  ;;  %v17544_v42 = vcombine.low %v15825_v17, %v15830_v30  ;;  %v8764_v17 = vrot.slane %v16024_v61, 5  ;;  %v16081_v60 = vld [vmem:[#allocation3 + $0x68] sm:$0x1] }
 0x435   : > { %v7222_v20 = vsel %vm14095_vm15, %v11455_v27, %v7221_v49  ;;  %v16054_v27 = vld [vmem:[#allocation3 + $0x58] sm:$0xf]  ;;  %v11571_v16 = vrot.slane %v8686_v44, 9  ;;  %v16111_v44 = vld [vmem:[#allocation3 + $0x7c] sm:$0xf] }
 0x43b   : > { %12473 = vmatmul.mubr.msk.bf16.gmra.mrb[24].mxu1 %vm1391_vm7, %v17541_v51  ;;  %v13370_v51 = vld [vmem:[#allocation3 + $0x38] sm:$0x1] }
 0x43c   : > { %12476 = vmatprep.mubr.msk.bf16.mxu1 %vm1391_vm7, %v17542_v38  ;;  %v7224_v38 = vrot.slane %v13370_v51, 5  ;;  %v16041_v51 = vld [vmem:[#allocation3 + $0x44] sm:$0x1] }
 0x443   : > { %12477 = vmatmul.mubr.msk.bf16.gmra.mrb[28].mxu1 %vm1391_vm7, %v17543_v0  ;;  %v7215_v0 = vsel %vm14095_vm15, %v11454_v48, %v7214_v31  ;;  %v7239_v31 = vsel %vm14095_vm15, %v7237_v11, %v7238_v56  ;;  %v16047_v48 = vld [vmem:[#allocation3 + $0x50] sm:$0x1]  ;;  %v8778_v11 = vrot.slane %v16041_v51, 5 }
 0x444   : > { %12482 = vmatprep.mubr.msk.bf16.mxu1 %vm1391_vm7, %v11468_v43  ;;  %v7225_v43 = vsel %vm14095_vm15, %v7223_v10, %v7224_v38  ;;  %v11471_v34 = vcombine.low %v7215_v0, %v7218_v58  ;;  %v11474_v49 = vcombine.low %v7236_v8, %v7239_v31  ;;  %v16039_v10 = vld [vmem:[#allocation3 + $0x38] sm:$0x1]  ;;  %v16043_v38 = vld [vmem:[#allocation3 + $0x4c] sm:$0xf]  ;;  %v8688_v31 = vld [vmem:[#allocation3 + $0x60] sm:$0xe] }
 0x445   : > { %v11472_v28 = vcombine.low %v7222_v20, %v7225_v43  ;;  %v8771_v0 = vrot.slane %v16039_v10, 5  ;;  %v16061_v20 = vld [vmem:[#allocation3 + $0x5c] sm:$0x1]  ;;  %v8782_v41 = vrot.slane %v16043_v38, 5  ;;  %v8785_v14 = vrot.slane %v16047_v48, 5 }
 0x446   : > { %v16172_v8 = vld [vmem:[#allocation3 + $0xa4] sm:$0x1] }
 0x44b   : > { %12483 = vmatmul.mubr.msk.bf16.vlgmr.msra.gmra.mrb[0].mxu1 %vm1391_vm7, %v11469_v47  ;;  %v16026_v47 = vld [vmem:[#allocation3 + $0x34] sm:$0xf] }
 0x44c   : > { %12515 = vmatpush3.bf16.msra.mxu1 %v7760_v18  ;;  %12486 = vmatprep.mubr.msk.bf16.mxu1 %vm1391_vm7, %v11470_v2  ;;  %v8761_v18 = vrot.slane %v16022_v39, 5  ;;  %v16033_v2 = vld [vmem:[#allocation3 + $0x40] sm:$0xf]  ;;  %v8768_v30 = vrot.slane %v16026_v47, 5 }
 0x44d   : > { %13243 = vmatprep.subr.msk.bf16.mxu1 %vm1440_vm0, %v15992_v23  ;;  %v8775_v58 = vrot.slane %v16033_v2, 5 }
 0x44e   : > { %v8763_v37 = vrot.slane %v8761_v18, 4  ;;  %v16051_v40 = vsel %vm14095_vm15, %v11568_v29, %v8761_v18  ;;  %v8770_v35 = vrot.slane %v8768_v30, 4  ;;  %v16067_v26 = vsel %vm14095_vm15, %v11569_v24, %v8768_v30  ;;  %v16104_v30 = vld [vmem:[#allocation3 + $0x74] sm:$0x1] }
 0x44f   : > { %17546 = vst [vmem:[#allocation16_spill] sm:$0xff] %v16051_v40  ;;  %17548 = vst [vmem:[#allocation18_spill] sm:$0xff] %v16067_v26  ;;  %v8777_v9 = vrot.slane %v8775_v58, 4  ;;  %v8789_v18 = vrot.slane %v16054_v27, 5  ;;  %v11572_v29 = vrot.slane %v8687_v46, 9  ;;  %v11573_v24 = vrot.slane %v8688_v31, 9 }
 0x450   : > { %v16058_v43 = vsel %vm14095_vm15, %v8763_v37, %v8764_v17  ;;  %v16074_v56 = vsel %vm14095_vm15, %v8770_v35, %v8771_v0  ;;  %v8792_v37 = vrot.slane %v16061_v20, 5  ;;  %v17553_v17 = vcombine.low %v15860_v21, %v15868_v55  ;;  %v16142_v46 = vld [vmem:[#allocation3 + $0x94] sm:$0xf]  ;;  %v13308_v40 = vld [vmem:[#allocation3 + $0x78] sm:$0xff]  }
 0x451   : > { %17547 = vst [vmem:[#allocation17_spill] sm:$0xff] %v16058_v43  ;;  %17549 = vst [vmem:[#allocation19_spill] sm:$0xff] %v16074_v56  ;;  %v16119_v21 = vsel %vm14095_vm15, %v11572_v29, %v8789_v18  ;;  %v8799_v55 = vrot.slane %v16081_v60, 5  ;;  %v8806_v29 = vrot.slane %v16104_v30, 5 }
 0x452   : > { %17556 = vst [vmem:[#allocation9_spill] sm:$0xff] %v16119_v21  ;;  %v8061_v21 = vshll.u32 %v16022_v39, 16 }
 0x453   : > { %12487 = vmatmul.mubr.msk.bf16.gmra.mrb[4].mxu1 %vm1391_vm7, %v11471_v34  ;;  %v11570_v34 = vrot.slane %v8685_v3, 9  ;;  %v8689_v3 = vld [vmem:[#allocation3 + $0x6c] sm:$0xe] }
 0x454   : > { %12490 = vmatprep.mubr.msk.bf16.mxu1 %vm1391_vm7, %v11472_v28  ;;  %v11574_v31 = vrot.slane %v8689_v3, 9 }
 0x455   : > { %v16078_v12 = vsel %vm14095_vm15, %v11570_v34, %v8775_v58  ;;  %v8796_v58 = vrot.slane %v16070_v36, 5  ;;  %v8690_v34 = vld [vmem:[#allocation3 + $0x78] sm:$0xe] }
 0x456   : > { %17550 = vst [vmem:[#allocation20_spill] sm:$0xff] %v16078_v12 }
 0x45b   : > { %12491 = vmatmul.mubr.msk.bf16.gmra.mrb[8].mxu1 %vm1391_vm7, %v11473_v33  ;;  %v16083_v33 = vld [vmem:[#allocation3 + $0x70] sm:$0xf] }
 0x45c   : > { %12494 = vmatprep.mubr.msk.bf16.mxu1 %vm1391_vm7, %v11474_v49  ;;  %v16089_v49 = vsel %vm14095_vm15, %v8777_v9, %v8778_v11  ;;  %v8803_v0 = vrot.slane %v16083_v33, 5  ;;  %v16123_v9 = vld [vmem:[#allocation3 + $0x80] sm:$0x1]  ;;  %v16125_v11 = vld [vmem:[#allocation3 + $0x88] sm:$0xf] }
 0x45d   : > { %17551 = vst [vmem:[#allocation21_spill] sm:$0xff] %v16089_v49  ;;  %v16317_v49 = vrot.slane %v8061_v21, 5 }
 0x45e   : > { %v16150_v3 = vsel %vm14095_vm15, %v11574_v31, %v8803_v0 }
 0x45f   : > { %17560 = vst [vmem:[#allocation13_spill] sm:$0xff] %v16150_v3  ;;  %v8834_v3 = vrot.slane %v16172_v8, 5 }
 0x463   : > { %12495 = vmatmul.mubr.msk.bf16.gmra.mrb[12].mxu1 %vm1391_vm7, %v17544_v42  ;;  %v17552_v42 = vcombine.low %v15852_v59, %v15856_v62  ;;  %v16108_v59 = vsel %vm14095_vm15, %v11571_v16, %v8782_v41  ;;  %v8791_v62 = vrot.slane %v8789_v18, 4  ;;  %v8810_v18 = vrot.slane %v16111_v44, 5 }
 0x464   : > { %12498 = vmatprep.mubr.msk.bf16.mxu1 %vm1391_vm7, %v17545_v63  ;;  %v8784_v63 = vrot.slane %v8782_v41, 4  ;;  %17554 = vst [vmem:[#allocation7_spill] sm:$0xff] %v16108_v59  ;;  %v8798_v41 = vrot.slane %v8796_v58, 4 }
 0x465   : > { %v16131_v16 = vsel %vm14095_vm15, %v8791_v62, %v8792_v37  ;;  %v11575_v62 = vrot.slane %v8690_v34, 9  ;;  %v8824_v34 = vrot.slane %v16142_v46, 5 }
 0x466   : > { %v16115_v35 = vsel %vm14095_vm15, %v8784_v63, %v8785_v14  ;;  %17557 = vst [vmem:[#allocation10_spill] sm:$0xff] %v16131_v16  ;;  %v16133_v14 = vld [vmem:[#allocation3 + $0x8c] sm:$0x1]  ;;  %v8805_v63 = vrot.slane %v8803_v0, 4  ;;  %v16146_v37 = vsel %vm14095_vm15, %v8798_v41, %v8799_v55  ;;  %v8813_v55 = vrot.slane %v16123_v9, 5 }
 0x467   : > { %17555 = vst [vmem:[#allocation8_spill] sm:$0xff] %v16115_v35  ;;  %17559 = vst [vmem:[#allocation12_spill] sm:$0xff] %v16146_v37  ;;  %v8817_v0 = vrot.slane %v16125_v11, 5  ;;  %v8812_v41 = vrot.slane %v8810_v18, 4  ;;  %v8820_v50 = vrot.slane %v16133_v14, 5 }
 0x468   : > { %v16161_v28 = vsel %vm14095_vm15, %v8805_v63, %v8806_v29  ;;  %v16176_v63 = vsel %vm14095_vm15, %v11575_v62, %v8810_v18  ;;  %v16195_v18 = vld [vmem:[#allocation3 + $0xb8] sm:$0xf]  ;;  %v8826_v62 = vrot.slane %v8824_v34, 4  ;;  %v8695_v37 = vld [vmem:[#allocation3 + $0xb4] sm:$0xe] }
 0x469   : > { %17561 = vst [vmem:[#allocation14_spill] sm:$0xff] %v16161_v28  ;;  %17563 = vst [vmem:[#allocation15_spill] sm:$0xff] %v16176_v63  ;;  %v8819_v29 = vrot.slane %v8817_v0, 4  ;;  %v16183_v28 = vld [vmem:[#allocation3 + $0xac] sm:$0xf]  ;;  %v16187_v1 = vsel %vm14095_vm15, %v8812_v41, %v8813_v55  ;;  %v11578_v55 = vrot.slane %v8693_v4, 9 }
 0x46a   : > { %17565 = vst [vmem:[#allocation6_spill] sm:$0xff] %v16187_v1  ;;  %v8694_v41 = vld [vmem:[#allocation3 + $0xa8] sm:$0xe]  ;;  %v16210_v16 = vld [vmem:[#allocation3 + $0xc4] sm:$0xf] }
 0x46b   : > { %12499 = vmatmul.mubr.msk.bf16.gmra.mrb[16].mxu1 %vm1391_vm7, %v17552_v42  ;;  %v16139_v42 = vsel %vm14095_vm15, %v11573_v24, %v8796_v58  ;;  %v16153_v24 = vld [vmem:[#allocation3 + $0x98] sm:$0x1]  ;;  %v16155_v58 = vld [vmem:[#allocation3 + $0xa0] sm:$0xf]  ;;  %v16232_v1 = vld [vmem:[#allocation3 + $0xc8] sm:$0x1] }
 0x46c   : > { %12502 = vmatprep.mubr.msk.bf16.mxu1 %vm1391_vm7, %v17553_v17  ;;  %17558 = vst [vmem:[#allocation11_spill] sm:$0xff] %v16139_v42  ;;  %v8691_v17 = vld [vmem:[#allocation3 + $0x84] sm:$0xe]  ;;  %v8831_v6 = vrot.slane %v16155_v58, 5  ;;  %v16208_v42 = vld [vmem:[#allocation3 + $0xbc] sm:$0x1] }
 0x46d   : > { %v11576_v31 = vrot.slane %v8691_v17, 9  ;;  %v17564_v17 = vcombine.low %v15886_v32, %v15893_v19  ;;  %v16201_v19 = vsel %vm14095_vm15, %v8819_v29, %v8820_v50  ;;  %v16214_v50 = vsel %vm14095_vm15, %v11577_v5, %v8824_v34  ;;  %v8696_v34 = vld [vmem:[#allocation3 + $0xc0] sm:$0xe]  ;;  %17572 = vst [vmem:[#allocation26_spill] sm:$0xff] %v16232_v1 }
 0x46e   : > { %17567 = vst [vmem:[#allocation4_spill] sm:$0xff] %v16201_v19  ;;  %17568 = vst [vmem:[#allocation22_spill] sm:$0xff] %v16214_v50  ;;  %v16222_v29 = vsel %vm14095_vm15, %v11578_v55, %v8831_v6  ;;  %v8845_v5 = vrot.slane %v16195_v18, 5  ;;  %v11580_v55 = vrot.slane %v8695_v37, 9  ;;  %v8848_v32 = vrot.slane %v16208_v42, 5 }
 0x46f   : > { %v16191_v52 = vsel %vm14095_vm15, %v11576_v31, %v8817_v0  ;;  %v8833_v31 = vrot.slane %v8831_v6, 4  ;;  %17570 = vst [vmem:[#allocation24_spill] sm:$0xff] %v16222_v29  ;;  %v8838_v0 = vrot.slane %v16183_v28, 5  ;;  %v13305_v29 = vld [vmem:[#allocation3 + $0x54] sm:$0xff]  }
 0x470   : > { %17566 = vst [vmem:[#allocation5_spill] sm:$0xff] %v16191_v52  ;;  %v11579_v52 = vrot.slane %v8694_v41, 9  ;;  %v8847_v63 = vrot.slane %v8845_v5, 4  ;;  %v16253_v37 = vsel %vm14095_vm15, %v11580_v55, %v8845_v5  ;;  %v13302_v55 = vld [vmem:[#allocation3 + $0x30] sm:$0xff]  }
 0x471   : > { %v16229_v19 = vsel %vm14095_vm15, %v8833_v31, %v8834_v3  ;;  %v8840_v6 = vrot.slane %v8838_v0, 4  ;;  %v17573_v3 = vcombine.low %v15903_v13, %v15907_v7  ;;  %17576 = vst [vmem:[#allocation29_spill] sm:$0xff] %v16253_v37 }
 0x472   : > { %17571 = vst [vmem:[#allocation25_spill] sm:$0xff] %v16229_v19  ;;  %v16245_v41 = vsel %vm14095_vm15, %v11579_v52, %v8838_v0  ;;  %v17577_v19 = vcombine.low %v15915_v15, %v15919_v57  ;;  %v16263_v7 = vsel %vm14095_vm15, %v8847_v63, %v8848_v32  ;;  %v8855_v0 = vrot.slane %v16232_v1, 5  ;;  %v13300_v32 = vld [vmem:[#allocation3 + $0x18] sm:$0xff]   ;;  %v10241_v1 = vld [vmem:[#allocation3 + $0x54] sm:$0xe] }
 0x473   : > { %12503 = vmatmul.mubr.msk.bf16.gmra.mrb[20].mxu1 %vm1391_vm7, %v17562_v53  ;;  %v8827_v53 = vrot.slane %v16153_v24, 5  ;;  %17574 = vst [vmem:[#allocation27_spill] sm:$0xff] %v16245_v41  ;;  %17578 = vst [vmem:[#allocation30_spill] sm:$0xff] %v16263_v7  ;;  %v17581_v63 = vcombine.low %v15927_v54, %v15931_v45  ;;  %v16292_v54 = vld [vmem:[#allocation3 + $0x10] sm:$0xf]  ;;  %v13304_v41 = vld [vmem:[#allocation3 + $0x48] sm:$0xff]  }
 0x474   : > { %12506 = vmatprep.mubr.msk.bf16.mxu1 %vm1391_vm7, %v17564_v17  ;;  %v16203_v17 = vld [vmem:[#allocation3 + $0xb0] sm:$0x1]  ;;  %v7955_v45 = vld [vmem:[#allocation3 + $0xc] sm:$0xf]  ;;  %v7961_v7 = vld [vmem:[#allocation3 + $0x24] sm:$0xf] }
 0x475   : > { %v16218_v4 = vsel %vm14095_vm15, %v8826_v62, %v8827_v53  ;;  %v8841_v62 = vrot.slane %v16203_v17, 5  ;;  %v11581_v53 = vrot.slane %v8696_v34, 9 }
 0x476   : > { %17569 = vst [vmem:[#allocation23_spill] sm:$0xff] %v16218_v4  ;;  %v8852_v4 = vrot.slane %v16210_v16, 5 }
 0x477   : > { %v16249_v31 = vsel %vm14095_vm15, %v8840_v6, %v8841_v62  ;;  %v16288_v6 = vld [vmem:[%s17341_s4 + $0xa] sm:$0x3]  ;;  %v8013_v62 = vshll.u32 %v16292_v54, 16 }
 0x478   : > { %17575 = vst [vmem:[#allocation28_spill] sm:$0xff] %v16249_v31  ;;  %v8854_v52 = vrot.slane %v8852_v4, 4  ;;  %v16270_v34 = vsel %vm14095_vm15, %v11581_v53, %v8852_v4  ;;  %v8486_v4 = vsel %vm1440_vm0, %v15992_v23, 0  ;;  %v13301_v53 = vld [vmem:[#allocation3 + $0x24] sm:$0xff]   ;;  %v8017_v23 = vshrl.u32 %v16292_v54, 16 }
 0x479   : > { %17579 = vst [vmem:[#allocation31_spill] sm:$0xff] %v16270_v34 }
 0x47a   : > { %v16274_v15 = vsel %vm14095_vm15, %v8854_v52, %v8855_v0  ;;  %v8007_v52 = vshll.u32 %v7955_v45, 16  ;;  %v7958_v0 = vld [vmem:[#allocation3 + $0x18] sm:$0xf] }
 0x47b   : > { %12507 = vmatmul.mubr.msk.bf16.gmra.mrb[24].mxu1 %vm1391_vm7, %v17573_v3  ;;  %17580 = vst [vmem:[#allocation32_spill] sm:$0xff] %v16274_v15  ;;  %v8004_v3 = vshrl.u32 %v7955_v45, 16  ;;  %v8031_v57 = vshll.u32 %v7958_v0, 16  ;;  %v16302_v15 = vld [vmem:[#allocation3 + $0x14] sm:$0x1] }
 0x47c   : > { %12510 = vmatprep.mubr.msk.bf16.mxu1 %vm1391_vm7, %v17577_v19  ;;  %v13299_v19 = vld [vmem:[#allocation3 + $0xc] sm:$0xff]   ;;  %v8009_v13 = vrot.slane %v8007_v52, 5  ;;  %17583 = vst [vmem:[#allocation34_spill] sm:$0xff] %v16302_v15  ;;  %v8052_v52 = vshrl.u32 %v7961_v7, 16 }
 0x47d   : > { %v8006_v5 = vrot.slane %v8004_v3, 4 }
 0x47e   : > { %v8054_v59 = vrot.slane %v8052_v52, 4 }
 0x47f   : > { %v8010_v50 = vor.u32 %v8009_v13, %v8006_v5 }
 0x481   : > { %v8011_v13 = vrot.slane %v8010_v50, 4  ;;  %v7967_v50 = vld [vmem:[#allocation3 + $0x3c] sm:$0xf] }
 0x483   : > { %12511 = vmatmul.mubr.msk.bf16.gmra.mrb[28].mxu1 %vm1391_vm7, %v17581_v63  ;;  %v16299_v63 = vld [vmem:[#allocation3 + $0x1c] sm:$0xf] }
 0x484   : > { %12516 = vmatprep.mubr.msk.bf16.mxu1 %vm1391_vm7, %v13299_v19  ;;  %v13303_v19 = vld [vmem:[#allocation3 + $0x3c] sm:$0xff]   ;;  %17582 = vst [vmem:[#allocation33_spill] sm:$0xff] %v16299_v63  ;;  %v8037_v34 = vshll.u32 %v16299_v63, 16  ;;  %v8041_v45 = vshrl.u32 %v16299_v63, 16 }
 0x486   : > { %v8043_v3 = vrot.slane %v8041_v45, 4 }
 0x48b   : > { %12517 = vmatmul.mubr.msk.bf16.vlgmr.msra.gmra.mrb[0].mxu1 %vm1391_vm7, %v13300_v32  ;;  %v8015_v32 = vrot.slane %v8013_v62, 5  ;;  %v8023_v62 = vshll.u32 %v16302_v15, 16 }
 0x48c   : > { %12549 = vmatpush3.bf16.msra.mxu1 %v8486_v4  ;;  %12520 = vmatprep.mubr.msk.bf16.mxu1 %vm1391_vm7, %v13301_v53  ;;  %v8019_v4 = vrot.slane %v8017_v23, 4  ;;  %v8028_v53 = vshrl.u32 %v7958_v0, 16  ;;  %v16307_v23 = vld [vmem:[#allocation3 + $0x20] sm:$0x1]  ;;  %v16309_v0 = vrot.slane %v8037_v34, 5 }
 0x48d   : > { %13244 = vmatprep.subr.msk.bf16.mxu1 %vm1440_vm0, %v16288_v6  ;;  %17584 = vst [vmem:[#allocation35_spill] sm:$0xff] %v16307_v23  ;;  %v8047_v5 = vshll.u32 %v16307_v23, 16  ;;  %v8025_v35 = vrot.slane %v8023_v62, 5 }
 0x48e   : > { %v8020_v37 = vor.u32 %v8019_v4, %v8015_v32  ;;  %v8030_v31 = vrot.slane %v8028_v53, 4  ;;  %v8065_v4 = vshrl.u32 %v16022_v39, 16  ;;  %v8044_v34 = vor.u32 %v8043_v3, %v16309_v0  ;;  %v13307_v3 = vld [vmem:[#allocation3 + $0x6c] sm:$0xff]  }
 0x48f   : > { %v8049_v62 = vrot.slane %v8047_v5, 5  ;;  %v8103_v5 = vshll.u32 %v7967_v50, 16 }
 0x490   : > { %v8045_v52 = vrot.slane %v8044_v34, 4  ;;  %v8113_v34 = vshrl.u32 %v16033_v2, 16 }
 0x493   : > { %12521 = vmatmul.mubr.msk.bf16.gmra.mrb[4].mxu1 %vm1391_vm7, %v13302_v55  ;;  %v8033_v55 = vrot.slane %v8031_v57, 5  ;;  %v8021_v57 = vrot.slane %v8020_v37, 4  ;;  %v13306_v37 = vld [vmem:[#allocation3 + $0x60] sm:$0xff]  }
 0x494   : > { %12524 = vmatprep.mubr.msk.bf16.mxu1 %vm1391_vm7, %v13303_v19  ;;  %v8055_v19 = vshll.u32 %v7961_v7, 16  ;;  %v8067_v7 = vrot.slane %v8065_v4, 4 }
 0x495   : > { %v8034_v53 = vor.u32 %v8033_v55, %v8030_v31  ;;  %v8026_v12 = vsel %vm13682_vm9, %v8021_v57, %v8025_v35  ;;  %v8089_v31 = vshrl.u32 %v16026_v47, 16  ;;  %v8016_v55 = vsel %vm13682_vm9, %v8011_v13, %v8015_v32 }
 0x496   : > { %v8057_v45 = vrot.slane %v8055_v19, 5  ;;  %v8071_v19 = vshll.u32 %v16024_v61, 16  ;;  %v16327_v35 = vcombine.low %v8016_v55, %v8026_v12  ;;  %v8068_v57 = vor.u32 %v8067_v7, %v16317_v49  ;;  %v7970_v12 = vld [vmem:[#allocation3 + $0x48] sm:$0xf] }
 0x497   : > { %v8035_v39 = vrot.slane %v8034_v53, 4  ;;  %v8109_v61 = vshll.u32 %v16033_v2, 16  ;;  %v8137_v7 = vshrl.u32 %v16043_v38, 16  ;;  %v8105_v2 = vrot.slane %v8103_v5, 5  ;;  %v7976_v5 = vld [vmem:[#allocation3 + $0x60] sm:$0xf] }
 0x498   : > { %v8058_v21 = vor.u32 %v8057_v45, %v8054_v59  ;;  %v8091_v59 = vrot.slane %v8089_v31, 4  ;;  %v8133_v45 = vshll.u32 %v16043_v38, 16  ;;  %v8073_v55 = vrot.slane %v8071_v19, 5 }
 0x499   : > { %v8040_v32 = vsel %vm13682_vm9, %v8035_v39, %v16309_v0  ;;  %v8069_v0 = vrot.slane %v8068_v57, 4  ;;  %v8124_v26 = vshrl.u32 %v7970_v12, 16  ;;  %v8127_v43 = vshll.u32 %v7970_v12, 16 }
 0x49a   : > { %v16344_v23 = vrot.slane %v8109_v61, 5  ;;  %v8115_v38 = vrot.slane %v8113_v34, 4  ;;  %v16346_v63 = vrot.slane %v8133_v45, 5  ;;  %v8119_v61 = vshll.u32 %v16041_v51, 16 }
 0x49b   : > { %12525 = vmatmul.mubr.msk.bf16.gmra.mrb[8].mxu1 %vm1391_vm7, %v13304_v41  ;;  %v7964_v41 = vld [vmem:[#allocation3 + $0x30] sm:$0xf]  ;;  %v8126_v34 = vrot.slane %v8124_v26, 4 }
 0x49c   : > { %12528 = vmatprep.mubr.msk.bf16.mxu1 %vm1391_vm7, %v13305_v29  ;;  %v8085_v29 = vshll.u32 %v16026_v47, 16  ;;  %v8076_v4 = vshrl.u32 %v7964_v41, 16  ;;  %v8079_v53 = vshll.u32 %v7964_v41, 16  ;;  %v8100_v47 = vshrl.u32 %v7967_v50, 16  ;;  %v7973_v50 = vld [vmem:[#allocation3 + $0x54] sm:$0xf] }
 0x49d   : > { %v8050_v41 = vsel %vm13682_vm9, %v8045_v52, %v8049_v62  ;;  %v8139_v62 = vrot.slane %v8137_v7, 4  ;;  %v13309_v52 = vld [vmem:[#allocation3 + $0x84] sm:$0xff]   ;;  %v8148_v19 = vshrl.u32 %v7973_v50, 16 }
 0x49e   : > { %v16334_v13 = vrot.slane %v8085_v29, 5  ;;  %v8081_v39 = vrot.slane %v8079_v53, 5  ;;  %v8095_v29 = vshll.u32 %v16039_v10, 16  ;;  %v8102_v31 = vrot.slane %v8100_v47, 4 }
 0x49f   : > { %v8157_v47 = vshll.u32 %v16054_v27, 16  ;;  %v8140_v7 = vor.u32 %v8139_v62, %v16346_v63 }
 0x4a0   : > { %v8092_v56 = vor.u32 %v8091_v59, %v16334_v13  ;;  %v8097_v53 = vrot.slane %v8095_v29, 5  ;;  %v8161_v59 = vshrl.u32 %v16054_v27, 16  ;;  %v8106_v45 = vor.u32 %v8105_v2, %v8102_v31  ;;  %v13310_v31 = vld [vmem:[#allocation3 + $0x90] sm:$0xff]  }
 0x4a1   : > { %v8175_v27 = vshll.u32 %v7976_v5, 16  ;;  %v8143_v29 = vshll.u32 %v16047_v48, 16 }
 0x4a2   : > { %v8093_v12 = vrot.slane %v8092_v56, 4  ;;  %v8185_v56 = vshrl.u32 %v16070_v36, 16 }
 0x4a3   : > { %12529 = vmatmul.mubr.msk.bf16.gmra.mrb[12].mxu1 %vm1391_vm7, %v13306_v37  ;;  %v8059_v37 = vrot.slane %v8058_v21, 4  ;;  %v16348_v21 = vcombine.low %v8040_v32, %v8050_v41  ;;  %v8074_v32 = vsel %vm13682_vm9, %v8069_v0, %v8073_v55  ;;  %v8150_v41 = vrot.slane %v8148_v19, 4  ;;  %v7979_v0 = vld [vmem:[#allocation3 + $0x6c] sm:$0xf] }
 0x4a4   : > { %12532 = vmatprep.mubr.msk.bf16.mxu1 %vm1391_vm7, %v13307_v3  ;;  %v8078_v3 = vrot.slane %v8076_v4, 4  ;;  %v8151_v4 = vshll.u32 %v7973_v50, 16  ;;  %v16365_v50 = vrot.slane %v8157_v47, 5  ;;  %v8163_v55 = vrot.slane %v8161_v59, 4 }
 0x4a5   : > { %v8064_v10 = vsel %vm13682_vm9, %v8059_v37, %v16317_v49  ;;  %v8129_v49 = vrot.slane %v8127_v43, 5  ;;  %v8181_v43 = vshll.u32 %v16070_v36, 16  ;;  %v8098_v2 = vsel %vm13682_vm9, %v8093_v12, %v8097_v53 }
 0x4a6   : > { %v8082_v57 = vor.u32 %v8081_v39, %v8078_v3  ;;  %v8153_v37 = vrot.slane %v8151_v4, 5  ;;  %v8172_v3 = vshrl.u32 %v7976_v5, 16  ;;  %v16362_v39 = vcombine.low %v8064_v10, %v8074_v32  ;;  %v13311_v10 = vld [vmem:[#allocation3 + $0x9c] sm:$0xff]  }
 0x4a7   : > { %v8130_v26 = vor.u32 %v8129_v49, %v8126_v34  ;;  %v8141_v19 = vrot.slane %v8140_v7, 4  ;;  %v8177_v47 = vrot.slane %v8175_v27, 5  ;;  %v8164_v59 = vor.u32 %v8163_v55, %v16365_v50 }
 0x4a8   : > { %v8083_v51 = vrot.slane %v8082_v57, 4  ;;  %v8154_v48 = vor.u32 %v8153_v37, %v8150_v41  ;;  %v8174_v4 = vrot.slane %v8172_v3, 4  ;;  %v8145_v57 = vrot.slane %v8143_v29, 5  ;;  %v7982_v3 = vld [vmem:[#allocation3 + $0x78] sm:$0xf] }
 0x4a9   : > { %v8196_v5 = vshrl.u32 %v7979_v0, 16  ;;  %v8199_v36 = vshll.u32 %v7979_v0, 16  ;;  %v8131_v32 = vrot.slane %v8130_v26, 4  ;;  %v8167_v53 = vshll.u32 %v16061_v20, 16  ;;  %v16409_v0 = vld [vmem:[#allocation3 + $0x20] sm:$0x1] }
 0x4aa   : > { %v16375_v34 = vrot.slane %v8181_v43, 5  ;;  %v8088_v49 = vsel %vm13682_vm9, %v8083_v51, %v16334_v13  ;;  %v8146_v41 = vsel %vm13682_vm9, %v8141_v19, %v8145_v57  ;;  %v16388_v20 = vrot.slane %v8154_v48, 4  ;;  %17586 = vst [vmem:[#allocation37_spill] sm:$0xff] %v16409_v0  ;;  %v13313_v19 = vld [vmem:[#allocation3 + $0xb4] sm:$0xff]  }
 0x4ab   : > { %12533 = vmatmul.mubr.msk.bf16.gmra.mrb[16].mxu1 %vm1391_vm7, %v13308_v40  ;;  %v8116_v40 = vor.u32 %v8115_v38, %v16344_v23  ;;  %v8107_v38 = vrot.slane %v8106_v45, 4  ;;  %v8205_v45 = vshll.u32 %v16083_v33, 16  ;;  %v16384_v7 = vcombine.low %v8088_v49, %v8098_v2 }
 0x4ac   : > { %12536 = vmatprep.mubr.msk.bf16.mxu1 %vm1391_vm7, %v13309_v52  ;;  %v8121_v52 = vrot.slane %v8119_v61, 5  ;;  %v8187_v61 = vrot.slane %v8185_v56, 4  ;;  %v8178_v37 = vor.u32 %v8177_v47, %v8174_v4  ;;  %v16393_v27 = vrot.slane %v8164_v59, 4  ;;  %v16426_v47 = vld [vmem:[#allocation3 + $0x28] sm:$0xf] }
 0x4ad   : > { %v8117_v62 = vrot.slane %v8116_v40, 4  ;;  %v8209_v40 = vshrl.u32 %v16083_v33, 16  ;;  %v8112_v13 = vsel %vm13682_vm9, %v8107_v38, %v16344_v23  ;;  %v16395_v29 = vrot.slane %v8196_v5, 4  ;;  %v16399_v33 = vld [vmem:[#allocation3 + $0x1c] sm:$0xf]  ;;  %17588 = vst [vmem:[#allocation39_spill] sm:$0xff] %v16426_v47 }
 0x4ae   : > { %v16397_v55 = vrot.slane %v8199_v36, 5  ;;  %17585 = vst [vmem:[#allocation36_spill] sm:$0xff] %v16399_v33  ;;  %v8136_v26 = vsel %vm13682_vm9, %v8131_v32, %v16346_v63  ;;  %v16406_v43 = vrot.slane %v8167_v53, 5  ;;  %v8188_v56 = vor.u32 %v8187_v61, %v16375_v34  ;;  %v10236_v23 = vld [vmem:[#allocation3 + $0x18] sm:$0xe] }
 0x4af   : > { %v8122_v12 = vsel %vm13682_vm9, %v8117_v62, %v8121_v52  ;;  %v16411_v2 = vcombine.low %v8136_v26, %v8146_v41  ;;  %v16414_v62 = vrot.slane %v8205_v45, 5  ;;  %v16416_v52 = vrot.slane %v8209_v40, 4  ;;  %v16437_v53 = vld [vmem:[#allocation3 + $0x2c] sm:$0x1]  ;;  %v10238_v61 = vld [vmem:[#allocation3 + $0x30] sm:$0xe] }
 0x4b0   : > { %v16401_v51 = vcombine.low %v8112_v13, %v8122_v12  ;;  %v16424_v48 = vrot.slane %v8178_v37, 4  ;;  %v8220_v4 = vshrl.u32 %v7982_v3, 16  ;;  %v10302_v57 = vrot.slane %v16399_v33, 5  ;;  %17589 = vst [vmem:[#allocation40_spill] sm:$0xff] %v16437_v53  ;;  %v16442_v12 = vld [vmem:[#allocation3 + $0x38] sm:$0x1] }
 0x4b1   : > { %v8223_v32 = vshll.u32 %v7982_v3, 16  ;;  %v16440_v49 = vrot.slane %v8188_v56, 4  ;;  %17590 = vst [vmem:[#allocation41_spill] sm:$0xff] %v16442_v12  ;;  %v11681_v45 = vrot.slane %v10236_v23, 9  ;;  %v10305_v41 = vrot.slane %v16409_v0, 5  ;;  %v13314_v13 = vld [vmem:[#allocation3 + $0xc0] sm:$0xff]  }
 0x4b2   : > { %v10304_v40 = vrot.slane %v10302_v57, 4  ;;  %v10237_v37 = vld [vmem:[#allocation3 + $0x24] sm:$0xe]  ;;  %v16452_v56 = vrot.slane %v8220_v4, 4  ;;  %v16454_v36 = vld [vmem:[#allocation3 + $0x40] sm:$0xf] }
 0x4b3   : > { %12537 = vmatmul.mubr.msk.bf16.gmra.mrb[20].mxu1 %vm1391_vm7, %v13310_v31  ;;  %v13312_v31 = vld [vmem:[#allocation3 + $0xa8] sm:$0xff]   ;;  %v16456_v23 = vld [vmem:[#allocation3 + $0x44] sm:$0x1]  ;;  %v16460_v38 = vsel %vm14095_vm15, %v11681_v45, %v10302_v57  ;;  %v16467_v5 = vrot.slane %v8223_v32, 5  ;;  %v16469_v3 = vld [vmem:[#allocation3 + $0x50] sm:$0x1] }
 0x4b4   : > { %12540 = vmatprep.mubr.msk.bf16.mxu1 %vm1391_vm7, %v13311_v10  ;;  %v16418_v10 = vld [vmem:[#allocation3 + $0x34] sm:$0xf]  ;;  %17592 = vst [vmem:[#allocation43_spill] sm:$0xff] %v16456_v23  ;;  %17593 = vst [vmem:[#allocation44_spill] sm:$0xff] %v16460_v38  ;;  %v16464_v63 = vsel %vm14095_vm15, %v10304_v40, %v10305_v41  ;;  %v11682_v26 = vrot.slane %v10237_v37, 9  ;;  %v11683_v0 = vrot.slane %v10238_v61, 9 }
 0x4b5   : > { %17587 = vst [vmem:[#allocation38_spill] sm:$0xff] %v16418_v10  ;;  %17594 = vst [vmem:[#allocation45_spill] sm:$0xff] %v16464_v63  ;;  %v10316_v59 = vrot.slane %v16418_v10, 5  ;;  %v16475_v57 = vsel %vm1440_vm0, %v16288_v6, 0  ;;  %v10312_v40 = vrot.slane %v16437_v53, 5  ;;  %v10319_v6 = vrot.slane %v16442_v12, 5 }
 0x4b6   : > { %17595 = vst [vmem:[#allocation46_spill] sm:$0xff] %v16469_v3  ;;  %v10240_v10 = vld [vmem:[#allocation3 + $0x48] sm:$0xe]  ;;  %v16478_v33 = vld [vmem:[#allocation3 + $0x58] sm:$0xf]  ;;  %v10323_v37 = vrot.slane %v16454_v36, 5 }
 0x4b7   : > { %v10318_v41 = vrot.slane %v10316_v59, 4  ;;  %17596 = vst [vmem:[#allocation47_spill] sm:$0xff] %v16478_v33  ;;  %v16480_v32 = vld [vmem:[#allocation3 + $0x64] sm:$0xf]  ;;  %v16488_v61 = vsel %vm14095_vm15, %v11683_v0, %v10316_v59  ;;  %v10326_v38 = vrot.slane %v16456_v23, 5  ;;  %v10333_v59 = vrot.slane %v16469_v3, 5 }
 0x4b8   : > { %17598 = vst [vmem:[#allocation49_spill] sm:$0xff] %v16488_v61  ;;  %v16501_v0 = vld [vmem:[#allocation3 + $0x68] sm:$0x1]  ;;  %v16546_v12 = vld [vmem:[#allocation3 + $0x94] sm:$0xf] }
 0x4b9   : > { %17601 = vst [vmem:[#allocation52_spill] sm:$0xff] %v16501_v0  ;;  %v10347_v3 = vrot.slane %v16501_v0, 5  ;;  %17611 = vst [vmem:[#allocation62_spill] sm:$0xff] %v16546_v12 }
 0x4bb   : > { %12541 = vmatmul.mubr.msk.bf16.gmra.mrb[24].mxu1 %vm1391_vm7, %v13312_v31  ;;  %v16449_v31 = vld [vmem:[#allocation3 + $0x4c] sm:$0xf] }
 0x4bc   : > { %12544 = vmatprep.mubr.msk.bf16.mxu1 %vm1391_vm7, %v13313_v19  ;;  %17591 = vst [vmem:[#allocation42_spill] sm:$0xff] %v16449_v31  ;;  %v10309_v19 = vrot.slane %v16426_v47, 5  ;;  %v10239_v47 = vld [vmem:[#allocation3 + $0x3c] sm:$0xe]  ;;  %v10330_v53 = vrot.slane %v16449_v31, 5 }
 0x4bd   : > { %v11684_v63 = vrot.slane %v10239_v47, 9  ;;  %v11685_v47 = vrot.slane %v10240_v10, 9 }
 0x4be   : > { %v10311_v45 = vrot.slane %v10309_v19, 4  ;;  %v16484_v15 = vsel %vm14095_vm15, %v11682_v26, %v10309_v19  ;;  %v16499_v26 = vld [vmem:[#allocation3 + $0x5c] sm:$0x1]  ;;  %v16507_v19 = vsel %vm14095_vm15, %v10318_v41, %v10319_v6  ;;  %v10332_v31 = vrot.slane %v10330_v53, 4  ;;  %v16520_v41 = vld [vmem:[#allocation3 + $0x70] sm:$0xf] }
 0x4bf   : > { %17597 = vst [vmem:[#allocation48_spill] sm:$0xff] %v16484_v15  ;;  %17600 = vst [vmem:[#allocation51_spill] sm:$0xff] %v16499_v26  ;;  %v16517_v23 = vsel %vm14095_vm15, %v11684_v63, %v10323_v37  ;;  %v11686_v6 = vrot.slane %v10241_v1, 9  ;;  %v16531_v63 = vld [vmem:[#allocation3 + $0x74] sm:$0x1] }
 0x4c0   : > { %v16494_v4 = vsel %vm14095_vm15, %v10311_v45, %v10312_v40  ;;  %17602 = vst [vmem:[#allocation53_spill] sm:$0xff] %v16507_v19  ;;  %v10325_v45 = vrot.slane %v10323_v37, 4  ;;  %v16511_v40 = vld [vmem:[#allocation3 + $0x7c] sm:$0xf]  ;;  %17604 = vst [vmem:[#allocation55_spill] sm:$0xff] %v16517_v23  ;;  %v16539_v15 = vsel %vm14095_vm15, %v10332_v31, %v10333_v59 }
 0x4c1   : > { %17599 = vst [vmem:[#allocation50_spill] sm:$0xff] %v16494_v4  ;;  %17603 = vst [vmem:[#allocation54_spill] sm:$0xff] %v16511_v40  ;;  %v10242_v4 = vld [vmem:[#allocation3 + $0x60] sm:$0xe]  ;;  %v10243_v19 = vld [vmem:[#allocation3 + $0x6c] sm:$0xe] }
 0x4c2   : > { %17605 = vst [vmem:[#allocation56_spill] sm:$0xff] %v16520_v41  ;;  %v16524_v10 = vsel %vm14095_vm15, %v10325_v45, %v10326_v38  ;;  %17608 = vst [vmem:[#allocation59_spill] sm:$0xff] %v16531_v63  ;;  %v16533_v37 = vld [vmem:[#allocation3 + $0x80] sm:$0x1]  ;;  %v10340_v38 = vrot.slane %v16499_v26, 5  ;;  %v11688_v59 = vrot.slane %v10243_v19, 9 }
 0x4c3   : > { %12545 = vmatmul.mubr.msk.bf16.gmra.mrb[28].mxu1 %vm1391_vm7, %v13314_v13  ;;  %17606 = vst [vmem:[#allocation57_spill] sm:$0xff] %v16524_v10  ;;  %v10337_v13 = vrot.slane %v16478_v33, 5  ;;  %17609 = vst [vmem:[#allocation60_spill] sm:$0xff] %v16533_v37  ;;  %v10244_v33 = vld [vmem:[#allocation3 + $0x78] sm:$0xe]  ;;  %v10351_v10 = vrot.slane %v16520_v41, 5 }
 0x4c4   : > { %12550 = vmatprep.mubr.msk.bf16.mxu1 %vm1391_vm7, %v16327_v35  ;;  %v16528_v35 = vsel %vm14095_vm15, %v11685_v47, %v10330_v53  ;;  %17610 = vst [vmem:[#allocation61_spill] sm:$0xff] %v16539_v15  ;;  %v10344_v53 = vrot.slane %v16480_v32, 5  ;;  %v11687_v47 = vrot.slane %v10242_v4, 9  ;;  %v16553_v23 = vld [vmem:[#allocation3 + $0x88] sm:$0xf]  ;;  %v10354_v15 = vrot.slane %v16531_v63, 5 }
 0x4c5   : > { %17607 = vst [vmem:[#allocation58_spill] sm:$0xff] %v16528_v35  ;;  %v10339_v45 = vrot.slane %v10337_v13, 4  ;;  %v16550_v61 = vsel %vm14095_vm15, %v11686_v6, %v10337_v13  ;;  %v16555_v26 = vld [vmem:[#allocation3 + $0x8c] sm:$0x1]  ;;  %v10358_v13 = vrot.slane %v16511_v40, 5  ;;  %v17618_v63 = vshll.u32 %v16111_v44, 16 }
 0x4c6   : > { %17612 = vst [vmem:[#allocation63_spill] sm:$0xff] %v16550_v61  ;;  %v10346_v31 = vrot.slane %v10344_v53, 4  ;;  %17613 = vst [vmem:[#allocation64_spill] sm:$0xff] %v16555_v26  ;;  %v16563_v1 = vsel %vm14095_vm15, %v11687_v47, %v10344_v53  ;;  %v16570_v19 = vld [vmem:[%s17341_s4 + $0xc] sm:$0x3]  ;;  %v10353_v53 = vrot.slane %v10351_v10, 4 }
 0x4c7   : > { %v16559_v4 = vsel %vm14095_vm15, %v10339_v45, %v10340_v38  ;;  %17615 = vst [vmem:[#allocation66_spill] sm:$0xff] %v16563_v1  ;;  %v16572_v6 = vld [vmem:[#allocation3 + $0x98] sm:$0x1]  ;;  %v11689_v45 = vrot.slane %v10244_v33, 9  ;;  %v10245_v47 = vld [vmem:[#allocation3 + $0x84] sm:$0xe] }
 0x4c8   : > { %17614 = vst [vmem:[#allocation65_spill] sm:$0xff] %v16559_v4  ;;  %17616 = vst [vmem:[#allocation67_spill] sm:$0xff] %v16572_v6  ;;  %v16578_v38 = vsel %vm14095_vm15, %v10346_v31, %v10347_v3  ;;  %v16584_v0 = vrot.slane %v17618_v63, 5  ;;  %v10360_v41 = vrot.slane %v10358_v13, 4  ;;  %v10361_v35 = vrot.slane %v16533_v37, 5  ;;  %v17712_v22 = vld [vmem:[#allocation55_spill] sm:$0xff] }
 0x4c9   : > { %17617 = vst [vmem:[#allocation68_spill] sm:$0xff] %v16578_v38  ;;  %v10246_v4 = vld [vmem:[#allocation3 + $0x90] sm:$0xe]  ;;  %v16592_v33 = vld [vmem:[#allocation3 + $0xa0] sm:$0xf]  ;;  %v16602_v63 = vsel %vm14095_vm15, %v10353_v53, %v10354_v15  ;;  %v16606_v31 = vsel %vm14095_vm15, %v11689_v45, %v10358_v13  ;;  %v11690_v15 = vrot.slane %v10245_v47, 9 }
 0x4ca   : > { %17619 = vst [vmem:[#allocation69_spill] sm:$0xff] %v16592_v33  ;;  %v16594_v3 = vld [vmem:[#allocation3 + $0xac] sm:$0xf]  ;;  %17622 = vst [vmem:[#allocation72_spill] sm:$0xff] %v16602_v63  ;;  %v10247_v53 = vld [vmem:[#allocation3 + $0x9c] sm:$0xe] }
 0x4cb   : > { %12551 = vmatmul.mubr.msk.bf16.vlgmr.msra.gmra.mrb[0].mxu1 %vm1391_vm7, %v16348_v21  ;;  %17620 = vst [vmem:[#allocation70_spill] sm:$0xff] %v16594_v3  ;;  %v16598_v21 = vsel %vm14095_vm15, %v11688_v59, %v10351_v10  ;;  %17623 = vst [vmem:[#allocation73_spill] sm:$0xff] %v16606_v31  ;;  %v16617_v10 = vsel %vm14095_vm15, %v10360_v41, %v10361_v35  ;;  %v10372_v59 = vrot.slane %v16546_v12, 5  ;;  %v9548_v13 = vld [vmem:[#allocation3 + $0xb0] sm:$0x1]  ;;  %v10368_v1 = vrot.slane %v16555_v26, 5 }
 0x4cc   : > { %12583 = vmatpush3.bf16.msra.mxu1 %v16475_v57  ;;  %12554 = vmatprep.mubr.msk.bf16.mxu1 %vm1391_vm7, %v16362_v39  ;;  %17621 = vst [vmem:[#allocation71_spill] sm:$0xff] %v16598_v21  ;;  %v10365_v57 = vrot.slane %v16553_v23, 5  ;;  %v16611_v39 = vld [vmem:[#allocation3 + $0xa4] sm:$0x1]  ;;  %17624 = vst [vmem:[#allocation74_spill] sm:$0xff] %v16617_v10  ;;  %v11691_v61 = vrot.slane %v10246_v4, 9 }
 0x4cd   : > { %13245 = vmatprep.subr.msk.bf16.mxu1 %vm1440_vm0, %v16570_v19  ;;  %v10374_v40 = vrot.slane %v10372_v59, 4  ;;  %v10375_v41 = vrot.slane %v16572_v6, 5  ;;  %v10379_v35 = vrot.slane %v16592_v33, 5  ;;  %v10248_v47 = vld [vmem:[#allocation3 + $0xa8] sm:$0xe]  ;;  %v11692_v4 = vrot.slane %v10247_v53, 9 }
 0x4ce   : > { %v10367_v38 = vrot.slane %v10365_v57, 4  ;;  %v16625_v37 = vsel %vm14095_vm15, %v11690_v15, %v10365_v57  ;;  %v16629_v63 = vld [vmem:[#allocation3 + $0xb8] sm:$0xf]  ;;  %v16637_v45 = vsel %vm14095_vm15, %v11691_v61, %v10372_v59  ;;  %v10386_v57 = vrot.slane %v16594_v3, 5  ;;  %v7985_v15 = vld [vmem:[#allocation3 + $0x84] sm:$0xf] }
 0x4cf   : > { %17626 = vst [vmem:[#allocation76_spill] sm:$0xff] %v16637_v45  ;;  %v9551_v10 = vld [vmem:[#allocation3 + $0xbc] sm:$0x1]  ;;  %v16640_v31 = vld [vmem:[#allocation3 + $0xc4] sm:$0xf]  ;;  %v16646_v33 = vsel %vm14095_vm15, %v10374_v40, %v10375_v41  ;;  %v11693_v59 = vrot.slane %v10248_v47, 9  ;;  %v16657_v40 = vsel %vm14095_vm15, %v11692_v4, %v10379_v35 }
 0x4d0   : > { %v16633_v21 = vsel %vm14095_vm15, %v10367_v38, %v10368_v1  ;;  %17627 = vst [vmem:[#allocation77_spill] sm:$0xff] %v16646_v33  ;;  %v10381_v1 = vrot.slane %v10379_v35, 4  ;;  %v10382_v38 = vrot.slane %v16611_v39, 5  ;;  %v10388_v53 = vrot.slane %v10386_v57, 4  ;;  %v10249_v26 = vld [vmem:[#allocation3 + $0xb4] sm:$0xe] }
 0x4d1   : > { %17625 = vst [vmem:[#allocation75_spill] sm:$0xff] %v16633_v21  ;;  %v10389_v3 = vrot.slane %v9548_v13, 5  ;;  %v17628_v12 = vshrl.u32 %v16111_v44, 16  ;;  %v9554_v21 = vld [vmem:[#allocation3 + $0xc8] sm:$0x1]  ;;  %v10393_v47 = vrot.slane %v16629_v63, 5  ;;  %v16670_v44 = vsel %vm14095_vm15, %v11693_v59, %v10386_v57 }
 0x4d2   : > { %v16661_v41 = vsel %vm14095_vm15, %v10381_v1, %v10382_v38  ;;  %v10250_v61 = vld [vmem:[#allocation3 + $0xc0] sm:$0xe]  ;;  %v10400_v13 = vrot.slane %v16640_v31, 5  ;;  %v11694_v4 = vrot.slane %v10249_v26, 9  ;;  %v10396_v38 = vrot.slane %v9551_v10, 5 }
 0x4d3   : > { %12555 = vmatmul.mubr.msk.bf16.gmra.mrb[4].mxu1 %vm1391_vm7, %v16384_v7  ;;  %v8235_v6 = vrot.slane %v17628_v12, 4  ;;  %17629 = vst [vmem:[#allocation78_spill] sm:$0xff] %v16661_v41  ;;  %v16674_v12 = vsel %vm14095_vm15, %v10388_v53, %v10389_v3  ;;  %v10395_v1 = vrot.slane %v10393_v47, 4  ;;  %v11695_v33 = vrot.slane %v10250_v61, 9 }
 0x4d4   : > { %12558 = vmatprep.mubr.msk.bf16.mxu1 %vm1391_vm7, %v16401_v51  ;;  %v11710_v35 = vcombine.low %v16670_v44, %v16674_v12  ;;  %v8244_v51 = vshrl.u32 %v7985_v15, 16  ;;  %v10402_v45 = vrot.slane %v10400_v13, 4  ;;  %v10403_v7 = vrot.slane %v9554_v21, 5  ;;  %v17165_v44 = vld [vmem:[%s17343_s6] ss:$0 sm:$0xff] }
 0x4d5   : > { %v8253_v41 = vshll.u32 %v16125_v11, 16  ;;  %v8257_v57 = vshrl.u32 %v16125_v11, 16  ;;  %v16683_v3 = vsel %vm14095_vm15, %v11694_v4, %v10393_v47  ;;  %v16687_v59 = vsel %vm14095_vm15, %v10395_v1, %v10396_v38 }
 0x4d6   : > { %v8247_v53 = vshll.u32 %v7985_v15, 16  ;;  %v11711_v26 = vcombine.low %v16683_v3, %v16687_v59  ;;  %v16693_v10 = vsel %vm14095_vm15, %v11695_v33, %v10400_v13  ;;  %v16697_v21 = vsel %vm14095_vm15, %v10402_v45, %v10403_v7  ;;  %v10786_v3 = vld [vmem:[%s13674_s10 + $0x10] sm:$0xff] }
 0x4d7   : > { %v17630_v11 = vor.u32 %v16397_v55, %v16395_v29  ;;  %v17631_v47 = vor.u32 %v16416_v52, %v16414_v62  ;;  %v8236_v15 = vor.u32 %v8235_v6, %v16584_v0  ;;  %v11712_v1 = vcombine.low %v16693_v10, %v16697_v21  ;;  %v10784_v21 = vld [vmem:[%s13674_s10] sm:$0xff] }
 0x4d8   : > { %v17632_v33 = vsel %vm13682_vm9, %v16393_v27, %v16406_v43  ;;  %v17633_v29 = vsel %vm13682_vm9, %v16388_v20, %v16365_v50  ;;  %v17634_v45 = vshll.u32 %v16081_v60, 16  ;;  %v17635_v6 = vshll.u32 %v16104_v30, 16  ;;  %v7988_v43 = vld [vmem:[#allocation3 + $0x90] sm:$0xf] }
 0x4d9   : > { %v8203_v61 = vrot.slane %v17630_v11, 4  ;;  %v8213_v4 = vrot.slane %v17631_v47, 4  ;;  %v11540_v55 = vcombine.low %v17633_v29, %v17632_v33  ;;  %v8239_v13 = vshll.u32 %v16123_v9, 16 }
 0x4da   : > { %v8193_v52 = vrot.slane %v17634_v45, 5  ;;  %v8217_v7 = vrot.slane %v17635_v6, 5  ;;  %v16725_v38 = vrot.slane %v8253_v41, 5  ;;  %v8259_v27 = vrot.slane %v8257_v57, 4 }
 0x4db   : > { %12559 = vmatmul.mubr.msk.bf16.gmra.mrb[8].mxu1 %vm1391_vm7, %v16411_v2  ;;  %v8184_v60 = vsel %vm13682_vm9, %v16424_v48, %v16375_v34  ;;  %v8226_v50 = vor.u32 %v16467_v5, %v16452_v56  ;;  %v8246_v20 = vrot.slane %v8244_v51, 4  ;;  %v8249_v2 = vrot.slane %v8247_v53, 5  ;;  %v7991_v5 = vld [vmem:[#allocation3 + $0x9c] sm:$0xf] }
 0x4dc   : > { %12562 = vmatprep.mubr.msk.bf16.mxu1 %vm1391_vm7, %v11540_v55  ;;  %v8194_v30 = vsel %vm13682_vm9, %v16440_v49, %v8193_v52  ;;  %v8208_v9 = vsel %vm13682_vm9, %v8203_v61, %v16414_v62  ;;  %v8218_v41 = vsel %vm13682_vm9, %v8213_v4, %v8217_v7  ;;  %v8237_v57 = vrot.slane %v8236_v15, 4 }
 0x4dd   : > { %v8268_v11 = vshrl.u32 %v7988_v43, 16  ;;  %v8271_v47 = vshll.u32 %v7988_v43, 16  ;;  %v8277_v34 = vshll.u32 %v16142_v46, 16  ;;  %v8281_v48 = vshrl.u32 %v16142_v46, 16 }
 0x4de   : > { %v8241_v56 = vrot.slane %v8239_v13, 5  ;;  %v8260_v51 = vor.u32 %v8259_v27, %v16725_v38  ;;  %v8301_v49 = vshll.u32 %v16155_v58, 16  ;;  %v8305_v53 = vshrl.u32 %v16155_v58, 16 }
 0x4df   : > { %v11541_v33 = vcombine.low %v8184_v60, %v8194_v30  ;;  %v11542_v62 = vcombine.low %v8208_v9, %v8218_v41  ;;  %v8227_v61 = vrot.slane %v8226_v50, 4  ;;  %v8250_v29 = vor.u32 %v8249_v2, %v8246_v20  ;;  %v7994_v30 = vld [vmem:[#allocation3 + $0xa8] sm:$0xf] }
 0x4e0   : > { %v8242_v4 = vsel %vm13682_vm9, %v8237_v57, %v8241_v56  ;;  %v8263_v15 = vshll.u32 %v16133_v14, 16  ;;  %v8292_v55 = vshrl.u32 %v7991_v5, 16  ;;  %v8295_v45 = vshll.u32 %v7991_v5, 16 }
 0x4e1   : > { %v8270_v46 = vrot.slane %v8268_v11, 4  ;;  %v8273_v52 = vrot.slane %v8271_v47, 5  ;;  %v8279_v6 = vrot.slane %v8277_v34, 5  ;;  %v8283_v7 = vrot.slane %v8281_v48, 4  ;;  %v7997_v47 = vld [vmem:[#allocation3 + $0xb4] sm:$0xf] }
 0x4e2   : > { %v8261_v13 = vrot.slane %v8260_v51, 4  ;;  %v8303_v27 = vrot.slane %v8301_v49, 5  ;;  %v8307_v58 = vrot.slane %v8305_v53, 4  ;;  %v8232_v43 = vsel %vm13682_vm9, %v8227_v61, %v16584_v0 }
 0x4e3   : > { %12563 = vmatmul.mubr.msk.bf16.gmra.mrb[12].mxu1 %vm1391_vm7, %v11541_v33  ;;  %v8251_v60 = vrot.slane %v8250_v29, 4  ;;  %v11543_v50 = vcombine.low %v8232_v43, %v8242_v4  ;;  %v8265_v14 = vrot.slane %v8263_v15, 5  ;;  %v8294_v20 = vrot.slane %v8292_v55, 4 }
 0x4e4   : > { %12566 = vmatprep.mubr.msk.bf16.mxu1 %vm1391_vm7, %v11542_v62  ;;  %v8297_v2 = vrot.slane %v8295_v45, 5  ;;  %v8274_v9 = vor.u32 %v8273_v52, %v8270_v46  ;;  %v8284_v41 = vor.u32 %v8283_v7, %v8279_v6  ;;  %v8325_v57 = vshll.u32 %v16183_v28, 16 }
 0x4e5   : > { %v8329_v11 = vshrl.u32 %v16183_v28, 16  ;;  %v8266_v34 = vsel %vm13682_vm9, %v8261_v13, %v8265_v14  ;;  %v8308_v48 = vor.u32 %v8307_v58, %v8303_v27  ;;  %v8349_v5 = vshll.u32 %v16195_v18, 16 }
 0x4e6   : > { %v8353_v0 = vshrl.u32 %v16195_v18, 16  ;;  %v8256_v56 = vsel %vm13682_vm9, %v8251_v60, %v16725_v38  ;;  %v8287_v51 = vshll.u32 %v16153_v24, 16  ;;  %v8316_v49 = vshrl.u32 %v7994_v30, 16  ;;  %v8000_v60 = vld [vmem:[#allocation3 + $0xc0] sm:$0xf] }
 0x4e7   : > { %v8319_v53 = vshll.u32 %v7994_v30, 16  ;;  %v8298_v33 = vor.u32 %v8297_v2, %v8294_v20  ;;  %v8311_v28 = vshll.u32 %v16172_v8, 16  ;;  %v8340_v62 = vshrl.u32 %v7997_v47, 16 }
 0x4e8   : > { %v8343_v61 = vshll.u32 %v7997_v47, 16  ;;  %v11544_v29 = vcombine.low %v8256_v56, %v8266_v34  ;;  %v8285_v4 = vrot.slane %v8284_v41, 4  ;;  %v8327_v15 = vrot.slane %v8325_v57, 5 }
 0x4e9   : > { %v8331_v55 = vrot.slane %v8329_v11, 4  ;;  %v8275_v18 = vrot.slane %v8274_v9, 4  ;;  %v8309_v45 = vrot.slane %v8308_v48, 4  ;;  %v8351_v46 = vrot.slane %v8349_v5, 5 }
 0x4ea   : > { %v8355_v52 = vrot.slane %v8353_v0, 4  ;;  %v8289_v24 = vrot.slane %v8287_v51, 5  ;;  %v8318_v38 = vrot.slane %v8316_v49, 4  ;;  %v8321_v7 = vrot.slane %v8319_v53, 5 }
 0x4eb   : > { %12567 = vmatmul.mubr.msk.bf16.gmra.mrb[16].mxu1 %vm1391_vm7, %v11543_v50  ;;  %v8299_v13 = vrot.slane %v8298_v33, 4  ;;  %v8313_v58 = vrot.slane %v8311_v28, 5  ;;  %v8342_v8 = vrot.slane %v8340_v62, 4  ;;  %v8345_v43 = vrot.slane %v8343_v61, 5 }
 0x4ec   : > { %12570 = vmatprep.mubr.msk.bf16.mxu1 %vm1391_vm7, %v11544_v29  ;;  %v8290_v14 = vsel %vm13682_vm9, %v8285_v4, %v8289_v24  ;;  %v8332_v20 = vor.u32 %v8331_v55, %v8327_v15  ;;  %v8373_v50 = vshll.u32 %v16210_v16, 16  ;;  %v8377_v2 = vshrl.u32 %v16210_v16, 16 }
 0x4ed   : > { %v8280_v30 = vsel %vm13682_vm9, %v8275_v18, %v8279_v6  ;;  %v8314_v9 = vsel %vm13682_vm9, %v8309_v45, %v8313_v58  ;;  %v8356_v41 = vor.u32 %v8355_v52, %v8351_v46  ;;  %v8322_v57 = vor.u32 %v8321_v7, %v8318_v38  ;;  %v17636_v52 = vld [vmem:[#allocation26_spill] sm:$0xff] }
 0x4ee   : > { %v8335_v11 = vshll.u32 %v16203_v17, 16  ;;  %v8364_v47 = vshrl.u32 %v8000_v60, 16  ;;  %v8367_v34 = vshll.u32 %v8000_v60, 16  ;;  %v11545_v48 = vcombine.low %v8280_v30, %v8290_v14  ;;  %v17637_v14 = vld [vmem:[#allocation34_spill] sm:$0xff] }
 0x4ef   : > { %v8304_v5 = vsel %vm13682_vm9, %v8299_v13, %v8303_v27  ;;  %v8346_v0 = vor.u32 %v8345_v43, %v8342_v8  ;;  %v8359_v56 = vshll.u32 %v16208_v42, 16  ;;  %v8333_v51 = vrot.slane %v8332_v20, 4 }
 0x4f0   : > { %v11546_v16 = vcombine.low %v8304_v5, %v8314_v9  ;;  %v8375_v49 = vrot.slane %v8373_v50, 5  ;;  %v8379_v6 = vrot.slane %v8377_v2, 4  ;;  %v8357_v53 = vrot.slane %v8356_v41, 4  ;;  %v17638_v50 = vld [vmem:[#allocation33_spill] sm:$0xff] }
 0x4f1   : > { %v8323_v33 = vrot.slane %v8322_v57, 4  ;;  %v8337_v17 = vrot.slane %v8335_v11, 5  ;;  %v8366_v28 = vrot.slane %v8364_v47, 4  ;;  %v8369_v62 = vrot.slane %v8367_v34, 5  ;;  %v8682_v34 = vld [vmem:[#allocation3 + $0x18] sm:$0xe] }
 0x4f2   : > { %v8347_v61 = vrot.slane %v8346_v0, 4  ;;  %v8361_v29 = vrot.slane %v8359_v56, 5  ;;  %v8380_v4 = vor.u32 %v8379_v6, %v8375_v49  ;;  %v8747_v55 = vrot.slane %v16292_v54, 5  ;;  %v8681_v54 = vld [vmem:[#allocation3 + $0xc] sm:$0xe] }
 0x4f3   : > { %12571 = vmatmul.mubr.msk.bf16.gmra.mrb[20].mxu1 %vm1391_vm7, %v11545_v48  ;;  %v8338_v27 = vsel %vm13682_vm9, %v8333_v51, %v8337_v17  ;;  %v8328_v18 = vsel %vm13682_vm9, %v8323_v33, %v8327_v15  ;;  %v8370_v45 = vor.u32 %v8369_v62, %v8366_v28  ;;  %v8383_v24 = vshll.u32 %v17636_v52, 16  ;;  %v17639_v48 = vld [vmem:[#allocation35_spill] sm:$0xff]  ;;  %v17641_v33 = vld [vmem:[#allocation17_spill] sm:$0xff]  ;;  %v17643_v28 = vld [vmem:[#allocation18_spill] sm:$0xff] }
 0x4f4   : > { %12574 = vmatprep.mubr.msk.bf16.mxu1 %vm1391_vm7, %v11546_v16  ;;  %v8362_v42 = vsel %vm13682_vm9, %v8357_v53, %v8361_v29  ;;  %v11547_v38 = vcombine.low %v8328_v18, %v8338_v27  ;;  %v8352_v7 = vsel %vm13682_vm9, %v8347_v61, %v8351_v46  ;;  %v8381_v58 = vrot.slane %v8380_v4, 4  ;;  %v11648_v6 = vld [vmem:[%s17341_s4 + $0xe] sm:$0x3]  ;;  %v17640_v53 = vld [vmem:[#allocation16_spill] sm:$0xff]  ;;  %v17647_v29 = vld [vmem:[#allocation21_spill] sm:$0xff] }
 0x4f5   : > { %v11548_v13 = vcombine.low %v8352_v7, %v8362_v42  ;;  %v8749_v8 = vrot.slane %v8747_v55, 4  ;;  %v8371_v43 = vrot.slane %v8370_v45, 4  ;;  %v8385_v60 = vrot.slane %v8383_v24, 5  ;;  %v17644_v62 = vld [vmem:[#allocation19_spill] sm:$0xff]  ;;  %v17650_v42 = vld [vmem:[#allocation8_spill] sm:$0xff]  ;;  %v17652_v18 = vld [vmem:[#allocation9_spill] sm:$0xff] }
 0x4f6   : > { %v8750_v20 = vrot.slane %v17637_v14, 5  ;;  %v8754_v2 = vrot.slane %v17638_v50, 5  ;;  %v11566_v30 = vrot.slane %v8681_v54, 9  ;;  %v8757_v5 = vrot.slane %v17639_v48, 5  ;;  %v17649_v4 = vld [vmem:[#allocation7_spill] sm:$0xff]  ;;  %v17653_v45 = vld [vmem:[#allocation10_spill] sm:$0xff] }
 0x4f7   : > { %v8386_v15 = vsel %vm13682_vm9, %v8381_v58, %v8385_v60  ;;  %v8376_v9 = vsel %vm13682_vm9, %v8371_v43, %v8375_v49  ;;  %v11567_v0 = vrot.slane %v8682_v34, 9  ;;  %v9315_v49 = vsel %vm1440_vm0, %v16570_v19, 0  ;;  %v17646_v19 = vld [vmem:[#allocation20_spill] sm:$0xff]  ;;  %v17655_v24 = vld [vmem:[#allocation11_spill] sm:$0xff]  ;;  %v17659_v58 = vld [vmem:[#allocation14_spill] sm:$0xff] }
 0x4f8   : > { %v8751_v46 = vsel %vm14095_vm15, %v8749_v8, %v8750_v20  ;;  %v11549_v41 = vcombine.low %v8376_v9, %v8386_v15  ;;  %v8748_v57 = vsel %vm14095_vm15, %v11566_v30, %v8747_v55  ;;  %v8756_v47 = vrot.slane %v8754_v2, 4  ;;  %v17661_v43 = vld [vmem:[#allocation15_spill] sm:$0xff]  ;;  %v17662_v60 = vld [vmem:[#allocation6_spill] sm:$0xff]  ;;  %v17664_v14 = vld [vmem:[#allocation5_spill] sm:$0xff] }
 0x4f9   : > { %v11583_v11 = vcombine.low %v8748_v57, %v8751_v46  ;;  %v8755_v16 = vsel %vm14095_vm15, %v11567_v0, %v8754_v2  ;;  %v17642_v17 = vcombine.low %v17640_v53, %v17641_v33  ;;  %v17645_v61 = vcombine.low %v17643_v28, %v17644_v62  ;;  %v17665_v20 = vld [vmem:[#allocation4_spill] sm:$0xff]  ;;  %v17667_v50 = vld [vmem:[#allocation22_spill] sm:$0xff]  ;;  %v17668_v2 = vld [vmem:[#allocation23_spill] sm:$0xff] }
 0x4fa   : > { %v8758_v56 = vsel %vm14095_vm15, %v8756_v47, %v8757_v5  ;;  %v17648_v27 = vcombine.low %v17646_v19, %v17647_v29  ;;  %v17651_v55 = vcombine.low %v17649_v4, %v17650_v42  ;;  %v17654_v52 = vcombine.low %v17652_v18, %v17653_v45  ;;  %v17670_v46 = vld [vmem:[#allocation24_spill] sm:$0xff]  ;;  %v17671_v9 = vld [vmem:[#allocation25_spill] sm:$0xff]  ;;  %v17673_v57 = vld [vmem:[#allocation27_spill] sm:$0xff] }
 0x4fb   : > { %12575 = vmatmul.mubr.msk.bf16.gmra.mrb[24].mxu1 %vm1391_vm7, %v11547_v38  ;;  %v11584_v51 = vcombine.low %v8755_v16, %v8758_v56  ;;  %v17656_v38 = vld [vmem:[#allocation12_spill] sm:$0xff]  ;;  %v17663_v54 = vcombine.low %v17661_v43, %v17662_v60  ;;  %v17666_v15 = vcombine.low %v17664_v14, %v17665_v20  ;;  %v17669_v30 = vcombine.low %v17667_v50, %v17668_v2  ;;  %v17676_v34 = vld [vmem:[#allocation29_spill] sm:$0xff]  ;;  %v17677_v48 = vld [vmem:[#allocation30_spill] sm:$0xff] }
 0x4fc   : > { %12578 = vmatprep.mubr.msk.bf16.mxu1 %vm1391_vm7, %v11548_v13  ;;  %v17657_v7 = vcombine.low %v17655_v24, %v17656_v38  ;;  %v17658_v13 = vld [vmem:[#allocation13_spill] sm:$0xff]  ;;  %v17678_v5 = vcombine.low %v17676_v34, %v17677_v48  ;;  %v13315_v0 = vld [vmem:[#allocation3 + $0x18] sm:$0xff]   ;;  %v17679_v56 = vld [vmem:[#allocation31_spill] sm:$0xff]  ;;  %v10041_v53 = vsel %vm1440_vm0, %v11648_v6, 0 }
 0x4fd   : > { %v17660_v8 = vcombine.low %v17658_v13, %v17659_v58  ;;  %v17680_v16 = vld [vmem:[#allocation32_spill] sm:$0xff]  ;;  %v13317_v33 = vld [vmem:[#allocation3 + $0x30] sm:$0xff]   ;;  %v13319_v62 = vld [vmem:[#allocation3 + $0x48] sm:$0xff]  }
 0x4fe   : > { %v13318_v28 = vld [vmem:[#allocation3 + $0x3c] sm:$0xff]   ;;  %v13322_v19 = vld [vmem:[#allocation3 + $0x6c] sm:$0xff]   ;;  %v9513_v38 = vld [vmem:[#allocation3 + $0x24] sm:$0xf] }
 0x4ff   : > { %v13323_v29 = vld [vmem:[#allocation3 + $0x78] sm:$0xff]   ;;  %v13325_v18 = vld [vmem:[#allocation3 + $0x90] sm:$0xff]   ;;  %v9583_v43 = vshrl.u32 %v9513_v38, 16  ;;  %v9586_v60 = vshll.u32 %v9513_v38, 16  ;;  %v9640_v38 = vshll.u32 %v16454_v36, 16 }
 0x500   : > { %v17682_v45 = vld [vmem:[#allocation36_spill] sm:$0xff]  ;;  %v9516_v50 = vld [vmem:[#allocation3 + $0x30] sm:$0xf] }
 0x501   : > { %v9572_v24 = vshrl.u32 %v17682_v45, 16  ;;  %v13326_v2 = vld [vmem:[#allocation3 + $0x9c] sm:$0xff]  }
 0x503   : > { %12579 = vmatmul.mubr.msk.bf16.gmra.mrb[28].mxu1 %vm1391_vm7, %v11549_v41  ;;  %v17672_v41 = vcombine.low %v17670_v46, %v17671_v9 }
 0x504   : > { %12584 = vmatprep.mubr.msk.bf16.mxu1 %vm1391_vm7, %v11583_v11  ;;  %v17674_v11 = vld [vmem:[#allocation28_spill] sm:$0xff] }
 0x505   : > { %v17675_v47 = vcombine.low %v17673_v57, %v17674_v11  ;;  %v9585_v11 = vrot.slane %v9583_v43, 4 }
 0x50b   : > { %12585 = vmatmul.mubr.msk.bf16.vlgmr.msra.gmra.mrb[0].mxu1 %vm1391_vm7, %v11584_v51  ;;  %v17681_v51 = vcombine.low %v17679_v56, %v17680_v16  ;;  %v17685_v16 = vld [vmem:[#allocation37_spill] sm:$0xff] }
 0x50c   : > { %12617 = vmatpush3.bf16.msra.mxu1 %v9315_v49  ;;  %12588 = vmatprep.mubr.msk.bf16.mxu1 %vm1391_vm7, %v17642_v17  ;;  %v13316_v49 = vld [vmem:[#allocation3 + $0x24] sm:$0xff]   ;;  %v16879_v17 = vld [vmem:[%s17341_s4 + $0x10] sm:$0x3] }
 0x50d   : > { %13246 = vmatprep.subr.msk.bf16.mxu1 %vm1440_vm0, %v11648_v6  ;;  %v13320_v6 = vld [vmem:[#allocation3 + $0x54] sm:$0xff]  }
 0x513   : > { %12589 = vmatmul.mubr.msk.bf16.gmra.mrb[4].mxu1 %vm1391_vm7, %v17645_v61  ;;  %v13321_v61 = vld [vmem:[#allocation3 + $0x60] sm:$0xff]  }
 0x514   : > { %12592 = vmatprep.mubr.msk.bf16.mxu1 %vm1391_vm7, %v17648_v27  ;;  %v9510_v27 = vld [vmem:[#allocation3 + $0x18] sm:$0xf] }
 0x515   : > { %v9559_v4 = vshrl.u32 %v9510_v27, 16  ;;  %v9562_v42 = vshll.u32 %v9510_v27, 16 }
 0x517   : > { %v9564_v13 = vrot.slane %v9562_v42, 5 }
 0x51b   : > { %12593 = vmatmul.mubr.msk.bf16.gmra.mrb[8].mxu1 %vm1391_vm7, %v17651_v55  ;;  %v13324_v55 = vld [vmem:[#allocation3 + $0x84] sm:$0xff]  }
 0x51c   : > { %12596 = vmatprep.mubr.msk.bf16.mxu1 %vm1391_vm7, %v17654_v52  ;;  %v9568_v52 = vshll.u32 %v17682_v45, 16  ;;  %v13328_v45 = vld [vmem:[#allocation3 + $0xb4] sm:$0xff]  }
 0x51e   : > { %v16895_v58 = vrot.slane %v9568_v52, 5 }
 0x523   : > { %12597 = vmatmul.mubr.msk.bf16.gmra.mrb[12].mxu1 %vm1391_vm7, %v17657_v7  ;;  %v9561_v7 = vrot.slane %v9559_v4, 4 }
 0x524   : > { %12600 = vmatprep.mubr.msk.bf16.mxu1 %vm1391_vm7, %v17660_v8  ;;  %v9574_v8 = vrot.slane %v9572_v24, 4 }
 0x526   : > { %v9575_v57 = vor.u32 %v9574_v8, %v16895_v58  ;;  %v13329_v8 = vld [vmem:[#allocation3 + $0xc0] sm:$0xff]  }
 0x52b   : > { %12601 = vmatmul.mubr.msk.bf16.gmra.mrb[16].mxu1 %vm1391_vm7, %v17663_v54  ;;  %v17683_v54 = vld [vmem:[#allocation39_spill] sm:$0xff] }
 0x52c   : > { %12604 = vmatprep.mubr.msk.bf16.mxu1 %vm1391_vm7, %v17666_v15  ;;  %v9592_v14 = vshll.u32 %v17683_v54, 16  ;;  %v9596_v20 = vshrl.u32 %v17683_v54, 16  ;;  %v9565_v15 = vor.u32 %v9564_v13, %v9561_v7  ;;  %v9644_v7 = vshrl.u32 %v16454_v36, 16  ;;  %v9522_v13 = vld [vmem:[#allocation3 + $0x48] sm:$0xf] }
 0x52d   : > { %v16925_v36 = vld [vmem:[#allocation3 + $0xd4] sm:$0x1] }
 0x52e   : > { %v16903_v34 = vrot.slane %v9592_v14, 5  ;;  %v9598_v48 = vrot.slane %v9596_v20, 4  ;;  %v9566_v56 = vrot.slane %v9565_v15, 4  ;;  %v17688_v14 = vld [vmem:[#allocation42_spill] sm:$0xff] }
 0x52f   : > { %v9664_v20 = vshll.u32 %v17688_v14, 16  ;;  %v9668_v15 = vshrl.u32 %v17688_v14, 16 }
 0x530   : > { %v9571_v42 = vsel %vm13682_vm9, %v9566_v56, %v16895_v58 }
 0x533   : > { %12605 = vmatmul.mubr.msk.bf16.gmra.mrb[20].mxu1 %vm1391_vm7, %v17669_v30  ;;  %v17684_v30 = vld [vmem:[#allocation38_spill] sm:$0xff] }
 0x534   : > { %12608 = vmatprep.mubr.msk.bf16.mxu1 %vm1391_vm7, %v17672_v41  ;;  %v9616_v46 = vshll.u32 %v17684_v30, 16  ;;  %v9620_v9 = vshrl.u32 %v17684_v30, 16  ;;  %v13327_v41 = vld [vmem:[#allocation3 + $0xa8] sm:$0xff]  }
 0x53b   : > { %12609 = vmatmul.mubr.msk.bf16.gmra.mrb[24].mxu1 %vm1391_vm7, %v17675_v47  ;;  %v9588_v47 = vrot.slane %v9586_v60, 5  ;;  %v17687_v60 = vld [vmem:[#allocation41_spill] sm:$0xff] }
 0x53c   : > { %12612 = vmatprep.mubr.msk.bf16.mxu1 %vm1391_vm7, %v17678_v5  ;;  %v9607_v5 = vshrl.u32 %v9516_v50, 16  ;;  %v9626_v54 = vshll.u32 %v17687_v60, 16 }
 0x543   : > { %12613 = vmatmul.mubr.msk.bf16.gmra.mrb[28].mxu1 %vm1391_vm7, %v17681_v51  ;;  %v9578_v51 = vshll.u32 %v17685_v16, 16  ;;  %v9658_v16 = vshll.u32 %v9522_v13, 16 }
 0x544   : > { %12618 = vmatprep.mubr.msk.bf16.mxu1 %vm1391_vm7, %v13315_v0  ;;  %v9610_v0 = vshll.u32 %v9516_v50, 16 }
 0x546   : > { %v9612_v27 = vrot.slane %v9610_v0, 5  ;;  %v9646_v0 = vrot.slane %v9644_v7, 4 }
 0x54b   : > { %12619 = vmatmul.mubr.msk.bf16.vlgmr.msra.gmra.mrb[0].mxu1 %vm1391_vm7, %v13316_v49  ;;  %v9519_v49 = vld [vmem:[#allocation3 + $0x3c] sm:$0xf] }
 0x54c   : > { %12651 = vmatpush3.bf16.msra.mxu1 %v10041_v53  ;;  %12622 = vmatprep.mubr.msk.bf16.mxu1 %vm1391_vm7, %v13317_v33  ;;  %v17686_v53 = vld [vmem:[#allocation40_spill] sm:$0xff]  ;;  %v9631_v4 = vshrl.u32 %v9519_v49, 16 }
 0x54d   : > { %13247 = vmatprep.subr.msk.bf16.mxu1 %vm1440_vm0, %v16879_v17  ;;  %v9602_v33 = vshll.u32 %v17686_v53, 16  ;;  %v9525_v53 = vld [vmem:[#allocation3 + $0x54] sm:$0xf] }
 0x54e   : > { %v9633_v30 = vrot.slane %v9631_v4, 4  ;;  %v9682_v7 = vshll.u32 %v9525_v53, 16 }
 0x54f   : > { %v9604_v52 = vrot.slane %v9602_v33, 5 }
 0x553   : > { %12623 = vmatmul.mubr.msk.bf16.gmra.mrb[4].mxu1 %vm1391_vm7, %v13318_v28  ;;  %v16908_v28 = vrot.slane %v9616_v46, 5  ;;  %v16923_v46 = vld [vmem:[#allocation3 + $0xd0] sm:$0xf] }
 0x554   : > { %12626 = vmatprep.mubr.msk.bf16.mxu1 %vm1391_vm7, %v13319_v62  ;;  %v9622_v62 = vrot.slane %v9620_v9, 4 }
 0x556   : > { %v9623_v24 = vor.u32 %v9622_v62, %v16908_v28  ;;  %v13330_v62 = vld [vmem:[#allocation3 + $0xcc] sm:$0xff]  }
 0x55b   : > { %12627 = vmatmul.mubr.msk.bf16.gmra.mrb[8].mxu1 %vm1391_vm7, %v13320_v6  ;;  %v9576_v6 = vrot.slane %v9575_v57, 4  ;;  %v10251_v57 = vld [vmem:[#allocation3 + $0xcc] sm:$0xe] }
 0x55c   : > { %12630 = vmatprep.mubr.msk.bf16.mxu1 %vm1391_vm7, %v13321_v61  ;;  %v9589_v61 = vor.u32 %v9588_v47, %v9585_v11  ;;  %v10407_v11 = vrot.slane %v16923_v46, 5  ;;  %v10410_v47 = vrot.slane %v16925_v36, 5  ;;  %v11696_v56 = vrot.slane %v10251_v57, 9 }
 0x55d   : > { %v9684_v57 = vrot.slane %v9682_v7, 5  ;;  %v17693_v7 = vld [vmem:[#allocation51_spill] sm:$0xff] }
 0x55e   : > { %v9590_v43 = vrot.slane %v9589_v61, 4  ;;  %v10409_v33 = vrot.slane %v10407_v11, 4 }
 0x560   : > { %v9595_v25 = vsel %vm13682_vm9, %v9590_v43, %v16903_v34 }
 0x563   : > { %12631 = vmatmul.mubr.msk.bf16.gmra.mrb[12].mxu1 %vm1391_vm7, %v13322_v19  ;;  %v9599_v19 = vor.u32 %v9598_v48, %v16903_v34  ;;  %v9624_v48 = vrot.slane %v9623_v24, 4 }
 0x564   : > { %12634 = vmatprep.mubr.msk.bf16.mxu1 %vm1391_vm7, %v13323_v29  ;;  %v9609_v29 = vrot.slane %v9607_v5, 4  ;;  %v16930_v5 = vrot.slane %v9640_v38, 5  ;;  %v9679_v38 = vshrl.u32 %v9525_v53, 16 }
 0x565   : > { %v9600_v50 = vrot.slane %v9599_v19, 4  ;;  %v9628_v19 = vrot.slane %v9626_v54, 5  ;;  %v17690_v54 = vld [vmem:[#allocation47_spill] sm:$0xff] }
 0x566   : > { %v9688_v14 = vshll.u32 %v17690_v54, 16 }
 0x567   : > { %v9605_v61 = vsel %vm13682_vm9, %v9600_v50, %v9604_v52  ;;  %v9629_v52 = vsel %vm13682_vm9, %v9624_v48, %v9628_v19  ;;  %v9692_v50 = vshrl.u32 %v17690_v54, 16  ;;  %v17691_v48 = vld [vmem:[#allocation46_spill] sm:$0xff] }
 0x569   : > { %v9694_v53 = vrot.slane %v9692_v50, 4 }
 0x56b   : > { %12635 = vmatmul.mubr.msk.bf16.gmra.mrb[16].mxu1 %vm1391_vm7, %v13324_v55  ;;  %v9580_v55 = vrot.slane %v9578_v51, 5  ;;  %v16932_v51 = vrot.slane %v9664_v20, 5  ;;  %v11650_v20 = vcombine.low %v9595_v25, %v9605_v61  ;;  %v10511_v61 = vsel %vm1440_vm0, %v16879_v17, 0 }
 0x56c   : > { %12638 = vmatprep.mubr.msk.bf16.mxu1 %vm1391_vm7, %v13325_v18  ;;  %v9634_v18 = vshll.u32 %v9519_v49, 16  ;;  %v9670_v49 = vrot.slane %v9668_v15, 4 }
 0x56d   : > { %v9581_v58 = vsel %vm13682_vm9, %v9576_v6, %v9580_v55  ;;  %v17689_v55 = vld [vmem:[#allocation43_spill] sm:$0xff] }
 0x56e   : > { %v9636_v9 = vrot.slane %v9634_v18, 5  ;;  %v11649_v6 = vcombine.low %v9571_v42, %v9581_v58  ;;  %v9650_v18 = vshll.u32 %v17689_v55, 16  ;;  %v9671_v60 = vor.u32 %v9670_v49, %v16932_v51 }
 0x56f   : > { %v9712_v49 = vshll.u32 %v16480_v32, 16 }
 0x570   : > { %v9637_v4 = vor.u32 %v9636_v9, %v9633_v30  ;;  %v9652_v58 = vrot.slane %v9650_v18, 5  ;;  %v9672_v43 = vrot.slane %v9671_v60, 4 }
 0x571   : > { %v16977_v17 = vrot.slane %v9712_v49, 5 }
 0x572   : > { %v9638_v9 = vrot.slane %v9637_v4, 4 }
 0x573   : > { %12639 = vmatmul.mubr.msk.bf16.gmra.mrb[20].mxu1 %vm1391_vm7, %v13326_v2  ;;  %v9613_v2 = vor.u32 %v9612_v27, %v9609_v29  ;;  %v16938_v29 = vsel %vm14095_vm15, %v11696_v56, %v10407_v11  ;;  %v9531_v11 = vld [vmem:[#allocation3 + $0x6c] sm:$0xf]  ;;  %v16962_v56 = vrot.slane %v9688_v14, 5 }
 0x574   : > { %12642 = vmatprep.mubr.msk.bf16.mxu1 %vm1391_vm7, %v13327_v41  ;;  %v9655_v41 = vshrl.u32 %v9522_v13, 16  ;;  %v9647_v13 = vor.u32 %v9646_v0, %v16930_v5  ;;  %v9674_v0 = vshll.u32 %v17691_v48, 16  ;;  %v9643_v18 = vsel %vm13682_vm9, %v9638_v9, %v16930_v5  ;;  %v17694_v9 = vld [vmem:[#allocation54_spill] sm:$0xff] }
 0x575   : > { %v9614_v27 = vrot.slane %v9613_v2, 4  ;;  %v9528_v2 = vld [vmem:[#allocation3 + $0x60] sm:$0xf]  ;;  %v9695_v60 = vor.u32 %v9694_v53, %v16962_v56 }
 0x576   : > { %v9657_v24 = vrot.slane %v9655_v41, 4  ;;  %v9681_v41 = vrot.slane %v9679_v38, 4  ;;  %v9676_v38 = vrot.slane %v9674_v0, 5 }
 0x577   : > { %v9619_v15 = vsel %vm13682_vm9, %v9614_v27, %v16908_v28  ;;  %v9716_v28 = vshrl.u32 %v16480_v32, 16  ;;  %v17692_v27 = vld [vmem:[#allocation56_spill] sm:$0xff]  ;;  %v9696_v0 = vrot.slane %v9695_v60, 4  ;;  %v9540_v60 = vld [vmem:[#allocation3 + $0x90] sm:$0xf] }
 0x578   : > { %v11651_v30 = vcombine.low %v9619_v15, %v9629_v52  ;;  %v9685_v19 = vor.u32 %v9684_v57, %v9681_v41  ;;  %v9736_v4 = vshll.u32 %v17692_v27, 16  ;;  %v9740_v55 = vshrl.u32 %v17692_v27, 16 }
 0x579   : > { %v9698_v52 = vshll.u32 %v17693_v7, 16  ;;  %v9677_v14 = vsel %vm13682_vm9, %v9672_v43, %v9676_v38  ;;  %v9760_v41 = vshll.u32 %v17694_v9, 16  ;;  %v9764_v57 = vshrl.u32 %v17694_v9, 16  ;;  %v17696_v7 = vld [vmem:[#allocation59_spill] sm:$0xff] }
 0x57a   : > { %v9686_v15 = vrot.slane %v9685_v19, 4  ;;  %v9784_v19 = vshll.u32 %v16553_v23, 16  ;;  %v9788_v27 = vshrl.u32 %v16553_v23, 16 }
 0x57b   : > { %12643 = vmatmul.mubr.msk.bf16.gmra.mrb[24].mxu1 %vm1391_vm7, %v13328_v45  ;;  %v16943_v45 = vsel %vm14095_vm15, %v10409_v33, %v10410_v47  ;;  %v9648_v47 = vrot.slane %v9647_v13, 4  ;;  %v9706_v33 = vshll.u32 %v9528_v2, 16 }
 0x57c   : > { %12646 = vmatprep.mubr.msk.bf16.mxu1 %vm1391_vm7, %v13329_v8  ;;  %v11713_v42 = vcombine.low %v16938_v29, %v16943_v45  ;;  %v9660_v8 = vrot.slane %v9658_v16, 5  ;;  %v9703_v16 = vshrl.u32 %v9528_v2, 16  ;;  %v9534_v2 = vld [vmem:[#allocation3 + $0x78] sm:$0xf]  ;;  %v9691_v53 = vsel %vm13682_vm9, %v9686_v15, %v16962_v56 }
 0x57d   : > { %v9708_v25 = vrot.slane %v9706_v33, 5  ;;  %v17008_v15 = vrot.slane %v9784_v19, 5  ;;  %v17699_v19 = vld [vmem:[#allocation64_spill] sm:$0xff] }
 0x57e   : > { %v9661_v34 = vor.u32 %v9660_v8, %v9657_v24  ;;  %v9653_v24 = vsel %vm13682_vm9, %v9648_v47, %v9652_v58  ;;  %v9705_v13 = vrot.slane %v9703_v16, 4  ;;  %v9718_v8 = vrot.slane %v9716_v28, 4  ;;  %v9537_v28 = vld [vmem:[#allocation3 + $0x84] sm:$0xf] }
 0x57f   : > { %v16983_v58 = vrot.slane %v9736_v4, 5  ;;  %v11652_v50 = vcombine.low %v9643_v18, %v9653_v24  ;;  %v9775_v18 = vshrl.u32 %v9537_v28, 16  ;;  %v9778_v24 = vshll.u32 %v9537_v28, 16 }
 0x580   : > { %v9662_v32 = vrot.slane %v9661_v34, 4  ;;  %v9719_v47 = vor.u32 %v9718_v8, %v16977_v17  ;;  %v17695_v34 = vld [vmem:[#allocation52_spill] sm:$0xff]  ;;  %v9709_v16 = vor.u32 %v9708_v25, %v9705_v13  ;;  %v17697_v25 = vld [vmem:[#allocation62_spill] sm:$0xff] }
 0x581   : > { %v9722_v48 = vshll.u32 %v17695_v34, 16  ;;  %v9808_v23 = vshll.u32 %v17697_v25, 16  ;;  %v9802_v34 = vshll.u32 %v9540_v60, 16 }
 0x582   : > { %v9720_v4 = vrot.slane %v9719_v47, 4  ;;  %v9799_v47 = vshrl.u32 %v9540_v60, 16  ;;  %v9546_v60 = vld [vmem:[#allocation3 + $0xa8] sm:$0xf] }
 0x583   : > { %12647 = vmatmul.mubr.msk.bf16.gmra.mrb[28].mxu1 %vm1391_vm7, %v13330_v62  ;;  %v9727_v62 = vshrl.u32 %v9531_v11, 16 }
 0x584   : > { %12652 = vmatprep.mubr.msk.bf16.mxu1 %vm1391_vm7, %v11649_v6  ;;  %v9730_v6 = vshll.u32 %v9531_v11, 16  ;;  %v9700_v11 = vrot.slane %v9698_v52, 5  ;;  %v9746_v52 = vshll.u32 %v17696_v7, 16 }
 0x585   : > { %v9729_v5 = vrot.slane %v9727_v62, 4  ;;  %v9751_v62 = vshrl.u32 %v9534_v2, 16 }
 0x586   : > { %v9732_v54 = vrot.slane %v9730_v6, 5  ;;  %v9754_v6 = vshll.u32 %v9534_v2, 16  ;;  %v9701_v56 = vsel %vm13682_vm9, %v9696_v0, %v9700_v11  ;;  %v17698_v2 = vld [vmem:[#allocation60_spill] sm:$0xff]  ;;  %v9748_v11 = vrot.slane %v9746_v52, 5 }
 0x587   : > { %v9753_v13 = vrot.slane %v9751_v62, 4  ;;  %v9770_v9 = vshll.u32 %v17698_v2, 16  ;;  %v17016_v0 = vrot.slane %v9808_v23, 5  ;;  %v17701_v23 = vld [vmem:[#allocation67_spill] sm:$0xff] }
 0x588   : > { %v9733_v49 = vor.u32 %v9732_v54, %v9729_v5  ;;  %v9756_v8 = vrot.slane %v9754_v6, 5  ;;  %v9812_v5 = vshrl.u32 %v17697_v25, 16 }
 0x58a   : > { %v9734_v38 = vrot.slane %v9733_v49, 4  ;;  %v9543_v49 = vld [vmem:[#allocation3 + $0x9c] sm:$0xf] }
 0x58b   : > { %12653 = vmatmul.mubr.msk.bf16.vlgmr.msra.gmra.mrb[0].mxu1 %vm1391_vm7, %v11650_v20  ;;  %v9742_v20 = vrot.slane %v9740_v55, 4  ;;  %v9724_v55 = vrot.slane %v9722_v48, 5 }
 0x58c   : > { %12685 = vmatpush3.bf16.msra.mxu1 %v10511_v61  ;;  %12656 = vmatprep.mubr.msk.bf16.mxu1 %vm1391_vm7, %v11651_v30  ;;  %v9667_v30 = vsel %vm13682_vm9, %v9662_v32, %v16932_v51  ;;  %v16996_v61 = vrot.slane %v9760_v41, 5  ;;  %v9766_v51 = vrot.slane %v9764_v57, 4  ;;  %v9710_v32 = vrot.slane %v9709_v16, 4 }
 0x58d   : > { %v11653_v43 = vcombine.low %v9667_v30, %v9677_v14  ;;  %v9743_v33 = vor.u32 %v9742_v20, %v16983_v58  ;;  %v9790_v20 = vrot.slane %v9788_v27, 4  ;;  %v9777_v41 = vrot.slane %v9775_v18, 4 }
 0x58e   : > { %v9767_v14 = vor.u32 %v9766_v51, %v16996_v61  ;;  %v9780_v57 = vrot.slane %v9778_v24, 5  ;;  %v11654_v30 = vcombine.low %v9691_v53, %v9701_v56  ;;  %v9715_v48 = vsel %vm13682_vm9, %v9710_v32, %v16977_v17 }
 0x58f   : > { %v9744_v54 = vrot.slane %v9743_v33, 4  ;;  %v9814_v16 = vrot.slane %v9812_v5, 4  ;;  %v9791_v6 = vor.u32 %v9790_v20, %v17008_v15  ;;  %v9739_v53 = vsel %vm13682_vm9, %v9734_v38, %v16983_v58 }
 0x590   : > { %v9768_v62 = vrot.slane %v9767_v14, 4  ;;  %v9772_v51 = vrot.slane %v9770_v9, 5  ;;  %v9781_v17 = vor.u32 %v9780_v57, %v9777_v41  ;;  %v9794_v27 = vshll.u32 %v17699_v19, 16 }
 0x591   : > { %v9749_v33 = vsel %vm13682_vm9, %v9744_v54, %v9748_v11  ;;  %v9823_v18 = vshrl.u32 %v9543_v49, 16  ;;  %v9826_v24 = vshll.u32 %v9543_v49, 16  ;;  %v9815_v7 = vor.u32 %v9814_v16, %v17016_v0  ;;  %v17702_v54 = vld [vmem:[#allocation70_spill] sm:$0xff] }
 0x592   : > { %v11656_v56 = vcombine.low %v9739_v53, %v9749_v33  ;;  %v9773_v52 = vsel %vm13682_vm9, %v9768_v62, %v9772_v51  ;;  %v9796_v25 = vrot.slane %v9794_v27, 5  ;;  %v9818_v5 = vshll.u32 %v17701_v23, 16  ;;  %v9549_v62 = vld [vmem:[#allocation3 + $0xb4] sm:$0xf] }
 0x593   : > { %12657 = vmatmul.mubr.msk.bf16.gmra.mrb[4].mxu1 %vm1391_vm7, %v11652_v50  ;;  %v9725_v50 = vsel %vm13682_vm9, %v9720_v4, %v9724_v55  ;;  %v9801_v4 = vrot.slane %v9799_v47, 4  ;;  %v9804_v55 = vrot.slane %v9802_v34, 5  ;;  %v9856_v14 = vshll.u32 %v17702_v54, 16 }
 0x594   : > { %12660 = vmatprep.mubr.msk.bf16.mxu1 %vm1391_vm7, %v11653_v43  ;;  %v9757_v43 = vor.u32 %v9756_v8, %v9753_v13  ;;  %v11655_v28 = vcombine.low %v9715_v48, %v9725_v50  ;;  %v9792_v13 = vrot.slane %v9791_v6, 4  ;;  %v17700_v8 = vld [vmem:[#allocation69_spill] sm:$0xff]  ;;  %v9860_v20 = vshrl.u32 %v17702_v54, 16  ;;  %v9555_v54 = vld [vmem:[#allocation3 + $0xcc] sm:$0xf] }
 0x595   : > { %v9832_v58 = vshll.u32 %v17700_v8, 16  ;;  %v9836_v38 = vshrl.u32 %v17700_v8, 16  ;;  %v9782_v50 = vrot.slane %v9781_v17, 4  ;;  %v9805_v2 = vor.u32 %v9804_v55, %v9801_v4 }
 0x596   : > { %v9758_v32 = vrot.slane %v9757_v43, 4  ;;  %v9825_v9 = vrot.slane %v9823_v18, 4  ;;  %v9828_v41 = vrot.slane %v9826_v24, 5  ;;  %v9847_v11 = vshrl.u32 %v9546_v60, 16 }
 0x597   : > { %v9850_v47 = vshll.u32 %v9546_v60, 16  ;;  %v9797_v48 = vsel %vm13682_vm9, %v9792_v13, %v9796_v25  ;;  %v17040_v43 = vrot.slane %v9832_v58, 5  ;;  %v9838_v16 = vrot.slane %v9836_v38, 4  ;;  %v13371_v38 = vld [vmem:[#allocation3 + $0xb0] sm:$0x1] }
 0x598   : > { %v9763_v57 = vsel %vm13682_vm9, %v9758_v32, %v16996_v61  ;;  %v9820_v49 = vrot.slane %v9818_v5, 5  ;;  %v9862_v33 = vrot.slane %v9860_v20, 4  ;;  %v9787_v61 = vsel %vm13682_vm9, %v9782_v50, %v17008_v15  ;;  %v9552_v32 = vld [vmem:[#allocation3 + $0xc0] sm:$0xf] }
 0x599   : > { %v11657_v34 = vcombine.low %v9763_v57, %v9773_v52  ;;  %v9806_v6 = vrot.slane %v9805_v2, 4  ;;  %v9829_v53 = vor.u32 %v9828_v41, %v9825_v9  ;;  %v9842_v51 = vshll.u32 %v16611_v39, 16 }
 0x59a   : > { %v11658_v17 = vcombine.low %v9787_v61, %v9797_v48  ;;  %v9849_v27 = vrot.slane %v9847_v11, 4  ;;  %v9852_v4 = vrot.slane %v9850_v47, 5  ;;  %v9839_v55 = vor.u32 %v9838_v16, %v17040_v43 }
 0x59b   : > { %12661 = vmatmul.mubr.msk.bf16.gmra.mrb[8].mxu1 %vm1391_vm7, %v11654_v30  ;;  %v9816_v30 = vrot.slane %v9815_v7, 4  ;;  %v9871_v18 = vshrl.u32 %v9549_v62, 16  ;;  %v9880_v24 = vshll.u32 %v16629_v63, 16  ;;  %v9874_v7 = vshll.u32 %v9549_v62, 16 }
 0x59c   : > { %12664 = vmatprep.mubr.msk.bf16.mxu1 %vm1391_vm7, %v11655_v28  ;;  %v17043_v28 = vrot.slane %v9856_v14, 5  ;;  %v9904_v52 = vshll.u32 %v16640_v31, 16  ;;  %v9908_v39 = vshrl.u32 %v16640_v31, 16  ;;  %v9811_v13 = vsel %vm13682_vm9, %v9806_v6, %v17016_v0 }
 0x59d   : > { %v9821_v19 = vsel %vm13682_vm9, %v9816_v30, %v9820_v49  ;;  %v9830_v8 = vrot.slane %v9829_v53, 4  ;;  %v9844_v58 = vrot.slane %v9842_v51, 5  ;;  %v9866_v60 = vshll.u32 %v13371_v38, 16  ;;  %v13372_v51 = vld [vmem:[#allocation3 + $0xbc] sm:$0x1] }
 0x59e   : > { %v9863_v15 = vor.u32 %v9862_v33, %v17043_v28  ;;  %v11659_v25 = vcombine.low %v9811_v13, %v9821_v19  ;;  %v9853_v23 = vor.u32 %v9852_v4, %v9849_v27  ;;  %v9895_v5 = vshrl.u32 %v9552_v32, 16 }
 0x59f   : > { %v9840_v14 = vrot.slane %v9839_v55, 4  ;;  %v9873_v20 = vrot.slane %v9871_v18, 4  ;;  %v9882_v50 = vrot.slane %v9880_v24, 5  ;;  %v9876_v9 = vrot.slane %v9874_v7, 5 }
 0x5a0   : > { %v9864_v31 = vrot.slane %v9863_v15, 4  ;;  %v9906_v41 = vrot.slane %v9904_v52, 5  ;;  %v9910_v57 = vrot.slane %v9908_v39, 4  ;;  %v9919_v0 = vshrl.u32 %v9555_v54, 16 }
 0x5a1   : > { %v9922_v30 = vshll.u32 %v9555_v54, 16  ;;  %v9928_v11 = vshll.u32 %v16923_v46, 16  ;;  %v9932_v47 = vshrl.u32 %v16923_v46, 16  ;;  %v9868_v48 = vrot.slane %v9866_v60, 5 }
 0x5a2   : > { %v9897_v16 = vrot.slane %v9895_v5, 4  ;;  %v9835_v33 = vsel %vm13682_vm9, %v9830_v8, %v17040_v43  ;;  %v9845_v62 = vsel %vm13682_vm9, %v9840_v14, %v9844_v58  ;;  %v9877_v53 = vor.u32 %v9876_v9, %v9873_v20 }
 0x5a3   : > { %12665 = vmatmul.mubr.msk.bf16.gmra.mrb[12].mxu1 %vm1391_vm7, %v11656_v56  ;;  %v9884_v56 = vshrl.u32 %v16629_v63, 16  ;;  %v9898_v63 = vshll.u32 %v9552_v32, 16  ;;  %v9869_v6 = vsel %vm13682_vm9, %v9864_v31, %v9868_v48  ;;  %v9911_v19 = vor.u32 %v9910_v57, %v9906_v41  ;;  %v17710_v48 = vld [vmem:[#allocation53_spill] sm:$0xff] }
 0x5a4   : > { %12668 = vmatprep.mubr.msk.bf16.mxu1 %vm1391_vm7, %v11657_v34  ;;  %v9854_v34 = vrot.slane %v9853_v23, 4  ;;  %v9921_v46 = vrot.slane %v9919_v0, 4  ;;  %v9924_v27 = vrot.slane %v9922_v30, 5  ;;  %v9930_v4 = vrot.slane %v9928_v11, 5  ;;  %v17704_v0 = vld [vmem:[#allocation45_spill] sm:$0xff]  ;;  %v17707_v11 = vld [vmem:[#allocation50_spill] sm:$0xff] }
 0x5a5   : > { %v9886_v2 = vrot.slane %v9884_v56, 4  ;;  %v9900_v49 = vrot.slane %v9898_v63, 5  ;;  %v9934_v55 = vrot.slane %v9932_v47, 4  ;;  %v11660_v18 = vcombine.low %v9835_v33, %v9845_v62  ;;  %v13373_v56 = vld [vmem:[#allocation3 + $0xc8] sm:$0x1] }
 0x5a6   : > { %v9859_v43 = vsel %vm13682_vm9, %v9854_v34, %v17043_v28  ;;  %v9914_v32 = vshll.u32 %v13373_v56, 16  ;;  %v9912_v39 = vrot.slane %v9911_v19, 4  ;;  %v9878_v13 = vrot.slane %v9877_v53, 4  ;;  %v17709_v34 = vld [vmem:[#allocation49_spill] sm:$0xff]  ;;  %v17715_v62 = vld [vmem:[#allocation58_spill] sm:$0xff]  ;;  %v17718_v53 = vld [vmem:[#allocation63_spill] sm:$0xff] }
 0x5a7   : > { %v9887_v61 = vor.u32 %v9886_v2, %v9882_v50  ;;  %v9901_v24 = vor.u32 %v9900_v49, %v9897_v16  ;;  %v11661_v15 = vcombine.low %v9859_v43, %v9869_v6  ;;  %v9925_v8 = vor.u32 %v9924_v27, %v9921_v46  ;;  %v17713_v49 = vld [vmem:[#allocation57_spill] sm:$0xff]  ;;  %v17721_v19 = vld [vmem:[#allocation66_spill] sm:$0xff]  ;;  %v17722_v46 = vld [vmem:[#allocation68_spill] sm:$0xff] }
 0x5a8   : > { %v9935_v58 = vor.u32 %v9934_v55, %v9930_v4  ;;  %v9938_v38 = vshll.u32 %v16925_v36, 16  ;;  %v9883_v5 = vsel %vm13682_vm9, %v9878_v13, %v9882_v50  ;;  %v17703_v50 = vld [vmem:[#allocation44_spill] sm:$0xff]  ;;  %v17711_v16 = vcombine.low %v17709_v34, %v17710_v48  ;;  %v17727_v43 = vld [vmem:[#allocation73_spill] sm:$0xff]  ;;  %v17735_v13 = vld [vmem:[#allocation78_spill] sm:$0xff] }
 0x5a9   : > { %v9888_v7 = vrot.slane %v9887_v61, 4  ;;  %v9902_v60 = vrot.slane %v9901_v24, 4  ;;  %v9926_v63 = vrot.slane %v9925_v8, 4  ;;  %v17705_v30 = vcombine.low %v17703_v50, %v17704_v0  ;;  %v17716_v61 = vld [vmem:[#allocation61_spill] sm:$0xff]  ;;  %v17725_v55 = vld [vmem:[#allocation72_spill] sm:$0xff]  ;;  %v17728_v24 = vld [vmem:[#allocation74_spill] sm:$0xff] }
 0x5aa   : > { %v9936_v54 = vrot.slane %v9935_v58, 4  ;;  %v9940_v14 = vrot.slane %v9938_v38, 5  ;;  %v17714_v33 = vcombine.low %v17712_v22, %v17713_v49  ;;  %v17717_v6 = vcombine.low %v17715_v62, %v17716_v61  ;;  %v10791_v48 = vld [vmem:[%s13674_s10 + $0x38] sm:$0xff] }
 0x5ab   : > { %12669 = vmatmul.mubr.msk.bf16.gmra.mrb[16].mxu1 %vm1391_vm7, %v11658_v17  ;;  %v9890_v17 = vshll.u32 %v13372_v51, 16  ;;  %v9907_v2 = vsel %vm13682_vm9, %v9902_v60, %v9906_v41  ;;  %v9931_v36 = vsel %vm13682_vm9, %v9926_v63, %v9930_v4  ;;  %v17706_v41 = vld [vmem:[#allocation48_spill] sm:$0xff]  ;;  %v17719_v51 = vld [vmem:[#allocation65_spill] sm:$0xff]  ;;  %v17723_v27 = vcombine.low %v17721_v19, %v17722_v46  ;;  %v17724_v4 = vld [vmem:[#allocation71_spill] sm:$0xff] }
 0x5ac   : > { %12672 = vmatprep.mubr.msk.bf16.mxu1 %vm1391_vm7, %v11659_v25  ;;  %v9916_v25 = vrot.slane %v9914_v32, 5  ;;  %v9941_v9 = vsel %vm13682_vm9, %v9936_v54, %v9940_v14  ;;  %v17708_v47 = vcombine.low %v17706_v41, %v17707_v11  ;;  %v17729_v56 = vcombine.low %v17727_v43, %v17728_v24  ;;  %v17730_v32 = vld [vmem:[#allocation75_spill] sm:$0xff]  ;;  %v10788_v41 = vld [vmem:[%s13674_s10 + $0x20] sm:$0xff] }
 0x5ad   : > { %v9892_v52 = vrot.slane %v9890_v17, 5  ;;  %v11664_v57 = vcombine.low %v9931_v36, %v9941_v9  ;;  %v17720_v17 = vcombine.low %v17718_v53, %v17719_v51  ;;  %v17736_v8 = vcombine.low %v16657_v40, %v17735_v13 }
 0x5ae   : > { %v9917_v23 = vsel %vm13682_vm9, %v9912_v39, %v9916_v25  ;;  %v10785_v25 = vld [vmem:[%s13674_s10 + $0x8] sm:$0xff] }
 0x5af   : > { %v9893_v28 = vsel %vm13682_vm9, %v9888_v7, %v9892_v52  ;;  %v11663_v31 = vcombine.low %v9907_v2, %v9917_v23  ;;  %v17732_v7 = vld [vmem:[#allocation76_spill] sm:$0xff]  ;;  %v17733_v52 = vld [vmem:[#allocation77_spill] sm:$0xff] }
 0x5b0   : > { %v11662_v20 = vcombine.low %v9883_v5, %v9893_v28  ;;  %v17734_v39 = vcombine.low %v17732_v7, %v17733_v52 }
 0x5b3   : > { %12673 = vmatmul.mubr.msk.bf16.gmra.mrb[20].mxu1 %vm1391_vm7, %v11660_v18  ;;  %v17726_v18 = vcombine.low %v17724_v4, %v17725_v55 }
 0x5b4   : > { %12676 = vmatprep.mubr.msk.bf16.mxu1 %vm1391_vm7, %v11661_v15  ;;  %v17731_v15 = vcombine.low %v16625_v37, %v17730_v32  ;;  %v17160_v37 = vld [vmem:[%s17342_s5] ss:$0 sm:$0xff] }
 0x5b5   : > { %v10792_v32 = vld [vmem:[%s13674_s10 + $0x40] sm:$0xff] }
 0x5bb   : > { %12677 = vmatmul.mubr.msk.bf16.gmra.mrb[24].mxu1 %vm1391_vm7, %v11662_v20 }
 0x5bc   : > { %12680 = vmatprep.mubr.msk.bf16.mxu1 %vm1391_vm7, %v11663_v31 }
 0x5c3   : > { %12681 = vmatmul.mubr.msk.bf16.gmra.mrb[28].mxu1 %vm1391_vm7, %v11664_v57  ;;  %v10790_v57 = vld [vmem:[%s13674_s10 + $0x30] sm:$0xff] }
 0x5c4   : > { %12686 = vmatprep.mubr.msk.bf16.mxu1 %vm1391_vm7, %v17705_v30 }
 0x5cb   : > { %12687 = vmatmul.mubr.msk.bf16.vlgmr.msra.gmra.mrb[0].mxu1 %vm1391_vm7, %v17708_v47 }
 0x5cc   : > { %12690 = vmatprep.mubr.msk.bf16.mxu1 %vm1391_vm7, %v17711_v16 }
 0x5d3   : > { %12691 = vmatmul.mubr.msk.bf16.gmra.mrb[4].mxu1 %vm1391_vm7, %v17714_v33  ;;  %v10789_v33 = vld [vmem:[%s13674_s10 + $0x28] sm:$0xff] }
 0x5d4   : > { %12694 = vmatprep.mubr.msk.bf16.mxu1 %vm1391_vm7, %v17717_v6 }
 0x5db   : > { %12695 = vmatmul.mubr.msk.bf16.gmra.mrb[8].mxu1 %vm1391_vm7, %v17720_v17 }
 0x5dc   : > { %12698 = vmatprep.mubr.msk.bf16.mxu1 %vm1391_vm7, %v17723_v27 }
 0x5e3   : > { %12699 = vmatmul.mubr.msk.bf16.gmra.mrb[12].mxu1 %vm1391_vm7, %v17726_v18  ;;  %v10794_v18 = vld [vmem:[%s13674_s10 + $0x50] sm:$0xff] }
 0x5e4   : > { %12702 = vmatprep.mubr.msk.bf16.mxu1 %vm1391_vm7, %v17729_v56 }
 0x5eb   : > { %12703 = vmatmul.mubr.msk.bf16.gmra.mrb[16].mxu1 %vm1391_vm7, %v17731_v15 }
 0x5ec   : > { %12706 = vmatprep.mubr.msk.bf16.mxu1 %vm1391_vm7, %v17734_v39  ;;  %v10795_v39 = vld [vmem:[%s13674_s10 + $0x58] sm:$0xff] }
 0x5f3   : > { %12707 = vmatmul.mubr.msk.bf16.gmra.mrb[20].mxu1 %vm1391_vm7, %v17736_v8 }
 0x5f4   : > { %12710 = vmatprep.mubr.msk.bf16.mxu1 %vm1391_vm7, %v11710_v35 }
 0x5fb   : > { %12711 = vmatmul.mubr.msk.bf16.gmra.mrb[24].mxu1 %vm1391_vm7, %v11711_v26 }
 0x5fc   : > { %12714 = vmatprep.mubr.msk.bf16.mxu1 %vm1391_vm7, %v11712_v1 }
 0x603   : > { %12715 = vmatmul.mubr.msk.bf16.gmra.mrb[28].mxu1 %vm1391_vm7, %v11713_v42  ;;  %v10787_v42 = vld [vmem:[%s13674_s10 + $0x18] sm:$0xff] }
 0x69e   : > { %v12688_v40 = vpop.f32.mrb[0].mxu1 }
 0x69f   : > { %v10715_v12 = vmul.f32 %v12688_v40, %v17160_v37  ;;  %v10547_v35 = vpop.f32.mrb[1].mxu1 }
 0x6a0   : > { %v10713_v59 = vmul.f32 %v17160_v37, %v10547_v35  ;;  %v12689_v26 = vpop.f32.mrb[2].mxu1 }
 0x6a1   : > { %v10754_v10 = vadd.f32 %v17165_v44, %v10715_v12  ;;  %v10716_v1 = vmul.f32 %v12689_v26, %v17160_v37  ;;  %v10550_v29 = vpop.f32.mrb[3].mxu1  ;;  %v10793_v12 = vld [vmem:[%s13674_s10 + $0x48] sm:$0xff] }
 0x6a2   : > { %v10752_v45 = vadd.f32 %v17165_v44, %v10713_v59  ;;  %v10714_v58 = vmul.f32 %v17160_v37, %v10550_v29 }
 0x6a3   : > { %v10818_v38 = vadd.f32 %v10786_v3, %v10754_v10  ;;  %v10755_v60 = vadd.f32 %v17165_v44, %v10716_v1 }
 0x6a4   : > { %v10816_v28 = vadd.f32 %v10784_v21, %v10752_v45  ;;  %v10753_v23 = vadd.f32 %v17165_v44, %v10714_v58 }
 0x6a5   : > { %v10850_v5 = vmax.f32 %v10818_v38, 0.0  ;;  %v10819_v63 = vadd.f32 %v10787_v42, %v10755_v60  ;;  %v10798_v38 = vld [vmem:[%s13674_s10 + $0x70] sm:$0xff] }
 0x6a6   : > { %v10848_v54 = vmax.f32 %v10816_v28, 0.0  ;;  %v10817_v14 = vadd.f32 %v10785_v25, %v10753_v23  ;;  %v12692_v20 = vpop.f32.mrb[4].mxu1  ;;  %v10796_v23 = vld [vmem:[%s13674_s10 + $0x60] sm:$0xff] }
 0x6a7   : > { %10882 = vst.msk [vmem:[%s17183_s21 + $0x10] sm:$0xff] %vm1391_vm7, %v10850_v5  ;;  %v10851_v2 = vmax.f32 %v10819_v63, 0.0  ;;  %v10719_v31 = vmul.f32 %v12692_v20, %v17160_v37  ;;  %v10563_v36 = vpop.f32.mrb[5].mxu1 }
 0x6a8   : > { %10880 = vst.msk [vmem:[%s17183_s21] sm:$0xff] %vm1391_vm7, %v10848_v54  ;;  %v10849_v9 = vmax.f32 %v10817_v14, 0.0  ;;  %v10717_v50 = vmul.f32 %v17160_v37, %v10563_v36  ;;  %v12693_v0 = vpop.f32.mrb[6].mxu1  ;;  %v10799_v14 = vld [vmem:[%s13674_s10 + $0x78] sm:$0xff]  ;;  %v10797_v36 = vld [vmem:[%s13674_s10 + $0x68] sm:$0xff] }
 0x6a9   : > { %10883 = vst.msk [vmem:[%s17183_s21 + $0x18] sm:$0xff] %vm1391_vm7, %v10851_v2  ;;  %v10758_v30 = vadd.f32 %v17165_v44, %v10719_v31  ;;  %v10720_v11 = vmul.f32 %v12693_v0, %v17160_v37  ;;  %v10566_v47 = vpop.f32.mrb[7].mxu1 }
 0x6aa   : > { %10881 = vst.msk [vmem:[%s17183_s21 + $0x8] sm:$0xff] %vm1391_vm7, %v10849_v9  ;;  %v10756_v34 = vadd.f32 %v17165_v44, %v10717_v50  ;;  %v10718_v16 = vmul.f32 %v17160_v37, %v10566_v47 }
 0x6ab   : > { %v10822_v22 = vadd.f32 %v10790_v57, %v10758_v30  ;;  %v10759_v49 = vadd.f32 %v17165_v44, %v10720_v11 }
 0x6ac   : > { %v10820_v62 = vadd.f32 %v10788_v41, %v10756_v34  ;;  %v10757_v61 = vadd.f32 %v17165_v44, %v10718_v16 }
 0x6ad   : > { %v10854_v6 = vmax.f32 %v10822_v22, 0.0  ;;  %v10823_v53 = vadd.f32 %v10791_v48, %v10759_v49  ;;  %v10802_v22 = vld [vmem:[%s13674_s10 + $0x90] sm:$0xff] }
 0x6ae   : > { %v10852_v51 = vmax.f32 %v10820_v62, 0.0  ;;  %v10821_v17 = vadd.f32 %v10789_v33, %v10757_v61  ;;  %v12696_v19 = vpop.f32.mrb[8].mxu1  ;;  %v10800_v61 = vld [vmem:[%s13674_s10 + $0x80] sm:$0xff] }
 0x6af   : > { %10886 = vst.msk [vmem:[%s17183_s21 + $0x30] sm:$0xff] %vm1391_vm7, %v10854_v6  ;;  %v10855_v46 = vmax.f32 %v10823_v53, 0.0  ;;  %v10723_v27 = vmul.f32 %v12696_v19, %v17160_v37  ;;  %v10579_v4 = vpop.f32.mrb[9].mxu1 }
 0x6b0   : > { %10884 = vst.msk [vmem:[%s17183_s21 + $0x20] sm:$0xff] %vm1391_vm7, %v10852_v51  ;;  %v10853_v55 = vmax.f32 %v10821_v17, 0.0  ;;  %v10721_v43 = vmul.f32 %v17160_v37, %v10579_v4  ;;  %v12697_v24 = vpop.f32.mrb[10].mxu1  ;;  %v10803_v17 = vld [vmem:[%s13674_s10 + $0x98] sm:$0xff]  ;;  %v10801_v4 = vld [vmem:[%s13674_s10 + $0x88] sm:$0xff] }
 0x6b1   : > { %10887 = vst.msk [vmem:[%s17183_s21 + $0x38] sm:$0xff] %vm1391_vm7, %v10855_v46  ;;  %v10762_v56 = vadd.f32 %v17165_v44, %v10723_v27  ;;  %v10724_v15 = vmul.f32 %v12697_v24, %v17160_v37  ;;  %v10582_v7 = vpop.f32.mrb[11].mxu1 }
 0x6b2   : > { %10885 = vst.msk [vmem:[%s17183_s21 + $0x28] sm:$0xff] %vm1391_vm7, %v10853_v55  ;;  %v10760_v52 = vadd.f32 %v17165_v44, %v10721_v43  ;;  %v10722_v13 = vmul.f32 %v17160_v37, %v10582_v7 }
 0x6b3   : > { %v10826_v8 = vadd.f32 %v10794_v18, %v10762_v56  ;;  %v10763_v40 = vadd.f32 %v17165_v44, %v10724_v15 }
 0x6b4   : > { %v10824_v35 = vadd.f32 %v10792_v32, %v10760_v52  ;;  %v10761_v3 = vadd.f32 %v17165_v44, %v10722_v13 }
 0x6b5   : > { %v10858_v59 = vmax.f32 %v10826_v8, 0.0  ;;  %v10827_v26 = vadd.f32 %v10795_v39, %v10763_v40  ;;  %v10806_v8 = vld [vmem:[%s13674_s10 + $0xb0] sm:$0xff] }
 0x6b6   : > { %v10856_v10 = vmax.f32 %v10824_v35, 0.0  ;;  %v10825_v21 = vadd.f32 %v10793_v12, %v10761_v3  ;;  %v12700_v1 = vpop.f32.mrb[12].mxu1  ;;  %v10804_v3 = vld [vmem:[%s13674_s10 + $0xa0] sm:$0xff] }
 0x6b7   : > { %10890 = vst.msk [vmem:[%s17183_s21 + $0x50] sm:$0xff] %vm1391_vm7, %v10858_v59  ;;  %v10859_v29 = vmax.f32 %v10827_v26, 0.0  ;;  %v10727_v45 = vmul.f32 %v12700_v1, %v17160_v37  ;;  %v10595_v42 = vpop.f32.mrb[13].mxu1 }
 0x6b8   : > { %10888 = vst.msk [vmem:[%s17183_s21 + $0x40] sm:$0xff] %vm1391_vm7, %v10856_v10  ;;  %v10857_v58 = vmax.f32 %v10825_v21, 0.0  ;;  %v10725_v60 = vmul.f32 %v17160_v37, %v10595_v42  ;;  %v12701_v25 = vpop.f32.mrb[14].mxu1  ;;  %v10807_v21 = vld [vmem:[%s13674_s10 + $0xb8] sm:$0xff]  ;;  %v10805_v42 = vld [vmem:[%s13674_s10 + $0xa8] sm:$0xff] }
 0x6b9   : > { %10891 = vst.msk [vmem:[%s17183_s21 + $0x58] sm:$0xff] %vm1391_vm7, %v10859_v29  ;;  %v10766_v28 = vadd.f32 %v17165_v44, %v10727_v45  ;;  %v10728_v5 = vmul.f32 %v12701_v25, %v17160_v37  ;;  %v10598_v63 = vpop.f32.mrb[15].mxu1 }
 0x6ba   : > { %10889 = vst.msk [vmem:[%s17183_s21 + $0x48] sm:$0xff] %vm1391_vm7, %v10857_v58  ;;  %v10764_v54 = vadd.f32 %v17165_v44, %v10725_v60  ;;  %v10726_v20 = vmul.f32 %v17160_v37, %v10598_v63 }
 0x6bb   : > { %v10830_v2 = vadd.f32 %v10798_v38, %v10766_v28  ;;  %v10767_v31 = vadd.f32 %v17165_v44, %v10728_v5 }
 0x6bc   : > { %v10828_v9 = vadd.f32 %v10796_v23, %v10764_v54  ;;  %v10765_v57 = vadd.f32 %v17165_v44, %v10726_v20 }
 0x6bd   : > { %v10862_v50 = vmax.f32 %v10830_v2, 0.0  ;;  %v10831_v0 = vadd.f32 %v10799_v14, %v10767_v31  ;;  %v10810_v2 = vld [vmem:[%s13674_s10 + $0xd0] sm:$0xff] }
 0x6be   : > { %v10860_v30 = vmax.f32 %v10828_v9, 0.0  ;;  %v10829_v41 = vadd.f32 %v10797_v36, %v10765_v57  ;;  %v12704_v11 = vpop.f32.mrb[16].mxu1  ;;  %v10808_v57 = vld [vmem:[%s13674_s10 + $0xc0] sm:$0xff] }
 0x6bf   : > { %10894 = vst.msk [vmem:[%s17183_s21 + $0x70] sm:$0xff] %vm1391_vm7, %v10862_v50  ;;  %v10863_v47 = vmax.f32 %v10831_v0, 0.0  ;;  %v10731_v34 = vmul.f32 %v12704_v11, %v17160_v37  ;;  %v10611_v48 = vpop.f32.mrb[17].mxu1 }
 0x6c0   : > { %10892 = vst.msk [vmem:[%s17183_s21 + $0x60] sm:$0xff] %vm1391_vm7, %v10860_v30  ;;  %v10861_v16 = vmax.f32 %v10829_v41, 0.0  ;;  %v10729_v49 = vmul.f32 %v17160_v37, %v10611_v48  ;;  %v12705_v33 = vpop.f32.mrb[18].mxu1  ;;  %v10811_v41 = vld [vmem:[%s13674_s10 + $0xd8] sm:$0xff]  ;;  %v10809_v48 = vld [vmem:[%s13674_s10 + $0xc8] sm:$0xff] }
 0x6c1   : > { %10895 = vst.msk [vmem:[%s17183_s21 + $0x78] sm:$0xff] %vm1391_vm7, %v10863_v47  ;;  %v10770_v62 = vadd.f32 %v17165_v44, %v10731_v34  ;;  %v10732_v6 = vmul.f32 %v12705_v33, %v17160_v37  ;;  %v10614_v53 = vpop.f32.mrb[19].mxu1 }
 0x6c2   : > { %10893 = vst.msk [vmem:[%s17183_s21 + $0x68] sm:$0xff] %vm1391_vm7, %v10861_v16  ;;  %v10768_v51 = vadd.f32 %v17165_v44, %v10729_v49  ;;  %v10730_v19 = vmul.f32 %v17160_v37, %v10614_v53 }
 0x6c3   : > { %v10834_v46 = vadd.f32 %v10802_v22, %v10770_v62  ;;  %v10771_v27 = vadd.f32 %v17165_v44, %v10732_v6 }
 0x6c4   : > { %v10832_v55 = vadd.f32 %v10800_v61, %v10768_v51  ;;  %v10769_v18 = vadd.f32 %v17165_v44, %v10730_v19 }
 0x6c5   : > { %v10866_v43 = vmax.f32 %v10834_v46, 0.0  ;;  %v10835_v24 = vadd.f32 %v10803_v17, %v10771_v27  ;;  %v10814_v46 = vld [vmem:[%s13674_s10 + $0xf0] sm:$0xff] }
 0x6c6   : > { %v10864_v56 = vmax.f32 %v10832_v55, 0.0  ;;  %v10833_v32 = vadd.f32 %v10801_v4, %v10769_v18  ;;  %v12708_v15 = vpop.f32.mrb[20].mxu1  ;;  %v10812_v18 = vld [vmem:[%s13674_s10 + $0xe0] sm:$0xff] }
 0x6c7   : > { %10898 = vst.msk [vmem:[%s17183_s21 + $0x90] sm:$0xff] %vm1391_vm7, %v10866_v43  ;;  %v10867_v7 = vmax.f32 %v10835_v24, 0.0  ;;  %v10735_v52 = vmul.f32 %v12708_v15, %v17160_v37  ;;  %v10627_v39 = vpop.f32.mrb[21].mxu1 }
 0x6c8   : > { %10896 = vst.msk [vmem:[%s17183_s21 + $0x80] sm:$0xff] %vm1391_vm7, %v10864_v56  ;;  %v10865_v13 = vmax.f32 %v10833_v32, 0.0  ;;  %v10733_v40 = vmul.f32 %v17160_v37, %v10627_v39  ;;  %v12709_v12 = vpop.f32.mrb[22].mxu1  ;;  %v10815_v32 = vld [vmem:[%s13674_s10 + $0xf8] sm:$0xff]  ;;  %v10813_v39 = vld [vmem:[%s13674_s10 + $0xe8] sm:$0xff] }
 0x6c9   : > { %10899 = vst.msk [vmem:[%s17183_s21 + $0x98] sm:$0xff] %vm1391_vm7, %v10867_v7  ;;  %v10774_v35 = vadd.f32 %v17165_v44, %v10735_v52  ;;  %v10736_v59 = vmul.f32 %v12709_v12, %v17160_v37  ;;  %v10630_v26 = vpop.f32.mrb[23].mxu1 }
 0x6ca   : > { %10897 = vst.msk [vmem:[%s17183_s21 + $0x88] sm:$0xff] %vm1391_vm7, %v10865_v13  ;;  %v10772_v10 = vadd.f32 %v17165_v44, %v10733_v40  ;;  %v10734_v1 = vmul.f32 %v17160_v37, %v10630_v26 }
 0x6cb   : > { %v10838_v29 = vadd.f32 %v10806_v8, %v10774_v35  ;;  %v10775_v45 = vadd.f32 %v17165_v44, %v10736_v59 }
 0x6cc   : > { %v10836_v58 = vadd.f32 %v10804_v3, %v10772_v10  ;;  %v10773_v38 = vadd.f32 %v17165_v44, %v10734_v1 }
 0x6cd   : > { %v10870_v60 = vmax.f32 %v10838_v29, 0.0  ;;  %v10839_v25 = vadd.f32 %v10807_v21, %v10775_v45 }
 0x6ce   : > { %v10868_v28 = vmax.f32 %v10836_v58, 0.0  ;;  %v10837_v23 = vadd.f32 %v10805_v42, %v10773_v38  ;;  %v12712_v5 = vpop.f32.mrb[24].mxu1 }
 0x6cf   : > { %10902 = vst.msk [vmem:[%s17183_s21 + $0xb0] sm:$0xff] %vm1391_vm7, %v10870_v60  ;;  %v10871_v63 = vmax.f32 %v10839_v25, 0.0  ;;  %v10739_v54 = vmul.f32 %v12712_v5, %v17160_v37  ;;  %v10643_v14 = vpop.f32.mrb[25].mxu1 }
 0x6d0   : > { %10900 = vst.msk [vmem:[%s17183_s21 + $0xa0] sm:$0xff] %vm1391_vm7, %v10868_v28  ;;  %v10869_v20 = vmax.f32 %v10837_v23, 0.0  ;;  %v10737_v31 = vmul.f32 %v17160_v37, %v10643_v14  ;;  %v12713_v36 = vpop.f32.mrb[26].mxu1 }
 0x6d1   : > { %10903 = vst.msk [vmem:[%s17183_s21 + $0xb8] sm:$0xff] %vm1391_vm7, %v10871_v63  ;;  %v10778_v9 = vadd.f32 %v17165_v44, %v10739_v54  ;;  %v10740_v50 = vmul.f32 %v12713_v36, %v17160_v37  ;;  %v10646_v0 = vpop.f32.mrb[27].mxu1 }
 0x6d2   : > { %10901 = vst.msk [vmem:[%s17183_s21 + $0xa8] sm:$0xff] %vm1391_vm7, %v10869_v20  ;;  %v10776_v30 = vadd.f32 %v17165_v44, %v10737_v31  ;;  %v10738_v11 = vmul.f32 %v17160_v37, %v10646_v0 }
 0x6d3   : > { %v10842_v47 = vadd.f32 %v10810_v2, %v10778_v9  ;;  %v10779_v34 = vadd.f32 %v17165_v44, %v10740_v50 }
 0x6d4   : > { %v10840_v16 = vadd.f32 %v10808_v57, %v10776_v30  ;;  %v10777_v22 = vadd.f32 %v17165_v44, %v10738_v11 }
 0x6d5   : > { %v10874_v49 = vmax.f32 %v10842_v47, 0.0  ;;  %v10843_v33 = vadd.f32 %v10811_v41, %v10779_v34 }
 0x6d6   : > { %v10872_v62 = vmax.f32 %v10840_v16, 0.0  ;;  %v10841_v61 = vadd.f32 %v10809_v48, %v10777_v22  ;;  %v12716_v6 = vpop.f32.mrb[28].mxu1 }
 0x6d7   : > { %10906 = vst.msk [vmem:[%s17183_s21 + $0xd0] sm:$0xff] %vm1391_vm7, %v10874_v49  ;;  %v10875_v53 = vmax.f32 %v10843_v33, 0.0  ;;  %v10743_v51 = vmul.f32 %v12716_v6, %v17160_v37  ;;  %v10659_v17 = vpop.f32.mrb[29].mxu1 }
 0x6d8   : > { %10904 = vst.msk [vmem:[%s17183_s21 + $0xc0] sm:$0xff] %vm1391_vm7, %v10872_v62  ;;  %v10873_v19 = vmax.f32 %v10841_v61, 0.0  ;;  %v10741_v27 = vmul.f32 %v17160_v37, %v10659_v17  ;;  %v12717_v4 = vpop.f32.mrb[30].mxu1 }
 0x6d9   : > { %10907 = vst.msk [vmem:[%s17183_s21 + $0xd8] sm:$0xff] %vm1391_vm7, %v10875_v53  ;;  %v10782_v55 = vadd.f32 %v17165_v44, %v10743_v51  ;;  %v10744_v43 = vmul.f32 %v12717_v4, %v17160_v37  ;;  %v10662_v24 = vpop.f32.mrb[31].mxu1 }
 0x6da   : > { %10905 = vst.msk [vmem:[%s17183_s21 + $0xc8] sm:$0xff] %vm1391_vm7, %v10873_v19  ;;  %v10780_v56 = vadd.f32 %v17165_v44, %v10741_v27  ;;  %v10742_v15 = vmul.f32 %v17160_v37, %v10662_v24 }
 0x6db   : > { %v10846_v7 = vadd.f32 %v10814_v46, %v10782_v55  ;;  %v10783_v52 = vadd.f32 %v17165_v44, %v10744_v43 }
 0x6dc   : > { %v10844_v13 = vadd.f32 %v10812_v18, %v10780_v56  ;;  %v10781_v8 = vadd.f32 %v17165_v44, %v10742_v15 }
 0x6dd   : > { %v10878_v40 = vmax.f32 %v10846_v7, 0.0  ;;  %v10847_v12 = vadd.f32 %v10815_v32, %v10783_v52 }
 0x6de   : > { %v10876_v35 = vmax.f32 %v10844_v13, 0.0  ;;  %v10845_v3 = vadd.f32 %v10813_v39, %v10781_v8 }
 0x6df   : > { %10910 = vst.msk [vmem:[%s17183_s21 + $0xf0] sm:$0xff] %vm1391_vm7, %v10878_v40  ;;  %v10879_v59 = vmax.f32 %v10847_v12, 0.0 }
 0x6e0   : > { %10908 = vst.msk [vmem:[%s17183_s21 + $0xe0] sm:$0xff] %vm1391_vm7, %v10876_v35  ;;  %v10877_v26 = vmax.f32 %v10845_v3, 0.0 }
 0x6e1   : > { %10911 = vst.msk [vmem:[%s17183_s21 + $0xf8] sm:$0xff] %vm1391_vm7, %v10879_v59 }
 0x6e2   : > { %10909 = vst.msk [vmem:[%s17183_s21 + $0xe8] sm:$0xff] %vm1391_vm7, %v10877_v26 }
 0x6e3 PF: > { %s17_s24 = sadd.s32 1, %s13380_s24  }
 0x6e4   : > { %p14_p4 = scmp.ge.s32.totalorder %s17_s24, 4  }
 0x6e6   :  { %16 = sbr.rel (!%p14_p4) target bundleno = 1 (0x1), region = 98 }

</bundles_post_ra>
